<compile_context>
chip_gen: v7x
topology: tpu7x:2x2x1
jax: 0.10.0
libtpu: 0.0.40
codegen_flags: <defaults>
</compile_context>

<pallas_src>
import functools
import math

import jax
import jax.numpy as jnp
from jax import lax
from jax.experimental import pallas as pl
from jax.experimental.pallas import tpu as pltpu


def _attention_kernel(x_q_ref, x_kv_ref, wqkv_ref, wo_ref, bo_ref, o_ref, acc_ref,
                      *, heads, dim_head, scale, softmax_dtype):
    """One (batch, query-tile) grid step.

    x_q_ref : (TQ, D)       query rows of this tile
    x_kv_ref: (N,  D)       full sequence (keys/values)
    wqkv_ref: (D, 3*inner)  [Wq | Wk | Wv]
    wo_ref  : (inner, D)
    bo_ref  : (1, D)
    o_ref   : (TQ, D)
    acc_ref : (TQ, inner)   VMEM scratch holding the concatenated head outputs
    """
    inner = heads * dim_head
    compute_dtype = x_q_ref.dtype  # bf16 inputs -> bf16 MXU operands; f32 inputs -> f32 path

    # Projections (to_qkv has no bias). Operands stay in input dtype, accumulation is f32.
    q = jnp.dot(x_q_ref[...], wqkv_ref[:, :inner],
                preferred_element_type=jnp.float32)                       # (TQ, inner) f32
    kv = jnp.dot(x_kv_ref[...], wqkv_ref[:, inner:],
                 preferred_element_type=jnp.float32)                      # (N, 2*inner) f32
    q = (q * scale).astype(compute_dtype)                                 # fold scale into Q

    for h in range(heads):                         # static loop; all slices 128-lane aligned
        lo = h * dim_head
        q_h = q[:, lo:lo + dim_head]                                      # (TQ, dh)
        k_h = kv[:, lo:lo + dim_head].astype(compute_dtype)               # (N, dh)
        v_h = kv[:, inner + lo:inner + lo + dim_head].astype(compute_dtype)

        # dots = q @ k^T (contract dim_head of both operands; no explicit transpose op).
        dots = lax.dot_general(q_h, k_h, (((1,), (1,)), ((), ())),
                               preferred_element_type=jnp.float32)        # (TQ, N) f32

        # Numerically stable, *un-normalized* softmax; normalization folded into the output.
        m = jnp.max(dots, axis=-1, keepdims=True)                         # (TQ, 1) f32
        p = jnp.exp((dots - m).astype(softmax_dtype))                     # (TQ, N)
        l = jnp.sum(p, axis=-1, keepdims=True, dtype=jnp.float32)         # (TQ, 1) f32

        o_h = jnp.dot(p.astype(compute_dtype), v_h,
                      preferred_element_type=jnp.float32)                 # (TQ, dh) f32
        inv_l = pl.reciprocal(l, approx=True)                             # EUP slot (~free)
        acc_ref[:, lo:lo + dim_head] = (o_h * inv_l).astype(acc_ref.dtype)

    # Output projection (to_out Linear, bias=True); Dropout in eval mode is identity.
    y = jnp.dot(acc_ref[...], wo_ref[...],
                preferred_element_type=jnp.float32) + bo_ref[...].astype(jnp.float32)
    o_ref[...] = y.astype(o_ref.dtype)


def _vmem_limit_bytes():
    # Per-generation scoped-VMEM budget (~55% of physical): 128 MiB on v5e/v6e, 64 MiB on v7x.
    try:
        cap = int(pltpu.get_tpu_info().vmem_capacity_bytes)
    except Exception:
        cap = 64 * 1024 * 1024
    return max(32 * 1024 * 1024, min(int(cap * 0.55), 100 * 1024 * 1024))


def attention(x, w_qkv, w_out, b_out, *, heads, dim_head, q_tile=256, softmax_dtype=None):
    """x: [B, N, D] -> [B, N, D] fused multi-head self-attention (mask=None path)."""
    B, N, D = x.shape
    inner = heads * dim_head
    assert w_qkv.shape == (D, 3 * inner)
    assert w_out.shape == (inner, D)
    assert b_out.shape == (D,)
    tq = min(q_tile, N)
    assert N % tq == 0, "sequence length must be a multiple of the query tile"
    scale = dim_head ** (-0.5)
    if softmax_dtype is None:
        # bf16 exp/row-sum on v6e/v7x; pass jnp.float32 explicitly on v5e (no bf16 VPU/EUP).
        softmax_dtype = jnp.bfloat16 if x.dtype == jnp.bfloat16 else jnp.float32

    kernel = functools.partial(_attention_kernel, heads=heads, dim_head=dim_head,
                               scale=scale, softmax_dtype=softmax_dtype)

    return pl.pallas_call(
        kernel,
        out_shape=jax.ShapeDtypeStruct((B, N, D), x.dtype),
        grid=(B, N // tq),
        in_specs=[
            pl.BlockSpec((None, tq, D), lambda b, i: (b, i, 0)),   # query tile
            pl.BlockSpec((None, N, D), lambda b, i: (b, 0, 0)),    # full sequence for K/V
            pl.BlockSpec((D, 3 * inner), lambda b, i: (0, 0)),     # W_qkv (VMEM-resident)
            pl.BlockSpec((inner, D), lambda b, i: (0, 0)),         # W_out (VMEM-resident)
            pl.BlockSpec((1, D), lambda b, i: (0, 0)),             # b_out
        ],
        out_specs=pl.BlockSpec((None, tq, D), lambda b, i: (b, i, 0)),
        scratch_shapes=[pltpu.VMEM((tq, inner), x.dtype)],         # concatenated head outputs
        compiler_params=pltpu.CompilerParams(
            dimension_semantics=("parallel", "parallel"),
            vmem_limit_bytes=_vmem_limit_bytes(),
        ),
    )(x, x, w_qkv, w_out, b_out.reshape(1, D))


def _reference(x, w_qkv, w_out, b_out, *, heads, dim_head):
    B, N, D = x.shape
    inner = heads * dim_head
    scale = dim_head ** (-0.5)
    hi = jax.lax.Precision.HIGHEST
    qkv = jnp.einsum("bnd,de->bne", x, w_qkv, precision=hi)
    q, k, v = jnp.split(qkv, 3, axis=-1)
    to_heads = lambda t: t.reshape(B, N, heads, dim_head).transpose(0, 2, 1, 3)
    q, k, v = map(to_heads, (q, k, v))
    dots = jnp.einsum("bhid,bhjd->bhij", q, k, precision=hi) * scale
    attn = jax.nn.softmax(dots, axis=-1)
    out = jnp.einsum("bhij,bhjd->bhid", attn, v, precision=hi)
    out = out.transpose(0, 2, 1, 3).reshape(B, N, inner)
    return jnp.einsum("bne,ed->bnd", out, w_out, precision=hi) + b_out


if __name__ == "__main__":
    # Lane-dense shapes: dim=128, heads=2, dim_head=128 -> inner_dim=256; two query tiles per batch.
    B, N, D = 2, 512, 128
    heads, dim_head = 2, 128
    inner = heads * dim_head

    key = jax.random.PRNGKey(0)
    kx, kqkv, ko, kb = jax.random.split(key, 4)
    x_f32 = jax.random.normal(kx, (B, N, D), dtype=jnp.float32)
    w_qkv_f32 = jax.random.normal(kqkv, (D, 3 * inner), dtype=jnp.float32) * (1.0 / math.sqrt(D))
    w_out_f32 = jax.random.normal(ko, (inner, D), dtype=jnp.float32) * (1.0 / math.sqrt(inner))
    b_out_f32 = jax.random.normal(kb, (D,), dtype=jnp.float32) * 0.02

    # --- primary path: bf16 operands (fast MXU on all gens), f32 accumulation ---
    xb = x_f32.astype(jnp.bfloat16)
    wqkvb = w_qkv_f32.astype(jnp.bfloat16)
    woutb = w_out_f32.astype(jnp.bfloat16)
    boutb = b_out_f32.astype(jnp.bfloat16)
    out_bf16 = attention(xb, wqkvb, woutb, boutb, heads=heads, dim_head=dim_head, q_tile=256)
    out_bf16 = jax.block_until_ready(out_bf16)
    assert out_bf16.shape == (B, N, D)
    ref_bf16 = _reference(xb.astype(jnp.float32), wqkvb.astype(jnp.float32),
                          woutb.astype(jnp.float32), boutb.astype(jnp.float32),
                          heads=heads, dim_head=dim_head)
    err_b = float(jnp.max(jnp.abs(out_bf16.astype(jnp.float32) - ref_bf16)))
    assert jnp.allclose(out_bf16.astype(jnp.float32), ref_bf16, atol=1e-1, rtol=1e-1), \
        f"bf16 max abs err = {err_b}"

    # --- f32 path: tight correctness check of the same kernel ---
    out_f32 = attention(x_f32, w_qkv_f32, w_out_f32, b_out_f32,
                        heads=heads, dim_head=dim_head, q_tile=256)
    out_f32 = jax.block_until_ready(out_f32)
    assert out_f32.shape == (B, N, D)
    ref_f32 = _reference(x_f32, w_qkv_f32, w_out_f32, b_out_f32, heads=heads, dim_head=dim_head)
    err_f = float(jnp.max(jnp.abs(out_f32 - ref_f32)))
    assert jnp.allclose(out_f32, ref_f32, atol=5e-3, rtol=5e-3), f"f32 max abs err = {err_f}"

    print("KERNEL_OK")
</pallas_src>

<mosaic_0001>
module attributes {stable_mosaic.version = 11 : i64} {
  func.func @_attention_kernel(%arg0: i32, %arg1: i32, %arg2: memref<1x256x128xbf16, #tpu.memory_space<vmem>>, %arg3: memref<1x512x128xbf16, #tpu.memory_space<vmem>>, %arg4: memref<128x768xbf16, #tpu.memory_space<vmem>>, %arg5: memref<256x128xbf16, #tpu.memory_space<vmem>>, %arg6: memref<1x128xbf16, #tpu.memory_space<vmem>>, %arg7: memref<1x256x128xbf16, #tpu.memory_space<vmem>>, %arg8: memref<256x256xbf16, #tpu.memory_space<vmem>>) attributes {dimension_semantics = [#tpu.dimension_semantics<parallel>, #tpu.dimension_semantics<parallel>], iteration_bounds = array<i64: 2, 2>, scalar_prefetch = 0 : i64, scratch_operands = 1 : i64, tpu.core_type = #tpu.core_type<tc>, window_params = [{transform_indices = @transform_0, window_bounds = array<i64: 1, 256, 128>}, {transform_indices = @transform_1, window_bounds = array<i64: 1, 512, 128>}, {pipeline_mode = #tpu.pipeline_mode<synchronous>, transform_indices = @transform_2, window_bounds = array<i64: 128, 768>}, {pipeline_mode = #tpu.pipeline_mode<synchronous>, transform_indices = @transform_3, window_bounds = array<i64: 256, 128>}, {pipeline_mode = #tpu.pipeline_mode<synchronous>, transform_indices = @transform_4, window_bounds = array<i64: 1, 128>}, {transform_indices = @transform_5, window_bounds = array<i64: 1, 256, 128>}]} {
    %c0 = arith.constant 0 : index
    %c0_0 = arith.constant 0 : index
    %c0_1 = arith.constant 0 : index
    %0 = vector.load %arg2[%c0, %c0_0, %c0_1] : memref<1x256x128xbf16, #tpu.memory_space<vmem>>, vector<1x256x128xbf16>
    %1 = vector.shape_cast %0 : vector<1x256x128xbf16> to vector<256x128xbf16>
    %c0_2 = arith.constant 0 : index
    %c0_3 = arith.constant 0 : index
    %2 = vector.load %arg4[%c0_2, %c0_3] : memref<128x768xbf16, #tpu.memory_space<vmem>>, vector<128x256xbf16>
    %cst = arith.constant dense<0.000000e+00> : vector<256x256xf32>
    %3 = tpu.matmul %1, %2, %cst {dimension_numbers = #tpu.dot_dimension_numbers<[1], [0], [0], [1], [0, 0, 1, 1], [], []>} : vector<256x128xbf16>, vector<128x256xbf16>, vector<256x256xf32> -> vector<256x256xf32>
    %c0_4 = arith.constant 0 : index
    %c0_5 = arith.constant 0 : index
    %c0_6 = arith.constant 0 : index
    %4 = vector.load %arg3[%c0_4, %c0_5, %c0_6] : memref<1x512x128xbf16, #tpu.memory_space<vmem>>, vector<1x512x128xbf16>
    %5 = vector.shape_cast %4 : vector<1x512x128xbf16> to vector<512x128xbf16>
    %c0_7 = arith.constant 0 : index
    %c256 = arith.constant 256 : index
    %6 = vector.load %arg4[%c0_7, %c256] : memref<128x768xbf16, #tpu.memory_space<vmem>>, vector<128x512xbf16>
    %cst_8 = arith.constant dense<0.000000e+00> : vector<512x512xf32>
    %7 = tpu.matmul %5, %6, %cst_8 {dimension_numbers = #tpu.dot_dimension_numbers<[1], [0], [0], [1], [0, 0, 1, 1], [], []>} : vector<512x128xbf16>, vector<128x512xbf16>, vector<512x512xf32> -> vector<512x512xf32>
    %cst_9 = arith.constant 0.0883883461 : f32
    %8 = vector.broadcast %cst_9 : f32 to vector<256x256xf32>
    %9 = arith.mulf %3, %8 : vector<256x256xf32>
    %10 = arith.truncf %9 : vector<256x256xf32> to vector<256x256xbf16>
    %11 = vector.extract_strided_slice %10 {offsets = [0, 0], sizes = [256, 128], strides = [1, 1]} : vector<256x256xbf16> to vector<256x128xbf16>
    %12 = vector.extract_strided_slice %7 {offsets = [0, 0], sizes = [512, 128], strides = [1, 1]} : vector<512x512xf32> to vector<512x128xf32>
    %13 = arith.truncf %12 : vector<512x128xf32> to vector<512x128xbf16>
    %14 = vector.extract_strided_slice %7 {offsets = [0, 256], sizes = [512, 128], strides = [1, 1]} : vector<512x512xf32> to vector<512x128xf32>
    %15 = arith.truncf %14 : vector<512x128xf32> to vector<512x128xbf16>
    %cst_10 = arith.constant dense<0.000000e+00> : vector<256x512xf32>
    %16 = tpu.matmul %11, %13, %cst_10 {dimension_numbers = #tpu.dot_dimension_numbers<[1], [1], [0], [0], [0, 0, 1, 0], [], []>} : vector<256x128xbf16>, vector<512x128xbf16>, vector<256x512xf32> -> vector<256x512xf32>
    %cst_11 = arith.constant dense<0xFF800000> : vector<256xf32>
    %17 = vector.multi_reduction <maximumf>, %16, %cst_11 [1] : vector<256x512xf32> to vector<256xf32>
    %18 = vector.shape_cast %17 : vector<256xf32> to vector<256x1xf32>
    %19 = vector.broadcast %18 : vector<256x1xf32> to vector<256x512xf32>
    %20 = arith.subf %16, %19 : vector<256x512xf32>
    %21 = arith.truncf %20 : vector<256x512xf32> to vector<256x512xbf16>
    %22 = math.exp %21 : vector<256x512xbf16>
    %23 = arith.extf %22 : vector<256x512xbf16> to vector<256x512xf32>
    %cst_12 = arith.constant dense<0.000000e+00> : vector<256xf32>
    %24 = vector.multi_reduction <add>, %23, %cst_12 [1] : vector<256x512xf32> to vector<256xf32>
    %25 = vector.shape_cast %24 : vector<256xf32> to vector<256x1xf32>
    %cst_13 = arith.constant dense<0.000000e+00> : vector<256x128xf32>
    %26 = tpu.matmul %22, %15, %cst_13 {dimension_numbers = #tpu.dot_dimension_numbers<[1], [0], [0], [1], [0, 0, 1, 1], [], []>} : vector<256x512xbf16>, vector<512x128xbf16>, vector<256x128xf32> -> vector<256x128xf32>
    %27 = tpu.reciprocal %25 {approx = true} : vector<256x1xf32> -> vector<256x1xf32>
    %28 = vector.broadcast %27 : vector<256x1xf32> to vector<256x128xf32>
    %29 = arith.mulf %26, %28 : vector<256x128xf32>
    %30 = arith.truncf %29 : vector<256x128xf32> to vector<256x128xbf16>
    %c0_14 = arith.constant 0 : index
    %c0_15 = arith.constant 0 : index
    %31 = vector.load %arg8[%c0_14, %c0_15] : memref<256x256xbf16, #tpu.memory_space<vmem>>, vector<256x128xbf16>
    tpu.vector_store %arg8[%c0_14, %c0_15], %30 {strides = array<i32>} : memref<256x256xbf16, #tpu.memory_space<vmem>>, vector<256x128xbf16>,
    %32 = vector.extract_strided_slice %10 {offsets = [0, 128], sizes = [256, 128], strides = [1, 1]} : vector<256x256xbf16> to vector<256x128xbf16>
    %33 = vector.extract_strided_slice %7 {offsets = [0, 128], sizes = [512, 128], strides = [1, 1]} : vector<512x512xf32> to vector<512x128xf32>
    %34 = arith.truncf %33 : vector<512x128xf32> to vector<512x128xbf16>
    %35 = vector.extract_strided_slice %7 {offsets = [0, 384], sizes = [512, 128], strides = [1, 1]} : vector<512x512xf32> to vector<512x128xf32>
    %36 = arith.truncf %35 : vector<512x128xf32> to vector<512x128xbf16>
    %cst_16 = arith.constant dense<0.000000e+00> : vector<256x512xf32>
    %37 = tpu.matmul %32, %34, %cst_16 {dimension_numbers = #tpu.dot_dimension_numbers<[1], [1], [0], [0], [0, 0, 1, 0], [], []>} : vector<256x128xbf16>, vector<512x128xbf16>, vector<256x512xf32> -> vector<256x512xf32>
    %cst_17 = arith.constant dense<0xFF800000> : vector<256xf32>
    %38 = vector.multi_reduction <maximumf>, %37, %cst_17 [1] : vector<256x512xf32> to vector<256xf32>
    %39 = vector.shape_cast %38 : vector<256xf32> to vector<256x1xf32>
    %40 = vector.broadcast %39 : vector<256x1xf32> to vector<256x512xf32>
    %41 = arith.subf %37, %40 : vector<256x512xf32>
    %42 = arith.truncf %41 : vector<256x512xf32> to vector<256x512xbf16>
    %43 = math.exp %42 : vector<256x512xbf16>
    %44 = arith.extf %43 : vector<256x512xbf16> to vector<256x512xf32>
    %cst_18 = arith.constant dense<0.000000e+00> : vector<256xf32>
    %45 = vector.multi_reduction <add>, %44, %cst_18 [1] : vector<256x512xf32> to vector<256xf32>
    %46 = vector.shape_cast %45 : vector<256xf32> to vector<256x1xf32>
    %cst_19 = arith.constant dense<0.000000e+00> : vector<256x128xf32>
    %47 = tpu.matmul %43, %36, %cst_19 {dimension_numbers = #tpu.dot_dimension_numbers<[1], [0], [0], [1], [0, 0, 1, 1], [], []>} : vector<256x512xbf16>, vector<512x128xbf16>, vector<256x128xf32> -> vector<256x128xf32>
    %48 = tpu.reciprocal %46 {approx = true} : vector<256x1xf32> -> vector<256x1xf32>
    %49 = vector.broadcast %48 : vector<256x1xf32> to vector<256x128xf32>
    %50 = arith.mulf %47, %49 : vector<256x128xf32>
    %51 = arith.truncf %50 : vector<256x128xf32> to vector<256x128xbf16>
    %c0_20 = arith.constant 0 : index
    %c128 = arith.constant 128 : index
    %52 = vector.load %arg8[%c0_20, %c128] : memref<256x256xbf16, #tpu.memory_space<vmem>>, vector<256x128xbf16>
    tpu.vector_store %arg8[%c0_20, %c128], %51 {strides = array<i32>} : memref<256x256xbf16, #tpu.memory_space<vmem>>, vector<256x128xbf16>,
    %c0_21 = arith.constant 0 : index
    %c0_22 = arith.constant 0 : index
    %53 = vector.load %arg8[%c0_21, %c0_22] : memref<256x256xbf16, #tpu.memory_space<vmem>>, vector<256x256xbf16>
    %c0_23 = arith.constant 0 : index
    %c0_24 = arith.constant 0 : index
    %54 = vector.load %arg5[%c0_23, %c0_24] : memref<256x128xbf16, #tpu.memory_space<vmem>>, vector<256x128xbf16>
    %cst_25 = arith.constant dense<0.000000e+00> : vector<256x128xf32>
    %55 = tpu.matmul %53, %54, %cst_25 {dimension_numbers = #tpu.dot_dimension_numbers<[1], [0], [0], [1], [0, 0, 1, 1], [], []>} : vector<256x256xbf16>, vector<256x128xbf16>, vector<256x128xf32> -> vector<256x128xf32>
    %c0_26 = arith.constant 0 : index
    %c0_27 = arith.constant 0 : index
    %56 = vector.load %arg6[%c0_26, %c0_27] : memref<1x128xbf16, #tpu.memory_space<vmem>>, vector<1x128xbf16>
    %57 = arith.extf %56 : vector<1x128xbf16> to vector<1x128xf32>
    %58 = vector.broadcast %57 : vector<1x128xf32> to vector<256x128xf32>
    %59 = arith.addf %55, %58 : vector<256x128xf32>
    %60 = arith.truncf %59 : vector<256x128xf32> to vector<256x128xbf16>
    %c0_28 = arith.constant 0 : index
    %c0_29 = arith.constant 0 : index
    %c0_30 = arith.constant 0 : index
    %61 = vector.load %arg7[%c0_28, %c0_29, %c0_30] : memref<1x256x128xbf16, #tpu.memory_space<vmem>>, vector<1x256x128xbf16>
    %62 = vector.shape_cast %61 : vector<1x256x128xbf16> to vector<256x128xbf16>
    %63 = vector.shape_cast %60 : vector<256x128xbf16> to vector<1x256x128xbf16>
    tpu.vector_store %arg7[%c0_28, %c0_29, %c0_30], %63 {strides = array<i32>} : memref<1x256x128xbf16, #tpu.memory_space<vmem>>, vector<1x256x128xbf16>,
    return
  }
  func.func @transform_0(%arg0: i32, %arg1: i32) -> (i32, i32, i32) {
    %c0_i32 = arith.constant 0 : i32
    %c0_i32_0 = arith.constant 0 : i32
    return %arg0, %arg1, %c0_i32 : i32, i32, i32
  }
  func.func @transform_1(%arg0: i32, %arg1: i32) -> (i32, i32, i32) {
    %c0_i32 = arith.constant 0 : i32
    %c0_i32_0 = arith.constant 0 : i32
    %c0_i32_1 = arith.constant 0 : i32
    return %arg0, %c0_i32, %c0_i32_0 : i32, i32, i32
  }
  func.func @transform_2(%arg0: i32, %arg1: i32) -> (i32, i32) {
    %c0_i32 = arith.constant 0 : i32
    %c0_i32_0 = arith.constant 0 : i32
    %c0_i32_1 = arith.constant 0 : i32
    return %c0_i32, %c0_i32_0 : i32, i32
  }
  func.func @transform_3(%arg0: i32, %arg1: i32) -> (i32, i32) {
    %c0_i32 = arith.constant 0 : i32
    %c0_i32_0 = arith.constant 0 : i32
    %c0_i32_1 = arith.constant 0 : i32
    return %c0_i32, %c0_i32_0 : i32, i32
  }
  func.func @transform_4(%arg0: i32, %arg1: i32) -> (i32, i32) {
    %c0_i32 = arith.constant 0 : i32
    %c0_i32_0 = arith.constant 0 : i32
    %c0_i32_1 = arith.constant 0 : i32
    return %c0_i32, %c0_i32_0 : i32, i32
  }
  func.func @transform_5(%arg0: i32, %arg1: i32) -> (i32, i32, i32) {
    %c0_i32 = arith.constant 0 : i32
    %c0_i32_0 = arith.constant 0 : i32
    return %arg0, %arg1, %c0_i32 : i32, i32, i32
  }
}

</mosaic_0001>

<bundles_post_ra>
// kernel: tpu_custom_call.1
= control target key start
LH: loop header
LB: loop body
LE: loop exit
PB: predicated region body
PF: predicated region fallthrough
CT: control target
= control target key end

     0   :  { %s11831_s0 = inlined_call_operand.hbm [shape: bf16[2,512,128], index: 0, kind: input, shape index: {}]   ;;  %s11832_s1 = inlined_call_operand.hbm [shape: bf16[2,512,128], index: 1, kind: input, shape index: {}]   ;;  %s11833_s2 = inlined_call_operand.hbm [shape: bf16[128,768], index: 2, kind: input, shape index: {}]   ;;  %s11834_s3 = inlined_call_operand.hbm [shape: bf16[256,128], index: 3, kind: input, shape index: {}]   ;;  %s11835_s4 = inlined_call_operand.vmem [shape: bf16[1,128], index: 4, kind: input, shape index: {}]   ;;  %s11836_s5 = inlined_call_operand.hbm [shape: bf16[2,512,128], index: 5, kind: output, shape index: {}]  }
   0x1   :  { %12178 = sst [smem:[#allocation249_spill]] %s11833_s2 }
   0x2   :  { %12179 = sst [smem:[#allocation250_spill]] %s11834_s3 }
   0x3   :  { %12180 = sst [smem:[#allocation251_spill]] %s11836_s5 }
   0x4   :  { %10 = vsyncpa [#allocation4], 0 }
   0x5   :  { %12 = vsyncpa [#allocation4 + $0x1], 0 }
   0x6   :  { %13 = vsyncpa [#allocation7], 0 }
   0x7   :  { %15 = vsyncpa [#allocation7 + $0x1], 0 }
   0x8   :  { %16 = vsyncpa [#allocation10], 0 }
   0x9   :  { %17 = vsyncpa [#allocation5], 0 }
   0xa   :  { %19 = vsyncpa [#allocation5 + $0x1], 0  ;;  %s8033_s18 = smov 0   ;;  %s8035_s19 = smov 0  }
   0xb   :  { %s8037_s20 = smov 0   ;;  %s8039_s21 = smov 0  }
   0xc   :  { %s8041_s22 = smov 0   ;;  %s8043_s23 = smov 0  }
   0xd   :  { %s8045_s24 = smov 0   ;;  %s8047_s25 = smov 0  }
   0xe   :  { %s8049_s26 = smov 0   ;;  %s8051_s27 = smov 0  }
   0xf   :  { %s8053_s28 = smov 0  }
  0x10 LB: > { %12181 = sst [smem:[#allocation17_spill]] %s7961_s21  ;;  %s8087_s29 = sadd.s32 4294967295, %s7989_s28   ;;  %s7989_s28 = sphi %s8053_s28, %s25_s28   ;;  %s7985_s27 = sphi %s8051_s27, %s13110_s27   ;;  %s7981_s26 = sphi %s8049_s26, %s13109_s26   ;;  %s7977_s25 = sphi %s8047_s25, %s13108_s25   ;;  %s7973_s24 = sphi %s8045_s24, %s13107_s24   ;;  %s7969_s23 = sphi %s8043_s23, %s13106_s23   ;;  %s7965_s22 = sphi %s8041_s22, %s13105_s22   ;;  %s7961_s21 = sphi %s8039_s21, %s13104_s21   ;;  %s7957_s20 = sphi %s8037_s20, %s13103_s20   ;;  %s7953_s19 = sphi %s8035_s19, %s13102_s19   ;;  %s7949_s18 = sphi %s8033_s18, %s13101_s18  }
  0x11   : > { %12182 = sst [smem:[#allocation18_spill]] %s7977_s25  ;;  %s6036_s30 = sadd.s32 4294967294, %s7989_s28  }
  0x12   : > { %p59_p0 = scmp.ne.s32.totalorder %s7965_s22, %s7961_s21  ;;  %p11838_p1 = scmp.eq.s32.totalorder %s8087_s29, 0 }
  0x13   : > { %p85_p2 = scmp.ne.s32.totalorder %s7953_s19, %s7949_s18  ;;  %p180_p5 = scmp.eq.s32.totalorder %s6036_s30, 3 }
  0x14   : > { %p8097_p4 = por %p11838_p1, %p59_p0  ;;  %p6037_p7 = scmp.ge.s32.totalorder %s7989_s28, 1 }
  0x15   : > { %p8103_p6 = por %p85_p2, %p11838_p1  ;;  %p8108_p8 = por %p180_p5, %p59_p0 }
  0x16   : > { %s12183_s6 = scalar_select %p8097_p4, 1, 0 }
  0x17   : > { %s12184_s7 = scalar_select %p8103_p6, 1, 0 }
  0x18   : > { %s12185_s8 = scalar_select %p8108_p8, 1, 0 }
  0x19   : > { %p187_p9 = scmp.lt.s32.totalorder %s7989_s28, 5  ;;  %s7991_s10 = smov [#allocation8]  }
  0x1a   : > { %12186 = sst [smem:[#allocation19_spill]] %s12185_s8  ;;  %s199_s11 = sshll.u32 %s7991_s10, 4  ;;  %s200_s11 = int_to_ptr.vmem [resolvable:$true] %s199_s11 }
  0x1b   : > { %p8113_p10 = pnand %p6037_p7, %p187_p9  ;;  %s7992_s13 = smov [#allocation9]  }
  0x1c   : > { %s212_s14 = sshll.u32 %s7992_s13, 4  ;;  %s12189_s2 = sld [smem:[#allocation249_spill]]  ;;  %s8125_s14 = int_to_ptr.vmem [resolvable:$true] %s212_s14 }
  0x1d   : > { %s12187_s9 = scalar_select %p8113_p10, 1, 0 }
  0x1e   : > { %p7098_p11 = pneg %p8113_p10 }
  0x20   : > { %p8121_p12 = pnand %p7098_p11, %p11838_p1 }
  0x22   : > { %s7739_s17 = scalar_lea.hbm %s12189_s2, 6144  ;;  %p7741_p0 = pneg %p8121_p12 }
  0x23   : > { %p7740_p13 = scmp.ne.s32.totalorder %s12189_s2, %s7739_s17  ;;  %p7746_p7 = scmp.lt.u32.totalorder %s7739_s17, %s12189_s2 }
  0x25   : > { %p7742_p2 = pnand %p7741_p0, %p7740_p13 }
  0x27   : > { %p7743_p5 = pneg %p7742_p2 }
  0x29   : > { %p7748_p9 = pnand %p7746_p7, %p7743_p5 }
  0x2b   : > { %7751 = shalt.err (!%p7748_p9)
}
  0x2c   : > { %s7752_s13 = scalar_lea.vmem %s200_s11, 6144  ;;  %p7760_p8 = scmp.lt.s32.totalorder %s200_s11, %s200_s11 }
  0x2d   : > { %p7753_p11 = scmp.ne.s32.totalorder %s200_s11, %s7752_s13  ;;  %p7761_p6 = scmp.lt.s32.totalorder %s7752_s13, %s7752_s13 }
  0x2f   : > { %p7755_p1 = pnand %p7753_p11, %p7741_p0  ;;  %p7762_p4 = por %p7761_p6, %p7760_p8 }
  0x31   : > { %p7756_p3 = pneg %p7755_p1 }
  0x33   : > { %p7763_p10 = pnand %p7762_p4, %p7756_p3 }
  0x35   : > { %7766 = shalt.err (!%p7763_p10)
}
  0x36   : > { %s7993_s15 = smov 384   ;;  %s7994_s16 = smov 24  }
  0x37   : > { %7101 = dma.hbm_to_vmem [thread:$0]  (!%p8121_p12), %s12189_s2, 6144, %s200_s11, [#allocation7], %s7993_s15, %s7993_s15, %s7994_s16  }
  0x38   : > { %s12190_s3 = sld [smem:[#allocation250_spill]] }
  0x3e   : > { %s7767_s10 = scalar_lea.hbm %s12190_s3, 2048 }
  0x3f   : > { %p7768_p1 = scmp.ne.s32.totalorder %s12190_s3, %s7767_s10  ;;  %p7774_p6 = scmp.lt.u32.totalorder %s7767_s10, %s12190_s3 }
  0x41   : > { %p7770_p3 = pnand %p7768_p1, %p7741_p0 }
  0x43   : > { %p7771_p4 = pneg %p7770_p3 }
  0x45   : > { %p7776_p8 = pnand %p7774_p6, %p7771_p4 }
  0x47   : > { %7779 = shalt.err (!%p7776_p8)
}
  0x48   : > { %s7780_s11 = scalar_lea.vmem %s8125_s14, 2048  ;;  %p7788_p5 = scmp.lt.s32.totalorder %s8125_s14, %s8125_s14 }
  0x49   : > { %p7781_p10 = scmp.ne.s32.totalorder %s8125_s14, %s7780_s11  ;;  %p7789_p7 = scmp.lt.s32.totalorder %s7780_s11, %s7780_s11 }
  0x4b   : > { %p7783_p13 = pnand %p7781_p10, %p7741_p0  ;;  %p7790_p9 = por %p7789_p7, %p7788_p5 }
  0x4d   : > { %p7784_p2 = pneg %p7783_p13 }
  0x4f   : > { %p7791_p11 = pnand %p7790_p9, %p7784_p2 }
  0x51   : > { %7794 = shalt.err (!%p7791_p11)
}
  0x52   : > { %s11844_s5 = smov 64   ;;  %s11846_s21 = smov 4  }
  0x53   : > { %7104 = dma.hbm_to_vmem [thread:$0]  (!%p8121_p12), %s12190_s3, 2048, %s8125_s14, [#allocation10], %s11844_s5, %s11844_s5, %s11846_s21  }
  0x54   : > { %s34_s16 = sadd.s32 1, %s7981_s26  ;;  %s37_s8 = sadd.s32 1, %s7985_s27 }
  0x55   : > { %p35_p0 = scmp.ge.s32.totalorder %s34_s16, 2  ;;  %s46_s17 = sadd.s32 1, %s7969_s23 }
  0x56   : > { %p53_p1 = scmp.ne.s32.totalorder %s7969_s23, %s7965_s22  ;;  %p11853_p3 = scmp.eq.s32.totalorder %s7989_s28, 0 }
  0x57   : > { %s13112_s16 = smov (%p35_p0, %s34_s16), 0  ;;  %s13114_s8 = smov (!%p35_p0, %s37_s8), %s7985_s27 }
  0x58   : > { %12191 = sst [smem:[#allocation20_spill]] %s13112_s16  ;;  %s42_s12 = ssub.s32 %s7981_s26, %s13112_s16 }
  0x59   : > { %p8190_p4 = por %p11853_p3, %p53_p1  ;;  %p39_p12 = scmp.ge.s32.totalorder %s13114_s8, 2 }
  0x5a   : > { %p12193_p6 = scmp.eq.s32.totalorder %s8087_s29, 3  ;;  %p11852_p10 = scmp.lt.s32.totalorder %s7989_s28, 4 }
  0x5b   : > { %s229_s30 = sand.u32 1, %s7969_s23   ;;  %s13116_s8 = smov (%p39_p12, %s13114_s8), 0 }
  0x5c   : > { %p8196_p8 = por %p12193_p6, %p53_p1  ;;  %12196 = sst [smem:[#allocation22_spill]] %s13116_s8 }
  0x5d   : > { %s6041_s10 = sshll.u32 %s229_s30, 7  ;;  %s8206_s13 = ssub.s32 %s7985_s27, %s13116_s8 }
  0x5e   : > { %s12194_s14 = scalar_select %p8196_p8, 1, 0 }
  0x5f   : > { %s43_s11 = sor.u32 %s42_s12, %s8206_s13  ;;  %s6042_s25 = sshll.u32 %s7981_s26, 5 }
  0x60   : > { %12195 = sst [smem:[#allocation21_spill]] %s12194_s14  ;;  %p44_p2 = scmp.eq.s32.totalorder %s43_s11, 0 }
  0x61   : > { %s6043_s15 = sshll.u32 %s7985_s27, 6  ;;  %s233_s5 = scalar_lea.vmem [#allocation3], %s6041_s10 }
  0x62   : > { %s242_s21 = sshll.u32 %s233_s5, 4  ;;  %s239_s3 = sadd.s32 %s6043_s15, %s6042_s25  ;;  %s8215_s21 = int_to_ptr.vmem [resolvable:$true] %s242_s21 }
  0x63   : > { %s8213_s2 = scalar_select %p44_p2, %s7969_s23, %s46_s17  }
  0x64   : > { %s6044_s16 = sshll.u32 %s239_s3, 6  ;;  %p8221_p5 = pnand %p11852_p10, %p8190_p4 }
  0x65   : > { %s8228_s11 = scalar_lea.hbm %s11831_s0, %s6044_s16  ;;  %s8230_s5 = scalar_lea.sflag [#allocation4], %s229_s30 }
  0x66   : > { %s7795_s3 = scalar_lea.hbm %s8228_s11, 2048  ;;  %p7797_p9 = pneg %p8221_p5 }
  0x67   : > { %p7796_p7 = scmp.ne.s32.totalorder %s8228_s11, %s7795_s3  ;;  %s7800_s14 = scalar_lea.hbm %s11831_s0, 8192 }
  0x68   : > { %p7801_p1 = scmp.lt.u32.totalorder %s8228_s11, %s11831_s0  ;;  %p7802_p4 = scmp.lt.u32.totalorder %s7800_s14, %s7795_s3 }
  0x69   : > { %p7798_p11 = pnand %p7797_p9, %p7796_p7  ;;  %p7804_p6 = scmp.lt.u32.totalorder %s7795_s3, %s8228_s11 }
  0x6a   : > { %p7803_p12 = por %p7802_p4, %p7801_p1 }
  0x6b   : > { %p7799_p0 = pneg %p7798_p11 }
  0x6c   : > { %p7805_p2 = por %p7804_p6, %p7803_p12 }
  0x6e   : > { %p7806_p10 = pnand %p7805_p2, %p7799_p0 }
  0x70   : > { %7809 = shalt.err (!%p7806_p10)
}
  0x71   : > { %s7810_s30 = scalar_lea.vmem %s8215_s21, 2048  ;;  %s7997_s25 = smov [#allocation3]  }
  0x72   : > { %p7811_p7 = scmp.ne.s32.totalorder %s8215_s21, %s7810_s30  ;;  %s7815_s15 = sshll.u32 %s7997_s25, 4  ;;  %s7816_s15 = int_to_ptr.vmem [resolvable:$false] %s7815_s15 }
  0x73   : > { %s7817_s12 = scalar_lea.vmem %s7816_s15, 4096  ;;  %p7818_p13 = scmp.lt.s32.totalorder %s8215_s21, %s7816_s15 }
  0x74   : > { %p7813_p11 = pnand %p7811_p7, %p7797_p9  ;;  %p7819_p1 = scmp.lt.s32.totalorder %s7817_s12, %s7810_s30 }
  0x76   : > { %p7814_p3 = pneg %p7813_p11  ;;  %p7820_p4 = por %p7819_p1, %p7818_p13 }
  0x78   : > { %p7821_p12 = pnand %p7820_p4, %p7814_p3 }
  0x7a   : > { %7824 = shalt.err (!%p7821_p12)
}
  0x7b   : > { %s12198_s3 = smov 4   ;;  %s12199_s17 = smov 64  }
  0x7c   : > { %7108 = dma.hbm_to_vmem [thread:$0]  (!%p8221_p5), %s8228_s11, 2048, %s8215_s21, %s8230_s5, %s12199_s17, %s12199_s17, %s12198_s3  }
  0x7d   : > { %s72_s18 = sadd.s32 1, %s7957_s20  ;;  %p79_p3 = scmp.ne.s32.totalorder %s7957_s20, %s7953_s19 }
  0x7e   : > { %p12200_p10 = scmp.eq.s32.totalorder %s8206_s13, 0  ;;  %p12201_p13 = scmp.eq.s32.totalorder %s7989_s28, 0 }
  0x7f   : > { %s252_s14 = sand.u32 1, %s7989_s28   ;;  %s254_s16 = sand.u32 1, %s7957_s20  }
  0x80   : > { %s8267_s8 = scalar_select %p12200_p10, %s7957_s20, %s72_s18  }
  0x81   : > { %p81_p9 = por %p79_p3, %p12201_p13  ;;  %s6045_s10 = sshll.u32 %s254_s16, 8 }
  0x82   : > { %s6204_s30 = sshll.u32 %s7985_s27, 12  ;;  %s256_s21 = scalar_lea.vmem [#allocation6], %s6045_s10 }
  0x83   : > { %s8277_s12 = scalar_lea.hbm %s11832_s1, %s6204_s30  ;;  %s263_s11 = sshll.u32 %s256_s21, 4  ;;  %s8285_s11 = int_to_ptr.vmem [resolvable:$true] %s263_s11 }
  0x84   : > { %p12202_p5 = scmp.lt.s32.totalorder %s7989_s28, 4  ;;  %s8287_s5 = scalar_lea.sflag [#allocation7], %s252_s14 }
  0x85   : > { %s7825_s18 = scalar_lea.hbm %s8277_s12, 4096  ;;  %s7830_s30 = scalar_lea.hbm %s11832_s1, 8192 }
  0x86   : > { %p8281_p0 = pnand %p12202_p5, %p81_p9  ;;  %p7826_p6 = scmp.ne.s32.totalorder %s8277_s12, %s7825_s18 }
  0x87   : > { %p7831_p1 = scmp.lt.u32.totalorder %s8277_s12, %s11832_s1  ;;  %p7832_p4 = scmp.lt.u32.totalorder %s7830_s30, %s7825_s18 }
  0x88   : > { %p7827_p2 = pneg %p8281_p0  ;;  %p7834_p3 = scmp.lt.u32.totalorder %s7825_s18, %s8277_s12 }
  0x89   : > { %p7833_p12 = por %p7832_p4, %p7831_p1 }
  0x8a   : > { %p7828_p7 = pnand %p7827_p2, %p7826_p6 }
  0x8b   : > { %p7835_p10 = por %p7834_p3, %p7833_p12 }
  0x8c   : > { %p7829_p11 = pneg %p7828_p7 }
  0x8e   : > { %p7836_p13 = pnand %p7835_p10, %p7829_p11 }
  0x90   : > { %7839 = shalt.err (!%p7836_p13)
}
  0x91   : > { %s7840_s14 = scalar_lea.vmem %s8285_s11, 4096  ;;  %s7998_s21 = smov [#allocation6]  }
  0x92   : > { %p7841_p9 = scmp.ne.s32.totalorder %s8285_s11, %s7840_s14  ;;  %s7845_s16 = sshll.u32 %s7998_s21, 4  ;;  %s7846_s16 = int_to_ptr.vmem [resolvable:$false] %s7845_s16 }
  0x93   : > { %s7847_s10 = scalar_lea.vmem %s7846_s16, 8192  ;;  %p7848_p7 = scmp.lt.s32.totalorder %s8285_s11, %s7846_s16 }
  0x94   : > { %p7843_p5 = pnand %p7841_p9, %p7827_p2  ;;  %p7849_p1 = scmp.lt.s32.totalorder %s7847_s10, %s7840_s14 }
  0x96   : > { %p7844_p6 = pneg %p7843_p5  ;;  %p7850_p4 = por %p7849_p1, %p7848_p7 }
  0x98   : > { %p7851_p12 = pnand %p7850_p4, %p7844_p6 }
  0x9a   : > { %7854 = shalt.err (!%p7851_p12)
}
  0x9b   : > { %7111 = dma.hbm_to_vmem [thread:$0]  (!%p8281_p0), %s8277_s12, 4096, %s8285_s11, %s8287_s5, %s12199_s17, %s12199_s17, %s12198_s3  }
  0x9c   : > { %p12204_p2 = scmp.ne.s32.totalorder %s12187_s9, 0 }
  0x9e   : > { %275 = sbr.rel (%p12204_p2) target bundleno = 2169 (0x879), region = 40 }
  0xa5   : > { %s8321_s18 = sand.u32 1, %s7965_s22   ;;  %p12205_p11 = scmp.ne.s32.totalorder %s12183_s6, 0 }
  0xa6   : > { %s6049_s30 = sshll.u32 %s8321_s18, 7  ;;  %s278_s25 = scalar_lea.sflag [#allocation4], %s8321_s18 }
  0xa7   : > { %s8327_s13 = scalar_lea.vmem [#allocation3], %s6049_s30 }
  0xa8   : > { %7928 = dma.done.wait (%p12205_p11), %s278_s25, 2048  }
  0xa9   : > { %7930 = vsyncadd (%p12205_p11), %s278_s25, 4294965248  ;;  %s286_s9 = sand.u32 1, %s8087_s29   ;;  %s288_s3 = sand.u32 1, %s7953_s19  }
  0xaa   : > { %s6050_s17 = sshll.u32 %s288_s3, 8  ;;  %s287_s12 = scalar_lea.sflag [#allocation7], %s286_s9 }
  0xab   : > { %s8335_s11 = scalar_lea.vmem [#allocation6], %s6050_s17  ;;  %p12206_p0 = scmp.ne.s32.totalorder %s12184_s7, 0 }
  0xad   : > { %7932 = dma.done.wait (%p12206_p0), %s287_s12, 4096  }
  0xae   : > { %7934 = vsyncadd (%p12206_p0), %s287_s12, 4294963200  ;;  %p12207_p3 = scmp.eq.s32.totalorder %s8087_s29, 0 }
  0xb0   : > { %7936 = dma.done.wait (%p12207_p3), [#allocation7], 6144   ;;  %p12208_p10 = pmov %p12207_p3 }
  0xb1   : > { %p12209_p13 = pmov %p12207_p3 }
  0xb2   : > { %7938 = vsyncadd (%p12208_p10), [#allocation7], 4294961152 }
  0xb3   : > { %7940 = dma.done.wait (%p12209_p13), [#allocation10], 2048   ;;  %p12210_p9 = pmov %p12207_p3 }
  0xb4   : > { %v11856_v0 = vmov 0   ;;  %v7219_v1 = vld [vmem:[#allocation8 + $0x4] ss:$24 sps:$4 sm:$0xff]   ;;  %v7223_v3 = vld [vmem:[#allocation8] ss:$24 sps:$4 sm:$0xff]   ;;  %v7269_v35 = vld [vmem:[%s8327_s13 + $0x8] sm:$0xff]  }
  0xb5   : > { %7942 = vsyncadd (%p12210_p9), [#allocation10], 4294965248  ;;  %589 = vmatprep.mubr.bf16.mxu0 %v11856_v0  ;;  %1230 = vmatprep.mubr.bf16.mxu1 %v11856_v0  ;;  %v7221_v2 = vld [vmem:[#allocation8 + $0xc] ss:$24 sps:$4 sm:$0xff]   ;;  %v7224_v4 = vld [vmem:[#allocation8 + $0x8] ss:$24 sps:$4 sm:$0xff]  }
  0xb6   : > { %557 = vmatprep.subr.bf16.mxu0 %v7219_v1  ;;  %1198 = vmatprep.subr.bf16.mxu1 %v7221_v2  ;;  %v7225_v5 = vld [vmem:[#allocation8 + $0x34] ss:$24 sps:$4 sm:$0xff]   ;;  %v7229_v7 = vld [vmem:[#allocation8 + $0x30] ss:$24 sps:$4 sm:$0xff]   ;;  %v7231_v9 = vld [vmem:[#allocation8 + $0x64] ss:$24 sps:$4 sm:$0xff]  }
  0xb7   : > { %558 = vmatpush1.bf16.msra.mxu0 %v7223_v3  ;;  %1199 = vmatpush1.bf16.msra.mxu1 %v7224_v4  ;;  %v7227_v6 = vld [vmem:[#allocation8 + $0x3c] ss:$24 sps:$4 sm:$0xff]   ;;  %v7230_v8 = vld [vmem:[#allocation8 + $0x38] ss:$24 sps:$4 sm:$0xff]   ;;  %v7233_v10 = vld [vmem:[#allocation8 + $0x6c] ss:$24 sps:$4 sm:$0xff]  }
  0xb8   : > { %559 = vmatprep.subr.bf16.mxu0 %v7225_v5  ;;  %1200 = vmatprep.subr.bf16.mxu1 %v7227_v6  ;;  %v7235_v11 = vld [vmem:[#allocation8 + $0x60] ss:$24 sps:$4 sm:$0xff]   ;;  %v7237_v13 = vld [vmem:[#allocation8 + $0x94] ss:$24 sps:$4 sm:$0xff]   ;;  %v7241_v15 = vld [vmem:[#allocation8 + $0x90] ss:$24 sps:$4 sm:$0xff]  }
  0xb9   : > { %v7236_v12 = vld [vmem:[#allocation8 + $0x68] ss:$24 sps:$4 sm:$0xff]   ;;  %v7239_v14 = vld [vmem:[#allocation8 + $0x9c] ss:$24 sps:$4 sm:$0xff]   ;;  %v7242_v16 = vld [vmem:[#allocation8 + $0x98] ss:$24 sps:$4 sm:$0xff]  }
  0xba   : > { %v7243_v17 = vld [vmem:[#allocation8 + $0xc4] ss:$24 sps:$4 sm:$0xff]   ;;  %v7247_v19 = vld [vmem:[#allocation8 + $0xc0] ss:$24 sps:$4 sm:$0xff]   ;;  %v7249_v21 = vld [vmem:[#allocation8 + $0xf4] ss:$24 sps:$4 sm:$0xff]  }
  0xbb   : > { %560 = vmatpush1.bf16.msra.mxu0 %v7229_v7  ;;  %1201 = vmatpush1.bf16.msra.mxu1 %v7230_v8  ;;  %v7245_v18 = vld [vmem:[#allocation8 + $0xcc] ss:$24 sps:$4 sm:$0xff]   ;;  %v7248_v20 = vld [vmem:[#allocation8 + $0xc8] ss:$24 sps:$4 sm:$0xff]   ;;  %v7251_v22 = vld [vmem:[#allocation8 + $0xfc] ss:$24 sps:$4 sm:$0xff]  }
  0xbc   : > { %561 = vmatprep.subr.bf16.mxu0 %v7231_v9  ;;  %1202 = vmatprep.subr.bf16.mxu1 %v7233_v10  ;;  %v7253_v23 = vld [vmem:[#allocation8 + $0xf0] ss:$24 sps:$4 sm:$0xff]   ;;  %v7255_v25 = vld [vmem:[#allocation8 + $0x124] ss:$24 sps:$4 sm:$0xff]   ;;  %v7259_v27 = vld [vmem:[#allocation8 + $0x120] ss:$24 sps:$4 sm:$0xff]  }
  0xbd   : > { %v7254_v24 = vld [vmem:[#allocation8 + $0xf8] ss:$24 sps:$4 sm:$0xff]   ;;  %v7257_v26 = vld [vmem:[#allocation8 + $0x12c] ss:$24 sps:$4 sm:$0xff]   ;;  %v7260_v28 = vld [vmem:[#allocation8 + $0x128] ss:$24 sps:$4 sm:$0xff]  }
  0xbe   : > { %v7261_v29 = vld [vmem:[#allocation8 + $0x154] ss:$24 sps:$4 sm:$0xff]   ;;  %v7265_v31 = vld [vmem:[#allocation8 + $0x150] ss:$24 sps:$4 sm:$0xff]   ;;  %v7267_v33 = vld [vmem:[%s8327_s13] sm:$0xff]   ;;  %s11712_s7 = scalar_lea.vmem [#allocation11], %s6049_s30 }
  0xbf   : > { %562 = vmatpush1.bf16.msra.mxu0 %v7235_v11  ;;  %1203 = vmatpush1.bf16.msra.mxu1 %v7236_v12  ;;  %v7263_v30 = vld [vmem:[#allocation8 + $0x15c] ss:$24 sps:$4 sm:$0xff]   ;;  %v7266_v32 = vld [vmem:[#allocation8 + $0x158] ss:$24 sps:$4 sm:$0xff]   ;;  %v8353_v34 = vld [vmem:[%s8335_s11] sm:$0xff]   ;;  %s13093_s5 = sld [smem:[#allocation18_spill]] }
  0xc0   : > { %563 = vmatprep.subr.bf16.mxu0 %v7237_v13  ;;  %1204 = vmatprep.subr.bf16.mxu1 %v7239_v14  ;;  %v8360_v36 = vld [vmem:[%s8335_s11 + $0x8] sm:$0xff]   ;;  %v7271_v37 = vld [vmem:[%s8327_s13 + $0x10] sm:$0xff]   ;;  %v7298_v41 = vld [vmem:[#allocation8 + $0x44] ss:$24 sps:$4 sm:$0xff]   ;;  %s6199_s15 = sshll.u32 %s7973_s24, 5  ;;  %s5903_s10 = sshll.u32 %s11712_s7, 4  ;;  %s11762_s10 = int_to_ptr.vmem [resolvable:$true] %s5903_s10 }
  0xc1   : > { %v8367_v38 = vld [vmem:[%s8335_s11 + $0x10] sm:$0xff]   ;;  %v7296_v42 = vld [vmem:[#allocation8 + $0x40] ss:$24 sps:$4 sm:$0xff]   ;;  %v7306_v47 = vld [vmem:[#allocation8 + $0xa4] ss:$24 sps:$4 sm:$0xff]   ;;  %s5888_s3 = scalar_lea.sflag [#allocation5], %s8321_s18 }
  0xc2   : > { %v7295_v39 = vld [vmem:[#allocation8 + $0x14] ss:$24 sps:$4 sm:$0xff]   ;;  %v7293_v40 = vld [vmem:[#allocation8 + $0x10] ss:$24 sps:$4 sm:$0xff]   ;;  %v7273_v43 = vld [vmem:[%s8327_s13 + $0x18] sm:$0xff]   ;;  %s7855_s17 = scalar_lea.vmem %s11762_s10, 2048 }
  0xc3   : > { %564 = vmatpush1.bf16.msra.mxu0 %v7241_v15  ;;  %1205 = vmatpush1.bf16.msra.mxu1 %v7242_v16  ;;  %v7303_v44 = vld [vmem:[#allocation8 + $0x74] ss:$24 sps:$4 sm:$0xff]   ;;  %v8374_v45 = vld [vmem:[%s8335_s11 + $0x18] sm:$0xff]   ;;  %v7301_v46 = vld [vmem:[#allocation8 + $0x70] ss:$24 sps:$4 sm:$0xff]   ;;  %p7856_p5 = scmp.ne.s32.totalorder %s11762_s10, %s7855_s17  ;;  %s8000_s12 = smov [#allocation11]  }
  0xc4   : > { %565 = vmatprep.subr.bf16.mxu0 %v7243_v17  ;;  %1206 = vmatprep.subr.bf16.mxu1 %v7245_v18  ;;  %v7304_v48 = vld [vmem:[#allocation8 + $0xa0] ss:$24 sps:$4 sm:$0xff]   ;;  %v7311_v49 = vld [vmem:[#allocation8 + $0xd4] ss:$24 sps:$4 sm:$0xff]   ;;  %v7309_v52 = vld [vmem:[#allocation8 + $0xd0] ss:$24 sps:$4 sm:$0xff]  }
  0xc5   : > { %v7275_v50 = vld [vmem:[%s8327_s13 + $0x20] sm:$0xff]   ;;  %v7277_v55 = vld [vmem:[%s8327_s13 + $0x28] sm:$0xff]   ;;  %v7279_v61 = vld [vmem:[%s8327_s13 + $0x30] sm:$0xff]   ;;  %s6200_s14 = sshll.u32 %s13093_s5, 6  ;;  %p7857_p6 = pnand %p7856_p5, %p8196_p8 }
  0xc6   : > { %v8381_v51 = vld [vmem:[%s8335_s11 + $0x20] sm:$0xff]   ;;  %v8388_v56 = vld [vmem:[%s8335_s11 + $0x28] sm:$0xff]   ;;  %v8395_v62 = vld [vmem:[%s8335_s11 + $0x30] sm:$0xff]   ;;  %s5900_s16 = sadd.s32 %s6200_s14, %s6199_s15 }
  0xc7   : > { %566 = vmatpush1.bf16.msra.mxu0 %v7247_v19  ;;  %1207 = vmatpush1.bf16.msra.mxu1 %v7248_v20  ;;  %v7314_v53 = vld [vmem:[#allocation8 + $0x104] ss:$24 sps:$4 sm:$0xff]   ;;  %v7312_v54 = vld [vmem:[#allocation8 + $0x100] ss:$24 sps:$4 sm:$0xff]   ;;  %v7319_v57 = vld [vmem:[#allocation8 + $0x134] ss:$24 sps:$4 sm:$0xff]   ;;  %p7858_p7 = pneg %p7857_p6 }
  0xc8   : > { %567 = vmatprep.subr.bf16.mxu0 %v7249_v21  ;;  %1208 = vmatprep.subr.bf16.mxu1 %v7251_v22  ;;  %v7317_v58 = vld [vmem:[#allocation8 + $0x130] ss:$24 sps:$4 sm:$0xff]   ;;  %v7322_v59 = vld [vmem:[#allocation8 + $0x164] ss:$24 sps:$4 sm:$0xff]   ;;  %v7320_v60 = vld [vmem:[#allocation8 + $0x160] ss:$24 sps:$4 sm:$0xff]  }
  0xc9   : > { %v7281_v63 = vld [vmem:[%s8327_s13 + $0x38] sm:$0xff]   ;;  %v7283_v2 = vld [vmem:[%s8327_s13 + $0x40] sm:$0xff]   ;;  %v7285_v4 = vld [vmem:[%s8327_s13 + $0x48] sm:$0xff]   ;;  %s6201_s30 = sshll.u32 %s5900_s16, 6 }
  0xca   : > { %v8402_v1 = vld [vmem:[%s8335_s11 + $0x38] sm:$0xff]   ;;  %v8409_v3 = vld [vmem:[%s8335_s11 + $0x40] sm:$0xff]   ;;  %v8416_v5 = vld [vmem:[%s8335_s11 + $0x48] sm:$0xff]  }
  0xcb   : > { %568 = vmatpush1.bf16.msra.mxu0 %v7253_v23  ;;  %1209 = vmatpush1.bf16.msra.mxu1 %v7254_v24  ;;  %v7287_v6 = vld [vmem:[%s8327_s13 + $0x50] sm:$0xff]   ;;  %v7289_v8 = vld [vmem:[%s8327_s13 + $0x58] sm:$0xff]   ;;  %v7291_v10 = vld [vmem:[%s8327_s13 + $0x60] sm:$0xff]  }
  0xcc   : > { %569 = vmatprep.subr.bf16.mxu0 %v7255_v25  ;;  %1210 = vmatprep.subr.bf16.mxu1 %v7257_v26  ;;  %v8423_v7 = vld [vmem:[%s8335_s11 + $0x50] sm:$0xff]   ;;  %v8430_v9 = vld [vmem:[%s8335_s11 + $0x58] sm:$0xff]   ;;  %v8437_v11 = vld [vmem:[%s8335_s11 + $0x60] sm:$0xff]  }
  0xcd   : > { %v7299_v12 = vld [vmem:[%s8327_s13 + $0x68] sm:$0xff]   ;;  %v7307_v14 = vld [vmem:[%s8327_s13 + $0x70] sm:$0xff]   ;;  %v7315_v16 = vld [vmem:[%s8327_s13 + $0x78] sm:$0xff]   ;;  %s13095_s13 = sld [smem:[#allocation251_spill]] }
  0xce   : > { %v8444_v13 = vld [vmem:[%s8335_s11 + $0x68] sm:$0xff]   ;;  %v8451_v15 = vld [vmem:[%s8335_s11 + $0x70] sm:$0xff]   ;;  %v8458_v17 = vld [vmem:[%s8335_s11 + $0x78] sm:$0xff]  }
  0xcf   : > { %570 = vmatpush1.bf16.msra.mxu0 %v7259_v27  ;;  %1211 = vmatpush1.bf16.msra.mxu1 %v7260_v28  ;;  %v8464_v18 = vld [vmem:[%s8335_s11 + $0x80] sm:$0xff]   ;;  %v8471_v19 = vld [vmem:[%s8335_s11 + $0x88] sm:$0xff]   ;;  %v8478_v20 = vld [vmem:[%s8335_s11 + $0x90] sm:$0xff]  }
  0xd0   : > { %571 = vmatprep.subr.bf16.mxu0 %v7261_v29  ;;  %1212 = vmatprep.subr.bf16.mxu1 %v7263_v30  ;;  %v8485_v21 = vld [vmem:[%s8335_s11 + $0x98] sm:$0xff]   ;;  %v8492_v22 = vld [vmem:[%s8335_s11 + $0xa0] sm:$0xff]   ;;  %v8499_v23 = vld [vmem:[%s8335_s11 + $0xa8] sm:$0xff]  }
  0xd1   : > { %v8506_v24 = vld [vmem:[%s8335_s11 + $0xb0] sm:$0xff]   ;;  %v8513_v25 = vld [vmem:[%s8335_s11 + $0xb8] sm:$0xff]   ;;  %v8520_v26 = vld [vmem:[%s8335_s11 + $0xc0] sm:$0xff]  }
  0xd2   : > { %v8527_v27 = vld [vmem:[%s8335_s11 + $0xc8] sm:$0xff]   ;;  %v8534_v28 = vld [vmem:[%s8335_s11 + $0xd0] sm:$0xff]  }
  0xd3   : > { %572 = vmatpush1.bf16.msra.mxu0 %v7265_v31  ;;  %1213 = vmatpush1.bf16.msra.mxu1 %v7266_v32  ;;  %v8545_v32 = vld [vmem:[%s8335_s11 + $0xd8] sm:$0xff]   ;;  %s11767_s9 = scalar_lea.hbm %s13095_s13, %s6201_s30 }
  0xd4   : > { %1551 = vmatprep.subr.bf16.mxu0 %v7295_v39 }
  0xd6   : > { %590 = vmatmul.mubr.bf16.vlgmr.msra.gmra.mrb[0].mxu0 %v7267_v33  ;;  %1231 = vmatmul.mubr.bf16.vlgmr.msra.gmra.mrb[0].mxu1 %v8353_v34 }
  0xd7   : > { %599 = vmatprep.mubr.bf16.mxu0 %v11856_v0  ;;  %1240 = vmatprep.mubr.bf16.mxu1 %v11856_v0 }
  0xd8   : > { %1552 = vmatpush1.bf16.msra.mxu0 %v7293_v40 }
  0xd9   : > { %1553 = vmatprep.subr.bf16.mxu0 %v7298_v41 }
  0xdc   : > { %1554 = vmatpush1.bf16.msra.mxu0 %v7296_v42 }
  0xdd   : > { %1555 = vmatprep.subr.bf16.mxu0 %v7303_v44 }
  0xde   : > { %600 = vmatmul.mubr.bf16.gmra.mrb[4].mxu0 %v7269_v35  ;;  %1241 = vmatmul.mubr.bf16.gmra.mrb[4].mxu1 %v8360_v36 }
  0xdf   : > { %609 = vmatprep.mubr.bf16.mxu0 %v11856_v0  ;;  %1250 = vmatprep.mubr.bf16.mxu1 %v11856_v0 }
  0xe0   : > { %1556 = vmatpush1.bf16.msra.mxu0 %v7301_v46 }
  0xe1   : > { %1557 = vmatprep.subr.bf16.mxu0 %v7306_v47 }
  0xe4   : > { %1558 = vmatpush1.bf16.msra.mxu0 %v7304_v48 }
  0xe5   : > { %1559 = vmatprep.subr.bf16.mxu0 %v7311_v49  ;;  %v8568_v49 = vld [vmem:[%s8335_s11 + $0xe0] sm:$0xff]  }
  0xe6   : > { %610 = vmatmul.mubr.bf16.gmra.mrb[8].mxu0 %v7271_v37  ;;  %1251 = vmatmul.mubr.bf16.gmra.mrb[8].mxu1 %v8367_v38 }
  0xe7   : > { %619 = vmatprep.mubr.bf16.mxu0 %v11856_v0  ;;  %1260 = vmatprep.mubr.bf16.mxu1 %v11856_v0 }
  0xe8   : > { %1560 = vmatpush1.bf16.msra.mxu0 %v7309_v52 }
  0xe9   : > { %1561 = vmatprep.subr.bf16.mxu0 %v7314_v53 }
  0xec   : > { %1562 = vmatpush1.bf16.msra.mxu0 %v7312_v54 }
  0xed   : > { %1563 = vmatprep.subr.bf16.mxu0 %v7319_v57 }
  0xee   : > { %620 = vmatmul.mubr.bf16.gmra.mrb[12].mxu0 %v7273_v43  ;;  %1261 = vmatmul.mubr.bf16.gmra.mrb[12].mxu1 %v8374_v45 }
  0xef   : > { %629 = vmatprep.mubr.bf16.mxu0 %v11856_v0  ;;  %1270 = vmatprep.mubr.bf16.mxu1 %v11856_v0 }
  0xf0   : > { %1564 = vmatpush1.bf16.msra.mxu0 %v7317_v58 }
  0xf1   : > { %1565 = vmatprep.subr.bf16.mxu0 %v7322_v59 }
  0xf4   : > { %1566 = vmatpush1.bf16.msra.mxu0 %v7320_v60 }
  0xf6   : > { %630 = vmatmul.mubr.bf16.gmra.mrb[16].mxu0 %v7275_v50  ;;  %1271 = vmatmul.mubr.bf16.gmra.mrb[16].mxu1 %v8381_v51 }
  0xf7   : > { %639 = vmatprep.mubr.bf16.mxu0 %v11856_v0  ;;  %1280 = vmatprep.mubr.bf16.mxu1 %v11856_v0 }
  0xfe   : > { %640 = vmatmul.mubr.bf16.gmra.mrb[20].mxu0 %v7277_v55  ;;  %1281 = vmatmul.mubr.bf16.gmra.mrb[20].mxu1 %v8388_v56 }
  0xff   : > { %649 = vmatprep.mubr.bf16.mxu0 %v11856_v0  ;;  %1290 = vmatprep.mubr.bf16.mxu1 %v11856_v0 }
 0x106   : > { %650 = vmatmul.mubr.bf16.gmra.mrb[24].mxu0 %v7279_v61  ;;  %1291 = vmatmul.mubr.bf16.gmra.mrb[24].mxu1 %v8395_v62 }
 0x107   : > { %659 = vmatprep.mubr.bf16.mxu0 %v11856_v0  ;;  %1300 = vmatprep.mubr.bf16.mxu1 %v11856_v0 }
 0x10e   : > { %660 = vmatmul.mubr.bf16.gmra.mrb[28].mxu0 %v7281_v63  ;;  %1301 = vmatmul.mubr.bf16.gmra.mrb[28].mxu1 %v8402_v1 }
 0x10f   : > { %669 = vmatprep.mubr.bf16.mxu0 %v11856_v0  ;;  %1310 = vmatprep.mubr.bf16.mxu1 %v11856_v0 }
 0x116   : > { %670 = vmatmul.mubr.bf16.gmra.mrb[32].mxu0 %v7283_v2  ;;  %1311 = vmatmul.mubr.bf16.gmra.mrb[32].mxu1 %v8409_v3 }
 0x117   : > { %679 = vmatprep.mubr.bf16.mxu0 %v11856_v0  ;;  %1320 = vmatprep.mubr.bf16.mxu1 %v11856_v0 }
 0x11e   : > { %680 = vmatmul.mubr.bf16.gmra.mrb[36].mxu0 %v7285_v4  ;;  %1321 = vmatmul.mubr.bf16.gmra.mrb[36].mxu1 %v8416_v5 }
 0x11f   : > { %689 = vmatprep.mubr.bf16.mxu0 %v11856_v0  ;;  %1330 = vmatprep.mubr.bf16.mxu1 %v11856_v0 }
 0x126   : > { %690 = vmatmul.mubr.bf16.gmra.mrb[40].mxu0 %v7287_v6  ;;  %1331 = vmatmul.mubr.bf16.gmra.mrb[40].mxu1 %v8423_v7 }
 0x127   : > { %699 = vmatprep.mubr.bf16.mxu0 %v11856_v0  ;;  %1340 = vmatprep.mubr.bf16.mxu1 %v11856_v0 }
 0x12e   : > { %700 = vmatmul.mubr.bf16.gmra.mrb[44].mxu0 %v7289_v8  ;;  %1341 = vmatmul.mubr.bf16.gmra.mrb[44].mxu1 %v8430_v9 }
 0x12f   : > { %709 = vmatprep.mubr.bf16.mxu0 %v11856_v0  ;;  %1350 = vmatprep.mubr.bf16.mxu1 %v11856_v0 }
 0x136   : > { %710 = vmatmul.mubr.bf16.gmra.mrb[48].mxu0 %v7291_v10  ;;  %1351 = vmatmul.mubr.bf16.gmra.mrb[48].mxu1 %v8437_v11 }
 0x137   : > { %719 = vmatprep.mubr.bf16.mxu0 %v11856_v0  ;;  %1360 = vmatprep.mubr.bf16.mxu1 %v11856_v0 }
 0x13e   : > { %720 = vmatmul.mubr.bf16.gmra.mrb[52].mxu0 %v7299_v12  ;;  %1361 = vmatmul.mubr.bf16.gmra.mrb[52].mxu1 %v8444_v13 }
 0x13f   : > { %729 = vmatprep.mubr.bf16.mxu0 %v11856_v0  ;;  %1370 = vmatprep.mubr.bf16.mxu1 %v11856_v0 }
 0x146   : > { %730 = vmatmul.mubr.bf16.gmra.mrb[56].mxu0 %v7307_v14  ;;  %1371 = vmatmul.mubr.bf16.gmra.mrb[56].mxu1 %v8451_v15 }
 0x147   : > { %739 = vmatprep.mubr.bf16.mxu0 %v11856_v0  ;;  %1380 = vmatprep.mubr.bf16.mxu1 %v11856_v0 }
 0x14e   : > { %740 = vmatmul.mubr.bf16.gmra.mrb[60].mxu0 %v7315_v16  ;;  %1381 = vmatmul.mubr.bf16.gmra.mrb[60].mxu1 %v8458_v17 }
 0x14f   : > { %1390 = vmatprep.mubr.bf16.mxu1 %v11856_v0  ;;  %1583 = vmatprep.mubr.bf16.mxu0 %v11856_v0 }
 0x156   : > { %1391 = vmatmul.mubr.bf16.gmra.mrb[64].mxu1 %v8464_v18  ;;  %1584 = vmatmul.mubr.bf16.vlgmr.msra.gmra.mrb[64].mxu0 %v8353_v34 }
 0x157   : > { %1400 = vmatprep.mubr.bf16.mxu1 %v11856_v0  ;;  %1593 = vmatprep.mubr.bf16.mxu0 %v11856_v0 }
 0x15e   : > { %1401 = vmatmul.mubr.bf16.gmra.mrb[68].mxu1 %v8471_v19  ;;  %1594 = vmatmul.mubr.bf16.gmra.mrb[68].mxu0 %v8360_v36 }
 0x15f   : > { %1410 = vmatprep.mubr.bf16.mxu1 %v11856_v0  ;;  %1603 = vmatprep.mubr.bf16.mxu0 %v11856_v0 }
 0x166   : > { %1411 = vmatmul.mubr.bf16.gmra.mrb[72].mxu1 %v8478_v20  ;;  %1604 = vmatmul.mubr.bf16.gmra.mrb[72].mxu0 %v8367_v38 }
 0x167   : > { %1420 = vmatprep.mubr.bf16.mxu1 %v11856_v0  ;;  %1613 = vmatprep.mubr.bf16.mxu0 %v11856_v0 }
 0x16e   : > { %1421 = vmatmul.mubr.bf16.gmra.mrb[76].mxu1 %v8485_v21  ;;  %1614 = vmatmul.mubr.bf16.gmra.mrb[76].mxu0 %v8374_v45 }
 0x16f   : > { %1430 = vmatprep.mubr.bf16.mxu1 %v11856_v0  ;;  %1623 = vmatprep.mubr.bf16.mxu0 %v11856_v0 }
 0x176   : > { %1431 = vmatmul.mubr.bf16.gmra.mrb[80].mxu1 %v8492_v22  ;;  %1624 = vmatmul.mubr.bf16.gmra.mrb[80].mxu0 %v8381_v51 }
 0x177   : > { %1440 = vmatprep.mubr.bf16.mxu1 %v11856_v0  ;;  %1633 = vmatprep.mubr.bf16.mxu0 %v11856_v0 }
 0x17e   : > { %1441 = vmatmul.mubr.bf16.gmra.mrb[84].mxu1 %v8499_v23  ;;  %1634 = vmatmul.mubr.bf16.gmra.mrb[84].mxu0 %v8388_v56 }
 0x17f   : > { %1450 = vmatprep.mubr.bf16.mxu1 %v11856_v0  ;;  %1643 = vmatprep.mubr.bf16.mxu0 %v11856_v0 }
 0x186   : > { %1451 = vmatmul.mubr.bf16.gmra.mrb[88].mxu1 %v8506_v24  ;;  %1644 = vmatmul.mubr.bf16.gmra.mrb[88].mxu0 %v8395_v62 }
 0x187   : > { %1460 = vmatprep.mubr.bf16.mxu1 %v11856_v0  ;;  %1653 = vmatprep.mubr.bf16.mxu0 %v11856_v0 }
 0x18e   : > { %1461 = vmatmul.mubr.bf16.gmra.mrb[92].mxu1 %v8513_v25  ;;  %1654 = vmatmul.mubr.bf16.gmra.mrb[92].mxu0 %v8402_v1 }
 0x18f   : > { %1470 = vmatprep.mubr.bf16.mxu1 %v11856_v0  ;;  %1663 = vmatprep.mubr.bf16.mxu0 %v11856_v0 }
 0x196   : > { %1471 = vmatmul.mubr.bf16.gmra.mrb[96].mxu1 %v8520_v26  ;;  %1664 = vmatmul.mubr.bf16.gmra.mrb[96].mxu0 %v8409_v3  ;;  %v8591_v3 = vld [vmem:[%s8335_s11 + $0xe8] sm:$0xff]  }
 0x197   : > { %1480 = vmatprep.mubr.bf16.mxu1 %v11856_v0  ;;  %1673 = vmatprep.mubr.bf16.mxu0 %v11856_v0 }
 0x19e   : > { %1481 = vmatmul.mubr.bf16.gmra.mrb[100].mxu1 %v8527_v27  ;;  %1674 = vmatmul.mubr.bf16.gmra.mrb[100].mxu0 %v8416_v5 }
 0x19f   : > { %1490 = vmatprep.mubr.bf16.mxu1 %v11856_v0  ;;  %1683 = vmatprep.mubr.bf16.mxu0 %v11856_v0 }
 0x1a6   : > { %1491 = vmatmul.mubr.bf16.gmra.mrb[104].mxu1 %v8534_v28  ;;  %1684 = vmatmul.mubr.bf16.gmra.mrb[104].mxu0 %v8423_v7 }
 0x1a7   : > { %1500 = vmatprep.mubr.bf16.mxu1 %v11856_v0  ;;  %1693 = vmatprep.mubr.bf16.mxu0 %v11856_v0 }
 0x1a9   : > { %v8540_v29 = vpop.f32.mrb[0].mxu1  ;;  %v591_v30 = vpop.f32.mrb[0].mxu0 }
 0x1aa   : > { %v8542_v31 = vpop.f32.mrb[1].mxu1  ;;  %v1904_v33 = vmul.f32 0.088388346, %v591_v30  ;;  %v593_v34 = vpop.f32.mrb[1].mxu0 }
 0x1ab   : > { %12211 = vst [vmem:[#allocation23_spill] sm:$0xff] %v8542_v31  ;;  %v8547_v35 = vpop.f32.mrb[2].mxu1  ;;  %v1905_v36 = vmul.f32 0.088388346, %v593_v34  ;;  %v595_v37 = vpop.f32.mrb[2].mxu0 }
 0x1ac   : > { %v8551_v39 = vpop.f32.mrb[3].mxu1  ;;  %v1906_v40 = vmul.f32 0.088388346, %v595_v37  ;;  %v597_v41 = vpop.f32.mrb[3].mxu0 }
 0x1ad   : > { %12212 = vst [vmem:[#allocation24_spill] sm:$0xff] %v8551_v39  ;;  %v1907_v43 = vmul.f32 0.088388346, %v597_v41 }
 0x1ae   : > { %1501 = vmatmul.mubr.bf16.gmra.mrb[108].mxu1 %v8545_v32  ;;  %1694 = vmatmul.mubr.bf16.gmra.mrb[108].mxu0 %v8430_v9  ;;  %v8557_v44 = vpack.c.bf16 %v1906_v40, %v1904_v33  ;;  %v8614_v40 = vld [vmem:[%s8335_s11 + $0xf0] sm:$0xff]  }
 0x1af   : > { %1510 = vmatprep.mubr.bf16.mxu1 %v11856_v0  ;;  %1703 = vmatprep.mubr.bf16.mxu0 %v11856_v0  ;;  %v8561_v45 = vpack.c.bf16 %v1907_v43, %v1905_v36 }
 0x1b1   : > { %12213 = vst [vmem:[#allocation25_spill] sm:$0xff] %v8561_v45  ;;  %v8563_v46 = vpop.f32.mrb[4].mxu1  ;;  %v601_v47 = vpop.f32.mrb[4].mxu0 }
 0x1b2   : > { %v8565_v48 = vpop.f32.mrb[5].mxu1  ;;  %v1908_v50 = vmul.f32 0.088388346, %v601_v47  ;;  %v603_v51 = vpop.f32.mrb[5].mxu0 }
 0x1b3   : > { %12214 = vst [vmem:[#allocation26_spill] sm:$0xff] %v8565_v48  ;;  %v8570_v52 = vpop.f32.mrb[6].mxu1  ;;  %v1909_v53 = vmul.f32 0.088388346, %v603_v51  ;;  %v605_v54 = vpop.f32.mrb[6].mxu0 }
 0x1b4   : > { %v8574_v56 = vpop.f32.mrb[7].mxu1  ;;  %v1910_v57 = vmul.f32 0.088388346, %v605_v54  ;;  %v607_v58 = vpop.f32.mrb[7].mxu0 }
 0x1b5   : > { %12215 = vst [vmem:[#allocation27_spill] sm:$0xff] %v8574_v56  ;;  %v1911_v60 = vmul.f32 0.088388346, %v607_v58 }
 0x1b6   : > { %1511 = vmatmul.mubr.bf16.gmra.mrb[112].mxu1 %v8568_v49  ;;  %1704 = vmatmul.mubr.bf16.gmra.mrb[112].mxu0 %v8437_v11  ;;  %v8580_v61 = vpack.c.bf16 %v1910_v57, %v1908_v50 }
 0x1b7   : > { %1520 = vmatprep.mubr.bf16.mxu1 %v11856_v0  ;;  %1713 = vmatprep.mubr.bf16.mxu0 %v11856_v0  ;;  %v8584_v62 = vpack.c.bf16 %v1911_v60, %v1909_v53 }
 0x1b9   : > { %12216 = vst [vmem:[#allocation28_spill] sm:$0xff] %v8584_v62  ;;  %v8586_v63 = vpop.f32.mrb[8].mxu1  ;;  %v611_v1 = vpop.f32.mrb[8].mxu0 }
 0x1ba   : > { %v8588_v2 = vpop.f32.mrb[9].mxu1  ;;  %v1912_v4 = vmul.f32 0.088388346, %v611_v1  ;;  %v613_v5 = vpop.f32.mrb[9].mxu0 }
 0x1bb   : > { %12217 = vst [vmem:[#allocation29_spill] sm:$0xff] %v8588_v2  ;;  %v8593_v6 = vpop.f32.mrb[10].mxu1  ;;  %v1913_v7 = vmul.f32 0.088388346, %v613_v5  ;;  %v615_v8 = vpop.f32.mrb[10].mxu0 }
 0x1bc   : > { %v8597_v10 = vpop.f32.mrb[11].mxu1  ;;  %v1914_v11 = vmul.f32 0.088388346, %v615_v8  ;;  %v617_v12 = vpop.f32.mrb[11].mxu0 }
 0x1bd   : > { %12218 = vst [vmem:[#allocation30_spill] sm:$0xff] %v8597_v10  ;;  %v1915_v16 = vmul.f32 0.088388346, %v617_v12 }
 0x1be   : > { %1521 = vmatmul.mubr.bf16.gmra.mrb[116].mxu1 %v8591_v3  ;;  %1714 = vmatmul.mubr.bf16.gmra.mrb[116].mxu0 %v8444_v13  ;;  %v8603_v30 = vpack.c.bf16 %v1914_v11, %v1912_v4  ;;  %v8637_v11 = vld [vmem:[%s8335_s11 + $0xf8] sm:$0xff]   ;;  %s7859_s11 = sshll.u32 %s8000_s12, 4  ;;  %s7860_s11 = int_to_ptr.vmem [resolvable:$false] %s7859_s11 }
 0x1bf   : > { %1530 = vmatprep.mubr.bf16.mxu1 %v11856_v0  ;;  %1723 = vmatprep.mubr.bf16.mxu0 %v11856_v0  ;;  %v8607_v33 = vpack.c.bf16 %v1915_v16, %v1913_v7  ;;  %s7861_s29 = scalar_lea.vmem %s7860_s11, 4096  ;;  %p7862_p1 = scmp.lt.s32.totalorder %s11762_s10, %s7860_s11 }
 0x1c0   : > { %p7863_p4 = scmp.lt.s32.totalorder %s7861_s29, %s7855_s17 }
 0x1c1   : > { %12219 = vst [vmem:[#allocation31_spill] sm:$0xff] %v8607_v33  ;;  %v8609_v34 = vpop.f32.mrb[12].mxu1  ;;  %v621_v36 = vpop.f32.mrb[12].mxu0 }
 0x1c2   : > { %v8611_v37 = vpop.f32.mrb[13].mxu1  ;;  %v1916_v41 = vmul.f32 0.088388346, %v621_v36  ;;  %v623_v43 = vpop.f32.mrb[13].mxu0  ;;  %p7864_p12 = por %p7863_p4, %p7862_p1 }
 0x1c3   : > { %12220 = vst [vmem:[#allocation32_spill] sm:$0xff] %v8611_v37  ;;  %v8616_v47 = vpop.f32.mrb[14].mxu1  ;;  %v1917_v13 = vmul.f32 0.088388346, %v623_v43  ;;  %v625_v50 = vpop.f32.mrb[14].mxu0 }
 0x1c4   : > { %v8620_v53 = vpop.f32.mrb[15].mxu1  ;;  %v1918_v54 = vmul.f32 0.088388346, %v625_v50  ;;  %v627_v57 = vpop.f32.mrb[15].mxu0  ;;  %p7865_p2 = pnand %p7864_p12, %p7858_p7 }
 0x1c5   : > { %12221 = vst [vmem:[#allocation33_spill] sm:$0xff] %v8620_v53  ;;  %v1919_v60 = vmul.f32 0.088388346, %v627_v57 }
 0x1c6   : > { %1531 = vmatmul.mubr.bf16.gmra.mrb[120].mxu1 %v8614_v40  ;;  %1724 = vmatmul.mubr.bf16.gmra.mrb[120].mxu0 %v8451_v15  ;;  %v8626_v1 = vpack.c.bf16 %v1918_v54, %v1916_v41 }
 0x1c7   : > { %1540 = vmatprep.mubr.bf16.mxu1 %v11856_v0  ;;  %1733 = vmatprep.mubr.bf16.mxu0 %v11856_v0  ;;  %v8630_v4 = vpack.c.bf16 %v1919_v60, %v1917_v13 }
 0x1c9   : > { %12222 = vst [vmem:[#allocation34_spill] sm:$0xff] %v8630_v4  ;;  %v8632_v5 = vpop.f32.mrb[16].mxu1  ;;  %v631_v7 = vpop.f32.mrb[16].mxu0 }
 0x1ca   : > { %v8634_v8 = vpop.f32.mrb[17].mxu1  ;;  %v1920_v12 = vmul.f32 0.088388346, %v631_v7  ;;  %v633_v16 = vpop.f32.mrb[17].mxu0 }
 0x1cb   : > { %12223 = vst [vmem:[#allocation35_spill] sm:$0xff] %v8634_v8  ;;  %v8639_v36 = vpop.f32.mrb[18].mxu1  ;;  %v1921_v15 = vmul.f32 0.088388346, %v633_v16  ;;  %v635_v41 = vpop.f32.mrb[18].mxu0 }
 0x1cc   : > { %v8643_v50 = vpop.f32.mrb[19].mxu1  ;;  %v1922_v13 = vmul.f32 0.088388346, %v635_v41  ;;  %v637_v54 = vpop.f32.mrb[19].mxu0 }
 0x1cd   : > { %12224 = vst [vmem:[#allocation36_spill] sm:$0xff] %v8643_v50  ;;  %v1923_v60 = vmul.f32 0.088388346, %v637_v54 }
 0x1ce   : > { %1541 = vmatmul.mubr.bf16.gmra.mrb[124].mxu1 %v8637_v11  ;;  %1734 = vmatmul.mubr.bf16.gmra.mrb[124].mxu0 %v8458_v17  ;;  %v8649_v7 = vpack.c.bf16 %v1922_v13, %v1920_v12 }
 0x1cf   : > { %1743 = vmatprep.mubr.bf16.mxu0 %v11856_v0  ;;  %v8652_v16 = vpack.c.bf16 %v1923_v60, %v1921_v15  ;;  %6348 = vmatprep.mubr.bf16.mxu1 %v8557_v44 }
 0x1d1   : > { %12225 = vst [vmem:[#allocation37_spill] sm:$0xff] %v8652_v16  ;;  %v8655_v58 = vpop.f32.mrb[20].mxu1  ;;  %v641_v41 = vpop.f32.mrb[20].mxu0 }
 0x1d2   : > { %v8657_v14 = vpop.f32.mrb[21].mxu1  ;;  %v1924_v59 = vmul.f32 0.088388346, %v641_v41  ;;  %v643_v57 = vpop.f32.mrb[21].mxu0 }
 0x1d3   : > { %12226 = vst [vmem:[#allocation38_spill] sm:$0xff] %v8657_v14  ;;  %v8659_v54 = vpop.f32.mrb[22].mxu1  ;;  %v1925_v42 = vmul.f32 0.088388346, %v643_v57  ;;  %v645_v43 = vpop.f32.mrb[22].mxu0 }
 0x1d4   : > { %v8663_v12 = vpop.f32.mrb[23].mxu1  ;;  %v1926_v15 = vmul.f32 0.088388346, %v645_v43  ;;  %v647_v13 = vpop.f32.mrb[23].mxu0 }
 0x1d5   : > { %12227 = vst [vmem:[#allocation39_spill] sm:$0xff] %v8663_v12  ;;  %v1927_v51 = vmul.f32 0.088388346, %v647_v13 }
 0x1d6   : > { %1744 = vmatmul.mubr.bf16.gmra.mrb[128].mxu0 %v8464_v18  ;;  %v8668_v9 = vpack.c.bf16 %v1926_v15, %v1924_v59 }
 0x1d7   : > { %1753 = vmatprep.mubr.bf16.mxu0 %v11856_v0  ;;  %v8671_v41 = vpack.c.bf16 %v1927_v51, %v1925_v42 }
 0x1d9   : > { %12228 = vst [vmem:[#allocation40_spill] sm:$0xff] %v8671_v41  ;;  %v8673_v57 = vpop.f32.mrb[24].mxu1  ;;  %v651_v55 = vpop.f32.mrb[24].mxu0 }
 0x1da   : > { %v8675_v17 = vpop.f32.mrb[25].mxu1  ;;  %v1928_v38 = vmul.f32 0.088388346, %v651_v55  ;;  %v653_v43 = vpop.f32.mrb[25].mxu0  ;;  %v12232_v55 = vmov 0  }
 0x1db   : > { %12229 = vst [vmem:[#allocation41_spill] sm:$0xff] %v8675_v17  ;;  %v8677_v16 = vpop.f32.mrb[26].mxu1  ;;  %v1929_v4 = vmul.f32 0.088388346, %v653_v43  ;;  %v655_v60 = vpop.f32.mrb[26].mxu0 }
 0x1dc   : > { %v8681_v59 = vpop.f32.mrb[27].mxu1  ;;  %v1930_v15 = vmul.f32 0.088388346, %v655_v60  ;;  %v657_v13 = vpop.f32.mrb[27].mxu0 }
 0x1dd   : > { %12230 = vst [vmem:[#allocation42_spill] sm:$0xff] %v8681_v59  ;;  %v1931_v51 = vmul.f32 0.088388346, %v657_v13 }
 0x1de   : > { %1754 = vmatmul.mubr.bf16.gmra.mrb[132].mxu0 %v8471_v19  ;;  %v8686_v0 = vpack.c.bf16 %v1930_v15, %v1928_v38 }
 0x1df   : > { %1763 = vmatprep.mubr.bf16.mxu0 %v12232_v55  ;;  %v8689_v41 = vpack.c.bf16 %v1931_v51, %v1929_v4 }
 0x1e0   : > { %12231 = vst [vmem:[#allocation43_spill] sm:$0xff] %v8686_v0 }
 0x1e1   : > { %12233 = vst [vmem:[#allocation44_spill] sm:$0xff] %v8689_v41  ;;  %v8691_v43 = vpop.f32.mrb[28].mxu1  ;;  %v661_v33 = vpop.f32.mrb[28].mxu0 }
 0x1e2   : > { %v8693_v18 = vpop.f32.mrb[29].mxu1  ;;  %v1932_v62 = vmul.f32 0.088388346, %v661_v33  ;;  %v663_v60 = vpop.f32.mrb[29].mxu0 }
 0x1e3   : > { %12234 = vst [vmem:[#allocation45_spill] sm:$0xff] %v8693_v18  ;;  %v8695_v45 = vpop.f32.mrb[30].mxu1  ;;  %v1933_v14 = vmul.f32 0.088388346, %v663_v60  ;;  %v665_v42 = vpop.f32.mrb[30].mxu0 }
 0x1e4   : > { %v8699_v38 = vpop.f32.mrb[31].mxu1  ;;  %v1934_v15 = vmul.f32 0.088388346, %v665_v42  ;;  %v667_v13 = vpop.f32.mrb[31].mxu0 }
 0x1e5   : > { %12235 = vst [vmem:[#allocation46_spill] sm:$0xff] %v8699_v38  ;;  %v1935_v51 = vmul.f32 0.088388346, %v667_v13 }
 0x1e6   : > { %1764 = vmatmul.mubr.bf16.gmra.mrb[136].mxu0 %v8478_v20  ;;  %v8704_v41 = vpack.c.bf16 %v1934_v15, %v1932_v62 }
 0x1e7   : > { %1773 = vmatprep.mubr.bf16.mxu0 %v12232_v55  ;;  %v8707_v33 = vpack.c.bf16 %v1935_v51, %v1933_v14 }
 0x1e9   : > { %12236 = vst [vmem:[#allocation47_spill] sm:$0xff] %v8707_v33  ;;  %v1312_v60 = vpop.f32.mrb[32].mxu1  ;;  %v671_v17 = vpop.f32.mrb[32].mxu0 }
 0x1ea   : > { %v8709_v59 = vpop.f32.mrb[33].mxu1  ;;  %v1936_v19 = vmul.f32 0.088388346, %v671_v17  ;;  %v673_v12 = vpop.f32.mrb[33].mxu0  ;;  %v12237_v17 = vpack.c.bf16 %v8547_v35, %v8540_v29 }
 0x1eb   : > { %v1316_v42 = vpop.f32.mrb[34].mxu1  ;;  %v1937_v8 = vmul.f32 0.088388346, %v673_v12  ;;  %v675_v50 = vpop.f32.mrb[34].mxu0 }
 0x1ec   : > { %v2008_v37 = vpack.c.bf16 %v1316_v42, %v1312_v60  ;;  %v8711_v4 = vpop.f32.mrb[35].mxu1  ;;  %v1938_v13 = vmul.f32 0.088388346, %v675_v50  ;;  %v677_v20 = vpop.f32.mrb[35].mxu0 }
 0x1ed   : > { %v1939_v15 = vmul.f32 0.088388346, %v677_v20 }
 0x1ee   : > { %1774 = vmatmul.mubr.bf16.gmra.mrb[140].mxu0 %v8485_v21  ;;  %6332 = vmatprep.subr.bf16.mxu1 %v2008_v37  ;;  %v8716_v14 = vpack.c.bf16 %v1938_v13, %v1936_v19 }
 0x1ef   : > { %6333 = vmatpush3.bf16.xpose.msra.mxu1 %v12237_v17  ;;  %1783 = vmatprep.mubr.bf16.mxu0 %v12232_v55  ;;  %v8722_v12 = vpack.c.bf16 %v1939_v15, %v1937_v8  ;;  %v12241_v15 = vpack.c.bf16 %v8570_v52, %v8563_v46 }
 0x1f1   : > { %12238 = vst [vmem:[#allocation48_spill] sm:$0xff] %v8722_v12  ;;  %v1322_v51 = vpop.f32.mrb[36].mxu1  ;;  %v681_v50 = vpop.f32.mrb[36].mxu0 }
 0x1f2   : > { %v8724_v60 = vpop.f32.mrb[37].mxu1  ;;  %v1940_v42 = vmul.f32 0.088388346, %v681_v50  ;;  %v683_v62 = vpop.f32.mrb[37].mxu0 }
 0x1f3   : > { %12239 = vst [vmem:[#allocation49_spill] sm:$0xff] %v8724_v60  ;;  %v1326_v20 = vpop.f32.mrb[38].mxu1  ;;  %v1941_v33 = vmul.f32 0.088388346, %v683_v62  ;;  %v685_v21 = vpop.f32.mrb[38].mxu0 }
 0x1f4   : > { %v2009_v37 = vpack.c.bf16 %v1326_v20, %v1322_v51  ;;  %v8726_v19 = vpop.f32.mrb[39].mxu1  ;;  %v1942_v13 = vmul.f32 0.088388346, %v685_v21  ;;  %v687_v18 = vpop.f32.mrb[39].mxu0 }
 0x1f5   : > { %12240 = vst [vmem:[#allocation50_spill] sm:$0xff] %v8726_v19  ;;  %v1943_v35 = vmul.f32 0.088388346, %v687_v18 }
 0x1f6   : > { %1784 = vmatmul.mubr.bf16.gmra.mrb[144].mxu0 %v8492_v22  ;;  %6334 = vmatprep.subr.bf16.mxu1 %v2009_v37  ;;  %v8731_v8 = vpack.c.bf16 %v1942_v13, %v1940_v42 }
 0x1f7   : > { %6335 = vmatpush3.bf16.xpose.msra.mxu1 %v12241_v15  ;;  %1793 = vmatprep.mubr.bf16.mxu0 %v12232_v55  ;;  %v8737_v62 = vpack.c.bf16 %v1943_v35, %v1941_v33  ;;  %v12245_v35 = vpack.c.bf16 %v8593_v6, %v8586_v63 }
 0x1f9   : > { %12242 = vst [vmem:[#allocation51_spill] sm:$0xff] %v8737_v62  ;;  %v1332_v17 = vpop.f32.mrb[40].mxu1  ;;  %v691_v51 = vpop.f32.mrb[40].mxu0 }
 0x1fa   : > { %v8739_v50 = vpop.f32.mrb[41].mxu1  ;;  %v1944_v20 = vmul.f32 0.088388346, %v691_v51  ;;  %v693_v21 = vpop.f32.mrb[41].mxu0 }
 0x1fb   : > { %12243 = vst [vmem:[#allocation52_spill] sm:$0xff] %v8739_v50  ;;  %v1336_v18 = vpop.f32.mrb[42].mxu1  ;;  %v1945_v29 = vmul.f32 0.088388346, %v693_v21  ;;  %v695_v22 = vpop.f32.mrb[42].mxu0 }
 0x1fc   : > { %v2010_v37 = vpack.c.bf16 %v1336_v18, %v1332_v17  ;;  %v8741_v42 = vpop.f32.mrb[43].mxu1  ;;  %v1946_v13 = vmul.f32 0.088388346, %v695_v22  ;;  %v697_v12 = vpop.f32.mrb[43].mxu0 }
 0x1fd   : > { %12244 = vst [vmem:[#allocation53_spill] sm:$0xff] %v8741_v42  ;;  %v1947_v52 = vmul.f32 0.088388346, %v697_v12 }
 0x1fe   : > { %1794 = vmatmul.mubr.bf16.gmra.mrb[148].mxu0 %v8499_v23  ;;  %6336 = vmatprep.subr.bf16.mxu1 %v2010_v37  ;;  %v8746_v33 = vpack.c.bf16 %v1946_v13, %v1944_v20 }
 0x1ff   : > { %6337 = vmatpush3.bf16.xpose.msra.mxu1 %v12245_v35  ;;  %1803 = vmatprep.mubr.bf16.mxu0 %v12232_v55  ;;  %v8752_v15 = vpack.c.bf16 %v1947_v52, %v1945_v29  ;;  %v12249_v52 = vpack.c.bf16 %v8616_v47, %v8609_v34 }
 0x201   : > { %12246 = vst [vmem:[#allocation54_spill] sm:$0xff] %v8752_v15  ;;  %v1342_v17 = vpop.f32.mrb[44].mxu1  ;;  %v701_v51 = vpop.f32.mrb[44].mxu0 }
 0x202   : > { %v8754_v21 = vpop.f32.mrb[45].mxu1  ;;  %v1948_v18 = vmul.f32 0.088388346, %v701_v51  ;;  %v703_v22 = vpop.f32.mrb[45].mxu0 }
 0x203   : > { %12247 = vst [vmem:[#allocation55_spill] sm:$0xff] %v8754_v21  ;;  %v1346_v12 = vpop.f32.mrb[46].mxu1  ;;  %v1949_v46 = vmul.f32 0.088388346, %v703_v22  ;;  %v705_v23 = vpop.f32.mrb[46].mxu0 }
 0x204   : > { %v2011_v37 = vpack.c.bf16 %v1346_v12, %v1342_v17  ;;  %v8756_v20 = vpop.f32.mrb[47].mxu1  ;;  %v1950_v13 = vmul.f32 0.088388346, %v705_v23  ;;  %v707_v62 = vpop.f32.mrb[47].mxu0 }
 0x205   : > { %12248 = vst [vmem:[#allocation56_spill] sm:$0xff] %v8756_v20  ;;  %v1951_v6 = vmul.f32 0.088388346, %v707_v62 }
 0x206   : > { %1804 = vmatmul.mubr.bf16.gmra.mrb[152].mxu0 %v8506_v24  ;;  %6338 = vmatprep.subr.bf16.mxu1 %v2011_v37  ;;  %v8761_v29 = vpack.c.bf16 %v1950_v13, %v1948_v18 }
 0x207   : > { %6339 = vmatpush3.bf16.xpose.msra.mxu1 %v12249_v52  ;;  %1813 = vmatprep.mubr.bf16.mxu0 %v12232_v55  ;;  %v8767_v35 = vpack.c.bf16 %v1951_v6, %v1949_v46  ;;  %v12253_v6 = vpack.c.bf16 %v8639_v36, %v8632_v5 }
 0x209   : > { %12250 = vst [vmem:[#allocation57_spill] sm:$0xff] %v8767_v35  ;;  %v1352_v17 = vpop.f32.mrb[48].mxu1  ;;  %v711_v51 = vpop.f32.mrb[48].mxu0 }
 0x20a   : > { %v8769_v22 = vpop.f32.mrb[49].mxu1  ;;  %v1952_v12 = vmul.f32 0.088388346, %v711_v51  ;;  %v713_v23 = vpop.f32.mrb[49].mxu0 }
 0x20b   : > { %12251 = vst [vmem:[#allocation58_spill] sm:$0xff] %v8769_v22  ;;  %v1356_v62 = vpop.f32.mrb[50].mxu1  ;;  %v1953_v63 = vmul.f32 0.088388346, %v713_v23  ;;  %v715_v24 = vpop.f32.mrb[50].mxu0 }
 0x20c   : > { %v2012_v37 = vpack.c.bf16 %v1356_v62, %v1352_v17  ;;  %v8771_v18 = vpop.f32.mrb[51].mxu1  ;;  %v1954_v13 = vmul.f32 0.088388346, %v715_v24  ;;  %v717_v15 = vpop.f32.mrb[51].mxu0 }
 0x20d   : > { %12252 = vst [vmem:[#allocation59_spill] sm:$0xff] %v8771_v18  ;;  %v1955_v47 = vmul.f32 0.088388346, %v717_v15 }
 0x20e   : > { %1814 = vmatmul.mubr.bf16.gmra.mrb[156].mxu0 %v8513_v25  ;;  %6340 = vmatprep.subr.bf16.mxu1 %v2012_v37  ;;  %v8776_v46 = vpack.c.bf16 %v1954_v13, %v1952_v12 }
 0x20f   : > { %6341 = vmatpush3.bf16.xpose.msra.mxu1 %v12253_v6  ;;  %1823 = vmatprep.mubr.bf16.mxu0 %v12232_v55  ;;  %v8782_v52 = vpack.c.bf16 %v1955_v47, %v1953_v63  ;;  %v12257_v47 = vpack.c.bf16 %v8659_v54, %v8655_v58 }
 0x211   : > { %12254 = vst [vmem:[#allocation60_spill] sm:$0xff] %v8782_v52  ;;  %v1362_v17 = vpop.f32.mrb[52].mxu1  ;;  %v721_v51 = vpop.f32.mrb[52].mxu0 }
 0x212   : > { %v8784_v23 = vpop.f32.mrb[53].mxu1  ;;  %v1956_v62 = vmul.f32 0.088388346, %v721_v51  ;;  %v723_v24 = vpop.f32.mrb[53].mxu0 }
 0x213   : > { %12255 = vst [vmem:[#allocation61_spill] sm:$0xff] %v8784_v23  ;;  %v1366_v15 = vpop.f32.mrb[54].mxu1  ;;  %v1957_v34 = vmul.f32 0.088388346, %v723_v24  ;;  %v725_v25 = vpop.f32.mrb[54].mxu0 }
 0x214   : > { %v2013_v37 = vpack.c.bf16 %v1366_v15, %v1362_v17  ;;  %v8786_v12 = vpop.f32.mrb[55].mxu1  ;;  %v1958_v13 = vmul.f32 0.088388346, %v725_v25  ;;  %v727_v35 = vpop.f32.mrb[55].mxu0 }
 0x215   : > { %12256 = vst [vmem:[#allocation62_spill] sm:$0xff] %v8786_v12  ;;  %v1959_v36 = vmul.f32 0.088388346, %v727_v35 }
 0x216   : > { %1824 = vmatmul.mubr.bf16.gmra.mrb[160].mxu0 %v8520_v26  ;;  %6342 = vmatprep.subr.bf16.mxu1 %v2013_v37  ;;  %v8791_v63 = vpack.c.bf16 %v1958_v13, %v1956_v62 }
 0x217   : > { %6343 = vmatpush3.bf16.xpose.msra.mxu1 %v12257_v47  ;;  %1833 = vmatprep.mubr.bf16.mxu0 %v12232_v55  ;;  %v8797_v6 = vpack.c.bf16 %v1959_v36, %v1957_v34  ;;  %v12261_v36 = vpack.c.bf16 %v8677_v16, %v8673_v57 }
 0x219   : > { %12258 = vst [vmem:[#allocation63_spill] sm:$0xff] %v8797_v6  ;;  %v1372_v17 = vpop.f32.mrb[56].mxu1  ;;  %v731_v51 = vpop.f32.mrb[56].mxu0 }
 0x21a   : > { %v8799_v24 = vpop.f32.mrb[57].mxu1  ;;  %v1960_v15 = vmul.f32 0.088388346, %v731_v51  ;;  %v733_v25 = vpop.f32.mrb[57].mxu0 }
 0x21b   : > { %12259 = vst [vmem:[#allocation64_spill] sm:$0xff] %v8799_v24  ;;  %v1376_v35 = vpop.f32.mrb[58].mxu1  ;;  %v1961_v5 = vmul.f32 0.088388346, %v733_v25  ;;  %v735_v26 = vpop.f32.mrb[58].mxu0 }
 0x21c   : > { %v2014_v37 = vpack.c.bf16 %v1376_v35, %v1372_v17  ;;  %v8801_v62 = vpop.f32.mrb[59].mxu1  ;;  %v1962_v13 = vmul.f32 0.088388346, %v735_v26  ;;  %v737_v52 = vpop.f32.mrb[59].mxu0 }
 0x21d   : > { %12260 = vst [vmem:[#allocation65_spill] sm:$0xff] %v8801_v62  ;;  %v1963_v54 = vmul.f32 0.088388346, %v737_v52 }
 0x21e   : > { %1834 = vmatmul.mubr.bf16.gmra.mrb[164].mxu0 %v8527_v27  ;;  %6344 = vmatprep.subr.bf16.mxu1 %v2014_v37  ;;  %v8806_v34 = vpack.c.bf16 %v1962_v13, %v1960_v15 }
 0x21f   : > { %6345 = vmatpush3.bf16.xpose.msra.mxu1 %v12261_v36  ;;  %1843 = vmatprep.mubr.bf16.mxu0 %v12232_v55  ;;  %v8812_v47 = vpack.c.bf16 %v1963_v54, %v1961_v5  ;;  %v12265_v54 = vpack.c.bf16 %v8695_v45, %v8691_v43 }
 0x221   : > { %12262 = vst [vmem:[#allocation66_spill] sm:$0xff] %v8812_v47  ;;  %v1382_v17 = vpop.f32.mrb[60].mxu1  ;;  %v741_v51 = vpop.f32.mrb[60].mxu0 }
 0x222   : > { %v8814_v25 = vpop.f32.mrb[61].mxu1  ;;  %v1964_v35 = vmul.f32 0.088388346, %v741_v51  ;;  %v743_v26 = vpop.f32.mrb[61].mxu0 }
 0x223   : > { %12263 = vst [vmem:[#allocation67_spill] sm:$0xff] %v8814_v25  ;;  %v1386_v52 = vpop.f32.mrb[62].mxu1  ;;  %v1965_v58 = vmul.f32 0.088388346, %v743_v26  ;;  %v745_v27 = vpop.f32.mrb[62].mxu0 }
 0x224   : > { %v2015_v37 = vpack.c.bf16 %v1386_v52, %v1382_v17  ;;  %v8816_v15 = vpop.f32.mrb[63].mxu1  ;;  %v1966_v13 = vmul.f32 0.088388346, %v745_v27  ;;  %v747_v6 = vpop.f32.mrb[63].mxu0 }
 0x225   : > { %12264 = vst [vmem:[#allocation68_spill] sm:$0xff] %v8816_v15  ;;  %v1967_v57 = vmul.f32 0.088388346, %v747_v6 }
 0x226   : > { %1844 = vmatmul.mubr.bf16.gmra.mrb[168].mxu0 %v8534_v28  ;;  %6346 = vmatprep.subr.bf16.mxu1 %v2015_v37  ;;  %v8821_v5 = vpack.c.bf16 %v1966_v13, %v1964_v35 }
 0x227   : > { %6347 = vmatpush3.bf16.xpose.msra.mxu1 %v12265_v54  ;;  %1853 = vmatprep.mubr.bf16.mxu0 %v12232_v55  ;;  %v8827_v36 = vpack.c.bf16 %v1967_v57, %v1965_v58 }
 0x229   : > { %12266 = vst [vmem:[#allocation69_spill] sm:$0xff] %v8827_v36  ;;  %v8829_v17 = vpop.f32.mrb[64].mxu1  ;;  %v8831_v51 = vpop.f32.mrb[64].mxu0 }
 0x22a   : > { %v8833_v26 = vpop.f32.mrb[65].mxu1  ;;  %v8835_v6 = vpop.f32.mrb[65].mxu0 }
 0x22b   : > { %12267 = vst [vmem:[#allocation70_spill] sm:$0xff] %v8833_v26  ;;  %12268 = vst [vmem:[#allocation71_spill] sm:$0xff] %v8835_v6  ;;  %v8837_v28 = vpop.f32.mrb[66].mxu1  ;;  %v8839_v35 = vpop.f32.mrb[66].mxu0 }
 0x22c   : > { %v8843_v43 = vpop.f32.mrb[67].mxu1  ;;  %v8847_v52 = vpop.f32.mrb[67].mxu0 }
 0x22d   : > { %12269 = vst [vmem:[#allocation72_spill] sm:$0xff] %v8843_v43  ;;  %12270 = vst [vmem:[#allocation73_spill] sm:$0xff] %v8847_v52 }
 0x22e   : > { %1854 = vmatmul.mubr.bf16.gmra.mrb[172].mxu0 %v8545_v32  ;;  %6349 = vmatmul.mubr.bf16.vlgmr.msra.gmra.mrb[128].mxu1 %v8557_v44 }
 0x22f   : > { %1863 = vmatprep.mubr.bf16.mxu0 %v12232_v55  ;;  %6350 = vmatprep.mubr.bf16.mxu1 %v8580_v61 }
 0x231   : > { %v8857_v13 = vpop.f32.mrb[68].mxu1  ;;  %v8859_v57 = vpop.f32.mrb[68].mxu0 }
 0x232   : > { %v8861_v54 = vpop.f32.mrb[69].mxu1  ;;  %v8863_v16 = vpop.f32.mrb[69].mxu0 }
 0x233   : > { %12271 = vst [vmem:[#allocation74_spill] sm:$0xff] %v8861_v54  ;;  %12272 = vst [vmem:[#allocation75_spill] sm:$0xff] %v8863_v16  ;;  %v8865_v27 = vpop.f32.mrb[70].mxu1  ;;  %v8867_v58 = vpop.f32.mrb[70].mxu0 }
 0x234   : > { %v8871_v37 = vpop.f32.mrb[71].mxu1  ;;  %v8875_v36 = vpop.f32.mrb[71].mxu0 }
 0x235   : > { %12273 = vst [vmem:[#allocation76_spill] sm:$0xff] %v8871_v37  ;;  %12274 = vst [vmem:[#allocation77_spill] sm:$0xff] %v8875_v36 }
 0x236   : > { %1864 = vmatmul.mubr.bf16.gmra.mrb[176].mxu0 %v8568_v49  ;;  %6351 = vmatmul.mubr.bf16.gmra.mrb[132].mxu1 %v8580_v61 }
 0x237   : > { %1873 = vmatprep.mubr.bf16.mxu0 %v12232_v55  ;;  %6352 = vmatprep.mubr.bf16.mxu1 %v8603_v30 }
 0x239   : > { %v8885_v32 = vpop.f32.mrb[72].mxu1  ;;  %v8887_v52 = vpop.f32.mrb[72].mxu0 }
 0x23a   : > { %v8889_v45 = vpop.f32.mrb[73].mxu1  ;;  %v8891_v38 = vpop.f32.mrb[73].mxu0 }
 0x23b   : > { %12275 = vst [vmem:[#allocation78_spill] sm:$0xff] %v8889_v45  ;;  %12276 = vst [vmem:[#allocation79_spill] sm:$0xff] %v8891_v38  ;;  %v8893_v47 = vpop.f32.mrb[74].mxu1  ;;  %v8895_v25 = vpop.f32.mrb[74].mxu0 }
 0x23c   : > { %v8899_v6 = vpop.f32.mrb[75].mxu1  ;;  %v8903_v36 = vpop.f32.mrb[75].mxu0 }
 0x23d   : > { %12277 = vst [vmem:[#allocation80_spill] sm:$0xff] %v8899_v6  ;;  %12278 = vst [vmem:[#allocation81_spill] sm:$0xff] %v8903_v36 }
 0x23e   : > { %1874 = vmatmul.mubr.bf16.gmra.mrb[180].mxu0 %v8591_v3  ;;  %6353 = vmatmul.mubr.bf16.gmra.mrb[136].mxu1 %v8603_v30 }
 0x23f   : > { %1883 = vmatprep.mubr.bf16.mxu0 %v12232_v55  ;;  %6354 = vmatprep.mubr.bf16.mxu1 %v8626_v1 }
 0x241   : > { %v8913_v49 = vpop.f32.mrb[76].mxu1  ;;  %v8915_v62 = vpop.f32.mrb[76].mxu0 }
 0x242   : > { %v8917_v16 = vpop.f32.mrb[77].mxu1  ;;  %v8919_v23 = vpop.f32.mrb[77].mxu0 }
 0x243   : > { %12279 = vst [vmem:[#allocation82_spill] sm:$0xff] %v8917_v16  ;;  %12280 = vst [vmem:[#allocation83_spill] sm:$0xff] %v8919_v23  ;;  %v8921_v15 = vpop.f32.mrb[78].mxu1  ;;  %v8923_v12 = vpop.f32.mrb[78].mxu0 }
 0x244   : > { %v8927_v24 = vpop.f32.mrb[79].mxu1  ;;  %v8931_v36 = vpop.f32.mrb[79].mxu0 }
 0x245   : > { %12281 = vst [vmem:[#allocation84_spill] sm:$0xff] %v8927_v24  ;;  %12282 = vst [vmem:[#allocation85_spill] sm:$0xff] %v8931_v36 }
 0x246   : > { %1884 = vmatmul.mubr.bf16.gmra.mrb[184].mxu0 %v8614_v40  ;;  %6355 = vmatmul.mubr.bf16.gmra.mrb[140].mxu1 %v8626_v1 }
 0x247   : > { %1893 = vmatprep.mubr.bf16.mxu0 %v12232_v55  ;;  %6356 = vmatprep.mubr.bf16.mxu1 %v8649_v7 }
 0x249   : > { %v8941_v3 = vpop.f32.mrb[80].mxu1  ;;  %v8943_v53 = vpop.f32.mrb[80].mxu0 }
 0x24a   : > { %v8945_v38 = vpop.f32.mrb[81].mxu1  ;;  %v8947_v45 = vpop.f32.mrb[81].mxu0 }
 0x24b   : > { %12283 = vst [vmem:[#allocation86_spill] sm:$0xff] %v8945_v38  ;;  %12284 = vst [vmem:[#allocation87_spill] sm:$0xff] %v8947_v45  ;;  %v8949_v22 = vpop.f32.mrb[82].mxu1  ;;  %v8951_v16 = vpop.f32.mrb[82].mxu0 }
 0x24c   : > { %v8955_v18 = vpop.f32.mrb[83].mxu1  ;;  %v8959_v23 = vpop.f32.mrb[83].mxu0 }
 0x24d   : > { %12285 = vst [vmem:[#allocation88_spill] sm:$0xff] %v8955_v18  ;;  %12286 = vst [vmem:[#allocation89_spill] sm:$0xff] %v8959_v23 }
 0x24e   : > { %1894 = vmatmul.mubr.bf16.gmra.mrb[188].mxu0 %v8637_v11  ;;  %6357 = vmatmul.mubr.bf16.gmra.mrb[144].mxu1 %v8649_v7 }
 0x24f   : > { %6396 = vmatprep.mubr.bf16.mxu0 %v8557_v44  ;;  %6358 = vmatprep.mubr.bf16.mxu1 %v8668_v9 }
 0x251   : > { %v8969_v40 = vpop.f32.mrb[84].mxu1  ;;  %v8971_v6 = vpop.f32.mrb[84].mxu0 }
 0x252   : > { %v8973_v55 = vpop.f32.mrb[85].mxu1  ;;  %v8975_v21 = vpop.f32.mrb[85].mxu0 }
 0x253   : > { %12287 = vst [vmem:[#allocation90_spill] sm:$0xff] %v8973_v55  ;;  %12288 = vst [vmem:[#allocation91_spill] sm:$0xff] %v8975_v21  ;;  %v8977_v36 = vpop.f32.mrb[86].mxu1  ;;  %v8979_v38 = vpop.f32.mrb[86].mxu0 }
 0x254   : > { %v8983_v24 = vpop.f32.mrb[87].mxu1  ;;  %v8987_v23 = vpop.f32.mrb[87].mxu0 }
 0x255   : > { %12289 = vst [vmem:[#allocation92_spill] sm:$0xff] %v8983_v24  ;;  %12290 = vst [vmem:[#allocation93_spill] sm:$0xff] %v8987_v23 }
 0x256   : > { %6359 = vmatmul.mubr.bf16.gmra.mrb[148].mxu1 %v8668_v9 }
 0x257   : > { %6360 = vmatprep.mubr.bf16.mxu1 %v8686_v0 }
 0x259   : > { %v8995_v2 = vpop.f32.mrb[88].mxu1  ;;  %v8997_v11 = vpop.f32.mrb[88].mxu0 }
 0x25a   : > { %v8999_v10 = vpop.f32.mrb[89].mxu1  ;;  %v9001_v54 = vpop.f32.mrb[89].mxu0 }
 0x25b   : > { %12291 = vst [vmem:[#allocation94_spill] sm:$0xff] %v8999_v10  ;;  %12292 = vst [vmem:[#allocation95_spill] sm:$0xff] %v9001_v54  ;;  %v9003_v45 = vpop.f32.mrb[90].mxu1  ;;  %v9005_v37 = vpop.f32.mrb[90].mxu0 }
 0x25c   : > { %v9009_v20 = vpop.f32.mrb[91].mxu1  ;;  %v9013_v23 = vpop.f32.mrb[91].mxu0 }
 0x25d   : > { %12293 = vst [vmem:[#allocation96_spill] sm:$0xff] %v9009_v20  ;;  %12294 = vst [vmem:[#allocation97_spill] sm:$0xff] %v9013_v23 }
 0x25e   : > { %6361 = vmatmul.mubr.bf16.gmra.mrb[152].mxu1 %v8686_v0 }
 0x25f   : > { %6362 = vmatprep.mubr.bf16.mxu1 %v8704_v41 }
 0x261   : > { %v9021_v50 = vpop.f32.mrb[92].mxu1  ;;  %v9023_v18 = vpop.f32.mrb[92].mxu0 }
 0x262   : > { %v9025_v42 = vpop.f32.mrb[93].mxu1  ;;  %v9027_v48 = vpop.f32.mrb[93].mxu0 }
 0x263   : > { %12295 = vst [vmem:[#allocation98_spill] sm:$0xff] %v9025_v42  ;;  %12296 = vst [vmem:[#allocation99_spill] sm:$0xff] %v9027_v48  ;;  %v9029_v21 = vpop.f32.mrb[94].mxu1  ;;  %v9031_v56 = vpop.f32.mrb[94].mxu0 }
 0x264   : > { %v9035_v24 = vpop.f32.mrb[95].mxu1  ;;  %v9039_v23 = vpop.f32.mrb[95].mxu0 }
 0x265   : > { %12297 = vst [vmem:[#allocation100_spill] sm:$0xff] %v9035_v24  ;;  %12298 = vst [vmem:[#allocation101_spill] sm:$0xff] %v9039_v23  ;;  %v12301_v23 = vpack.c.bf16 %v8837_v28, %v8829_v17 }
 0x266   : > { %6363 = vmatmul.mubr.bf16.gmra.mrb[156].mxu1 %v8704_v41 }
 0x267   : > { %6364 = vmatprep.mubr.bf16.mxu1 %v8716_v14 }
 0x269   : > { %v1472_v26 = vpop.f32.mrb[96].mxu1  ;;  %v1665_v43 = vpop.f32.mrb[96].mxu0 }
 0x26a   : > { %v9047_v55 = vpop.f32.mrb[97].mxu1  ;;  %v9049_v60 = vpop.f32.mrb[97].mxu0 }
 0x26b   : > { %12299 = vst [vmem:[#allocation102_spill] sm:$0xff] %v9049_v60  ;;  %v1476_v19 = vpop.f32.mrb[98].mxu1  ;;  %v1669_v54 = vpop.f32.mrb[98].mxu0 }
 0x26c   : > { %v2024_v31 = vpack.c.bf16 %v1476_v19, %v1472_v26  ;;  %v9051_v39 = vpop.f32.mrb[99].mxu1  ;;  %v2040_v0 = vpack.c.bf16 %v1669_v54, %v1665_v43  ;;  %v9053_v10 = vpop.f32.mrb[99].mxu0  ;;  %v12302_v19 = vpack.c.bf16 %v8839_v35, %v8831_v51  ;;  %v12307_v35 = vpack.c.bf16 %v8865_v27, %v8857_v13 }
 0x26d   : > { %12300 = vst [vmem:[#allocation103_spill] sm:$0xff] %v9053_v10 }
 0x26e   : > { %6380 = vmatprep.subr.bf16.mxu0 %v2024_v31  ;;  %6428 = vmatprep.subr.bf16.mxu1 %v2040_v0 }
 0x26f   : > { %6381 = vmatpush3.bf16.xpose.msra.mxu0 %v12301_v23  ;;  %6429 = vmatpush3.bf16.msra.mxu1 %v12302_v19  ;;  %v12308_v19 = vpack.c.bf16 %v8867_v58, %v8859_v57 }
 0x270   : > { %6365 = vmatmul.mubr.bf16.gmra.mrb[160].mxu1 %v8716_v14 }
 0x271   : > { %v1482_v26 = vpop.f32.mrb[100].mxu1  ;;  %v1675_v43 = vpop.f32.mrb[100].mxu0  ;;  %6366 = vmatprep.mubr.bf16.mxu1 %v8731_v8 }
 0x272   : > { %v9067_v54 = vpop.f32.mrb[101].mxu1  ;;  %v9069_v20 = vpop.f32.mrb[101].mxu0 }
 0x273   : > { %12303 = vst [vmem:[#allocation104_spill] sm:$0xff] %v9067_v54  ;;  %12304 = vst [vmem:[#allocation105_spill] sm:$0xff] %v9069_v20  ;;  %v1486_v31 = vpop.f32.mrb[102].mxu1  ;;  %v1679_v0 = vpop.f32.mrb[102].mxu0 }
 0x274   : > { %v2025_v48 = vpack.c.bf16 %v1486_v31, %v1482_v26  ;;  %v9071_v42 = vpop.f32.mrb[103].mxu1  ;;  %v2041_v23 = vpack.c.bf16 %v1679_v0, %v1675_v43  ;;  %v9073_v17 = vpop.f32.mrb[103].mxu0 }
 0x275   : > { %12305 = vst [vmem:[#allocation106_spill] sm:$0xff] %v9071_v42  ;;  %12306 = vst [vmem:[#allocation107_spill] sm:$0xff] %v9073_v17 }
 0x276   : > { %6382 = vmatprep.subr.bf16.mxu0 %v2025_v48  ;;  %6430 = vmatprep.subr.bf16.mxu1 %v2041_v23 }
 0x277   : > { %6383 = vmatpush3.bf16.xpose.msra.mxu0 %v12307_v35  ;;  %6431 = vmatpush3.bf16.msra.mxu1 %v12308_v19  ;;  %v12313_v35 = vpack.c.bf16 %v8893_v47, %v8885_v32  ;;  %v12314_v19 = vpack.c.bf16 %v8895_v25, %v8887_v52 }
 0x278   : > { %6367 = vmatmul.mubr.bf16.gmra.mrb[164].mxu1 %v8731_v8 }
 0x279   : > { %v1492_v26 = vpop.f32.mrb[104].mxu1  ;;  %v1685_v43 = vpop.f32.mrb[104].mxu0  ;;  %6368 = vmatprep.mubr.bf16.mxu1 %v8746_v33 }
 0x27a   : > { %v9087_v31 = vpop.f32.mrb[105].mxu1  ;;  %v9089_v0 = vpop.f32.mrb[105].mxu0 }
 0x27b   : > { %12309 = vst [vmem:[#allocation108_spill] sm:$0xff] %v9087_v31  ;;  %12310 = vst [vmem:[#allocation109_spill] sm:$0xff] %v9089_v0  ;;  %v1496_v48 = vpop.f32.mrb[106].mxu1  ;;  %v1689_v23 = vpop.f32.mrb[106].mxu0 }
 0x27c   : > { %v2026_v28 = vpack.c.bf16 %v1496_v48, %v1492_v26  ;;  %v9091_v51 = vpop.f32.mrb[107].mxu1  ;;  %v2042_v27 = vpack.c.bf16 %v1689_v23, %v1685_v43  ;;  %v9093_v13 = vpop.f32.mrb[107].mxu0 }
 0x27d   : > { %12311 = vst [vmem:[#allocation110_spill] sm:$0xff] %v9091_v51  ;;  %12312 = vst [vmem:[#allocation111_spill] sm:$0xff] %v9093_v13 }
 0x27e   : > { %6384 = vmatprep.subr.bf16.mxu0 %v2026_v28  ;;  %6432 = vmatprep.subr.bf16.mxu1 %v2042_v27 }
 0x27f   : > { %6385 = vmatpush3.bf16.xpose.msra.mxu0 %v12313_v35  ;;  %6433 = vmatpush3.bf16.msra.mxu1 %v12314_v19  ;;  %v12319_v35 = vpack.c.bf16 %v8921_v15, %v8913_v49  ;;  %v12320_v19 = vpack.c.bf16 %v8923_v12, %v8915_v62 }
 0x280   : > { %6369 = vmatmul.mubr.bf16.gmra.mrb[168].mxu1 %v8746_v33 }
 0x281   : > { %v1502_v26 = vpop.f32.mrb[108].mxu1  ;;  %v1695_v43 = vpop.f32.mrb[108].mxu0  ;;  %6370 = vmatprep.mubr.bf16.mxu1 %v8761_v29 }
 0x282   : > { %v9107_v48 = vpop.f32.mrb[109].mxu1  ;;  %v9109_v23 = vpop.f32.mrb[109].mxu0 }
 0x283   : > { %12315 = vst [vmem:[#allocation112_spill] sm:$0xff] %v9107_v48  ;;  %12316 = vst [vmem:[#allocation113_spill] sm:$0xff] %v9109_v23  ;;  %v1506_v28 = vpop.f32.mrb[110].mxu1  ;;  %v1699_v27 = vpop.f32.mrb[110].mxu0 }
 0x284   : > { %v2027_v57 = vpack.c.bf16 %v1506_v28, %v1502_v26  ;;  %v9111_v58 = vpop.f32.mrb[111].mxu1  ;;  %v2043_v47 = vpack.c.bf16 %v1699_v27, %v1695_v43  ;;  %v9113_v32 = vpop.f32.mrb[111].mxu0 }
 0x285   : > { %12317 = vst [vmem:[#allocation114_spill] sm:$0xff] %v9111_v58  ;;  %12318 = vst [vmem:[#allocation115_spill] sm:$0xff] %v9113_v32 }
 0x286   : > { %6386 = vmatprep.subr.bf16.mxu0 %v2027_v57  ;;  %6434 = vmatprep.subr.bf16.mxu1 %v2043_v47 }
 0x287   : > { %6387 = vmatpush3.bf16.xpose.msra.mxu0 %v12319_v35  ;;  %6435 = vmatpush3.bf16.msra.mxu1 %v12320_v19  ;;  %v12325_v35 = vpack.c.bf16 %v8949_v22, %v8941_v3  ;;  %v12326_v19 = vpack.c.bf16 %v8951_v16, %v8943_v53 }
 0x288   : > { %6371 = vmatmul.mubr.bf16.gmra.mrb[172].mxu1 %v8761_v29 }
 0x289   : > { %v1512_v26 = vpop.f32.mrb[112].mxu1  ;;  %v1705_v43 = vpop.f32.mrb[112].mxu0  ;;  %6372 = vmatprep.mubr.bf16.mxu1 %v8776_v46 }
 0x28a   : > { %v9127_v28 = vpop.f32.mrb[113].mxu1  ;;  %v9129_v27 = vpop.f32.mrb[113].mxu0 }
 0x28b   : > { %12321 = vst [vmem:[#allocation116_spill] sm:$0xff] %v9127_v28  ;;  %12322 = vst [vmem:[#allocation117_spill] sm:$0xff] %v9129_v27  ;;  %v1516_v57 = vpop.f32.mrb[114].mxu1  ;;  %v1709_v47 = vpop.f32.mrb[114].mxu0 }
 0x28c   : > { %v2028_v52 = vpack.c.bf16 %v1516_v57, %v1512_v26  ;;  %v9131_v25 = vpop.f32.mrb[115].mxu1  ;;  %v2044_v15 = vpack.c.bf16 %v1709_v47, %v1705_v43  ;;  %v9133_v49 = vpop.f32.mrb[115].mxu0 }
 0x28d   : > { %12323 = vst [vmem:[#allocation118_spill] sm:$0xff] %v9131_v25  ;;  %12324 = vst [vmem:[#allocation119_spill] sm:$0xff] %v9133_v49 }
 0x28e   : > { %6388 = vmatprep.subr.bf16.mxu0 %v2028_v52  ;;  %6436 = vmatprep.subr.bf16.mxu1 %v2044_v15 }
 0x28f   : > { %6389 = vmatpush3.bf16.xpose.msra.mxu0 %v12325_v35  ;;  %6437 = vmatpush3.bf16.msra.mxu1 %v12326_v19  ;;  %v12331_v35 = vpack.c.bf16 %v8977_v36, %v8969_v40  ;;  %v12332_v19 = vpack.c.bf16 %v8979_v38, %v8971_v6 }
 0x290   : > { %6373 = vmatmul.mubr.bf16.gmra.mrb[176].mxu1 %v8776_v46 }
 0x291   : > { %v1522_v26 = vpop.f32.mrb[116].mxu1  ;;  %v1715_v43 = vpop.f32.mrb[116].mxu0  ;;  %6374 = vmatprep.mubr.bf16.mxu1 %v8791_v63 }
 0x292   : > { %v9147_v57 = vpop.f32.mrb[117].mxu1  ;;  %v9149_v47 = vpop.f32.mrb[117].mxu0 }
 0x293   : > { %12327 = vst [vmem:[#allocation120_spill] sm:$0xff] %v9147_v57  ;;  %12328 = vst [vmem:[#allocation121_spill] sm:$0xff] %v9149_v47  ;;  %v1526_v52 = vpop.f32.mrb[118].mxu1  ;;  %v1719_v15 = vpop.f32.mrb[118].mxu0 }
 0x294   : > { %v2029_v62 = vpack.c.bf16 %v1526_v52, %v1522_v26  ;;  %v9151_v12 = vpop.f32.mrb[119].mxu1  ;;  %v2045_v22 = vpack.c.bf16 %v1719_v15, %v1715_v43  ;;  %v9153_v3 = vpop.f32.mrb[119].mxu0 }
 0x295   : > { %12329 = vst [vmem:[#allocation122_spill] sm:$0xff] %v9151_v12  ;;  %12330 = vst [vmem:[#allocation123_spill] sm:$0xff] %v9153_v3 }
 0x296   : > { %6390 = vmatprep.subr.bf16.mxu0 %v2029_v62  ;;  %6438 = vmatprep.subr.bf16.mxu1 %v2045_v22 }
 0x297   : > { %6391 = vmatpush3.bf16.xpose.msra.mxu0 %v12331_v35  ;;  %6439 = vmatpush3.bf16.msra.mxu1 %v12332_v19  ;;  %v12337_v35 = vpack.c.bf16 %v9003_v45, %v8995_v2  ;;  %v12338_v19 = vpack.c.bf16 %v9005_v37, %v8997_v11 }
 0x298   : > { %6375 = vmatmul.mubr.bf16.gmra.mrb[180].mxu1 %v8791_v63 }
 0x299   : > { %v1532_v26 = vpop.f32.mrb[120].mxu1  ;;  %v1725_v43 = vpop.f32.mrb[120].mxu0  ;;  %6376 = vmatprep.mubr.bf16.mxu1 %v8806_v34 }
 0x29a   : > { %v9167_v52 = vpop.f32.mrb[121].mxu1  ;;  %v9169_v15 = vpop.f32.mrb[121].mxu0 }
 0x29b   : > { %12333 = vst [vmem:[#allocation124_spill] sm:$0xff] %v9167_v52  ;;  %12334 = vst [vmem:[#allocation125_spill] sm:$0xff] %v9169_v15  ;;  %v1536_v62 = vpop.f32.mrb[122].mxu1  ;;  %v1729_v22 = vpop.f32.mrb[122].mxu0 }
 0x29c   : > { %v2030_v16 = vpack.c.bf16 %v1536_v62, %v1532_v26  ;;  %v2046_v53 = vpack.c.bf16 %v1729_v22, %v1725_v43  ;;  %v9171_v36 = vpop.f32.mrb[123].mxu1  ;;  %v9173_v40 = vpop.f32.mrb[123].mxu0 }
 0x29d   : > { %12335 = vst [vmem:[#allocation126_spill] sm:$0xff] %v9171_v36  ;;  %12336 = vst [vmem:[#allocation127_spill] sm:$0xff] %v9173_v40 }
 0x29e   : > { %6392 = vmatprep.subr.bf16.mxu0 %v2030_v16  ;;  %6440 = vmatprep.subr.bf16.mxu1 %v2046_v53 }
 0x29f   : > { %6393 = vmatpush3.bf16.xpose.msra.mxu0 %v12337_v35  ;;  %6441 = vmatpush3.bf16.msra.mxu1 %v12338_v19  ;;  %v12343_v35 = vpack.c.bf16 %v9029_v21, %v9021_v50  ;;  %v12344_v19 = vpack.c.bf16 %v9031_v56, %v9023_v18  ;;  %v12358_v50 = vld [vmem:[#allocation43_spill] sm:$0xff] }
 0x2a0   : > { %6377 = vmatmul.mubr.bf16.gmra.mrb[184].mxu1 %v8806_v34 }
 0x2a1   : > { %v1542_v26 = vpop.f32.mrb[124].mxu1  ;;  %v1735_v43 = vpop.f32.mrb[124].mxu0  ;;  %6378 = vmatprep.mubr.bf16.mxu1 %v8821_v5 }
 0x2a2   : > { %v9187_v62 = vpop.f32.mrb[125].mxu1  ;;  %v9189_v22 = vpop.f32.mrb[125].mxu0 }
 0x2a3   : > { %12339 = vst [vmem:[#allocation128_spill] sm:$0xff] %v9187_v62  ;;  %12340 = vst [vmem:[#allocation129_spill] sm:$0xff] %v9189_v22  ;;  %v1546_v16 = vpop.f32.mrb[126].mxu1  ;;  %v1739_v53 = vpop.f32.mrb[126].mxu0 }
 0x2a4   : > { %v2031_v6 = vpack.c.bf16 %v1546_v16, %v1542_v26  ;;  %v2047_v38 = vpack.c.bf16 %v1739_v53, %v1735_v43  ;;  %v9191_v2 = vpop.f32.mrb[127].mxu0  ;;  %v9193_v45 = vpop.f32.mrb[127].mxu1  ;;  %v12345_v26 = vpack.c.bf16 %v8711_v4, %v8709_v59 }
 0x2a5   : > { %12341 = vst [vmem:[#allocation130_spill] sm:$0xff] %v9191_v2  ;;  %12342 = vst [vmem:[#allocation131_spill] sm:$0xff] %v9193_v45 }
 0x2a6   : > { %6394 = vmatprep.subr.bf16.mxu0 %v2031_v6  ;;  %6442 = vmatprep.subr.bf16.mxu1 %v2047_v38 }
 0x2a7   : > { %6395 = vmatpush3.bf16.xpose.msra.mxu0 %v12343_v35  ;;  %6443 = vmatpush3.bf16.msra.mxu1 %v12344_v19 }
 0x2a8   : > { %6652 = vmatprep.subr.bf16.mxu1 %v12345_v26  ;;  %6379 = vmatmul.mubr.bf16.gmra.mrb[188].mxu1 %v8821_v5 }
 0x2a9   : > { %v9209_v43 = vpop.f32.mrb[128].mxu0 }
 0x2aa   : > { %v9211_v16 = vpop.f32.mrb[129].mxu0 }
 0x2ab   : > { %12346 = vst [vmem:[#allocation132_spill] sm:$0xff] %v9211_v16  ;;  %v9213_v6 = vpop.f32.mrb[130].mxu0 }
 0x2ac   : > { %v9217_v21 = vpop.f32.mrb[131].mxu0 }
 0x2ad   : > { %12347 = vst [vmem:[#allocation133_spill] sm:$0xff] %v9217_v21 }
 0x2ae   : > { %6397 = vmatmul.mubr.bf16.vlgmr.msra.gmra.mrb[192].mxu0 %v8557_v44 }
 0x2af   : > { %6398 = vmatprep.mubr.bf16.mxu0 %v8580_v61 }
 0x2b1   : > { %v9223_v59 = vpop.f32.mrb[132].mxu0 }
 0x2b2   : > { %v9225_v4 = vpop.f32.mrb[133].mxu0 }
 0x2b3   : > { %12348 = vst [vmem:[#allocation134_spill] sm:$0xff] %v9225_v4  ;;  %v9227_v18 = vpop.f32.mrb[134].mxu0 }
 0x2b4   : > { %v9231_v53 = vpop.f32.mrb[135].mxu0 }
 0x2b5   : > { %12349 = vst [vmem:[#allocation135_spill] sm:$0xff] %v9231_v53 }
 0x2b6   : > { %6399 = vmatmul.mubr.bf16.gmra.mrb[196].mxu0 %v8580_v61 }
 0x2b7   : > { %6400 = vmatprep.mubr.bf16.mxu0 %v8603_v30 }
 0x2b9   : > { %v9237_v44 = vpop.f32.mrb[136].mxu0 }
 0x2ba   : > { %v9239_v19 = vpop.f32.mrb[137].mxu0 }
 0x2bb   : > { %12350 = vst [vmem:[#allocation136_spill] sm:$0xff] %v9239_v19  ;;  %v9241_v26 = vpop.f32.mrb[138].mxu0 }
 0x2bc   : > { %v9245_v56 = vpop.f32.mrb[139].mxu0 }
 0x2bd   : > { %12351 = vst [vmem:[#allocation137_spill] sm:$0xff] %v9245_v56 }
 0x2be   : > { %6401 = vmatmul.mubr.bf16.gmra.mrb[200].mxu0 %v8603_v30 }
 0x2bf   : > { %6402 = vmatprep.mubr.bf16.mxu0 %v8626_v1 }
 0x2c1   : > { %v9251_v61 = vpop.f32.mrb[140].mxu0 }
 0x2c2   : > { %v9253_v35 = vpop.f32.mrb[141].mxu0 }
 0x2c3   : > { %12352 = vst [vmem:[#allocation138_spill] sm:$0xff] %v9253_v35  ;;  %v9255_v38 = vpop.f32.mrb[142].mxu0 }
 0x2c4   : > { %v9259_v22 = vpop.f32.mrb[143].mxu0 }
 0x2c5   : > { %12353 = vst [vmem:[#allocation139_spill] sm:$0xff] %v9259_v22 }
 0x2c6   : > { %6403 = vmatmul.mubr.bf16.gmra.mrb[204].mxu0 %v8626_v1 }
 0x2c7   : > { %6404 = vmatprep.mubr.bf16.mxu0 %v8649_v7 }
 0x2c9   : > { %v9265_v30 = vpop.f32.mrb[144].mxu0 }
 0x2ca   : > { %v9267_v11 = vpop.f32.mrb[145].mxu0 }
 0x2cb   : > { %12354 = vst [vmem:[#allocation140_spill] sm:$0xff] %v9267_v11  ;;  %v9269_v2 = vpop.f32.mrb[146].mxu0 }
 0x2cc   : > { %v9273_v40 = vpop.f32.mrb[147].mxu0 }
 0x2cd   : > { %12355 = vst [vmem:[#allocation141_spill] sm:$0xff] %v9273_v40 }
 0x2ce   : > { %6405 = vmatmul.mubr.bf16.gmra.mrb[208].mxu0 %v8649_v7 }
 0x2cf   : > { %6406 = vmatprep.mubr.bf16.mxu0 %v8668_v9 }
 0x2d1   : > { %v9279_v1 = vpop.f32.mrb[148].mxu0 }
 0x2d2   : > { %v9281_v37 = vpop.f32.mrb[149].mxu0 }
 0x2d3   : > { %12356 = vst [vmem:[#allocation142_spill] sm:$0xff] %v9281_v37  ;;  %v9283_v47 = vpop.f32.mrb[150].mxu0 }
 0x2d4   : > { %v9287_v35 = vpop.f32.mrb[151].mxu0 }
 0x2d5   : > { %12357 = vst [vmem:[#allocation143_spill] sm:$0xff] %v9287_v35 }
 0x2d6   : > { %6407 = vmatmul.mubr.bf16.gmra.mrb[212].mxu0 %v8668_v9 }
 0x2d7   : > { %6408 = vmatprep.mubr.bf16.mxu0 %v12358_v50 }
 0x2d9   : > { %v9293_v7 = vpop.f32.mrb[152].mxu0 }
 0x2da   : > { %v9295_v11 = vpop.f32.mrb[153].mxu0 }
 0x2db   : > { %12359 = vst [vmem:[#allocation43_spill] sm:$0xff] %v9295_v11  ;;  %v9297_v40 = vpop.f32.mrb[154].mxu0 }
 0x2dc   : > { %v9301_v27 = vpop.f32.mrb[155].mxu0 }
 0x2dd   : > { %12360 = vst [vmem:[#allocation144_spill] sm:$0xff] %v9301_v27 }
 0x2de   : > { %6409 = vmatmul.mubr.bf16.gmra.mrb[216].mxu0 %v12358_v50 }
 0x2df   : > { %6410 = vmatprep.mubr.bf16.mxu0 %v8704_v41 }
 0x2e1   : > { %v9307_v9 = vpop.f32.mrb[156].mxu0 }
 0x2e2   : > { %v9309_v15 = vpop.f32.mrb[157].mxu0 }
 0x2e3   : > { %12361 = vst [vmem:[#allocation145_spill] sm:$0xff] %v9309_v15  ;;  %v9311_v37 = vpop.f32.mrb[158].mxu0 }
 0x2e4   : > { %v9315_v49 = vpop.f32.mrb[159].mxu0 }
 0x2e5   : > { %12362 = vst [vmem:[#allocation146_spill] sm:$0xff] %v9315_v49 }
 0x2e6   : > { %6411 = vmatmul.mubr.bf16.gmra.mrb[220].mxu0 %v8704_v41  ;;  %v12365_v41 = vpack.c.bf16 %v9213_v6, %v9209_v43 }
 0x2e7   : > { %6412 = vmatprep.mubr.bf16.mxu0 %v8716_v14 }
 0x2e9   : > { %v1825_v50 = vpop.f32.mrb[160].mxu0 }
 0x2ea   : > { %v9321_v3 = vpop.f32.mrb[161].mxu0 }
 0x2eb   : > { %12363 = vst [vmem:[#allocation147_spill] sm:$0xff] %v9321_v3  ;;  %v1829_v11 = vpop.f32.mrb[162].mxu0 }
 0x2ec   : > { %v2056_v27 = vpack.c.bf16 %v1829_v11, %v1825_v50  ;;  %v9323_v19 = vpop.f32.mrb[163].mxu0 }
 0x2ed   : > { %12364 = vst [vmem:[#allocation148_spill] sm:$0xff] %v9323_v19 }
 0x2ee   : > { %6413 = vmatmul.mubr.bf16.gmra.mrb[224].mxu0 %v8716_v14  ;;  %6540 = vmatprep.subr.bf16.mxu0 %v2056_v27  ;;  %v12368_v14 = vpack.c.bf16 %v9227_v18, %v9223_v59 }
 0x2ef   : > { %6414 = vmatprep.mubr.bf16.mxu0 %v8731_v8  ;;  %6541 = vmatpush3.bf16.msra.mxu0 %v12365_v41 }
 0x2f1   : > { %v1835_v22 = vpop.f32.mrb[164].mxu0 }
 0x2f2   : > { %v9332_v35 = vpop.f32.mrb[165].mxu0 }
 0x2f3   : > { %12366 = vst [vmem:[#allocation149_spill] sm:$0xff] %v9332_v35  ;;  %v1839_v15 = vpop.f32.mrb[166].mxu0 }
 0x2f4   : > { %v2057_v49 = vpack.c.bf16 %v1839_v15, %v1835_v22  ;;  %v9334_v11 = vpop.f32.mrb[167].mxu0 }
 0x2f5   : > { %12367 = vst [vmem:[#allocation150_spill] sm:$0xff] %v9334_v11 }
 0x2f6   : > { %6415 = vmatmul.mubr.bf16.gmra.mrb[228].mxu0 %v8731_v8  ;;  %6542 = vmatprep.subr.bf16.mxu0 %v2057_v49  ;;  %v12371_v8 = vpack.c.bf16 %v9241_v26, %v9237_v44 }
 0x2f7   : > { %6416 = vmatprep.mubr.bf16.mxu0 %v8746_v33  ;;  %6543 = vmatpush3.bf16.msra.mxu0 %v12368_v14 }
 0x2f9   : > { %v1845_v27 = vpop.f32.mrb[168].mxu0 }
 0x2fa   : > { %v9343_v43 = vpop.f32.mrb[169].mxu0 }
 0x2fb   : > { %12369 = vst [vmem:[#allocation151_spill] sm:$0xff] %v9343_v43  ;;  %v1849_v6 = vpop.f32.mrb[170].mxu0 }
 0x2fc   : > { %v2058_v41 = vpack.c.bf16 %v1849_v6, %v1845_v27  ;;  %v9345_v15 = vpop.f32.mrb[171].mxu0 }
 0x2fd   : > { %12370 = vst [vmem:[#allocation152_spill] sm:$0xff] %v9345_v15 }
 0x2fe   : > { %6417 = vmatmul.mubr.bf16.gmra.mrb[232].mxu0 %v8746_v33  ;;  %6544 = vmatprep.subr.bf16.mxu0 %v2058_v41 }
 0x2ff   : > { %6418 = vmatprep.mubr.bf16.mxu0 %v8761_v29  ;;  %6545 = vmatpush3.bf16.msra.mxu0 %v12371_v8  ;;  %v12376_v8 = vpack.c.bf16 %v9255_v38, %v9251_v61 }
 0x301   : > { %v1855_v49 = vpop.f32.mrb[172].mxu0  ;;  %v9354_v59 = vpop.f32.mrb[128].mxu1 }
 0x302   : > { %12372 = vst [vmem:[#allocation153_spill] sm:$0xff] %v9354_v59  ;;  %v9356_v18 = vpop.f32.mrb[173].mxu0  ;;  %v9358_v14 = vpop.f32.mrb[129].mxu1 }
 0x303   : > { %12373 = vst [vmem:[#allocation154_spill] sm:$0xff] %v9356_v18  ;;  %12374 = vst [vmem:[#allocation155_spill] sm:$0xff] %v9358_v14  ;;  %v1859_v27 = vpop.f32.mrb[174].mxu0  ;;  %v9362_v22 = vpop.f32.mrb[130].mxu1  ;;  %v12431_v42 = vmax.f32 %v9354_v59, %v9358_v14 }
 0x304   : > { %v2059_v33 = vpack.c.bf16 %v1859_v27, %v1855_v49  ;;  %v9364_v41 = vpop.f32.mrb[175].mxu0  ;;  %v9366_v50 = vpop.f32.mrb[131].mxu1 }
 0x305   : > { %12375 = vst [vmem:[#allocation156_spill] sm:$0xff] %v9364_v41  ;;  %v12433_v58 = vmax.f32 %v9362_v22, %v9366_v50 }
 0x306   : > { %6419 = vmatmul.mubr.bf16.gmra.mrb[236].mxu0 %v8761_v29  ;;  %6546 = vmatprep.subr.bf16.mxu0 %v2059_v33 }
 0x307   : > { %6420 = vmatprep.mubr.bf16.mxu0 %v8776_v46  ;;  %6547 = vmatpush3.bf16.msra.mxu0 %v12376_v8  ;;  %v12380_v8 = vpack.c.bf16 %v9269_v2, %v9265_v30 }
 0x309   : > { %v1865_v49 = vpop.f32.mrb[176].mxu0  ;;  %v9377_v27 = vpop.f32.mrb[132].mxu1 }
 0x30a   : > { %v9379_v56 = vpop.f32.mrb[177].mxu0  ;;  %v9381_v6 = vpop.f32.mrb[133].mxu1 }
 0x30b   : > { %12377 = vst [vmem:[#allocation157_spill] sm:$0xff] %v9379_v56  ;;  %12378 = vst [vmem:[#allocation158_spill] sm:$0xff] %v9381_v6  ;;  %v1869_v44 = vpop.f32.mrb[178].mxu0  ;;  %v9385_v18 = vpop.f32.mrb[134].mxu1 }
 0x30c   : > { %v2060_v29 = vpack.c.bf16 %v1869_v44, %v1865_v49  ;;  %v9387_v33 = vpop.f32.mrb[179].mxu0  ;;  %v9389_v41 = vpop.f32.mrb[135].mxu1 }
 0x30d   : > { %12379 = vst [vmem:[#allocation159_spill] sm:$0xff] %v9387_v33 }
 0x30e   : > { %6421 = vmatmul.mubr.bf16.gmra.mrb[240].mxu0 %v8776_v46  ;;  %6548 = vmatprep.subr.bf16.mxu0 %v2060_v29 }
 0x30f   : > { %6422 = vmatprep.mubr.bf16.mxu0 %v8791_v63  ;;  %6549 = vmatpush3.bf16.msra.mxu0 %v12380_v8  ;;  %v12385_v8 = vpack.c.bf16 %v9283_v47, %v9279_v1 }
 0x311   : > { %v1875_v44 = vpop.f32.mrb[180].mxu0  ;;  %v9400_v49 = vpop.f32.mrb[136].mxu1 }
 0x312   : > { %12381 = vst [vmem:[#allocation160_spill] sm:$0xff] %v9400_v49  ;;  %v9402_v26 = vpop.f32.mrb[181].mxu0  ;;  %v9404_v23 = vpop.f32.mrb[137].mxu1 }
 0x313   : > { %12382 = vst [vmem:[#allocation161_spill] sm:$0xff] %v9402_v26  ;;  %12383 = vst [vmem:[#allocation162_spill] sm:$0xff] %v9404_v23  ;;  %v1879_v38 = vpop.f32.mrb[182].mxu0  ;;  %v9406_v56 = vpop.f32.mrb[138].mxu1 }
 0x314   : > { %v2061_v29 = vpack.c.bf16 %v1879_v38, %v1875_v44  ;;  %v9410_v61 = vpop.f32.mrb[183].mxu0  ;;  %v9412_v33 = vpop.f32.mrb[139].mxu1 }
 0x315   : > { %12384 = vst [vmem:[#allocation163_spill] sm:$0xff] %v9410_v61 }
 0x316   : > { %6423 = vmatmul.mubr.bf16.gmra.mrb[244].mxu0 %v8791_v63  ;;  %6550 = vmatprep.subr.bf16.mxu0 %v2061_v29 }
 0x317   : > { %6424 = vmatprep.mubr.bf16.mxu0 %v8806_v34  ;;  %6551 = vmatpush3.bf16.msra.mxu0 %v12385_v8  ;;  %v12390_v8 = vpack.c.bf16 %v9297_v40, %v9293_v7 }
 0x319   : > { %v1885_v38 = vpop.f32.mrb[184].mxu0  ;;  %v9423_v44 = vpop.f32.mrb[140].mxu1 }
 0x31a   : > { %12386 = vst [vmem:[#allocation164_spill] sm:$0xff] %v9423_v44  ;;  %v9425_v46 = vpop.f32.mrb[185].mxu0  ;;  %v9427_v32 = vpop.f32.mrb[141].mxu1 }
 0x31b   : > { %12387 = vst [vmem:[#allocation165_spill] sm:$0xff] %v9425_v46  ;;  %12388 = vst [vmem:[#allocation166_spill] sm:$0xff] %v9427_v32  ;;  %v1889_v2 = vpop.f32.mrb[186].mxu0  ;;  %v9429_v26 = vpop.f32.mrb[142].mxu1 }
 0x31c   : > { %v2062_v29 = vpack.c.bf16 %v1889_v2, %v1885_v38  ;;  %v9433_v30 = vpop.f32.mrb[187].mxu0  ;;  %v9435_v61 = vpop.f32.mrb[143].mxu1 }
 0x31d   : > { %12389 = vst [vmem:[#allocation167_spill] sm:$0xff] %v9433_v30  ;;  %v12395_v30 = vpack.c.bf16 %v9311_v37, %v9307_v9 }
 0x31e   : > { %6425 = vmatmul.mubr.bf16.gmra.mrb[248].mxu0 %v8806_v34  ;;  %6552 = vmatprep.subr.bf16.mxu0 %v2062_v29 }
 0x31f   : > { %6553 = vmatpush3.bf16.msra.mxu0 %v12390_v8  ;;  %6426 = vmatprep.mubr.bf16.mxu0 %v8821_v5 }
 0x321   : > { %v1895_v2 = vpop.f32.mrb[188].mxu0  ;;  %v9446_v38 = vpop.f32.mrb[144].mxu1 }
 0x322   : > { %12391 = vst [vmem:[#allocation168_spill] sm:$0xff] %v9446_v38  ;;  %v9448_v63 = vpop.f32.mrb[189].mxu0  ;;  %v9450_v43 = vpop.f32.mrb[145].mxu1 }
 0x323   : > { %12392 = vst [vmem:[#allocation169_spill] sm:$0xff] %v9448_v63  ;;  %12393 = vst [vmem:[#allocation170_spill] sm:$0xff] %v9450_v43  ;;  %v1899_v47 = vpop.f32.mrb[190].mxu0  ;;  %v9452_v46 = vpop.f32.mrb[146].mxu1 }
 0x324   : > { %v2063_v29 = vpack.c.bf16 %v1899_v47, %v1895_v2  ;;  %v9456_v1 = vpop.f32.mrb[191].mxu0  ;;  %v9458_v40 = vpop.f32.mrb[147].mxu1  ;;  %v12396_v47 = vpack.c.bf16 %v9051_v39, %v9047_v55 }
 0x325   : > { %12394 = vst [vmem:[#allocation171_spill] sm:$0xff] %v9456_v1 }
 0x326   : > { %6427 = vmatmul.mubr.bf16.gmra.mrb[252].mxu0 %v8821_v5  ;;  %6554 = vmatprep.subr.bf16.mxu0 %v2063_v29 }
 0x327   : > { %6555 = vmatpush3.bf16.msra.mxu0 %v12395_v30 }
 0x328   : > { %6700 = vmatprep.subr.bf16.mxu0 %v12396_v47 }
 0x329   : > { %v9471_v2 = vpop.f32.mrb[148].mxu1 }
 0x32a   : > { %12397 = vst [vmem:[#allocation172_spill] sm:$0xff] %v9471_v2  ;;  %v9473_v34 = vpop.f32.mrb[149].mxu1 }
 0x32b   : > { %12398 = vst [vmem:[#allocation173_spill] sm:$0xff] %v9473_v34  ;;  %v9475_v15 = vpop.f32.mrb[150].mxu1 }
 0x32c   : > { %v9479_v8 = vpop.f32.mrb[151].mxu1 }
 0x331   : > { %v9483_v37 = vpop.f32.mrb[152].mxu1 }
 0x332   : > { %12399 = vst [vmem:[#allocation174_spill] sm:$0xff] %v9483_v37  ;;  %v9485_v9 = vpop.f32.mrb[153].mxu1 }
 0x333   : > { %12400 = vst [vmem:[#allocation175_spill] sm:$0xff] %v9485_v9  ;;  %v9487_v39 = vpop.f32.mrb[154].mxu1 }
 0x334   : > { %v9491_v30 = vpop.f32.mrb[155].mxu1 }
 0x339   : > { %v9495_v47 = vpop.f32.mrb[156].mxu1 }
 0x33a   : > { %12401 = vst [vmem:[#allocation176_spill] sm:$0xff] %v9495_v47  ;;  %v9497_v7 = vpop.f32.mrb[157].mxu1 }
 0x33b   : > { %12402 = vst [vmem:[#allocation177_spill] sm:$0xff] %v9497_v7  ;;  %v9499_v63 = vpop.f32.mrb[158].mxu1 }
 0x33c   : > { %v9503_v1 = vpop.f32.mrb[159].mxu1 }
 0x343   : > { %v9507_v55 = vpop.f32.mrb[160].mxu1 }
 0x344   : > { %12403 = vst [vmem:[#allocation178_spill] sm:$0xff] %v9507_v55  ;;  %v9509_v53 = vpop.f32.mrb[161].mxu1 }
 0x345   : > { %12404 = vst [vmem:[#allocation179_spill] sm:$0xff] %v9509_v53  ;;  %v9511_v0 = vpop.f32.mrb[162].mxu1 }
 0x346   : > { %v9515_v13 = vpop.f32.mrb[163].mxu1 }
 0x34b   : > { %v9519_v5 = vpop.f32.mrb[164].mxu1 }
 0x34c   : > { %12405 = vst [vmem:[#allocation180_spill] sm:$0xff] %v9519_v5  ;;  %v9521_v11 = vpop.f32.mrb[165].mxu1 }
 0x34d   : > { %12406 = vst [vmem:[#allocation181_spill] sm:$0xff] %v9521_v11  ;;  %v9523_v16 = vpop.f32.mrb[166].mxu1 }
 0x34e   : > { %v9527_v21 = vpop.f32.mrb[167].mxu1 }
 0x353   : > { %v9531_v29 = vpop.f32.mrb[168].mxu1 }
 0x354   : > { %12407 = vst [vmem:[#allocation182_spill] sm:$0xff] %v9531_v29  ;;  %v9533_v17 = vpop.f32.mrb[169].mxu1 }
 0x355   : > { %12408 = vst [vmem:[#allocation183_spill] sm:$0xff] %v9533_v17  ;;  %v9535_v3 = vpop.f32.mrb[170].mxu1 }
 0x356   : > { %v9539_v19 = vpop.f32.mrb[171].mxu1 }
 0x357   : > { %12409 = vst [vmem:[#allocation184_spill] sm:$0xff] %v9539_v19 }
 0x35b   : > { %v9543_v4 = vpop.f32.mrb[172].mxu1 }
 0x35c   : > { %12410 = vst [vmem:[#allocation185_spill] sm:$0xff] %v9543_v4  ;;  %v9545_v60 = vpop.f32.mrb[173].mxu1 }
 0x35d   : > { %12411 = vst [vmem:[#allocation186_spill] sm:$0xff] %v9545_v60  ;;  %v9547_v10 = vpop.f32.mrb[174].mxu1 }
 0x35e   : > { %12412 = vst [vmem:[#allocation187_spill] sm:$0xff] %v9547_v10  ;;  %v9551_v62 = vpop.f32.mrb[175].mxu1 }
 0x35f   : > { %12413 = vst [vmem:[#allocation188_spill] sm:$0xff] %v9551_v62 }
 0x363   : > { %v9555_v35 = vpop.f32.mrb[176].mxu1 }
 0x364   : > { %12414 = vst [vmem:[#allocation189_spill] sm:$0xff] %v9555_v35  ;;  %v9557_v52 = vpop.f32.mrb[177].mxu1 }
 0x365   : > { %12415 = vst [vmem:[#allocation190_spill] sm:$0xff] %v9557_v52  ;;  %v9559_v36 = vpop.f32.mrb[178].mxu1 }
 0x366   : > { %12416 = vst [vmem:[#allocation191_spill] sm:$0xff] %v9559_v36  ;;  %v9563_v57 = vpop.f32.mrb[179].mxu1 }
 0x367   : > { %12417 = vst [vmem:[#allocation192_spill] sm:$0xff] %v9563_v57 }
 0x36b   : > { %v9567_v20 = vpop.f32.mrb[180].mxu1 }
 0x36c   : > { %12418 = vst [vmem:[#allocation193_spill] sm:$0xff] %v9567_v20  ;;  %v9569_v28 = vpop.f32.mrb[181].mxu1 }
 0x36d   : > { %12419 = vst [vmem:[#allocation194_spill] sm:$0xff] %v9569_v28  ;;  %v9571_v25 = vpop.f32.mrb[182].mxu1 }
 0x36e   : > { %12420 = vst [vmem:[#allocation195_spill] sm:$0xff] %v9571_v25  ;;  %v9575_v48 = vpop.f32.mrb[183].mxu1 }
 0x36f   : > { %12421 = vst [vmem:[#allocation196_spill] sm:$0xff] %v9575_v48 }
 0x373   : > { %v9579_v24 = vpop.f32.mrb[184].mxu1 }
 0x374   : > { %12422 = vst [vmem:[#allocation197_spill] sm:$0xff] %v9579_v24  ;;  %v9581_v31 = vpop.f32.mrb[185].mxu1 }
 0x375   : > { %12423 = vst [vmem:[#allocation198_spill] sm:$0xff] %v9581_v31  ;;  %v9583_v51 = vpop.f32.mrb[186].mxu1 }
 0x376   : > { %12424 = vst [vmem:[#allocation199_spill] sm:$0xff] %v9583_v51  ;;  %v9587_v54 = vpop.f32.mrb[187].mxu1 }
 0x377   : > { %12425 = vst [vmem:[#allocation200_spill] sm:$0xff] %v9587_v54 }
 0x37b   : > { %v9591_v45 = vpop.f32.mrb[188].mxu1 }
 0x37c   : > { %12426 = vst [vmem:[#allocation201_spill] sm:$0xff] %v9591_v45  ;;  %v9593_v28 = vpop.f32.mrb[189].mxu1 }
 0x37d   : > { %12427 = vst [vmem:[#allocation202_spill] sm:$0xff] %v9593_v28  ;;  %v9595_v20 = vpop.f32.mrb[190].mxu1 }
 0x37e   : > { %12428 = vst [vmem:[#allocation203_spill] sm:$0xff] %v9595_v20  ;;  %v9599_v48 = vpop.f32.mrb[191].mxu1 }
 0x37f   : > { %12429 = vst [vmem:[#allocation204_spill] sm:$0xff] %v9599_v48 }
 0x381   : > { %v9603_v12 = vpop.f32.mrb[192].mxu0 }
 0x382   : > { %12430 = vst [vmem:[#allocation205_spill] sm:$0xff] %v9603_v12  ;;  %v2451_v54 = vmax.f32 %v12431_v42, %v9603_v12  ;;  %v9609_v51 = vpop.f32.mrb[193].mxu0  ;;  %v12436_v42 = vmax.f32 %v9377_v27, %v9381_v6 }
 0x383   : > { %v9611_v31 = vpop.f32.mrb[194].mxu0 }
 0x384   : > { %12432 = vst [vmem:[#allocation206_spill] sm:$0xff] %v9611_v31  ;;  %v2456_v28 = vmax.f32 %v12433_v58, %v9611_v31  ;;  %v2452_v45 = vmax.f32 %v2451_v54, %v9609_v51  ;;  %v9618_v24 = vpop.f32.mrb[195].mxu0  ;;  %v12437_v54 = vmax.f32 %v9385_v18, %v9389_v41 }
 0x385   : > { %12434 = vst [vmem:[#allocation207_spill] sm:$0xff] %v9618_v24 }
 0x386   : > { %2453 = vmax.xlane.f32.xlu0 %v2452_v45  ;;  %v2457_v25 = vmax.f32 %v2456_v28, %v9618_v24 }
 0x389   : > { %v9621_v48 = vpop.f32.mrb[196].mxu0 }
 0x38a   : > { %12435 = vst [vmem:[#allocation208_spill] sm:$0xff] %v9621_v48  ;;  %v2461_v12 = vmax.f32 %v12436_v42, %v9621_v48  ;;  %2458 = vmax.xlane.f32.xlu0 %v2457_v25  ;;  %v9627_v14 = vpop.f32.mrb[197].mxu0  ;;  %v12440_v25 = vmax.f32 %v9400_v49, %v9404_v23 }
 0x38b   : > { %v9629_v59 = vpop.f32.mrb[198].mxu0 }
 0x38c   : > { %v2466_v58 = vmax.f32 %v12437_v54, %v9629_v59  ;;  %v2462_v45 = vmax.f32 %v2461_v12, %v9627_v14  ;;  %v9636_v28 = vpop.f32.mrb[199].mxu0  ;;  %v12441_v12 = vmax.f32 %v9406_v56, %v9412_v33 }
 0x38d   : > { %12438 = vst [vmem:[#allocation209_spill] sm:$0xff] %v9636_v28 }
 0x38e   : > { %2463 = vmax.xlane.f32.xlu1 %v2462_v45  ;;  %v2467_v24 = vmax.f32 %v2466_v58, %v9636_v28 }
 0x391   : > { %v9639_v31 = vpop.f32.mrb[200].mxu0 }
 0x392   : > { %12439 = vst [vmem:[#allocation210_spill] sm:$0xff] %v9639_v31  ;;  %v2471_v42 = vmax.f32 %v12440_v25, %v9639_v31  ;;  %2468 = vmax.xlane.f32.xlu1 %v2467_v24  ;;  %v9645_v48 = vpop.f32.mrb[201].mxu0  ;;  %v12444_v24 = vmax.f32 %v9423_v44, %v9427_v32 }
 0x393   : > { %v9647_v6 = vpop.f32.mrb[202].mxu0 }
 0x394   : > { %v2476_v54 = vmax.f32 %v12441_v12, %v9647_v6  ;;  %v9653_v45 = vpop.f32.mrb[203].mxu0  ;;  %v2472_v58 = vmax.f32 %v2471_v42, %v9645_v48  ;;  %v12445_v12 = vmax.f32 %v9429_v26, %v9435_v61 }
 0x395   : > { %12442 = vst [vmem:[#allocation211_spill] sm:$0xff] %v9653_v45 }
 0x396   : > { %2473 = vmax.xlane.f32.xlu0 %v2472_v58  ;;  %v2477_v28 = vmax.f32 %v2476_v54, %v9653_v45 }
 0x398   : > { %2478 = vmax.xlane.f32.xlu1 %v2477_v28 }
 0x399   : > { %v9657_v23 = vpop.f32.mrb[204].mxu0 }
 0x39a   : > { %12443 = vst [vmem:[#allocation212_spill] sm:$0xff] %v9657_v23  ;;  %v2481_v25 = vmax.f32 %v12444_v24, %v9657_v23  ;;  %v9663_v31 = vpop.f32.mrb[205].mxu0  ;;  %v12448_v24 = vmax.f32 %v9446_v38, %v9450_v43 }
 0x39b   : > { %v9665_v49 = vpop.f32.mrb[206].mxu0 }
 0x39c   : > { %v2486_v42 = vmax.f32 %v12445_v12, %v9665_v49  ;;  %v9671_v58 = vpop.f32.mrb[207].mxu0  ;;  %v2482_v28 = vmax.f32 %v2481_v25, %v9663_v31  ;;  %v12449_v12 = vmax.f32 %v9452_v46, %v9458_v40 }
 0x39d   : > { %12446 = vst [vmem:[#allocation213_spill] sm:$0xff] %v9671_v58 }
 0x39e   : > { %2483 = vmax.xlane.f32.xlu0 %v2482_v28  ;;  %v2487_v54 = vmax.f32 %v2486_v42, %v9671_v58 }
 0x3a0   : > { %2488 = vmax.xlane.f32.xlu1 %v2487_v54 }
 0x3a1   : > { %v9675_v45 = vpop.f32.mrb[208].mxu0 }
 0x3a2   : > { %12447 = vst [vmem:[#allocation214_spill] sm:$0xff] %v9675_v45  ;;  %v2491_v23 = vmax.f32 %v12448_v24, %v9675_v45  ;;  %v9681_v32 = vpop.f32.mrb[209].mxu0  ;;  %v12452_v24 = vmax.f32 %v9471_v2, %v9473_v34 }
 0x3a3   : > { %v9683_v44 = vpop.f32.mrb[210].mxu0 }
 0x3a4   : > { %v2496_v25 = vmax.f32 %v12449_v12, %v9683_v44  ;;  %v9689_v28 = vpop.f32.mrb[211].mxu0  ;;  %v2492_v42 = vmax.f32 %v2491_v23, %v9681_v32  ;;  %v12453_v12 = vmax.f32 %v9475_v15, %v9479_v8 }
 0x3a5   : > { %12450 = vst [vmem:[#allocation215_spill] sm:$0xff] %v9689_v28 }
 0x3a6   : > { %2493 = vmax.xlane.f32.xlu0 %v2492_v42  ;;  %v2497_v54 = vmax.f32 %v2496_v25, %v9689_v28 }
 0x3a8   : > { %2498 = vmax.xlane.f32.xlu1 %v2497_v54 }
 0x3a9   : > { %v9693_v58 = vpop.f32.mrb[212].mxu0 }
 0x3aa   : > { %12451 = vst [vmem:[#allocation216_spill] sm:$0xff] %v9693_v58  ;;  %v2501_v45 = vmax.f32 %v12452_v24, %v9693_v58  ;;  %v9699_v43 = vpop.f32.mrb[213].mxu0  ;;  %v12456_v24 = vmax.f32 %v9483_v37, %v9485_v9 }
 0x3ab   : > { %v9701_v38 = vpop.f32.mrb[214].mxu0 }
 0x3ac   : > { %v2506_v23 = vmax.f32 %v12453_v12, %v9701_v38  ;;  %v9707_v42 = vpop.f32.mrb[215].mxu0  ;;  %v2502_v25 = vmax.f32 %v2501_v45, %v9699_v43  ;;  %v12457_v12 = vmax.f32 %v9487_v39, %v9491_v30 }
 0x3ad   : > { %12454 = vst [vmem:[#allocation217_spill] sm:$0xff] %v9707_v42 }
 0x3ae   : > { %2503 = vmax.xlane.f32.xlu0 %v2502_v25  ;;  %v2507_v54 = vmax.f32 %v2506_v23, %v9707_v42 }
 0x3b0   : > { %2508 = vmax.xlane.f32.xlu1 %v2507_v54 }
 0x3b1   : > { %v9711_v28 = vpop.f32.mrb[216].mxu0 }
 0x3b2   : > { %12455 = vst [vmem:[#allocation218_spill] sm:$0xff] %v9711_v28  ;;  %v2511_v58 = vmax.f32 %v12456_v24, %v9711_v28  ;;  %v9717_v34 = vpop.f32.mrb[217].mxu0  ;;  %v12460_v24 = vmax.f32 %v9495_v47, %v9497_v7 }
 0x3b3   : > { %v9719_v2 = vpop.f32.mrb[218].mxu0 }
 0x3b4   : > { %v2516_v45 = vmax.f32 %v12457_v12, %v9719_v2  ;;  %v9725_v25 = vpop.f32.mrb[219].mxu0  ;;  %v2512_v23 = vmax.f32 %v2511_v58, %v9717_v34  ;;  %v12461_v12 = vmax.f32 %v9499_v63, %v9503_v1 }
 0x3b5   : > { %12458 = vst [vmem:[#allocation219_spill] sm:$0xff] %v9725_v25 }
 0x3b6   : > { %2513 = vmax.xlane.f32.xlu0 %v2512_v23  ;;  %v2517_v54 = vmax.f32 %v2516_v45, %v9725_v25 }
 0x3b8   : > { %2518 = vmax.xlane.f32.xlu1 %v2517_v54 }
 0x3b9   : > { %v9729_v42 = vpop.f32.mrb[220].mxu0 }
 0x3ba   : > { %12459 = vst [vmem:[#allocation220_spill] sm:$0xff] %v9729_v42  ;;  %v2521_v28 = vmax.f32 %v12460_v24, %v9729_v42  ;;  %v9735_v9 = vpop.f32.mrb[221].mxu0  ;;  %v12464_v24 = vmax.f32 %v9507_v55, %v9509_v53 }
 0x3bb   : > { %v9737_v37 = vpop.f32.mrb[222].mxu0 }
 0x3bc   : > { %v2526_v58 = vmax.f32 %v12461_v12, %v9737_v37  ;;  %v9743_v23 = vpop.f32.mrb[223].mxu0  ;;  %v2522_v45 = vmax.f32 %v2521_v28, %v9735_v9  ;;  %v12465_v12 = vmax.f32 %v9511_v0, %v9515_v13 }
 0x3bd   : > { %12462 = vst [vmem:[#allocation221_spill] sm:$0xff] %v9743_v23 }
 0x3be   : > { %2523 = vmax.xlane.f32.xlu0 %v2522_v45  ;;  %v2527_v54 = vmax.f32 %v2526_v58, %v9743_v23 }
 0x3c0   : > { %2528 = vmax.xlane.f32.xlu1 %v2527_v54 }
 0x3c1   : > { %v9747_v25 = vpop.f32.mrb[224].mxu0 }
 0x3c2   : > { %12463 = vst [vmem:[#allocation222_spill] sm:$0xff] %v9747_v25  ;;  %v2531_v42 = vmax.f32 %v12464_v24, %v9747_v25  ;;  %v9753_v7 = vpop.f32.mrb[225].mxu0  ;;  %v12468_v24 = vmax.f32 %v9519_v5, %v9521_v11 }
 0x3c3   : > { %v9755_v47 = vpop.f32.mrb[226].mxu0 }
 0x3c4   : > { %v2536_v28 = vmax.f32 %v12465_v12, %v9755_v47  ;;  %v9761_v45 = vpop.f32.mrb[227].mxu0  ;;  %v2532_v58 = vmax.f32 %v2531_v42, %v9753_v7  ;;  %v12469_v12 = vmax.f32 %v9523_v16, %v9527_v21 }
 0x3c5   : > { %12466 = vst [vmem:[#allocation223_spill] sm:$0xff] %v9761_v45 }
 0x3c6   : > { %2533 = vmax.xlane.f32.xlu0 %v2532_v58  ;;  %v2537_v54 = vmax.f32 %v2536_v28, %v9761_v45 }
 0x3c8   : > { %2538 = vmax.xlane.f32.xlu1 %v2537_v54 }
 0x3c9   : > { %v9765_v23 = vpop.f32.mrb[228].mxu0 }
 0x3ca   : > { %12467 = vst [vmem:[#allocation224_spill] sm:$0xff] %v9765_v23  ;;  %v2541_v25 = vmax.f32 %v12468_v24, %v9765_v23  ;;  %v9771_v53 = vpop.f32.mrb[229].mxu0  ;;  %v12472_v24 = vmax.f32 %v9531_v29, %v9533_v17 }
 0x3cb   : > { %v9773_v55 = vpop.f32.mrb[230].mxu0 }
 0x3cc   : > { %v2546_v42 = vmax.f32 %v12469_v12, %v9773_v55  ;;  %v9779_v58 = vpop.f32.mrb[231].mxu0  ;;  %v2542_v28 = vmax.f32 %v2541_v25, %v9771_v53  ;;  %v12474_v12 = vmax.f32 %v9535_v3, %v9539_v19 }
 0x3cd   : > { %12470 = vst [vmem:[#allocation225_spill] sm:$0xff] %v9779_v58 }
 0x3ce   : > { %2543 = vmax.xlane.f32.xlu0 %v2542_v28  ;;  %v2547_v54 = vmax.f32 %v2546_v42, %v9779_v58 }
 0x3d0   : > { %2548 = vmax.xlane.f32.xlu1 %v2547_v54 }
 0x3d1   : > { %v9783_v45 = vpop.f32.mrb[232].mxu0 }
 0x3d2   : > { %12471 = vst [vmem:[#allocation226_spill] sm:$0xff] %v9783_v45  ;;  %v2551_v23 = vmax.f32 %v12472_v24, %v9783_v45  ;;  %v9789_v11 = vpop.f32.mrb[233].mxu0  ;;  %v12477_v24 = vmax.f32 %v9543_v4, %v9545_v60 }
 0x3d3   : > { %v9791_v5 = vpop.f32.mrb[234].mxu0 }
 0x3d4   : > { %12473 = vst [vmem:[#allocation227_spill] sm:$0xff] %v9791_v5  ;;  %v2556_v25 = vmax.f32 %v12474_v12, %v9791_v5  ;;  %v9797_v28 = vpop.f32.mrb[235].mxu0  ;;  %v2552_v42 = vmax.f32 %v2551_v23, %v9789_v11  ;;  %v12480_v12 = vmax.f32 %v9547_v10, %v9551_v62 }
 0x3d5   : > { %12475 = vst [vmem:[#allocation228_spill] sm:$0xff] %v9797_v28 }
 0x3d6   : > { %2553 = vmax.xlane.f32.xlu0 %v2552_v42  ;;  %v2557_v54 = vmax.f32 %v2556_v25, %v9797_v28 }
 0x3d8   : > { %2558 = vmax.xlane.f32.xlu1 %v2557_v54 }
 0x3d9   : > { %v9801_v58 = vpop.f32.mrb[236].mxu0 }
 0x3da   : > { %12476 = vst [vmem:[#allocation229_spill] sm:$0xff] %v9801_v58  ;;  %v2561_v45 = vmax.f32 %v12477_v24, %v9801_v58  ;;  %v9807_v17 = vpop.f32.mrb[237].mxu0  ;;  %v12483_v24 = vmax.f32 %v9555_v35, %v9557_v52 }
 0x3db   : > { %12478 = vst [vmem:[#allocation230_spill] sm:$0xff] %v9807_v17  ;;  %v9809_v29 = vpop.f32.mrb[238].mxu0 }
 0x3dc   : > { %12479 = vst [vmem:[#allocation231_spill] sm:$0xff] %v9809_v29  ;;  %v2566_v23 = vmax.f32 %v12480_v12, %v9809_v29  ;;  %v9815_v42 = vpop.f32.mrb[239].mxu0  ;;  %v2562_v25 = vmax.f32 %v2561_v45, %v9807_v17  ;;  %v12486_v12 = vmax.f32 %v9559_v36, %v9563_v57 }
 0x3dd   : > { %12481 = vst [vmem:[#allocation232_spill] sm:$0xff] %v9815_v42 }
 0x3de   : > { %2563 = vmax.xlane.f32.xlu0 %v2562_v25  ;;  %v2567_v54 = vmax.f32 %v2566_v23, %v9815_v42 }
 0x3e0   : > { %2568 = vmax.xlane.f32.xlu1 %v2567_v54 }
 0x3e1   : > { %v9819_v28 = vpop.f32.mrb[240].mxu0 }
 0x3e2   : > { %12482 = vst [vmem:[#allocation233_spill] sm:$0xff] %v9819_v28  ;;  %v2571_v58 = vmax.f32 %v12483_v24, %v9819_v28  ;;  %v9825_v60 = vpop.f32.mrb[241].mxu0  ;;  %v12489_v24 = vld [vmem:[#allocation193_spill] sm:$0xff]  ;;  %v12490_v28 = vld [vmem:[#allocation194_spill] sm:$0xff] }
 0x3e3   : > { %12484 = vst [vmem:[#allocation234_spill] sm:$0xff] %v9825_v60  ;;  %v9827_v4 = vpop.f32.mrb[242].mxu0  ;;  %v12491_v52 = vmax.f32 %v12489_v24, %v12490_v28 }
 0x3e4   : > { %12485 = vst [vmem:[#allocation235_spill] sm:$0xff] %v9827_v4  ;;  %v2576_v45 = vmax.f32 %v12486_v12, %v9827_v4  ;;  %v9833_v25 = vpop.f32.mrb[243].mxu0  ;;  %v2572_v23 = vmax.f32 %v2571_v58, %v9825_v60  ;;  %v12494_v12 = vld [vmem:[#allocation195_spill] sm:$0xff]  ;;  %v12495_v4 = vld [vmem:[#allocation196_spill] sm:$0xff] }
 0x3e5   : > { %12487 = vst [vmem:[#allocation236_spill] sm:$0xff] %v9833_v25  ;;  %v12496_v57 = vmax.f32 %v12494_v12, %v12495_v4 }
 0x3e6   : > { %2573 = vmax.xlane.f32.xlu0 %v2572_v23  ;;  %v2577_v54 = vmax.f32 %v2576_v45, %v9833_v25 }
 0x3e8   : > { %2578 = vmax.xlane.f32.xlu1 %v2577_v54 }
 0x3e9   : > { %v9837_v42 = vpop.f32.mrb[244].mxu0 }
 0x3ea   : > { %12488 = vst [vmem:[#allocation237_spill] sm:$0xff] %v9837_v42  ;;  %v2581_v35 = vmax.f32 %v12491_v52, %v9837_v42  ;;  %v9843_v29 = vpop.f32.mrb[245].mxu0  ;;  %v12499_v52 = vld [vmem:[#allocation197_spill] sm:$0xff]  ;;  %v12500_v42 = vld [vmem:[#allocation198_spill] sm:$0xff] }
 0x3eb   : > { %12492 = vst [vmem:[#allocation238_spill] sm:$0xff] %v9843_v29  ;;  %v9845_v62 = vpop.f32.mrb[246].mxu0  ;;  %v12501_v28 = vmax.f32 %v12499_v52, %v12500_v42 }
 0x3ec   : > { %12493 = vst [vmem:[#allocation239_spill] sm:$0xff] %v9845_v62  ;;  %v2586_v58 = vmax.f32 %v12496_v57, %v9845_v62  ;;  %v9851_v23 = vpop.f32.mrb[247].mxu0  ;;  %v2582_v45 = vmax.f32 %v2581_v35, %v9843_v29  ;;  %v12504_v57 = vld [vmem:[#allocation199_spill] sm:$0xff]  ;;  %v12505_v62 = vld [vmem:[#allocation200_spill] sm:$0xff] }
 0x3ed   : > { %12497 = vst [vmem:[#allocation240_spill] sm:$0xff] %v9851_v23  ;;  %v12506_v4 = vmax.f32 %v12504_v57, %v12505_v62  ;;  %v12519_v62 = vld [vmem:[#allocation205_spill] sm:$0xff] }
 0x3ee   : > { %2583 = vmax.xlane.f32.xlu0 %v2582_v45  ;;  %v2587_v54 = vmax.f32 %v2586_v58, %v9851_v23 }
 0x3f0   : > { %2588 = vmax.xlane.f32.xlu1 %v2587_v54 }
 0x3f1   : > { %v9855_v25 = vpop.f32.mrb[248].mxu0 }
 0x3f2   : > { %12498 = vst [vmem:[#allocation241_spill] sm:$0xff] %v9855_v25  ;;  %v2591_v24 = vmax.f32 %v12501_v28, %v9855_v25  ;;  %v9861_v60 = vpop.f32.mrb[249].mxu0  ;;  %v12509_v28 = vld [vmem:[#allocation201_spill] sm:$0xff]  ;;  %v12510_v25 = vld [vmem:[#allocation202_spill] sm:$0xff] }
 0x3f3   : > { %12502 = vst [vmem:[#allocation242_spill] sm:$0xff] %v9861_v60  ;;  %v9863_v36 = vpop.f32.mrb[250].mxu0  ;;  %v12511_v42 = vmax.f32 %v12509_v28, %v12510_v25  ;;  %v12517_v25 = vld [vmem:[#allocation153_spill] sm:$0xff] }
 0x3f4   : > { %12503 = vst [vmem:[#allocation243_spill] sm:$0xff] %v9863_v36  ;;  %v2596_v35 = vmax.f32 %v12506_v4, %v9863_v36  ;;  %v9869_v45 = vpop.f32.mrb[251].mxu0  ;;  %v2592_v58 = vmax.f32 %v2591_v24, %v9861_v60  ;;  %v12514_v4 = vld [vmem:[#allocation204_spill] sm:$0xff] }
 0x3f5   : > { %12507 = vst [vmem:[#allocation244_spill] sm:$0xff] %v9869_v45  ;;  %v12515_v36 = vmax.f32 %v9595_v20, %v12514_v4  ;;  %v12520_v4 = vld [vmem:[#allocation206_spill] sm:$0xff] }
 0x3f6   : > { %2593 = vmax.xlane.f32.xlu0 %v2592_v58  ;;  %v2597_v54 = vmax.f32 %v2596_v35, %v9869_v45 }
 0x3f8   : > { %2598 = vmax.xlane.f32.xlu1 %v2597_v54 }
 0x3f9   : > { %v9873_v23 = vpop.f32.mrb[252].mxu0 }
 0x3fa   : > { %12508 = vst [vmem:[#allocation245_spill] sm:$0xff] %v9873_v23  ;;  %v2601_v52 = vmax.f32 %v12511_v42, %v9873_v23  ;;  %v9879_v12 = vpop.f32.mrb[253].mxu0  ;;  %v12518_v23 = vld [vmem:[#allocation155_spill] sm:$0xff] }
 0x3fb   : > { %12512 = vst [vmem:[#allocation246_spill] sm:$0xff] %v9879_v12  ;;  %v9881_v29 = vpop.f32.mrb[254].mxu0 }
 0x3fc   : > { %12513 = vst [vmem:[#allocation247_spill] sm:$0xff] %v9881_v29  ;;  %v2606_v24 = vmax.f32 %v12515_v36, %v9881_v29  ;;  %v9887_v58 = vpop.f32.mrb[255].mxu0  ;;  %v2602_v35 = vmax.f32 %v2601_v52, %v9879_v12 }
 0x3fd   : > { %12516 = vst [vmem:[#allocation248_spill] sm:$0xff] %v9887_v58 }
 0x3fe   : > { %2603 = vmax.xlane.f32.xlu0 %v2602_v35  ;;  %v2607_v54 = vmax.f32 %v2606_v24, %v9887_v58  ;;  %v12521_v35 = vld [vmem:[#allocation207_spill] sm:$0xff] }
 0x400   : > { %2608 = vmax.xlane.f32.xlu1 %v2607_v54 }
 0x413   : > { %v2454_v45 = vpop.xlane.xlu0 %2453 }
 0x414   : > { %v2610_v42 = vsub.f32 %v12517_v25, %v2454_v45  ;;  %v2611_v28 = vsub.f32 %v12518_v23, %v2454_v45  ;;  %v2612_v57 = vsub.f32 %v12519_v62, %v2454_v45  ;;  %v2613_v60 = vsub.f32 %v9609_v51, %v2454_v45 }
 0x417   : > { %v2459_v10 = vpop.xlane.xlu0 %2458 }
 0x418   : > { %v2614_v36 = vsub.f32 %v9362_v22, %v2459_v10  ;;  %v2615_v29 = vsub.f32 %v9366_v50, %v2459_v10  ;;  %v2616_v52 = vsub.f32 %v12520_v4, %v2459_v10  ;;  %v2617_v20 = vsub.f32 %v12521_v35, %v2459_v10  ;;  %v12522_v22 = vld [vmem:[#allocation158_spill] sm:$0xff]  ;;  %v12523_v50 = vld [vmem:[#allocation208_spill] sm:$0xff] }
 0x41a   : > { %v2738_v24 = vpack.c.bf16 %v2614_v36, %v2610_v42  ;;  %v2739_v54 = vpack.c.bf16 %v2615_v29, %v2611_v28  ;;  %v2740_v58 = vpack.c.bf16 %v2616_v52, %v2612_v57  ;;  %v2741_v12 = vpack.c.bf16 %v2617_v20, %v2613_v60 }
 0x41b   : > { %v2464_v25 = vpop.xlane.xlu1 %2463 }
 0x41c   : > { %v2803_v17 = vmul.bf16 1069105081, %v2738_v24  ;;  %v2806_v23 = vmul.bf16 1069105081, %v2739_v54  ;;  %v2809_v5 = vmul.bf16 1069105081, %v2740_v58  ;;  %v2618_v51 = vsub.f32 %v9377_v27, %v2464_v25 }
 0x41d   : > { %v2812_v62 = vmul.bf16 1069105081, %v2741_v12  ;;  %v2619_v45 = vsub.f32 %v12522_v22, %v2464_v25  ;;  %v2620_v19 = vsub.f32 %v12523_v50, %v2464_v25  ;;  %v2621_v20 = vsub.f32 %v9627_v14, %v2464_v25  ;;  %v12524_v12 = vld [vmem:[#allocation209_spill] sm:$0xff]  ;;  %v12525_v24 = vld [vmem:[#allocation160_spill] sm:$0xff]  ;;  %v12526_v54 = vld [vmem:[#allocation162_spill] sm:$0xff] }
 0x41e   : > { %7355 = vpow.bf16 %v2803_v17  ;;  %v12528_v22 = vld [vmem:[#allocation211_spill] sm:$0xff] }
 0x41f   : > { %7357 = vpow.bf16 %v2806_v23  ;;  %v2469_v4 = vpop.xlane.xlu1 %2468  ;;  %v12527_v23 = vld [vmem:[#allocation210_spill] sm:$0xff] }
 0x420   : > { %7359 = vpow.bf16 %v2809_v5  ;;  %v2622_v10 = vsub.f32 %v9385_v18, %v2469_v4  ;;  %v2623_v29 = vsub.f32 %v9389_v41, %v2469_v4  ;;  %v2624_v60 = vsub.f32 %v9629_v59, %v2469_v4 }
 0x421   : > { %7361 = vpow.bf16 %v2812_v62  ;;  %v2625_v17 = vsub.f32 %v12524_v12, %v2469_v4 }
 0x422   : > { %v2742_v57 = vpack.c.bf16 %v2622_v10, %v2618_v51  ;;  %v2743_v28 = vpack.c.bf16 %v2623_v29, %v2619_v45  ;;  %v2744_v27 = vpack.c.bf16 %v2624_v60, %v2620_v19 }
 0x423   : > { %v2745_v58 = vpack.c.bf16 %v2625_v17, %v2621_v20  ;;  %v2474_v42 = vpop.xlane.xlu0 %2473 }
 0x424   : > { %v2815_v36 = vmul.bf16 1069105081, %v2742_v57  ;;  %v2818_v52 = vmul.bf16 1069105081, %v2743_v28  ;;  %v2821_v35 = vmul.bf16 1069105081, %v2744_v27  ;;  %v2626_v18 = vsub.f32 %v12525_v24, %v2474_v42 }
 0x425   : > { %v2824_v5 = vmul.bf16 1069105081, %v2745_v58  ;;  %v2627_v41 = vsub.f32 %v12526_v54, %v2474_v42  ;;  %v2628_v59 = vsub.f32 %v12527_v23, %v2474_v42  ;;  %v2479_v62 = vpop.xlane.xlu1 %2478  ;;  %v2629_v51 = vsub.f32 %v9645_v48, %v2474_v42  ;;  %v12529_v42 = vld [vmem:[#allocation164_spill] sm:$0xff] }
 0x426   : > { %7363 = vpow.bf16 %v2815_v36  ;;  %v2630_v14 = vsub.f32 %v9406_v56, %v2479_v62  ;;  %v2631_v25 = vsub.f32 %v9412_v33, %v2479_v62  ;;  %v2632_v19 = vsub.f32 %v9647_v6, %v2479_v62  ;;  %v12531_v24 = vld [vmem:[#allocation24_spill] sm:$0xff] }
 0x427   : > { %7365 = vpow.bf16 %v2818_v52  ;;  %v2633_v45 = vsub.f32 %v12528_v22, %v2479_v62  ;;  %v12530_v52 = vld [vmem:[#allocation166_spill] sm:$0xff] }
 0x428   : > { %7367 = vpow.bf16 %v2821_v35  ;;  %v2746_v50 = vpack.c.bf16 %v2630_v14, %v2626_v18  ;;  %v2747_v4 = vpack.c.bf16 %v2631_v25, %v2627_v41  ;;  %v2748_v10 = vpack.c.bf16 %v2632_v19, %v2628_v59  ;;  %v12532_v18 = vld [vmem:[#allocation23_spill] sm:$0xff]  ;;  %v12534_v41 = vld [vmem:[#allocation212_spill] sm:$0xff]  ;;  %v12535_v25 = vld [vmem:[#allocation50_spill] sm:$0xff] }
 0x429   : > { %v7356_v29 = vpop.eup %7355  ;;  %7369 = vpow.bf16 %v2824_v5  ;;  %v2749_v60 = vpack.c.bf16 %v2633_v45, %v2629_v51  ;;  %v12533_v54 = vpack.c.bf16 %v12531_v24, %v12532_v18  ;;  %v12536_v19 = vld [vmem:[#allocation49_spill] sm:$0xff] }
 0x42a   : > { %v7358_v20 = vpop.eup %7357  ;;  %v2827_v12 = vmul.bf16 1069105081, %v2746_v50  ;;  %v2830_v17 = vmul.bf16 1069105081, %v2747_v4  ;;  %v2833_v56 = vmul.bf16 1069105081, %v2748_v10  ;;  %v2994_v28 = vunpack.c.l.bf16 %v7356_v29 }
 0x42b   : > { %v7360_v57 = vpop.eup %7359  ;;  %v2836_v33 = vmul.bf16 1069105081, %v2749_v60  ;;  %3314 = vmatprep.mubr.bf16.mxu1 %v7358_v20  ;;  %v2484_v6 = vpop.xlane.xlu0 %2483  ;;  %v2995_v27 = vunpack.c.l.bf16 %v7358_v20  ;;  %v2998_v48 = vunpack.c.h.bf16 %v7356_v29  ;;  %v2999_v5 = vunpack.c.h.bf16 %v7358_v20  ;;  %v12538_v4 = vld [vmem:[#allocation72_spill] sm:$0xff]  ;;  %v12539_v10 = vld [vmem:[#allocation70_spill] sm:$0xff] }
 0x42c   : > { %v7362_v58 = vpop.eup %7361  ;;  %7371 = vpow.bf16 %v2827_v12  ;;  %3315 = vmatmul.mubr.bf16.vlgmr.msra.gmra.mrb[192].mxu1 %v7356_v29  ;;  %v2634_v36 = vsub.f32 %v12529_v42, %v2484_v6  ;;  %v2635_v35 = vsub.f32 %v12530_v52, %v2484_v6  ;;  %v2636_v23 = vsub.f32 %v12534_v41, %v2484_v6 }
 0x42d   : > { %7373 = vpow.bf16 %v2830_v17  ;;  %3475 = vmatprep.mubr.bf16.mxu0 %v7362_v58  ;;  %6653 = vmatpush3.bf16.xpose.msra.mxu1 %v12533_v54  ;;  %v2637_v59 = vsub.f32 %v9663_v31, %v2484_v6  ;;  %v2489_v62 = vpop.xlane.xlu1 %2488  ;;  %v2996_v14 = vunpack.c.l.bf16 %v7360_v57  ;;  %v12537_v51 = vpack.c.bf16 %v12535_v25, %v12536_v19  ;;  %v12541_v31 = vld [vmem:[#allocation213_spill] sm:$0xff]  ;;  %v12542_v17 = vld [vmem:[#allocation106_spill] sm:$0xff] }
 0x42e   : > { %7375 = vpow.bf16 %v2833_v56  ;;  %3476 = vmatmul.mubr.bf16.vlgmr.msra.gmra.mrb[0].mxu0 %v7360_v57  ;;  %v2638_v22 = vsub.f32 %v9429_v26, %v2489_v62  ;;  %v2639_v45 = vsub.f32 %v9435_v61, %v2489_v62  ;;  %v2640_v50 = vsub.f32 %v9665_v49, %v2489_v62  ;;  %v12543_v56 = vld [vmem:[#allocation104_spill] sm:$0xff] }
 0x42f   : > { %6654 = vmatprep.subr.bf16.mxu1 %v12537_v51  ;;  %7377 = vpow.bf16 %v2836_v33  ;;  %v12540_v29 = vpack.c.bf16 %v12538_v4, %v12539_v10  ;;  %v2641_v60 = vsub.f32 %v12541_v31, %v2489_v62  ;;  %v2997_v20 = vunpack.c.l.bf16 %v7362_v58  ;;  %v12550_v4 = vld [vmem:[#allocation214_spill] sm:$0xff] }
 0x430   : > { %v3122_v12 = vadd.f32 %v2995_v27, %v2994_v28  ;;  %v12544_v6 = vpack.c.bf16 %v12542_v17, %v12543_v56  ;;  %v2750_v42 = vpack.c.bf16 %v2638_v22, %v2634_v36  ;;  %v2751_v52 = vpack.c.bf16 %v2639_v45, %v2635_v35  ;;  %v12548_v45 = vld [vmem:[#allocation26_spill] sm:$0xff] }
 0x431   : > { %6701 = vmatpush3.bf16.xpose.msra.mxu0 %v12540_v29  ;;  %v2752_v26 = vpack.c.bf16 %v2640_v50, %v2636_v23  ;;  %v3000_v24 = vunpack.c.h.bf16 %v7360_v57  ;;  %v9935_v61 = vpop.eup %7363  ;;  %v2753_v49 = vpack.c.bf16 %v2641_v60, %v2637_v59  ;;  %v3001_v18 = vunpack.c.h.bf16 %v7362_v58 }
 0x432   : > { %6702 = vmatprep.subr.bf16.mxu0 %v12544_v6  ;;  %v3123_v33 = vadd.f32 %v3122_v12, %v2996_v14  ;;  %v3127_v54 = vadd.f32 %v2999_v5, %v2998_v48  ;;  %v7366_v41 = vpop.eup %7365  ;;  %v2839_v25 = vmul.bf16 1069105081, %v2750_v42  ;;  %v2842_v19 = vmul.bf16 1069105081, %v2751_v52  ;;  %v12545_v48 = vld [vmem:[#allocation168_spill] sm:$0xff]  ;;  %v12546_v5 = vld [vmem:[#allocation170_spill] sm:$0xff] }
 0x433   : > { %v2845_v62 = vmul.bf16 1069105081, %v2752_v26  ;;  %v3002_v28 = vunpack.c.l.bf16 %v9935_v61  ;;  %v9938_v27 = vpop.eup %7367  ;;  %v2848_v51 = vmul.bf16 1069105081, %v2753_v49  ;;  %3322 = vmatprep.mubr.bf16.mxu1 %v7366_v41  ;;  %v2494_v36 = vpop.xlane.xlu0 %2493  ;;  %v3003_v23 = vunpack.c.l.bf16 %v7366_v41  ;;  %v12547_v14 = vld [vmem:[#allocation27_spill] sm:$0xff]  ;;  %v12552_v12 = vld [vmem:[#allocation52_spill] sm:$0xff] }
 0x434   : > { %v9940_v35 = vadd.f32 %v3123_v33, %v2997_v20  ;;  %v3128_v57 = vadd.f32 %v3127_v54, %v3000_v24  ;;  %v9942_v22 = vpop.eup %7369  ;;  %7379 = vpow.bf16 %v2839_v25  ;;  %3323 = vmatmul.mubr.bf16.gmra.mrb[196].mxu1 %v9935_v61  ;;  %v2642_v58 = vsub.f32 %v12545_v48, %v2494_v36  ;;  %v12551_v20 = vld [vmem:[#allocation53_spill] sm:$0xff]  ;;  %v12555_v26 = vld [vmem:[#allocation74_spill] sm:$0xff]  ;;  %v12557_v49 = vld [vmem:[#allocation215_spill] sm:$0xff] }
 0x435   : > { %v2643_v59 = vsub.f32 %v12546_v5, %v2494_v36  ;;  %7381 = vpow.bf16 %v2842_v19  ;;  %3483 = vmatprep.mubr.bf16.mxu0 %v9942_v22  ;;  %v12549_v50 = vpack.c.bf16 %v12547_v14, %v12548_v45  ;;  %v2644_v10 = vsub.f32 %v12550_v4, %v2494_v36  ;;  %v2499_v31 = vpop.xlane.xlu1 %2498  ;;  %v12558_v19 = vld [vmem:[#allocation110_spill] sm:$0xff] }
 0x436   : > { %v2645_v29 = vsub.f32 %v9681_v32, %v2494_v36  ;;  %v9953_v60 = vadd.f32 %v3128_v57, %v3001_v18  ;;  %7383 = vpow.bf16 %v2845_v62  ;;  %3484 = vmatmul.mubr.bf16.gmra.mrb[4].mxu0 %v9938_v27  ;;  %v12553_v17 = vpack.c.bf16 %v12551_v20, %v12552_v12  ;;  %v12554_v32 = vld [vmem:[#allocation76_spill] sm:$0xff]  ;;  %v12562_v12 = vld [vmem:[#allocation173_spill] sm:$0xff] }
 0x437   : > { %6655 = vmatpush3.bf16.xpose.msra.mxu1 %v12549_v50  ;;  %v2646_v56 = vsub.f32 %v9452_v46, %v2499_v31  ;;  %v2647_v6 = vsub.f32 %v9458_v40, %v2499_v31  ;;  %v2648_v42 = vsub.f32 %v9683_v44, %v2499_v31  ;;  %v9962_v52 = vpop.eup %7371  ;;  %7385 = vpow.bf16 %v2848_v51  ;;  %v12559_v46 = vld [vmem:[#allocation108_spill] sm:$0xff] }
 0x438   : > { %6656 = vmatprep.subr.bf16.mxu1 %v12553_v17  ;;  %v12556_v24 = vpack.c.bf16 %v12554_v32, %v12555_v26  ;;  %v2649_v33 = vsub.f32 %v12557_v49, %v2499_v31  ;;  %v3004_v18 = vunpack.c.l.bf16 %v9938_v27  ;;  %v3132_v54 = vadd.f32 %v3003_v23, %v3002_v28  ;;  %v9969_v25 = vpop.eup %7373  ;;  %v12566_v32 = vld [vmem:[#allocation216_spill] sm:$0xff] }
 0x439   : > { %v12560_v62 = vpack.c.bf16 %v12558_v19, %v12559_v46  ;;  %v2754_v40 = vpack.c.bf16 %v2646_v56, %v2642_v58  ;;  %v2755_v44 = vpack.c.bf16 %v2647_v6, %v2643_v59  ;;  %v2756_v36 = vpack.c.bf16 %v2648_v42, %v2644_v10  ;;  %v9975_v57 = vpop.eup %7375  ;;  %3330 = vmatprep.mubr.bf16.mxu1 %v9969_v25  ;;  %v12564_v6 = vld [vmem:[#allocation29_spill] sm:$0xff] }
 0x43a   : > { %6703 = vmatpush3.bf16.xpose.msra.mxu0 %v12556_v24  ;;  %v3006_v51 = vunpack.c.h.bf16 %v9935_v61  ;;  %v2757_v48 = vpack.c.bf16 %v2649_v33, %v2645_v29  ;;  %v3005_v5 = vunpack.c.l.bf16 %v9942_v22  ;;  %v3133_v14 = vadd.f32 %v3132_v54, %v3004_v18  ;;  %v9979_v23 = vpop.eup %7377  ;;  %v12567_v33 = vld [vmem:[#allocation56_spill] sm:$0xff]  ;;  %v12568_v18 = vld [vmem:[#allocation55_spill] sm:$0xff] }
 0x43b   : > { %6704 = vmatprep.subr.bf16.mxu0 %v12560_v62  ;;  %v3007_v28 = vunpack.c.h.bf16 %v7366_v41  ;;  %v2851_v45 = vmul.bf16 1069105081, %v2754_v40  ;;  %v2854_v50 = vmul.bf16 1069105081, %v2755_v44  ;;  %v2857_v4 = vmul.bf16 1069105081, %v2756_v36  ;;  %3491 = vmatprep.mubr.bf16.mxu0 %v9979_v23  ;;  %v2504_v61 = vpop.xlane.xlu0 %2503 }
 0x43c   : > { %v3008_v58 = vunpack.c.h.bf16 %v9938_v27  ;;  %v2860_v59 = vmul.bf16 1069105081, %v2757_v48  ;;  %v9983_v10 = vadd.f32 %v3133_v14, %v3005_v5  ;;  %v3009_v29 = vunpack.c.h.bf16 %v9942_v22  ;;  %3331 = vmatmul.mubr.bf16.gmra.mrb[200].mxu1 %v9962_v52  ;;  %v12561_v41 = vld [vmem:[#allocation172_spill] sm:$0xff]  ;;  %v12563_v27 = vld [vmem:[#allocation30_spill] sm:$0xff]  ;;  %v12573_v5 = vld [vmem:[#allocation217_spill] sm:$0xff] }
 0x43d   : > { %v3137_v31 = vadd.f32 %v3007_v28, %v3006_v51  ;;  %7387 = vpow.bf16 %v2851_v45  ;;  %v2650_v20 = vsub.f32 %v12561_v41, %v2504_v61  ;;  %v2651_v17 = vsub.f32 %v12562_v12, %v2504_v61  ;;  %v2509_v24 = vpop.xlane.xlu1 %2508  ;;  %v12570_v44 = vld [vmem:[#allocation80_spill] sm:$0xff]  ;;  %v12571_v36 = vld [vmem:[#allocation78_spill] sm:$0xff] }
 0x43e   : > { %v3010_v56 = vunpack.c.l.bf16 %v9962_v52  ;;  %7389 = vpow.bf16 %v2854_v50  ;;  %v12565_v42 = vpack.c.bf16 %v12563_v27, %v12564_v6  ;;  %v2652_v26 = vsub.f32 %v12566_v32, %v2504_v61  ;;  %3492 = vmatmul.mubr.bf16.gmra.mrb[8].mxu0 %v9975_v57  ;;  %v12576_v50 = vld [vmem:[#allocation112_spill] sm:$0xff] }
 0x43f   : > { %v3138_v49 = vadd.f32 %v3137_v31, %v3008_v58  ;;  %v3011_v22 = vunpack.c.l.bf16 %v9969_v25  ;;  %7391 = vpow.bf16 %v2857_v4  ;;  %v12569_v54 = vpack.c.bf16 %v12567_v33, %v12568_v18  ;;  %v10002_v40 = vpop.eup %7379  ;;  %v12580_v33 = vld [vmem:[#allocation218_spill] sm:$0xff] }
 0x440   : > { %6657 = vmatpush3.bf16.xpose.msra.mxu1 %v12565_v42  ;;  %v2654_v19 = vsub.f32 %v9475_v15, %v2509_v24  ;;  %v2655_v46 = vsub.f32 %v9479_v8, %v2509_v24  ;;  %v2656_v62 = vsub.f32 %v9701_v38, %v2509_v24  ;;  %7393 = vpow.bf16 %v2860_v59  ;;  %v10011_v45 = vpop.eup %7381  ;;  %v12575_v15 = vld [vmem:[#allocation114_spill] sm:$0xff] }
 0x441   : > { %6658 = vmatprep.subr.bf16.mxu1 %v12569_v54  ;;  %v12572_v51 = vpack.c.bf16 %v12570_v44, %v12571_v36  ;;  %v2653_v48 = vsub.f32 %v9699_v43, %v2504_v61  ;;  %v2657_v14 = vsub.f32 %v12573_v5, %v2509_v24  ;;  %v10009_v28 = vadd.f32 %v3138_v49, %v3009_v29  ;;  %v10017_v31 = vpop.eup %7383  ;;  %v12586_v5 = vld [vmem:[#allocation58_spill] sm:$0xff] }
 0x442   : > { %v12577_v8 = vpack.c.bf16 %v12575_v15, %v12576_v50  ;;  %v2758_v38 = vpack.c.bf16 %v2654_v19, %v2650_v20  ;;  %v2759_v4 = vpack.c.bf16 %v2655_v46, %v2651_v17  ;;  %v2760_v58 = vpack.c.bf16 %v2656_v62, %v2652_v26  ;;  %3338 = vmatprep.mubr.bf16.mxu1 %v10011_v45  ;;  %v10022_v12 = vpop.eup %7385  ;;  %v12581_v19 = vld [vmem:[#allocation33_spill] sm:$0xff]  ;;  %v12582_v46 = vld [vmem:[#allocation32_spill] sm:$0xff] }
 0x443   : > { %6705 = vmatpush3.bf16.xpose.msra.mxu0 %v12572_v51  ;;  %12574 = vst [vmem:[#allocation153_spill] sm:$0xff] %v10009_v28  ;;  %v3012_v59 = vunpack.c.l.bf16 %v9975_v57  ;;  %v2761_v41 = vpack.c.bf16 %v2657_v14, %v2653_v48  ;;  %v3142_v43 = vadd.f32 %v3011_v22, %v3010_v56  ;;  %v3014_v61 = vunpack.c.h.bf16 %v9962_v52  ;;  %3499 = vmatprep.mubr.bf16.mxu0 %v10022_v12  ;;  %v2514_v32 = vpop.xlane.xlu0 %2513  ;;  %v12578_v52 = vld [vmem:[#allocation174_spill] sm:$0xff]  ;;  %v12585_v48 = vld [vmem:[#allocation59_spill] sm:$0xff] }
 0x444   : > { %6706 = vmatprep.subr.bf16.mxu0 %v12577_v8  ;;  %v3015_v29 = vunpack.c.h.bf16 %v9969_v25  ;;  %v2863_v27 = vmul.bf16 1069105081, %v2758_v38  ;;  %v2866_v6 = vmul.bf16 1069105081, %v2759_v4  ;;  %v2869_v42 = vmul.bf16 1069105081, %v2760_v58  ;;  %3339 = vmatmul.mubr.bf16.gmra.mrb[204].mxu1 %v10002_v40 }
 0x445   : > { %v3013_v20 = vunpack.c.l.bf16 %v9979_v23  ;;  %v2872_v17 = vmul.bf16 1069105081, %v2761_v41  ;;  %v3143_v26 = vadd.f32 %v3142_v43, %v3012_v59  ;;  %v3016_v24 = vunpack.c.h.bf16 %v9975_v57  ;;  %v12579_v25 = vld [vmem:[#allocation175_spill] sm:$0xff]  ;;  %v2519_v36 = vpop.xlane.xlu1 %2518  ;;  %v12589_v38 = vld [vmem:[#allocation82_spill] sm:$0xff] }
 0x446   : > { %v3147_v49 = vadd.f32 %v3015_v29, %v3014_v61  ;;  %v2658_v56 = vsub.f32 %v12578_v52, %v2514_v32  ;;  %v2659_v22 = vsub.f32 %v12579_v25, %v2514_v32  ;;  %v2660_v18 = vsub.f32 %v12580_v33, %v2514_v32  ;;  %3500 = vmatmul.mubr.bf16.gmra.mrb[12].mxu0 %v10017_v31  ;;  %v12591_v58 = vld [vmem:[#allocation219_spill] sm:$0xff]  ;;  %v12594_v29 = vld [vmem:[#allocation116_spill] sm:$0xff] }
 0x447   : > { %v3017_v54 = vunpack.c.h.bf16 %v9979_v23  ;;  %7395 = vpow.bf16 %v2866_v6  ;;  %v12583_v62 = vpack.c.bf16 %v12581_v19, %v12582_v46  ;;  %v2661_v44 = vsub.f32 %v9717_v34, %v2514_v32  ;;  %v12588_v34 = vld [vmem:[#allocation84_spill] sm:$0xff] }
 0x448   : > { %v10036_v57 = vadd.f32 %v3143_v26, %v3013_v20  ;;  %v3148_v51 = vadd.f32 %v3147_v49, %v3016_v24  ;;  %7397 = vpow.bf16 %v2863_v27  ;;  %v12587_v14 = vpack.c.bf16 %v12585_v48, %v12586_v5  ;;  %v10045_v8 = vpop.eup %7387  ;;  %v12596_v46 = vld [vmem:[#allocation176_spill] sm:$0xff] }
 0x449   : > { %6659 = vmatpush3.bf16.xpose.msra.mxu1 %v12583_v62  ;;  %v2662_v23 = vsub.f32 %v9487_v39, %v2519_v36  ;;  %v2663_v15 = vsub.f32 %v9491_v30, %v2519_v36  ;;  %v2664_v50 = vsub.f32 %v9719_v2, %v2519_v36  ;;  %7399 = vpow.bf16 %v2872_v17  ;;  %v10054_v61 = vpop.eup %7389  ;;  %v12593_v39 = vld [vmem:[#allocation118_spill] sm:$0xff]  ;;  %v12597_v62 = vld [vmem:[#allocation177_spill] sm:$0xff]  ;;  %v12599_v5 = vld [vmem:[#allocation36_spill] sm:$0xff] }
 0x44a   : > { %12584 = vst [vmem:[#allocation155_spill] sm:$0xff] %v10036_v57  ;;  %6660 = vmatprep.subr.bf16.mxu1 %v12587_v14  ;;  %v12590_v4 = vpack.c.bf16 %v12588_v34, %v12589_v38  ;;  %v2665_v59 = vsub.f32 %v12591_v58, %v2519_v36  ;;  %v10051_v41 = vadd.f32 %v3148_v51, %v3017_v54  ;;  %v3018_v43 = vunpack.c.l.bf16 %v10002_v40  ;;  %v10060_v17 = vpop.eup %7391  ;;  %v12598_v36 = vld [vmem:[#allocation220_spill] sm:$0xff]  ;;  %v12600_v14 = vld [vmem:[#allocation35_spill] sm:$0xff]  ;;  %v12602_v34 = vld [vmem:[#allocation62_spill] sm:$0xff] }
 0x44b   : > { %v12595_v30 = vpack.c.bf16 %v12593_v39, %v12594_v29  ;;  %v2762_v2 = vpack.c.bf16 %v2662_v23, %v2658_v56  ;;  %v2763_v27 = vpack.c.bf16 %v2663_v15, %v2659_v22  ;;  %v2764_v6 = vpack.c.bf16 %v2664_v50, %v2660_v18  ;;  %3346 = vmatprep.mubr.bf16.mxu1 %v10054_v61  ;;  %v10065_v49 = vpop.eup %7393  ;;  %v2524_v54 = vpop.xlane.xlu0 %2523  ;;  %v12603_v38 = vld [vmem:[#allocation61_spill] sm:$0xff]  ;;  %v12606_v39 = vld [vmem:[#allocation86_spill] sm:$0xff] }
 0x44c   : > { %6707 = vmatpush3.bf16.xpose.msra.mxu0 %v12590_v4  ;;  %12592 = vst [vmem:[#allocation205_spill] sm:$0xff] %v10051_v41  ;;  %v3019_v20 = vunpack.c.l.bf16 %v10011_v45  ;;  %7401 = vpow.bf16 %v2869_v42  ;;  %v2765_v32 = vpack.c.bf16 %v2665_v59, %v2661_v44  ;;  %v3020_v26 = vunpack.c.l.bf16 %v10017_v31  ;;  %3507 = vmatprep.mubr.bf16.mxu0 %v10065_v49  ;;  %v12608_v29 = vld [vmem:[#allocation221_spill] sm:$0xff] }
 0x44d   : > { %6708 = vmatprep.subr.bf16.mxu0 %v12595_v30  ;;  %v3022_v24 = vunpack.c.h.bf16 %v10002_v40  ;;  %v2875_v52 = vmul.bf16 1069105081, %v2762_v2  ;;  %v2878_v25 = vmul.bf16 1069105081, %v2763_v27  ;;  %v3021_v56 = vunpack.c.l.bf16 %v10022_v12  ;;  %3347 = vmatmul.mubr.bf16.gmra.mrb[208].mxu1 %v10045_v8 }
 0x44e   : > { %v3152_v22 = vadd.f32 %v3019_v20, %v3018_v43  ;;  %v2881_v33 = vmul.bf16 1069105081, %v2764_v6  ;;  %v2884_v18 = vmul.bf16 1069105081, %v2765_v32  ;;  %v3023_v42 = vunpack.c.h.bf16 %v10011_v45  ;;  %v2529_v45 = vpop.xlane.xlu1 %2528  ;;  %3508 = vmatmul.mubr.bf16.gmra.mrb[16].mxu0 %v10060_v17  ;;  %v12605_v43 = vld [vmem:[#allocation88_spill] sm:$0xff]  ;;  %v12610_v20 = vld [vmem:[#allocation122_spill] sm:$0xff] }
 0x44f   : > { %v3024_v19 = vunpack.c.h.bf16 %v10017_v31  ;;  %v2666_v40 = vsub.f32 %v12596_v46, %v2524_v54  ;;  %v2667_v44 = vsub.f32 %v12597_v62, %v2524_v54  ;;  %v2668_v51 = vsub.f32 %v12598_v36, %v2524_v54  ;;  %v12611_v32 = vld [vmem:[#allocation120_spill] sm:$0xff] }
 0x450   : > { %v3025_v48 = vunpack.c.h.bf16 %v10022_v12  ;;  %7403 = vpow.bf16 %v2878_v25  ;;  %v12601_v23 = vpack.c.bf16 %v12599_v5, %v12600_v14  ;;  %v2669_v15 = vsub.f32 %v9735_v9, %v2524_v54  ;;  %v12615_v14 = vld [vmem:[#allocation179_spill] sm:$0xff] }
 0x451   : > { %v3153_v50 = vadd.f32 %v3152_v22, %v3020_v26  ;;  %v3157_v31 = vadd.f32 %v3023_v42, %v3022_v24  ;;  %7405 = vpow.bf16 %v2875_v52  ;;  %v12604_v4 = vpack.c.bf16 %v12602_v34, %v12603_v38  ;;  %v12619_v34 = vld [vmem:[#allocation222_spill] sm:$0xff] }
 0x452   : > { %6661 = vmatpush3.bf16.xpose.msra.mxu1 %v12601_v23  ;;  %v2670_v58 = vsub.f32 %v9499_v63, %v2529_v45  ;;  %v2671_v12 = vsub.f32 %v9503_v1, %v2529_v45  ;;  %v2672_v59 = vsub.f32 %v9737_v37, %v2529_v45  ;;  %7407 = vpow.bf16 %v2884_v18  ;;  %v10093_v6 = vpop.eup %7395 }
 0x453   : > { %6662 = vmatprep.subr.bf16.mxu1 %v12604_v4  ;;  %v12607_v9 = vpack.c.bf16 %v12605_v43, %v12606_v39  ;;  %v2673_v30 = vsub.f32 %v12608_v29, %v2529_v45  ;;  %v10091_v2 = vadd.f32 %v3153_v50, %v3021_v56  ;;  %v3158_v27 = vadd.f32 %v3157_v31, %v3024_v19  ;;  %v10099_v52 = vpop.eup %7397  ;;  %v2534_v62 = vpop.xlane.xlu0 %2533  ;;  %v12616_v45 = vld [vmem:[#allocation39_spill] sm:$0xff]  ;;  %v12617_v50 = vld [vmem:[#allocation38_spill] sm:$0xff]  ;;  %v12623_v29 = vld [vmem:[#allocation92_spill] sm:$0xff] }
 0x454   : > { %v12612_v26 = vpack.c.bf16 %v12610_v20, %v12611_v32  ;;  %v2766_v63 = vpack.c.bf16 %v2670_v58, %v2666_v40  ;;  %v2767_v1 = vpack.c.bf16 %v2671_v12, %v2667_v44  ;;  %v2768_v24 = vpack.c.bf16 %v2672_v59, %v2668_v51  ;;  %3354 = vmatprep.mubr.bf16.mxu1 %v10093_v6  ;;  %v10105_v18 = vpop.eup %7399  ;;  %v12620_v12 = vld [vmem:[#allocation65_spill] sm:$0xff]  ;;  %v12621_v59 = vld [vmem:[#allocation64_spill] sm:$0xff] }
 0x455   : > { %6709 = vmatpush3.bf16.xpose.msra.mxu0 %v12607_v9  ;;  %12609 = vst [vmem:[#allocation206_spill] sm:$0xff] %v10091_v2  ;;  %v3026_v37 = vunpack.c.l.bf16 %v10045_v8  ;;  %7409 = vpow.bf16 %v2881_v33  ;;  %v2769_v25 = vpack.c.bf16 %v2673_v30, %v2669_v15  ;;  %v10102_v56 = vadd.f32 %v3158_v27, %v3025_v48  ;;  %3515 = vmatprep.mubr.bf16.mxu0 %v10105_v18  ;;  %v12614_v48 = vld [vmem:[#allocation178_spill] sm:$0xff]  ;;  %v2539_v4 = vpop.xlane.xlu1 %2538 }
 0x456   : > { %6710 = vmatprep.subr.bf16.mxu0 %v12612_v26  ;;  %v3027_v22 = vunpack.c.l.bf16 %v10054_v61  ;;  %v2887_v54 = vmul.bf16 1069105081, %v2766_v63  ;;  %v2890_v42 = vmul.bf16 1069105081, %v2767_v1  ;;  %v2893_v19 = vmul.bf16 1069105081, %v2768_v24  ;;  %3355 = vmatmul.mubr.bf16.gmra.mrb[212].mxu1 %v10099_v52 }
 0x457   : > { %12613 = vst [vmem:[#allocation207_spill] sm:$0xff] %v10102_v56  ;;  %v3028_v46 = vunpack.c.l.bf16 %v10060_v17  ;;  %v2896_v40 = vmul.bf16 1069105081, %v2769_v25  ;;  %v3029_v33 = vunpack.c.l.bf16 %v10065_v49  ;;  %v3030_v36 = vunpack.c.h.bf16 %v10045_v8  ;;  %v10111_v51 = vpop.eup %7401  ;;  %v12624_v30 = vld [vmem:[#allocation90_spill] sm:$0xff]  ;;  %v12629_v24 = vld [vmem:[#allocation124_spill] sm:$0xff] }
 0x458   : > { %v3162_v44 = vadd.f32 %v3027_v22, %v3026_v37  ;;  %7411 = vpow.bf16 %v2887_v54  ;;  %v2674_v5 = vsub.f32 %v12614_v48, %v2534_v62  ;;  %v2675_v23 = vsub.f32 %v12615_v14, %v2534_v62  ;;  %3516 = vmatmul.mubr.bf16.gmra.mrb[20].mxu0 %v10111_v51  ;;  %v12628_v1 = vld [vmem:[#allocation126_spill] sm:$0xff] }
 0x459   : > { %v3031_v15 = vunpack.c.h.bf16 %v10054_v61  ;;  %7413 = vpow.bf16 %v2890_v42  ;;  %v12618_v31 = vpack.c.bf16 %v12616_v45, %v12617_v50  ;;  %v2676_v38 = vsub.f32 %v12619_v34, %v2534_v62  ;;  %v12632_v50 = vld [vmem:[#allocation181_spill] sm:$0xff]  ;;  %v12633_v34 = vld [vmem:[#allocation224_spill] sm:$0xff] }
 0x45a   : > { %v2677_v8 = vsub.f32 %v9753_v7, %v2534_v62  ;;  %v3163_v58 = vadd.f32 %v3162_v44, %v3028_v46  ;;  %7415 = vpow.bf16 %v2893_v19  ;;  %v12622_v43 = vpack.c.bf16 %v12620_v12, %v12621_v59  ;;  %v12626_v7 = vld [vmem:[#allocation223_spill] sm:$0xff] }
 0x45b   : > { %6663 = vmatpush3.bf16.xpose.msra.mxu1 %v12618_v31  ;;  %v2678_v61 = vsub.f32 %v9511_v0, %v2539_v4  ;;  %v2679_v39 = vsub.f32 %v9515_v13, %v2539_v4  ;;  %v2680_v9 = vsub.f32 %v9755_v47, %v2539_v4  ;;  %7417 = vpow.bf16 %v2896_v40  ;;  %v10136_v63 = vpop.eup %7403 }
 0x45c   : > { %6664 = vmatprep.subr.bf16.mxu1 %v12622_v43  ;;  %v12625_v27 = vpack.c.bf16 %v12623_v29, %v12624_v30  ;;  %v2681_v20 = vsub.f32 %v12626_v7, %v2539_v4  ;;  %v10133_v32 = vadd.f32 %v3163_v58, %v3029_v33  ;;  %v3032_v26 = vunpack.c.h.bf16 %v10060_v17  ;;  %v10141_v22 = vpop.eup %7405  ;;  %3362 = vmatprep.mubr.bf16.mxu1 %v10136_v63  ;;  %v12634_v4 = vld [vmem:[#allocation42_spill] sm:$0xff]  ;;  %v12635_v58 = vld [vmem:[#allocation41_spill] sm:$0xff]  ;;  %v12639_v29 = vld [vmem:[#allocation67_spill] sm:$0xff] }
 0x45d   : > { %v12630_v0 = vpack.c.bf16 %v12628_v1, %v12629_v24  ;;  %v2770_v13 = vpack.c.bf16 %v2678_v61, %v2674_v5  ;;  %v2771_v37 = vpack.c.bf16 %v2679_v39, %v2675_v23  ;;  %v2772_v47 = vpack.c.bf16 %v2680_v9, %v2676_v38  ;;  %v10147_v46 = vpop.eup %7407  ;;  %v2544_v5 = vpop.xlane.xlu0 %2543  ;;  %v12638_v9 = vld [vmem:[#allocation68_spill] sm:$0xff]  ;;  %v12644_v24 = vld [vmem:[#allocation225_spill] sm:$0xff] }
 0x45e   : > { %6711 = vmatpush3.bf16.xpose.msra.mxu0 %v12625_v27  ;;  %12627 = vst [vmem:[#allocation158_spill] sm:$0xff] %v10133_v32  ;;  %v3167_v25 = vadd.f32 %v3031_v15, %v3030_v36  ;;  %v2773_v54 = vpack.c.bf16 %v2681_v20, %v2677_v8  ;;  %v3033_v42 = vunpack.c.h.bf16 %v10065_v49  ;;  %v3034_v19 = vunpack.c.l.bf16 %v10099_v52  ;;  %3523 = vmatprep.mubr.bf16.mxu0 %v10147_v46  ;;  %v12631_v15 = vld [vmem:[#allocation180_spill] sm:$0xff]  ;;  %v2549_v43 = vpop.xlane.xlu1 %2548 }
 0x45f   : > { %6712 = vmatprep.subr.bf16.mxu0 %v12630_v0  ;;  %v3035_v17 = vunpack.c.l.bf16 %v10093_v6  ;;  %v2899_v40 = vmul.bf16 1069105081, %v2770_v13  ;;  %v2902_v62 = vmul.bf16 1069105081, %v2771_v37  ;;  %v3036_v44 = vunpack.c.l.bf16 %v10111_v51  ;;  %3363 = vmatmul.mubr.bf16.gmra.mrb[216].mxu1 %v10141_v22 }
 0x460   : > { %v3168_v33 = vadd.f32 %v3167_v25, %v3032_v26  ;;  %v2905_v48 = vmul.bf16 1069105081, %v2772_v47  ;;  %v2908_v36 = vmul.bf16 1069105081, %v2773_v54  ;;  %v3037_v14 = vunpack.c.l.bf16 %v10105_v18  ;;  %v10152_v49 = vpop.eup %7409  ;;  %v12642_v26 = vld [vmem:[#allocation94_spill] sm:$0xff] }
 0x461   : > { %v3172_v23 = vadd.f32 %v3035_v17, %v3034_v19  ;;  %v2682_v45 = vsub.f32 %v12631_v15, %v2544_v5  ;;  %v2683_v31 = vsub.f32 %v12632_v50, %v2544_v5  ;;  %v2684_v38 = vsub.f32 %v12633_v34, %v2544_v5  ;;  %3524 = vmatmul.mubr.bf16.gmra.mrb[24].mxu0 %v10152_v49  ;;  %v12650_v34 = vld [vmem:[#allocation183_spill] sm:$0xff] }
 0x462   : > { %v3038_v8 = vunpack.c.h.bf16 %v10099_v52  ;;  %7419 = vpow.bf16 %v2902_v62  ;;  %v12636_v12 = vpack.c.bf16 %v12634_v4, %v12635_v58  ;;  %v2685_v59 = vsub.f32 %v9771_v53, %v2544_v5  ;;  %v12641_v53 = vld [vmem:[#allocation96_spill] sm:$0xff]  ;;  %v12652_v58 = vld [vmem:[#allocation46_spill] sm:$0xff] }
 0x463   : > { %v10163_v61 = vadd.f32 %v3168_v33, %v3033_v42  ;;  %v3173_v39 = vadd.f32 %v3172_v23, %v3036_v44  ;;  %7421 = vpow.bf16 %v2899_v40  ;;  %v12640_v30 = vpack.c.bf16 %v12638_v9, %v12639_v29  ;;  %v10172_v20 = vpop.eup %7411  ;;  %v2554_v15 = vpop.xlane.xlu0 %2553 }
 0x464   : > { %6665 = vmatpush3.bf16.xpose.msra.mxu1 %v12636_v12  ;;  %v2686_v52 = vsub.f32 %v9523_v16, %v2549_v43  ;;  %v2687_v27 = vsub.f32 %v9527_v21, %v2549_v43  ;;  %v2688_v7 = vsub.f32 %v9773_v55, %v2549_v43  ;;  %7423 = vpow.bf16 %v2908_v36  ;;  %v10181_v47 = vpop.eup %7413  ;;  %v12646_v16 = vld [vmem:[#allocation131_spill] sm:$0xff]  ;;  %v12647_v21 = vld [vmem:[#allocation128_spill] sm:$0xff]  ;;  %v12653_v12 = vld [vmem:[#allocation45_spill] sm:$0xff] }
 0x465   : > { %12637 = vst [vmem:[#allocation208_spill] sm:$0xff] %v10163_v61  ;;  %6666 = vmatprep.subr.bf16.mxu1 %v12640_v30  ;;  %v12643_v1 = vpack.c.bf16 %v12641_v53, %v12642_v26  ;;  %v2689_v0 = vsub.f32 %v12644_v24, %v2549_v43  ;;  %v10178_v13 = vadd.f32 %v3173_v39, %v3037_v14  ;;  %v3039_v37 = vunpack.c.h.bf16 %v10093_v6  ;;  %v10186_v19 = vpop.eup %7415  ;;  %v2559_v39 = vpop.xlane.xlu1 %2558  ;;  %v12656_v30 = vld [vmem:[#allocation103_spill] sm:$0xff]  ;;  %v12659_v53 = vld [vmem:[#allocation184_spill] sm:$0xff] }
 0x466   : > { %7425 = vpow.bf16 %v2905_v48  ;;  %v12648_v25 = vpack.c.bf16 %v12646_v16, %v12647_v21  ;;  %v2774_v55 = vpack.c.bf16 %v2686_v52, %v2682_v45  ;;  %v2775_v54 = vpack.c.bf16 %v2687_v27, %v2683_v31  ;;  %3370 = vmatprep.mubr.bf16.mxu1 %v10181_v47  ;;  %v10191_v33 = vpop.eup %7417  ;;  %v12657_v52 = vld [vmem:[#allocation102_spill] sm:$0xff]  ;;  %v12664_v16 = vld [vmem:[#allocation228_spill] sm:$0xff] }
 0x467   : > { %6713 = vmatpush3.bf16.xpose.msra.mxu0 %v12643_v1  ;;  %12645 = vst [vmem:[#allocation209_spill] sm:$0xff] %v10178_v13  ;;  %v2776_v42 = vpack.c.bf16 %v2688_v7, %v2684_v38  ;;  %v2777_v17 = vpack.c.bf16 %v2689_v0, %v2685_v59  ;;  %v3040_v40 = vunpack.c.h.bf16 %v10111_v51  ;;  %v3177_v62 = vadd.f32 %v3039_v37, %v3038_v8  ;;  %v12649_v51 = vld [vmem:[#allocation182_spill] sm:$0xff]  ;;  %v12660_v1 = vld [vmem:[#allocation227_spill] sm:$0xff]  ;;  %v12661_v0 = vld [vmem:[#allocation100_spill] sm:$0xff] }
 0x468   : > { %6714 = vmatprep.subr.bf16.mxu0 %v12648_v25  ;;  %v3042_v6 = vunpack.c.l.bf16 %v10141_v22  ;;  %v2911_v44 = vmul.bf16 1069105081, %v2774_v55  ;;  %v2914_v48 = vmul.bf16 1069105081, %v2775_v54  ;;  %v3041_v36 = vunpack.c.h.bf16 %v10105_v18  ;;  %3531 = vmatprep.mubr.bf16.mxu0 %v10191_v33  ;;  %v12651_v8 = vld [vmem:[#allocation226_spill] sm:$0xff] }
 0x469   : > { %v3043_v5 = vunpack.c.l.bf16 %v10136_v63  ;;  %v2917_v14 = vmul.bf16 1069105081, %v2776_v42  ;;  %v2920_v23 = vmul.bf16 1069105081, %v2777_v17  ;;  %v3178_v45 = vadd.f32 %v3177_v62, %v3040_v40  ;;  %3371 = vmatmul.mubr.bf16.gmra.mrb[220].mxu1 %v10172_v20  ;;  %3532 = vmatmul.mubr.bf16.gmra.mrb[28].mxu0 %v10186_v19  ;;  %v12665_v42 = vld [vmem:[#allocation148_spill] sm:$0xff]  ;;  %v12666_v17 = vld [vmem:[#allocation147_spill] sm:$0xff] }
 0x46a   : > { %v3044_v50 = vunpack.c.l.bf16 %v10152_v49  ;;  %v2690_v31 = vsub.f32 %v12649_v51, %v2554_v15  ;;  %v2691_v38 = vsub.f32 %v12650_v34, %v2554_v15  ;;  %v2692_v4 = vsub.f32 %v12651_v8, %v2554_v15 }
 0x46b   : > { %v3045_v18 = vunpack.c.l.bf16 %v10147_v46  ;;  %7427 = vpow.bf16 %v2914_v48  ;;  %v12654_v59 = vpack.c.bf16 %v12652_v58, %v12653_v12  ;;  %v2693_v43 = vsub.f32 %v9789_v11, %v2554_v15  ;;  %v12662_v11 = vld [vmem:[#allocation98_spill] sm:$0xff]  ;;  %v12671_v12 = vld [vmem:[#allocation229_spill] sm:$0xff] }
 0x46c   : > { %v10206_v9 = vadd.f32 %v3178_v45, %v3041_v36  ;;  %v3182_v29 = vadd.f32 %v3043_v5, %v3042_v6  ;;  %7429 = vpow.bf16 %v2911_v44  ;;  %v12658_v27 = vpack.c.bf16 %v12656_v30, %v12657_v52  ;;  %v12673_v52 = vld [vmem:[#allocation187_spill] sm:$0xff] }
 0x46d   : > { %6667 = vmatpush3.bf16.xpose.msra.mxu1 %v12654_v59  ;;  %v2694_v7 = vsub.f32 %v9535_v3, %v2559_v39  ;;  %v2695_v26 = vsub.f32 %v12659_v53, %v2559_v39  ;;  %v2696_v24 = vsub.f32 %v12660_v1, %v2559_v39  ;;  %7431 = vpow.bf16 %v2920_v23  ;;  %v10220_v54 = vpop.eup %7419 }
 0x46e   : > { %12655 = vst [vmem:[#allocation160_spill] sm:$0xff] %v10206_v9  ;;  %6748 = vmatprep.subr.bf16.mxu1 %v12658_v27  ;;  %v12663_v37 = vpack.c.bf16 %v12661_v0, %v12662_v11  ;;  %v2697_v21 = vsub.f32 %v12664_v16, %v2559_v39  ;;  %v3183_v25 = vadd.f32 %v3182_v29, %v3044_v50  ;;  %v3046_v55 = vunpack.c.h.bf16 %v10141_v22  ;;  %v10226_v48 = vpop.eup %7421  ;;  %v2569_v29 = vpop.xlane.xlu1 %2568  ;;  %v12676_v0 = vld [vmem:[#allocation232_spill] sm:$0xff] }
 0x46f   : > { %v12667_v40 = vpack.c.bf16 %v12665_v42, %v12666_v17  ;;  %v2778_v3 = vpack.c.bf16 %v2694_v7, %v2690_v31  ;;  %v2779_v62 = vpack.c.bf16 %v2695_v26, %v2691_v38  ;;  %v2780_v6 = vpack.c.bf16 %v2696_v24, %v2692_v4  ;;  %3378 = vmatprep.mubr.bf16.mxu1 %v10220_v54  ;;  %v10232_v23 = vpop.eup %7423  ;;  %v12674_v7 = vld [vmem:[#allocation188_spill] sm:$0xff]  ;;  %v12675_v26 = vld [vmem:[#allocation231_spill] sm:$0xff] }
 0x470   : > { %6715 = vmatpush3.bf16.xpose.msra.mxu0 %v12663_v37  ;;  %v3047_v44 = vunpack.c.h.bf16 %v10136_v63  ;;  %7433 = vpow.bf16 %v2917_v14  ;;  %v2781_v36 = vpack.c.bf16 %v2697_v21, %v2693_v43  ;;  %v10229_v5 = vadd.f32 %v3183_v25, %v3045_v18  ;;  %3539 = vmatprep.mubr.bf16.mxu0 %v10232_v23  ;;  %v2564_v14 = vpop.xlane.xlu0 %2563  ;;  %v12670_v18 = vld [vmem:[#allocation186_spill] sm:$0xff] }
 0x471   : > { %6860 = vmatprep.subr.bf16.mxu0 %v12667_v40  ;;  %v3048_v22 = vunpack.c.h.bf16 %v10152_v49  ;;  %v2923_v15 = vmul.bf16 1069105081, %v2778_v3  ;;  %v2926_v45 = vmul.bf16 1069105081, %v2779_v62  ;;  %v3049_v50 = vunpack.c.h.bf16 %v10147_v46  ;;  %v10235_v31 = vpop.eup %7425  ;;  %3379 = vmatmul.mubr.bf16.gmra.mrb[224].mxu1 %v10226_v48  ;;  %v12669_v49 = vld [vmem:[#allocation185_spill] sm:$0xff]  ;;  %v12672_v43 = vld [vmem:[#allocation230_spill] sm:$0xff] }
 0x472   : > { %12668 = vst [vmem:[#allocation162_spill] sm:$0xff] %v10229_v5  ;;  %v3187_v51 = vadd.f32 %v3047_v44, %v3046_v55  ;;  %v2929_v63 = vmul.bf16 1069105081, %v2780_v6  ;;  %v2932_v34 = vmul.bf16 1069105081, %v2781_v36  ;;  %v3050_v38 = vunpack.c.l.bf16 %v10172_v20  ;;  %3540 = vmatmul.mubr.bf16.gmra.mrb[32].mxu0 %v10235_v31 }
 0x473   : > { %v3051_v8 = vunpack.c.l.bf16 %v10181_v47  ;;  %7435 = vpow.bf16 %v2923_v15  ;;  %v2698_v4 = vsub.f32 %v12669_v49, %v2564_v14  ;;  %v2699_v58 = vsub.f32 %v12670_v18, %v2564_v14 }
 0x474   : > { %v3052_v46 = vunpack.c.l.bf16 %v10186_v19  ;;  %7437 = vpow.bf16 %v2926_v45  ;;  %v2700_v59 = vsub.f32 %v12671_v12, %v2564_v14  ;;  %v2701_v39 = vsub.f32 %v12672_v43, %v2564_v14  ;;  %v12683_v43 = vld [vmem:[#allocation192_spill] sm:$0xff] }
 0x475   : > { %v3188_v30 = vadd.f32 %v3187_v51, %v3048_v22  ;;  %v2702_v27 = vsub.f32 %v12673_v52, %v2569_v29  ;;  %v2703_v53 = vsub.f32 %v12674_v7, %v2569_v29  ;;  %v2704_v1 = vsub.f32 %v12675_v26, %v2569_v29 }
 0x476   : > { %v3053_v24 = vunpack.c.l.bf16 %v10191_v33  ;;  %7439 = vpow.bf16 %v2932_v34  ;;  %v2705_v11 = vsub.f32 %v12676_v0, %v2569_v29  ;;  %v3192_v16 = vadd.f32 %v3051_v8, %v3050_v38  ;;  %v10254_v21 = vpop.eup %7427  ;;  %v12680_v8 = vld [vmem:[#allocation190_spill] sm:$0xff]  ;;  %v12684_v29 = vld [vmem:[#allocation235_spill] sm:$0xff] }
 0x477   : > { %v10252_v37 = vadd.f32 %v3188_v30, %v3049_v50  ;;  %v2782_v25 = vpack.c.bf16 %v2702_v27, %v2698_v4  ;;  %v2783_v55 = vpack.c.bf16 %v2703_v53, %v2699_v58  ;;  %v2784_v42 = vpack.c.bf16 %v2704_v1, %v2700_v59  ;;  %v10257_v40 = vpop.eup %7429  ;;  %3386 = vmatprep.mubr.bf16.mxu1 %v10254_v21  ;;  %v12681_v4 = vld [vmem:[#allocation233_spill] sm:$0xff]  ;;  %v2579_v58 = vpop.xlane.xlu1 %2578  ;;  %v12685_v27 = vld [vmem:[#allocation234_spill] sm:$0xff]  ;;  %v12686_v53 = vld [vmem:[#allocation236_spill] sm:$0xff] }
 0x478   : > { %v3054_v17 = vunpack.c.h.bf16 %v10172_v20  ;;  %7441 = vpow.bf16 %v2929_v63  ;;  %v2785_v3 = vpack.c.bf16 %v2705_v11, %v2701_v39  ;;  %v3193_v62 = vadd.f32 %v3192_v16, %v3052_v46  ;;  %v10261_v44 = vpop.eup %7431  ;;  %v2574_v20 = vpop.xlane.xlu0 %2573 }
 0x479   : > { %12677 = vst [vmem:[#allocation210_spill] sm:$0xff] %v10252_v37  ;;  %v3055_v6 = vunpack.c.h.bf16 %v10181_v47  ;;  %v2935_v36 = vmul.bf16 1069105081, %v2782_v25  ;;  %v2938_v22 = vmul.bf16 1069105081, %v2783_v55  ;;  %v3056_v45 = vunpack.c.h.bf16 %v10186_v19  ;;  %3547 = vmatprep.mubr.bf16.mxu0 %v10261_v44  ;;  %3387 = vmatmul.mubr.bf16.gmra.mrb[228].mxu1 %v10257_v40  ;;  %v12679_v47 = vld [vmem:[#allocation189_spill] sm:$0xff] }
 0x47a   : > { %v2941_v15 = vmul.bf16 1069105081, %v2784_v42  ;;  %v2944_v50 = vmul.bf16 1069105081, %v2785_v3  ;;  %v10265_v51 = vadd.f32 %v3193_v62, %v3053_v24  ;;  %v3057_v63 = vunpack.c.h.bf16 %v10191_v33  ;;  %v12682_v33 = vld [vmem:[#allocation191_spill] sm:$0xff] }
 0x47b   : > { %v3197_v34 = vadd.f32 %v3055_v6, %v3054_v17  ;;  %v10268_v14 = vpop.eup %7433  ;;  %7443 = vpow.bf16 %v2935_v36  ;;  %v2706_v38 = vsub.f32 %v12679_v47, %v2574_v20  ;;  %v2707_v49 = vsub.f32 %v12680_v8, %v2574_v20 }
 0x47c   : > { %12678 = vst [vmem:[#allocation211_spill] sm:$0xff] %v10265_v51  ;;  %v3058_v19 = vunpack.c.l.bf16 %v10226_v48  ;;  %7445 = vpow.bf16 %v2938_v22  ;;  %v2708_v18 = vsub.f32 %v12681_v4, %v2574_v20  ;;  %v3059_v12 = vunpack.c.l.bf16 %v10220_v54  ;;  %3548 = vmatmul.mubr.bf16.gmra.mrb[36].mxu0 %v10268_v14 }
 0x47d   : > { %v3198_v46 = vadd.f32 %v3197_v34, %v3056_v45  ;;  %7447 = vpow.bf16 %v2941_v15  ;;  %v2710_v59 = vsub.f32 %v12682_v33, %v2579_v58  ;;  %v2711_v39 = vsub.f32 %v12683_v43, %v2579_v58  ;;  %v12693_v33 = vld [vmem:[#allocation195_spill] sm:$0xff]  ;;  %v12694_v43 = vld [vmem:[#allocation196_spill] sm:$0xff] }
 0x47e   : > { %v2712_v30 = vsub.f32 %v12684_v29, %v2579_v58  ;;  %v10280_v52 = vpop.eup %7435  ;;  %7449 = vpow.bf16 %v2944_v50  ;;  %v2709_v7 = vsub.f32 %v12685_v27, %v2574_v20  ;;  %v2713_v26 = vsub.f32 %v12686_v53, %v2579_v58  ;;  %v2584_v50 = vpop.xlane.xlu0 %2583  ;;  %v12695_v29 = vld [vmem:[#allocation239_spill] sm:$0xff] }
 0x47f   : > { %v10284_v1 = vadd.f32 %v3198_v46, %v3057_v63  ;;  %v10286_v24 = vpop.eup %7437  ;;  %v2786_v0 = vpack.c.bf16 %v2710_v59, %v2706_v38  ;;  %v2787_v11 = vpack.c.bf16 %v2711_v39, %v2707_v49  ;;  %v3060_v25 = vunpack.c.l.bf16 %v10235_v31  ;;  %v12689_v38 = vld [vmem:[#allocation194_spill] sm:$0xff] }
 0x480   : > { %v2788_v16 = vpack.c.bf16 %v2712_v30, %v2708_v18  ;;  %v2789_v55 = vpack.c.bf16 %v2713_v26, %v2709_v7  ;;  %3394 = vmatprep.mubr.bf16.mxu1 %v10286_v24  ;;  %v3202_v42 = vadd.f32 %v3059_v12, %v3058_v19  ;;  %v3062_v17 = vunpack.c.h.bf16 %v10226_v48  ;;  %v12690_v19 = vld [vmem:[#allocation237_spill] sm:$0xff]  ;;  %v2589_v18 = vpop.xlane.xlu1 %2588 }
 0x481   : > { %12687 = vst [vmem:[#allocation164_spill] sm:$0xff] %v10284_v1  ;;  %v3063_v3 = vunpack.c.h.bf16 %v10220_v54  ;;  %v10292_v62 = vpop.eup %7439  ;;  %v2947_v6 = vmul.bf16 1069105081, %v2786_v0  ;;  %v2950_v36 = vmul.bf16 1069105081, %v2787_v11  ;;  %v3061_v15 = vunpack.c.l.bf16 %v10232_v23  ;;  %3395 = vmatmul.mubr.bf16.gmra.mrb[232].mxu1 %v10280_v52  ;;  %v12688_v54 = vld [vmem:[#allocation193_spill] sm:$0xff] }
 0x482   : > { %v2953_v22 = vmul.bf16 1069105081, %v2788_v16  ;;  %v2956_v45 = vmul.bf16 1069105081, %v2789_v55  ;;  %3555 = vmatprep.mubr.bf16.mxu0 %v10292_v62  ;;  %v3203_v20 = vadd.f32 %v3202_v42, %v3060_v25  ;;  %v3064_v63 = vunpack.c.h.bf16 %v10235_v31  ;;  %v12692_v31 = vld [vmem:[#allocation238_spill] sm:$0xff] }
 0x483   : > { %v3207_v34 = vadd.f32 %v3063_v3, %v3062_v17  ;;  %v10297_v47 = vpop.eup %7441  ;;  %7451 = vpow.bf16 %v2947_v6  ;;  %v2714_v48 = vsub.f32 %v12688_v54, %v2584_v50  ;;  %v2715_v8 = vsub.f32 %v12689_v38, %v2584_v50  ;;  %v2594_v54 = vpop.xlane.xlu0 %2593 }
 0x484   : > { %v3065_v49 = vunpack.c.h.bf16 %v10232_v23  ;;  %7453 = vpow.bf16 %v2950_v36  ;;  %v2716_v4 = vsub.f32 %v12690_v19, %v2584_v50  ;;  %v10304_v58 = vadd.f32 %v3203_v20, %v3061_v15  ;;  %3556 = vmatmul.mubr.bf16.gmra.mrb[40].mxu0 %v10297_v47  ;;  %v12696_v23 = vld [vmem:[#allocation240_spill] sm:$0xff] }
 0x485   : > { %v3208_v46 = vadd.f32 %v3207_v34, %v3064_v63  ;;  %v2717_v12 = vsub.f32 %v12692_v31, %v2584_v50  ;;  %v2718_v59 = vsub.f32 %v12693_v33, %v2589_v18  ;;  %v2719_v39 = vsub.f32 %v12694_v43, %v2589_v18  ;;  %v12703_v43 = vld [vmem:[#allocation200_spill] sm:$0xff] }
 0x486   : > { %12691 = vst [vmem:[#allocation166_spill] sm:$0xff] %v10304_v58  ;;  %v2720_v30 = vsub.f32 %v12695_v29, %v2589_v18  ;;  %v10311_v27 = vpop.eup %7443  ;;  %7455 = vpow.bf16 %v2956_v45  ;;  %v2721_v7 = vsub.f32 %v12696_v23, %v2589_v18  ;;  %v3066_v26 = vunpack.c.l.bf16 %v10257_v40  ;;  %v12704_v29 = vld [vmem:[#allocation243_spill] sm:$0xff] }
 0x487   : > { %v10314_v53 = vadd.f32 %v3208_v46, %v3065_v49  ;;  %v10317_v0 = vpop.eup %7445  ;;  %v2790_v11 = vpack.c.bf16 %v2718_v59, %v2714_v48  ;;  %v2791_v16 = vpack.c.bf16 %v2719_v39, %v2715_v8  ;;  %v3067_v55 = vunpack.c.l.bf16 %v10254_v21  ;;  %v12699_v8 = vld [vmem:[#allocation198_spill] sm:$0xff]  ;;  %v2599_v46 = vpop.xlane.xlu1 %2598 }
 0x488   : > { %v2792_v25 = vpack.c.bf16 %v2720_v30, %v2716_v4  ;;  %v10320_v42 = vpop.eup %7447  ;;  %7457 = vpow.bf16 %v2953_v22  ;;  %v2793_v17 = vpack.c.bf16 %v2721_v7, %v2717_v12  ;;  %3402 = vmatprep.mubr.bf16.mxu1 %v10317_v0  ;;  %v3068_v3 = vunpack.c.l.bf16 %v10268_v14  ;;  %v12700_v4 = vld [vmem:[#allocation241_spill] sm:$0xff] }
 0x489   : > { %12697 = vst [vmem:[#allocation24_spill] sm:$0xff] %v10314_v53  ;;  %v3070_v6 = vunpack.c.h.bf16 %v10257_v40  ;;  %v10325_v36 = vpop.eup %7449  ;;  %v2959_v15 = vmul.bf16 1069105081, %v2790_v11  ;;  %v2962_v45 = vmul.bf16 1069105081, %v2791_v16  ;;  %v3069_v50 = vunpack.c.l.bf16 %v10261_v44  ;;  %3403 = vmatmul.mubr.bf16.gmra.mrb[236].mxu1 %v10311_v27  ;;  %v12698_v40 = vld [vmem:[#allocation197_spill] sm:$0xff] }
 0x48a   : > { %v3212_v20 = vadd.f32 %v3067_v55, %v3066_v26  ;;  %v2965_v63 = vmul.bf16 1069105081, %v2792_v25  ;;  %v2968_v34 = vmul.bf16 1069105081, %v2793_v17  ;;  %3563 = vmatprep.mubr.bf16.mxu0 %v10325_v36  ;;  %v3071_v22 = vunpack.c.h.bf16 %v10254_v21  ;;  %v12701_v21 = vld [vmem:[#allocation242_spill] sm:$0xff] }
 0x48b   : > { %v3072_v48 = vunpack.c.h.bf16 %v10268_v14  ;;  %7459 = vpow.bf16 %v2959_v15  ;;  %v2722_v38 = vsub.f32 %v12698_v40, %v2594_v54  ;;  %v2723_v49 = vsub.f32 %v12699_v8, %v2594_v54  ;;  %v12702_v14 = vld [vmem:[#allocation199_spill] sm:$0xff]  ;;  %v2604_v40 = vpop.xlane.xlu0 %2603 }
 0x48c   : > { %v3073_v19 = vunpack.c.h.bf16 %v10261_v44  ;;  %7461 = vpow.bf16 %v2962_v45  ;;  %v2724_v18 = vsub.f32 %v12700_v4, %v2594_v54  ;;  %v3213_v31 = vadd.f32 %v3212_v20, %v3068_v3  ;;  %3564 = vmatmul.mubr.bf16.gmra.mrb[44].mxu0 %v10320_v42  ;;  %v12705_v44 = vld [vmem:[#allocation244_spill] sm:$0xff] }
 0x48d   : > { %v3217_v12 = vadd.f32 %v3071_v22, %v3070_v6  ;;  %v2725_v33 = vsub.f32 %v12701_v21, %v2594_v54  ;;  %v2726_v59 = vsub.f32 %v12702_v14, %v2599_v46  ;;  %v2727_v39 = vsub.f32 %v12703_v43, %v2599_v46 }
 0x48e   : > { %v2728_v30 = vsub.f32 %v12704_v29, %v2599_v46  ;;  %v10341_v23 = vpop.eup %7451  ;;  %7463 = vpow.bf16 %v2968_v34  ;;  %v2729_v7 = vsub.f32 %v12705_v44, %v2599_v46  ;;  %v10344_v26 = vadd.f32 %v3213_v31, %v3069_v50  ;;  %v12713_v29 = vld [vmem:[#allocation204_spill] sm:$0xff]  ;;  %v12714_v44 = vld [vmem:[#allocation247_spill] sm:$0xff] }
 0x48f   : > { %v3218_v11 = vadd.f32 %v3217_v12, %v3072_v48  ;;  %v10346_v16 = vpop.eup %7453  ;;  %v2794_v25 = vpack.c.bf16 %v2726_v59, %v2722_v38  ;;  %v2795_v55 = vpack.c.bf16 %v2727_v39, %v2723_v49  ;;  %v3074_v3 = vunpack.c.l.bf16 %v10280_v52  ;;  %v12710_v12 = vld [vmem:[#allocation245_spill] sm:$0xff]  ;;  %v2609_v59 = vpop.xlane.xlu1 %2608 }
 0x490   : > { %12706 = vst [vmem:[#allocation23_spill] sm:$0xff] %v10344_v26  ;;  %v2796_v17 = vpack.c.bf16 %v2728_v30, %v2724_v18  ;;  %7465 = vpow.bf16 %v2965_v63  ;;  %v2797_v6 = vpack.c.bf16 %v2729_v7, %v2725_v33  ;;  %3410 = vmatprep.mubr.bf16.mxu1 %v10346_v16  ;;  %v3075_v45 = vunpack.c.l.bf16 %v10286_v24  ;;  %v12709_v18 = vld [vmem:[#allocation202_spill] sm:$0xff] }
 0x491   : > { %v10350_v15 = vadd.f32 %v3218_v11, %v3073_v19  ;;  %v10353_v20 = vpop.eup %7455  ;;  %v2971_v50 = vmul.bf16 1069105081, %v2794_v25  ;;  %v2974_v34 = vmul.bf16 1069105081, %v2795_v55  ;;  %v3076_v22 = vunpack.c.l.bf16 %v10297_v47  ;;  %3411 = vmatmul.mubr.bf16.gmra.mrb[240].mxu1 %v10341_v23  ;;  %v12708_v19 = vld [vmem:[#allocation201_spill] sm:$0xff]  ;;  %v12711_v33 = vld [vmem:[#allocation246_spill] sm:$0xff] }
 0x492   : > { %v2977_v54 = vmul.bf16 1069105081, %v2796_v17  ;;  %v2980_v48 = vmul.bf16 1069105081, %v2797_v6  ;;  %3571 = vmatprep.mubr.bf16.mxu0 %v10353_v20  ;;  %v3077_v63 = vunpack.c.l.bf16 %v10292_v62  ;;  %v3222_v38 = vadd.f32 %v3075_v45, %v3074_v3 }
 0x493   : > { %12707 = vst [vmem:[#allocation212_spill] sm:$0xff] %v10350_v15  ;;  %v3078_v8 = vunpack.c.h.bf16 %v10280_v52  ;;  %v10359_v49 = vpop.eup %7457  ;;  %7467 = vpow.bf16 %v2971_v50  ;;  %v2730_v4 = vsub.f32 %v12708_v19, %v2604_v40  ;;  %v2731_v46 = vsub.f32 %v12709_v18, %v2604_v40  ;;  %v12712_v52 = vld [vmem:[#allocation203_spill] sm:$0xff] }
 0x494   : > { %v3079_v31 = vunpack.c.h.bf16 %v10286_v24  ;;  %7469 = vpow.bf16 %v2974_v34  ;;  %v2732_v21 = vsub.f32 %v12710_v12, %v2604_v40  ;;  %v2733_v14 = vsub.f32 %v12711_v33, %v2604_v40  ;;  %3572 = vmatmul.mubr.bf16.gmra.mrb[48].mxu0 %v10359_v49  ;;  %v12715_v24 = vld [vmem:[#allocation248_spill] sm:$0xff] }
 0x495   : > { %v3223_v43 = vadd.f32 %v3222_v38, %v3076_v22  ;;  %7471 = vpow.bf16 %v2977_v54  ;;  %v2734_v39 = vsub.f32 %v12712_v52, %v2609_v59  ;;  %v2735_v30 = vsub.f32 %v12713_v29, %v2609_v59 }
 0x496   : > { %v2736_v7 = vsub.f32 %v12714_v44, %v2609_v59  ;;  %v10371_v11 = vpop.eup %7459  ;;  %7473 = vpow.bf16 %v2980_v48  ;;  %v2737_v25 = vsub.f32 %v12715_v24, %v2609_v59  ;;  %v3080_v17 = vunpack.c.h.bf16 %v10297_v47 }
 0x497   : > { %v10374_v55 = vadd.f32 %v3223_v43, %v3077_v63  ;;  %v10377_v3 = vpop.eup %7461  ;;  %v2798_v6 = vpack.c.bf16 %v2734_v39, %v2730_v4  ;;  %v2799_v45 = vpack.c.bf16 %v2735_v30, %v2731_v46  ;;  %v3227_v34 = vadd.f32 %v3079_v31, %v3078_v8 }
 0x498   : > { %v2800_v50 = vpack.c.bf16 %v2736_v7, %v2732_v21  ;;  %v2801_v54 = vpack.c.bf16 %v2737_v25, %v2733_v14  ;;  %3418 = vmatprep.mubr.bf16.mxu1 %v10377_v3  ;;  %v3081_v22 = vunpack.c.h.bf16 %v10292_v62  ;;  %v3082_v40 = vunpack.c.l.bf16 %v10311_v27 }
 0x499   : > { %12716 = vst [vmem:[#allocation50_spill] sm:$0xff] %v10374_v55  ;;  %v3083_v48 = vunpack.c.l.bf16 %v10317_v0  ;;  %v10383_v38 = vpop.eup %7463  ;;  %v2983_v63 = vmul.bf16 1069105081, %v2798_v6  ;;  %v2986_v19 = vmul.bf16 1069105081, %v2799_v45  ;;  %v3228_v18 = vadd.f32 %v3227_v34, %v3080_v17  ;;  %3419 = vmatmul.mubr.bf16.gmra.mrb[244].mxu1 %v10371_v11 }
 0x49a   : > { %v2989_v47 = vmul.bf16 1069105081, %v2800_v50  ;;  %v2992_v12 = vmul.bf16 1069105081, %v2801_v54  ;;  %3579 = vmatprep.mubr.bf16.mxu0 %v10383_v38  ;;  %v3084_v8 = vunpack.c.l.bf16 %v10320_v42  ;;  %v3086_v46 = vunpack.c.h.bf16 %v10311_v27 }
 0x49b   : > { %v3232_v4 = vadd.f32 %v3083_v48, %v3082_v40  ;;  %v7466_v31 = vpop.eup %7465  ;;  %7475 = vpow.bf16 %v2983_v63  ;;  %v10389_v62 = vadd.f32 %v3228_v18, %v3081_v22  ;;  %v3085_v21 = vunpack.c.l.bf16 %v10325_v36 }
 0x49c   : > { %v3087_v33 = vunpack.c.h.bf16 %v10317_v0  ;;  %7477 = vpow.bf16 %v2986_v19  ;;  %v3088_v59 = vunpack.c.h.bf16 %v10320_v42  ;;  %v3090_v43 = vunpack.c.l.bf16 %v10341_v23  ;;  %3580 = vmatmul.mubr.bf16.gmra.mrb[52].mxu0 %v7466_v31 }
 0x49d   : > { %12717 = vst [vmem:[#allocation49_spill] sm:$0xff] %v10389_v62  ;;  %v3233_v14 = vadd.f32 %v3232_v4, %v3084_v8  ;;  %7479 = vpow.bf16 %v2989_v47  ;;  %v3089_v27 = vunpack.c.h.bf16 %v10325_v36  ;;  %v3091_v39 = vunpack.c.l.bf16 %v10346_v16 }
 0x49e   : > { %v3237_v52 = vadd.f32 %v3087_v33, %v3086_v46  ;;  %v7468_v29 = vpop.eup %7467  ;;  %7481 = vpow.bf16 %v2992_v12  ;;  %v3092_v44 = vunpack.c.l.bf16 %v10359_v49  ;;  %v3094_v0 = vunpack.c.h.bf16 %v10341_v23 }
 0x49f   : > { %v10397_v30 = vadd.f32 %v3233_v14, %v3085_v21  ;;  %v7470_v7 = vpop.eup %7469  ;;  %v3093_v42 = vunpack.c.l.bf16 %v10353_v20  ;;  %v3242_v25 = vadd.f32 %v3091_v39, %v3090_v43  ;;  %v3095_v17 = vunpack.c.h.bf16 %v10346_v16 }
 0x4a0   : > { %v3238_v24 = vadd.f32 %v3237_v52, %v3088_v59  ;;  %v7472_v6 = vpop.eup %7471  ;;  %3426 = vmatprep.mubr.bf16.mxu1 %v7470_v7  ;;  %v3096_v36 = vunpack.c.h.bf16 %v10359_v49  ;;  %v3097_v45 = vunpack.c.h.bf16 %v10353_v20  ;;  %v3098_v50 = vunpack.c.l.bf16 %v10371_v11 }
 0x4a1   : > { %12718 = vst [vmem:[#allocation72_spill] sm:$0xff] %v10397_v30  ;;  %v3099_v34 = vunpack.c.l.bf16 %v10377_v3  ;;  %v7474_v54 = vpop.eup %7473  ;;  %v3243_v23 = vadd.f32 %v3242_v25, %v3092_v44  ;;  %v3247_v40 = vadd.f32 %v3095_v17, %v3094_v0  ;;  %v3100_v48 = vunpack.c.l.bf16 %v7466_v31  ;;  %3427 = vmatmul.mubr.bf16.gmra.mrb[248].mxu1 %v7468_v29 }
 0x4a2   : > { %v10407_v22 = vadd.f32 %v3238_v24, %v3089_v27  ;;  %3587 = vmatprep.mubr.bf16.mxu0 %v7474_v54  ;;  %v3101_v63 = vunpack.c.l.bf16 %v10383_v38  ;;  %v3102_v19 = vunpack.c.h.bf16 %v10371_v11  ;;  %v3103_v49 = vunpack.c.h.bf16 %v10377_v3 }
 0x4a3   : > { %v3252_v16 = vadd.f32 %v3099_v34, %v3098_v50  ;;  %v10412_v20 = vadd.f32 %v3243_v23, %v3093_v42  ;;  %v3248_v47 = vadd.f32 %v3247_v40, %v3096_v36  ;;  %v3104_v18 = vunpack.c.h.bf16 %v7466_v31 }
 0x4a4   : > { %12719 = vst [vmem:[#allocation70_spill] sm:$0xff] %v10407_v22  ;;  %v3106_v12 = vunpack.c.l.bf16 %v7468_v29  ;;  %v3105_v4 = vunpack.c.h.bf16 %v10383_v38  ;;  %v3257_v46 = vadd.f32 %v3103_v49, %v3102_v19  ;;  %v3107_v21 = vunpack.c.l.bf16 %v7470_v7  ;;  %3588 = vmatmul.mubr.bf16.gmra.mrb[56].mxu0 %v7472_v6 }
 0x4a5   : > { %12720 = vst [vmem:[#allocation213_spill] sm:$0xff] %v10412_v20  ;;  %v3253_v8 = vadd.f32 %v3252_v16, %v3100_v48  ;;  %v10415_v33 = vadd.f32 %v3248_v47, %v3097_v45  ;;  %v3108_v14 = vunpack.c.l.bf16 %v7472_v6  ;;  %v3110_v59 = vunpack.c.h.bf16 %v7468_v29  ;;  %v12726_v16 = vld [vmem:[#allocation25_spill] sm:$0xff] }
 0x4a6   : > { %v3111_v43 = vunpack.c.h.bf16 %v7470_v7  ;;  %v7476_v11 = vpop.eup %7475  ;;  %v3258_v3 = vadd.f32 %v3257_v46, %v3104_v18  ;;  %v3109_v52 = vunpack.c.l.bf16 %v7474_v54  ;;  %v3262_v39 = vadd.f32 %v3107_v21, %v3106_v12  ;;  %v12732_v21 = vld [vmem:[#allocation28_spill] sm:$0xff] }
 0x4a7   : > { %12721 = vst [vmem:[#allocation106_spill] sm:$0xff] %v10415_v33  ;;  %v10417_v27 = vadd.f32 %v3253_v8, %v3101_v63  ;;  %v7478_v44 = vpop.eup %7477  ;;  %v3112_v31 = vunpack.c.h.bf16 %v7472_v6  ;;  %v3118_v24 = vunpack.c.h.bf16 %v7476_v11  ;;  %v3114_v42 = vunpack.c.l.bf16 %v7476_v11  ;;  %v12729_v8 = vld [vmem:[#allocation73_spill] sm:$0xff] }
 0x4a8   : > { %v3267_v0 = vadd.f32 %v3111_v43, %v3110_v59  ;;  %v7480_v38 = vpop.eup %7479  ;;  %3434 = vmatprep.mubr.bf16.mxu1 %v7478_v44  ;;  %v10419_v25 = vadd.f32 %v3258_v3, %v3105_v4  ;;  %v3263_v17 = vadd.f32 %v3262_v39, %v3108_v14  ;;  %v3119_v36 = vunpack.c.h.bf16 %v7478_v44  ;;  %v12730_v4 = vld [vmem:[#allocation71_spill] sm:$0xff]  ;;  %v12734_v59 = vld [vmem:[#allocation105_spill] sm:$0xff]  ;;  %v12737_v3 = vld [vmem:[#allocation132_spill] sm:$0xff] }
 0x4a9   : > { %12722 = vst [vmem:[#allocation104_spill] sm:$0xff] %v10417_v27  ;;  %v3115_v45 = vunpack.c.l.bf16 %v7478_v44  ;;  %v7482_v29 = vpop.eup %7481  ;;  %v3113_v7 = vunpack.c.h.bf16 %v7474_v54  ;;  %v3120_v23 = vunpack.c.h.bf16 %v7480_v38  ;;  %3435 = vmatmul.mubr.bf16.gmra.mrb[252].mxu1 %v7476_v11  ;;  %v3116_v48 = vunpack.c.l.bf16 %v7480_v38  ;;  %v12733_v14 = vld [vmem:[#allocation107_spill] sm:$0xff]  ;;  %v12736_v11 = vld [vmem:[#allocation133_spill] sm:$0xff]  ;;  %v12739_v39 = vld [vmem:[#allocation150_spill] sm:$0xff] }
 0x4aa   : > { %12723 = vst [vmem:[#allocation168_spill] sm:$0xff] %v10419_v25  ;;  %v3268_v50 = vadd.f32 %v3267_v0, %v3112_v31  ;;  %3595 = vmatprep.mubr.bf16.mxu0 %v7482_v29  ;;  %v10421_v34 = vadd.f32 %v3263_v17, %v3109_v52  ;;  %v3277_v40 = vadd.f32 %v3119_v36, %v3118_v24  ;;  %v3121_v19 = vunpack.c.h.bf16 %v7482_v29  ;;  %v12740_v44 = vld [vmem:[#allocation149_spill] sm:$0xff]  ;;  %v12743_v24 = vld [vmem:[#allocation75_spill] sm:$0xff] }
 0x4ab   : > { %v3272_v63 = vadd.f32 %v3115_v45, %v3114_v42  ;;  %6668 = vmatprep.mubr.bf16.mxu1 %v12726_v16  ;;  %v3117_v47 = vunpack.c.l.bf16 %v7482_v29  ;;  %v12731_v46 = vpack.c.bf16 %v12729_v8, %v12730_v4  ;;  %v12735_v43 = vpack.c.bf16 %v12733_v14, %v12734_v59  ;;  %v12742_v0 = vld [vmem:[#allocation77_spill] sm:$0xff]  ;;  %v12748_v45 = vld [vmem:[#allocation135_spill] sm:$0xff]  ;;  %v12749_v29 = vld [vmem:[#allocation134_spill] sm:$0xff] }
 0x4ac   : > { %12724 = vst [vmem:[#allocation170_spill] sm:$0xff] %v10421_v34  ;;  %v10423_v6 = vadd.f32 %v3268_v50, %v3113_v7  ;;  %v3278_v49 = vadd.f32 %v3277_v40, %v3120_v23  ;;  %3596 = vmatmul.mubr.bf16.gmra.mrb[60].mxu0 %v7480_v38  ;;  %v12738_v52 = vpack.c.bf16 %v12736_v11, %v12737_v3  ;;  %v12745_v38 = vld [vmem:[#allocation111_spill] sm:$0xff]  ;;  %v12746_v17 = vld [vmem:[#allocation109_spill] sm:$0xff]  ;;  %v12751_v50 = vld [vmem:[#allocation152_spill] sm:$0xff] }
 0x4ad   : > { %v3273_v18 = vadd.f32 %v3272_v63, %v3116_v48  ;;  %6716 = vmatprep.mubr.bf16.mxu0 %v12726_v16  ;;  %v12741_v31 = vpack.c.bf16 %v12739_v39, %v12740_v44  ;;  %v12744_v42 = vpack.c.bf16 %v12742_v0, %v12743_v24  ;;  %v12747_v36 = vpack.c.bf16 %v12745_v38, %v12746_v17  ;;  %v12752_v23 = vld [vmem:[#allocation151_spill] sm:$0xff]  ;;  %v12754_v48 = vld [vmem:[#allocation81_spill] sm:$0xff]  ;;  %v12762_v4 = vld [vmem:[#allocation136_spill] sm:$0xff] }
 0x4ae   : > { %12725 = vst [vmem:[#allocation27_spill] sm:$0xff] %v10423_v6  ;;  %v10427_v54 = vadd.f32 %v3278_v49, %v3121_v19  ;;  %v12750_v7 = vpack.c.bf16 %v12748_v45, %v12749_v29  ;;  %v12753_v40 = vpack.c.bf16 %v12751_v50, %v12752_v23  ;;  %v12755_v63 = vld [vmem:[#allocation79_spill] sm:$0xff]  ;;  %v12761_v8 = vld [vmem:[#allocation137_spill] sm:$0xff]  ;;  %v12764_v14 = vld [vmem:[#allocation156_spill] sm:$0xff] }
 0x4af   : > { %v10429_v12 = vadd.f32 %v3273_v18, %v3117_v47  ;;  %v12757_v19 = vld [vmem:[#allocation31_spill] sm:$0xff]  ;;  %v12759_v47 = vld [vmem:[#allocation113_spill] sm:$0xff]  ;;  %v12765_v59 = vld [vmem:[#allocation154_spill] sm:$0xff] }
 0x4b0   : > { %12727 = vst [vmem:[#allocation26_spill] sm:$0xff] %v10427_v54  ;;  %v12758_v49 = vld [vmem:[#allocation115_spill] sm:$0xff]  ;;  %v12767_v11 = vld [vmem:[#allocation85_spill] sm:$0xff]  ;;  %v12774_v0 = vld [vmem:[#allocation138_spill] sm:$0xff] }
 0x4b1   : > { %12728 = vst [vmem:[#allocation214_spill] sm:$0xff] %v10429_v12  ;;  %6669 = vmatmul.mubr.bf16.vlgmr.msra.gmra.mrb[0].mxu1 %v12726_v16  ;;  %v12760_v18 = vpack.c.bf16 %v12758_v49, %v12759_v47  ;;  %v12768_v3 = vld [vmem:[#allocation83_spill] sm:$0xff]  ;;  %v12777_v38 = vld [vmem:[#allocation157_spill] sm:$0xff] }
 0x4b2   : > { %6749 = vmatpush3.bf16.msra.mxu1 %v12731_v46  ;;  %6670 = vmatprep.mubr.bf16.mxu1 %v12732_v21  ;;  %v12763_v46 = vpack.c.bf16 %v12761_v8, %v12762_v4  ;;  %v12770_v39 = vld [vmem:[#allocation119_spill] sm:$0xff]  ;;  %v12784_v23 = vld [vmem:[#allocation121_spill] sm:$0xff] }
 0x4b3   : > { %6750 = vmatprep.subr.bf16.mxu1 %v12735_v43  ;;  %v12766_v43 = vpack.c.bf16 %v12764_v14, %v12765_v59  ;;  %v12780_v45 = vld [vmem:[#allocation87_spill] sm:$0xff]  ;;  %v12790_v47 = vld [vmem:[#allocation161_spill] sm:$0xff] }
 0x4b4   : > { %6717 = vmatmul.mubr.bf16.vlgmr.msra.gmra.mrb[64].mxu0 %v12726_v16  ;;  %v12756_v16 = vpack.c.bf16 %v12754_v48, %v12755_v63  ;;  %v12783_v50 = vld [vmem:[#allocation123_spill] sm:$0xff]  ;;  %v12786_v48 = vld [vmem:[#allocation141_spill] sm:$0xff]  ;;  %v12787_v63 = vld [vmem:[#allocation140_spill] sm:$0xff] }
 0x4b5   : > { %6861 = vmatpush3.bf16.msra.mxu0 %v12738_v52  ;;  %6718 = vmatprep.mubr.bf16.mxu0 %v12732_v21  ;;  %v12769_v52 = vpack.c.bf16 %v12767_v11, %v12768_v3  ;;  %v12789_v49 = vld [vmem:[#allocation163_spill] sm:$0xff]  ;;  %v12792_v8 = vld [vmem:[#allocation93_spill] sm:$0xff]  ;;  %v12799_v11 = vld [vmem:[#allocation142_spill] sm:$0xff] }
 0x4b6   : > { %6862 = vmatprep.subr.bf16.mxu0 %v12741_v31  ;;  %6751 = vmatpush3.bf16.msra.mxu1 %v12744_v42  ;;  %v12773_v31 = vld [vmem:[#allocation139_spill] sm:$0xff] }
 0x4b7   : > { %6752 = vmatprep.subr.bf16.mxu1 %v12747_v36  ;;  %v12775_v24 = vpack.c.bf16 %v12773_v31, %v12774_v0  ;;  %v12776_v42 = vld [vmem:[#allocation159_spill] sm:$0xff]  ;;  %v12779_v36 = vld [vmem:[#allocation89_spill] sm:$0xff] }
 0x4b8   : > { %v12778_v17 = vpack.c.bf16 %v12776_v42, %v12777_v38  ;;  %v12781_v29 = vpack.c.bf16 %v12779_v36, %v12780_v45  ;;  %v12793_v4 = vld [vmem:[#allocation91_spill] sm:$0xff]  ;;  %v12808_v42 = vld [vmem:[#allocation130_spill] sm:$0xff]  ;;  %v12809_v38 = vld [vmem:[#allocation129_spill] sm:$0xff] }
 0x4b9   : > { %6863 = vmatpush3.bf16.msra.mxu0 %v12750_v7  ;;  %6671 = vmatmul.mubr.bf16.gmra.mrb[4].mxu1 %v12732_v21  ;;  %v12782_v7 = vld [vmem:[#allocation34_spill] sm:$0xff]  ;;  %v12795_v14 = vld [vmem:[#allocation127_spill] sm:$0xff]  ;;  %v12811_v36 = vld [vmem:[#allocation144_spill] sm:$0xff] }
 0x4ba   : > { %6864 = vmatprep.subr.bf16.mxu0 %v12753_v40  ;;  %6753 = vmatpush3.bf16.msra.mxu1 %v12756_v16  ;;  %v12785_v40 = vpack.c.bf16 %v12783_v50, %v12784_v23  ;;  %v12788_v16 = vpack.c.bf16 %v12786_v48, %v12787_v63  ;;  %v12805_v31 = vld [vmem:[#allocation95_spill] sm:$0xff]  ;;  %v12815_v23 = vld [vmem:[#allocation169_spill] sm:$0xff] }
 0x4bb   : > { %6672 = vmatprep.mubr.bf16.mxu1 %v12757_v19  ;;  %6754 = vmatprep.subr.bf16.mxu1 %v12760_v18  ;;  %v12791_v18 = vpack.c.bf16 %v12789_v49, %v12790_v47  ;;  %v12812_v45 = vld [vmem:[#allocation43_spill] sm:$0xff]  ;;  %v12817_v48 = vld [vmem:[#allocation101_spill] sm:$0xff]  ;;  %v12820_v49 = vld [vmem:[#allocation146_spill] sm:$0xff] }
 0x4bc   : > { %6719 = vmatmul.mubr.bf16.gmra.mrb[68].mxu0 %v12732_v21  ;;  %v12771_v21 = vld [vmem:[#allocation117_spill] sm:$0xff]  ;;  %v12814_v50 = vld [vmem:[#allocation171_spill] sm:$0xff] }
 0x4bd   : > { %6865 = vmatpush3.bf16.msra.mxu0 %v12763_v46  ;;  %6720 = vmatprep.mubr.bf16.mxu0 %v12757_v19  ;;  %v12772_v44 = vpack.c.bf16 %v12770_v39, %v12771_v21  ;;  %v12794_v46 = vpack.c.bf16 %v12792_v8, %v12793_v4  ;;  %v12802_v39 = vld [vmem:[#allocation165_spill] sm:$0xff]  ;;  %v12818_v63 = vld [vmem:[#allocation99_spill] sm:$0xff]  ;;  %v12824_v8 = vld [vmem:[#allocation44_spill] sm:$0xff] }
 0x4be   : > { %6866 = vmatprep.subr.bf16.mxu0 %v12766_v43  ;;  %6755 = vmatpush3.bf16.msra.mxu1 %v12769_v52  ;;  %v12798_v43 = vld [vmem:[#allocation143_spill] sm:$0xff] }
 0x4bf   : > { %6756 = vmatprep.subr.bf16.mxu1 %v12772_v44  ;;  %v12800_v3 = vpack.c.bf16 %v12798_v43, %v12799_v11  ;;  %v12801_v52 = vld [vmem:[#allocation167_spill] sm:$0xff]  ;;  %v12804_v44 = vld [vmem:[#allocation97_spill] sm:$0xff] }
 0x4c0   : > { %v12803_v21 = vpack.c.bf16 %v12801_v52, %v12802_v39  ;;  %v12806_v0 = vpack.c.bf16 %v12804_v44, %v12805_v31  ;;  %v12825_v4 = vld [vmem:[#allocation47_spill] sm:$0xff] }
 0x4c1   : > { %6867 = vmatpush3.bf16.msra.mxu0 %v12775_v24  ;;  %6673 = vmatmul.mubr.bf16.gmra.mrb[8].mxu1 %v12757_v19  ;;  %v12807_v24 = vld [vmem:[#allocation37_spill] sm:$0xff] }
 0x4c2   : > { %6868 = vmatprep.subr.bf16.mxu0 %v12778_v17  ;;  %6757 = vmatpush3.bf16.msra.mxu1 %v12781_v29  ;;  %v12810_v17 = vpack.c.bf16 %v12808_v42, %v12809_v38  ;;  %v12813_v29 = vpack.c.bf16 %v12811_v36, %v12812_v45  ;;  %v12831_v36 = vld [vmem:[#allocation60_spill] sm:$0xff] }
 0x4c3   : > { %6674 = vmatprep.mubr.bf16.mxu1 %v12782_v7  ;;  %6758 = vmatprep.subr.bf16.mxu1 %v12785_v40  ;;  %v12816_v40 = vpack.c.bf16 %v12814_v50, %v12815_v23 }
 0x4c4   : > { %6721 = vmatmul.mubr.bf16.gmra.mrb[72].mxu0 %v12757_v19  ;;  %v12796_v19 = vld [vmem:[#allocation125_spill] sm:$0xff] }
 0x4c5   : > { %6869 = vmatpush3.bf16.msra.mxu0 %v12788_v16  ;;  %6722 = vmatprep.mubr.bf16.mxu0 %v12782_v7  ;;  %v12797_v59 = vpack.c.bf16 %v12795_v14, %v12796_v19  ;;  %v12819_v16 = vpack.c.bf16 %v12817_v48, %v12818_v63  ;;  %v12827_v14 = vld [vmem:[#allocation51_spill] sm:$0xff]  ;;  %v12828_v19 = vld [vmem:[#allocation54_spill] sm:$0xff] }
 0x4c6   : > { %6870 = vmatprep.subr.bf16.mxu0 %v12791_v18  ;;  %6759 = vmatpush3.bf16.msra.mxu1 %v12794_v46  ;;  %v12823_v18 = vld [vmem:[#allocation40_spill] sm:$0xff] }
 0x4c7   : > { %6760 = vmatprep.subr.bf16.mxu1 %v12797_v59  ;;  %v12826_v46 = vld [vmem:[#allocation48_spill] sm:$0xff]  ;;  %v12829_v59 = vld [vmem:[#allocation57_spill] sm:$0xff] }
 0x4c9   : > { %6871 = vmatpush3.bf16.msra.mxu0 %v12800_v3  ;;  %6675 = vmatmul.mubr.bf16.gmra.mrb[12].mxu1 %v12782_v7 }
 0x4ca   : > { %6872 = vmatprep.subr.bf16.mxu0 %v12803_v21  ;;  %6761 = vmatpush3.bf16.msra.mxu1 %v12806_v0 }
 0x4cb   : > { %6676 = vmatprep.mubr.bf16.mxu1 %v12807_v24  ;;  %6762 = vmatprep.subr.bf16.mxu1 %v12810_v17 }
 0x4cc   : > { %6723 = vmatmul.mubr.bf16.gmra.mrb[76].mxu0 %v12782_v7  ;;  %v12821_v7 = vld [vmem:[#allocation145_spill] sm:$0xff] }
 0x4cd   : > { %6873 = vmatpush3.bf16.msra.mxu0 %v12813_v29  ;;  %6724 = vmatprep.mubr.bf16.mxu0 %v12807_v24  ;;  %v12822_v47 = vpack.c.bf16 %v12820_v49, %v12821_v7 }
 0x4ce   : > { %6874 = vmatprep.subr.bf16.mxu0 %v12816_v40  ;;  %6763 = vmatpush3.bf16.msra.mxu1 %v12819_v16 }
 0x4d1   : > { %6875 = vmatpush3.bf16.msra.mxu0 %v12822_v47  ;;  %6677 = vmatmul.mubr.bf16.gmra.mrb[16].mxu1 %v12807_v24 }
 0x4d2   : > { %6678 = vmatprep.mubr.bf16.mxu1 %v12823_v18 }
 0x4d4   : > { %6725 = vmatmul.mubr.bf16.gmra.mrb[80].mxu0 %v12807_v24 }
 0x4d5   : > { %6726 = vmatprep.mubr.bf16.mxu0 %v12823_v18 }
 0x4d9   : > { %6679 = vmatmul.mubr.bf16.gmra.mrb[20].mxu1 %v12823_v18 }
 0x4da   : > { %6680 = vmatprep.mubr.bf16.mxu1 %v12824_v8 }
 0x4dc   : > { %6727 = vmatmul.mubr.bf16.gmra.mrb[84].mxu0 %v12823_v18 }
 0x4dd   : > { %6728 = vmatprep.mubr.bf16.mxu0 %v12824_v8 }
 0x4e1   : > { %6681 = vmatmul.mubr.bf16.gmra.mrb[24].mxu1 %v12824_v8 }
 0x4e2   : > { %6682 = vmatprep.mubr.bf16.mxu1 %v12825_v4 }
 0x4e4   : > { %6729 = vmatmul.mubr.bf16.gmra.mrb[88].mxu0 %v12824_v8 }
 0x4e5   : > { %6730 = vmatprep.mubr.bf16.mxu0 %v12825_v4 }
 0x4e9   : > { %6683 = vmatmul.mubr.bf16.gmra.mrb[28].mxu1 %v12825_v4 }
 0x4ea   : > { %6684 = vmatprep.mubr.bf16.mxu1 %v12826_v46 }
 0x4ec   : > { %6731 = vmatmul.mubr.bf16.gmra.mrb[92].mxu0 %v12825_v4 }
 0x4ed   : > { %6732 = vmatprep.mubr.bf16.mxu0 %v12826_v46 }
 0x4f1   : > { %6685 = vmatmul.mubr.bf16.gmra.mrb[32].mxu1 %v12826_v46 }
 0x4f2   : > { %6686 = vmatprep.mubr.bf16.mxu1 %v12827_v14 }
 0x4f4   : > { %6733 = vmatmul.mubr.bf16.gmra.mrb[96].mxu0 %v12826_v46  ;;  %v12834_v46 = vld [vmem:[#allocation63_spill] sm:$0xff] }
 0x4f5   : > { %6734 = vmatprep.mubr.bf16.mxu0 %v12827_v14 }
 0x4f9   : > { %6687 = vmatmul.mubr.bf16.gmra.mrb[36].mxu1 %v12827_v14 }
 0x4fa   : > { %6688 = vmatprep.mubr.bf16.mxu1 %v12828_v19 }
 0x4fc   : > { %6735 = vmatmul.mubr.bf16.gmra.mrb[100].mxu0 %v12827_v14 }
 0x4fd   : > { %6736 = vmatprep.mubr.bf16.mxu0 %v12828_v19 }
 0x4ff   : > { %v6444_v43 = vpop.f32.mrb[192].mxu1 }
 0x500   : > { %v6445_v11 = vpop.f32.mrb[193].mxu1 }
 0x501   : > { %6689 = vmatmul.mubr.bf16.gmra.mrb[40].mxu1 %v12828_v19  ;;  %v6556_v3 = vpop.f32.mrb[0].mxu0  ;;  %v6446_v52 = vadd.f32 %v6445_v11, %v6444_v43  ;;  %v6447_v39 = vpop.f32.mrb[194].mxu1 }
 0x502   : > { %6690 = vmatprep.mubr.bf16.mxu1 %v12829_v59  ;;  %v6557_v21 = vpop.f32.mrb[1].mxu0  ;;  %v6448_v44 = vpop.f32.mrb[195].mxu1 }
 0x503   : > { %v6558_v31 = vadd.f32 %v6557_v21, %v6556_v3  ;;  %v6559_v0 = vpop.f32.mrb[2].mxu0  ;;  %v6449_v24 = vadd.f32 %v6448_v44, %v6447_v39 }
 0x504   : > { %6737 = vmatmul.mubr.bf16.gmra.mrb[104].mxu0 %v12828_v19  ;;  %v6560_v42 = vpop.f32.mrb[3].mxu0 }
 0x505   : > { %6738 = vmatprep.mubr.bf16.mxu0 %v12829_v59  ;;  %v10566_v38 = vadd.f32 %v6558_v31, %v6446_v52  ;;  %v6561_v17 = vadd.f32 %v6560_v42, %v6559_v0 }
 0x507   : > { %12830 = vst [vmem:[#allocation53_spill] sm:$0xff] %v10566_v38  ;;  %v10570_v45 = vadd.f32 %v6561_v17, %v6449_v24  ;;  %v6450_v29 = vpop.f32.mrb[196].mxu1  ;;  %v12837_v17 = vld [vmem:[#allocation66_spill] sm:$0xff] }
 0x508   : > { %v6451_v50 = vpop.f32.mrb[197].mxu1 }
 0x509   : > { %6691 = vmatmul.mubr.bf16.gmra.mrb[44].mxu1 %v12829_v59  ;;  %12832 = vst [vmem:[#allocation52_spill] sm:$0xff] %v10570_v45  ;;  %v6562_v23 = vpop.f32.mrb[4].mxu0  ;;  %v6452_v40 = vadd.f32 %v6451_v50, %v6450_v29  ;;  %v6453_v48 = vpop.f32.mrb[198].mxu1 }
 0x50a   : > { %6692 = vmatprep.mubr.bf16.mxu1 %v12831_v36  ;;  %v6563_v63 = vpop.f32.mrb[5].mxu0  ;;  %v6454_v16 = vpop.f32.mrb[199].mxu1 }
 0x50b   : > { %v6564_v49 = vadd.f32 %v6563_v63, %v6562_v23  ;;  %v6565_v7 = vpop.f32.mrb[6].mxu0  ;;  %v6455_v47 = vadd.f32 %v6454_v16, %v6453_v48 }
 0x50c   : > { %6739 = vmatmul.mubr.bf16.gmra.mrb[108].mxu0 %v12829_v59  ;;  %v6566_v18 = vpop.f32.mrb[7].mxu0 }
 0x50d   : > { %6740 = vmatprep.mubr.bf16.mxu0 %v12831_v36  ;;  %v10574_v8 = vadd.f32 %v6564_v49, %v6452_v40  ;;  %v6567_v4 = vadd.f32 %v6566_v18, %v6565_v7 }
 0x50f   : > { %12833 = vst [vmem:[#allocation76_spill] sm:$0xff] %v10574_v8  ;;  %v10578_v14 = vadd.f32 %v6567_v4, %v6455_v47  ;;  %v6456_v19 = vpop.f32.mrb[200].mxu1 }
 0x510   : > { %v6457_v59 = vpop.f32.mrb[201].mxu1 }
 0x511   : > { %6693 = vmatmul.mubr.bf16.gmra.mrb[48].mxu1 %v12831_v36  ;;  %12835 = vst [vmem:[#allocation74_spill] sm:$0xff] %v10578_v14  ;;  %v6568_v43 = vpop.f32.mrb[8].mxu0  ;;  %v6458_v11 = vadd.f32 %v6457_v59, %v6456_v19  ;;  %v6459_v3 = vpop.f32.mrb[202].mxu1  ;;  %v12840_v19 = vld [vmem:[#allocation69_spill] sm:$0xff] }
 0x512   : > { %6694 = vmatprep.mubr.bf16.mxu1 %v12834_v46  ;;  %v6569_v52 = vpop.f32.mrb[9].mxu0  ;;  %v6460_v39 = vpop.f32.mrb[203].mxu1 }
 0x513   : > { %v6570_v21 = vadd.f32 %v6569_v52, %v6568_v43  ;;  %v6571_v44 = vpop.f32.mrb[10].mxu0  ;;  %v6461_v31 = vadd.f32 %v6460_v39, %v6459_v3 }
 0x514   : > { %6741 = vmatmul.mubr.bf16.gmra.mrb[112].mxu0 %v12831_v36  ;;  %v6572_v0 = vpop.f32.mrb[11].mxu0 }
 0x515   : > { %6742 = vmatprep.mubr.bf16.mxu0 %v12834_v46  ;;  %v10582_v24 = vadd.f32 %v6570_v21, %v6458_v11  ;;  %v6573_v42 = vadd.f32 %v6572_v0, %v6571_v44 }
 0x517   : > { %12836 = vst [vmem:[#allocation215_spill] sm:$0xff] %v10582_v24  ;;  %v10586_v36 = vadd.f32 %v6573_v42, %v6461_v31  ;;  %v6462_v29 = vpop.f32.mrb[204].mxu1 }
 0x518   : > { %v6463_v50 = vpop.f32.mrb[205].mxu1 }
 0x519   : > { %6695 = vmatmul.mubr.bf16.gmra.mrb[52].mxu1 %v12834_v46  ;;  %12838 = vst [vmem:[#allocation110_spill] sm:$0xff] %v10586_v36  ;;  %v6574_v23 = vpop.f32.mrb[12].mxu0  ;;  %v6464_v40 = vadd.f32 %v6463_v50, %v6462_v29  ;;  %v6465_v48 = vpop.f32.mrb[206].mxu1 }
 0x51a   : > { %6696 = vmatprep.mubr.bf16.mxu1 %v12837_v17  ;;  %v6575_v63 = vpop.f32.mrb[13].mxu0  ;;  %v6466_v16 = vpop.f32.mrb[207].mxu1 }
 0x51b   : > { %v6576_v49 = vadd.f32 %v6575_v63, %v6574_v23  ;;  %v6577_v7 = vpop.f32.mrb[14].mxu0  ;;  %v6467_v47 = vadd.f32 %v6466_v16, %v6465_v48 }
 0x51c   : > { %6743 = vmatmul.mubr.bf16.gmra.mrb[116].mxu0 %v12834_v46  ;;  %v6578_v18 = vpop.f32.mrb[15].mxu0 }
 0x51d   : > { %6744 = vmatprep.mubr.bf16.mxu0 %v12837_v17  ;;  %v10590_v4 = vadd.f32 %v6576_v49, %v6464_v40  ;;  %v6579_v46 = vadd.f32 %v6578_v18, %v6577_v7 }
 0x51f   : > { %12839 = vst [vmem:[#allocation108_spill] sm:$0xff] %v10590_v4  ;;  %v10594_v59 = vadd.f32 %v6579_v46, %v6467_v47 }
 0x520   : > { %v6468_v43 = vpop.f32.mrb[208].mxu1 }
 0x521   : > { %6697 = vmatmul.mubr.bf16.gmra.mrb[56].mxu1 %v12837_v17  ;;  %12841 = vst [vmem:[#allocation172_spill] sm:$0xff] %v10594_v59  ;;  %v6469_v11 = vpop.f32.mrb[209].mxu1  ;;  %v6580_v3 = vpop.f32.mrb[16].mxu0 }
 0x522   : > { %6698 = vmatprep.mubr.bf16.mxu1 %v12840_v19  ;;  %v6470_v52 = vadd.f32 %v6469_v11, %v6468_v43  ;;  %v6471_v39 = vpop.f32.mrb[210].mxu1  ;;  %v6581_v21 = vpop.f32.mrb[17].mxu0 }
 0x523   : > { %v6472_v44 = vpop.f32.mrb[211].mxu1  ;;  %v6582_v31 = vadd.f32 %v6581_v21, %v6580_v3  ;;  %v6583_v0 = vpop.f32.mrb[18].mxu0 }
 0x524   : > { %6745 = vmatmul.mubr.bf16.gmra.mrb[120].mxu0 %v12837_v17  ;;  %v6473_v42 = vadd.f32 %v6472_v44, %v6471_v39  ;;  %v6584_v29 = vpop.f32.mrb[19].mxu0 }
 0x525   : > { %6746 = vmatprep.mubr.bf16.mxu0 %v12840_v19  ;;  %v10598_v50 = vadd.f32 %v6582_v31, %v6470_v52  ;;  %v6585_v17 = vadd.f32 %v6584_v29, %v6583_v0 }
 0x527   : > { %12842 = vst [vmem:[#allocation173_spill] sm:$0xff] %v10598_v50  ;;  %v10601_v23 = vadd.f32 %v6585_v17, %v6473_v42 }
 0x529   : > { %6699 = vmatmul.mubr.bf16.gmra.mrb[60].mxu1 %v12840_v19  ;;  %12843 = vst [vmem:[#allocation30_spill] sm:$0xff] %v10601_v23  ;;  %v6474_v40 = vpop.f32.mrb[212].mxu1 }
 0x52a   : > { %v6475_v48 = vpop.f32.mrb[213].mxu1 }
 0x52b   : > { %v6586_v63 = vpop.f32.mrb[20].mxu0  ;;  %v6476_v16 = vadd.f32 %v6475_v48, %v6474_v40  ;;  %v6477_v49 = vpop.f32.mrb[214].mxu1 }
 0x52c   : > { %6747 = vmatmul.mubr.bf16.gmra.mrb[124].mxu0 %v12840_v19  ;;  %v6587_v7 = vpop.f32.mrb[21].mxu0  ;;  %v6478_v47 = vpop.f32.mrb[215].mxu1 }
 0x52d   : > { %v6588_v18 = vadd.f32 %v6587_v7, %v6586_v63  ;;  %v6589_v46 = vpop.f32.mrb[22].mxu0  ;;  %v6479_v43 = vadd.f32 %v6478_v47, %v6477_v49 }
 0x52e   : > { %v6590_v11 = vpop.f32.mrb[23].mxu0 }
 0x52f   : > { %v10603_v3 = vadd.f32 %v6588_v18, %v6476_v16  ;;  %v6591_v52 = vadd.f32 %v6590_v11, %v6589_v46 }
 0x531   : > { %12844 = vst [vmem:[#allocation29_spill] sm:$0xff] %v10603_v3  ;;  %v10605_v39 = vadd.f32 %v6591_v52, %v6479_v43 }
 0x532   : > { %v6480_v21 = vpop.f32.mrb[216].mxu1 }
 0x533   : > { %12845 = vst [vmem:[#allocation216_spill] sm:$0xff] %v10605_v39  ;;  %v6481_v19 = vpop.f32.mrb[217].mxu1 }
 0x534   : > { %v6592_v44 = vpop.f32.mrb[24].mxu0  ;;  %v6482_v31 = vadd.f32 %v6481_v19, %v6480_v21  ;;  %v6483_v0 = vpop.f32.mrb[218].mxu1 }
 0x535   : > { %v6593_v42 = vpop.f32.mrb[25].mxu0  ;;  %v6484_v29 = vpop.f32.mrb[219].mxu1 }
 0x536   : > { %v6594_v17 = vadd.f32 %v6593_v42, %v6592_v44  ;;  %v6595_v40 = vpop.f32.mrb[26].mxu0  ;;  %v6485_v48 = vadd.f32 %v6484_v29, %v6483_v0 }
 0x537   : > { %v6596_v23 = vpop.f32.mrb[27].mxu0 }
 0x538   : > { %v10607_v63 = vadd.f32 %v6594_v17, %v6482_v31  ;;  %v6597_v49 = vadd.f32 %v6596_v23, %v6595_v40 }
 0x53a   : > { %12846 = vst [vmem:[#allocation56_spill] sm:$0xff] %v10607_v63  ;;  %v10609_v7 = vadd.f32 %v6597_v49, %v6485_v48 }
 0x53c   : > { %12847 = vst [vmem:[#allocation55_spill] sm:$0xff] %v10609_v7  ;;  %v6486_v16 = vpop.f32.mrb[220].mxu1  ;;  %v6598_v18 = vpop.f32.mrb[28].mxu0 }
 0x53d   : > { %v6487_v47 = vpop.f32.mrb[221].mxu1  ;;  %v6599_v11 = vpop.f32.mrb[29].mxu0 }
 0x53e   : > { %v6488_v46 = vadd.f32 %v6487_v47, %v6486_v16  ;;  %v6489_v43 = vpop.f32.mrb[222].mxu1  ;;  %v6600_v21 = vadd.f32 %v6599_v11, %v6598_v18  ;;  %v6601_v19 = vpop.f32.mrb[30].mxu0 }
 0x53f   : > { %v6490_v52 = vpop.f32.mrb[223].mxu1  ;;  %v6602_v3 = vpop.f32.mrb[31].mxu0 }
 0x540   : > { %v6491_v39 = vadd.f32 %v6490_v52, %v6489_v43  ;;  %v10611_v44 = vadd.f32 %v6600_v21, %v6488_v46  ;;  %v6603_v0 = vadd.f32 %v6602_v3, %v6601_v19 }
 0x542   : > { %12848 = vst [vmem:[#allocation80_spill] sm:$0xff] %v10611_v44  ;;  %v10613_v42 = vadd.f32 %v6603_v0, %v6491_v39 }
 0x544   : > { %12849 = vst [vmem:[#allocation78_spill] sm:$0xff] %v10613_v42  ;;  %v6492_v31 = vpop.f32.mrb[224].mxu1 }
 0x545   : > { %v6493_v23 = vpop.f32.mrb[225].mxu1  ;;  %v6604_v29 = vpop.f32.mrb[32].mxu0 }
 0x546   : > { %v6494_v17 = vadd.f32 %v6493_v23, %v6492_v31  ;;  %v6495_v40 = vpop.f32.mrb[226].mxu1  ;;  %v6605_v48 = vpop.f32.mrb[33].mxu0 }
 0x547   : > { %v6496_v49 = vpop.f32.mrb[227].mxu1  ;;  %v6606_v16 = vadd.f32 %v6605_v48, %v6604_v29  ;;  %v6607_v47 = vpop.f32.mrb[34].mxu0 }
 0x548   : > { %v6497_v7 = vadd.f32 %v6496_v49, %v6495_v40  ;;  %v6608_v63 = vpop.f32.mrb[35].mxu0 }
 0x549   : > { %v10615_v18 = vadd.f32 %v6606_v16, %v6494_v17  ;;  %v6609_v43 = vadd.f32 %v6608_v63, %v6607_v47 }
 0x54b   : > { %12850 = vst [vmem:[#allocation217_spill] sm:$0xff] %v10615_v18  ;;  %v10617_v11 = vadd.f32 %v6609_v43, %v6497_v7 }
 0x54c   : > { %v6498_v46 = vpop.f32.mrb[228].mxu1 }
 0x54d   : > { %12851 = vst [vmem:[#allocation114_spill] sm:$0xff] %v10617_v11  ;;  %v6499_v3 = vpop.f32.mrb[229].mxu1 }
 0x54e   : > { %v6500_v52 = vadd.f32 %v6499_v3, %v6498_v46  ;;  %v6501_v21 = vpop.f32.mrb[230].mxu1 }
 0x54f   : > { %v6610_v39 = vpop.f32.mrb[36].mxu0  ;;  %v6502_v0 = vpop.f32.mrb[231].mxu1 }
 0x550   : > { %v6611_v19 = vpop.f32.mrb[37].mxu0  ;;  %v6503_v42 = vadd.f32 %v6502_v0, %v6501_v21 }
 0x551   : > { %v6612_v31 = vadd.f32 %v6611_v19, %v6610_v39  ;;  %v6613_v23 = vpop.f32.mrb[38].mxu0 }
 0x552   : > { %v6614_v44 = vpop.f32.mrb[39].mxu0 }
 0x553   : > { %v10619_v29 = vadd.f32 %v6612_v31, %v6500_v52  ;;  %v6615_v40 = vadd.f32 %v6614_v44, %v6613_v23 }
 0x554   : > { %v6504_v17 = vpop.f32.mrb[232].mxu1 }
 0x555   : > { %12852 = vst [vmem:[#allocation112_spill] sm:$0xff] %v10619_v29  ;;  %v10621_v48 = vadd.f32 %v6615_v40, %v6503_v42  ;;  %v6505_v63 = vpop.f32.mrb[233].mxu1 }
 0x556   : > { %v6506_v49 = vadd.f32 %v6505_v63, %v6504_v17  ;;  %v6507_v16 = vpop.f32.mrb[234].mxu1 }
 0x557   : > { %12853 = vst [vmem:[#allocation174_spill] sm:$0xff] %v10621_v48  ;;  %v6616_v7 = vpop.f32.mrb[40].mxu0  ;;  %v6508_v43 = vpop.f32.mrb[235].mxu1 }
 0x558   : > { %v6617_v47 = vpop.f32.mrb[41].mxu0  ;;  %v6509_v11 = vadd.f32 %v6508_v43, %v6507_v16 }
 0x559   : > { %v6618_v46 = vadd.f32 %v6617_v47, %v6616_v7  ;;  %v6619_v3 = vpop.f32.mrb[42].mxu0 }
 0x55a   : > { %v6620_v18 = vpop.f32.mrb[43].mxu0 }
 0x55b   : > { %v10623_v39 = vadd.f32 %v6618_v46, %v6506_v49  ;;  %v6621_v21 = vadd.f32 %v6620_v18, %v6619_v3 }
 0x55c   : > { %v6510_v52 = vpop.f32.mrb[236].mxu1 }
 0x55d   : > { %12854 = vst [vmem:[#allocation175_spill] sm:$0xff] %v10623_v39  ;;  %v10625_v19 = vadd.f32 %v6621_v21, %v6509_v11  ;;  %v6511_v44 = vpop.f32.mrb[237].mxu1 }
 0x55e   : > { %v6512_v0 = vadd.f32 %v6511_v44, %v6510_v52  ;;  %v6513_v31 = vpop.f32.mrb[238].mxu1 }
 0x55f   : > { %12855 = vst [vmem:[#allocation218_spill] sm:$0xff] %v10625_v19  ;;  %v6622_v42 = vpop.f32.mrb[44].mxu0  ;;  %v6514_v40 = vpop.f32.mrb[239].mxu1 }
 0x560   : > { %v6623_v23 = vpop.f32.mrb[45].mxu0  ;;  %v6515_v48 = vadd.f32 %v6514_v40, %v6513_v31 }
 0x561   : > { %v6624_v17 = vadd.f32 %v6623_v23, %v6622_v42  ;;  %v6625_v63 = vpop.f32.mrb[46].mxu0 }
 0x562   : > { %v6626_v29 = vpop.f32.mrb[47].mxu0 }
 0x563   : > { %v10627_v7 = vadd.f32 %v6624_v17, %v6512_v0  ;;  %v6627_v16 = vadd.f32 %v6626_v29, %v6625_v63 }
 0x564   : > { %v6516_v49 = vpop.f32.mrb[240].mxu1 }
 0x565   : > { %12856 = vst [vmem:[#allocation33_spill] sm:$0xff] %v10627_v7  ;;  %v10629_v47 = vadd.f32 %v6627_v16, %v6515_v48  ;;  %v6517_v18 = vpop.f32.mrb[241].mxu1 }
 0x566   : > { %v6518_v43 = vadd.f32 %v6517_v18, %v6516_v49  ;;  %v6519_v46 = vpop.f32.mrb[242].mxu1 }
 0x567   : > { %12857 = vst [vmem:[#allocation32_spill] sm:$0xff] %v10629_v47  ;;  %v6628_v11 = vpop.f32.mrb[48].mxu0  ;;  %v6520_v21 = vpop.f32.mrb[243].mxu1 }
 0x568   : > { %v6629_v3 = vpop.f32.mrb[49].mxu0  ;;  %v6521_v19 = vadd.f32 %v6520_v21, %v6519_v46 }
 0x569   : > { %v6630_v52 = vadd.f32 %v6629_v3, %v6628_v11  ;;  %v6631_v44 = vpop.f32.mrb[50].mxu0 }
 0x56a   : > { %v6632_v39 = vpop.f32.mrb[51].mxu0 }
 0x56b   : > { %v10631_v42 = vadd.f32 %v6630_v52, %v6518_v43  ;;  %v6633_v31 = vadd.f32 %v6632_v39, %v6631_v44 }
 0x56c   : > { %v6522_v0 = vpop.f32.mrb[244].mxu1 }
 0x56d   : > { %12858 = vst [vmem:[#allocation59_spill] sm:$0xff] %v10631_v42  ;;  %v10633_v23 = vadd.f32 %v6633_v31, %v6521_v19  ;;  %v6523_v29 = vpop.f32.mrb[245].mxu1 }
 0x56e   : > { %v6524_v40 = vadd.f32 %v6523_v29, %v6522_v0  ;;  %v6525_v17 = vpop.f32.mrb[246].mxu1 }
 0x56f   : > { %12859 = vst [vmem:[#allocation58_spill] sm:$0xff] %v10633_v23  ;;  %v6634_v48 = vpop.f32.mrb[52].mxu0  ;;  %v6526_v16 = vpop.f32.mrb[247].mxu1 }
 0x570   : > { %v6635_v63 = vpop.f32.mrb[53].mxu0  ;;  %v6527_v47 = vadd.f32 %v6526_v16, %v6525_v17 }
 0x571   : > { %v6636_v49 = vadd.f32 %v6635_v63, %v6634_v48  ;;  %v6637_v18 = vpop.f32.mrb[54].mxu0 }
 0x572   : > { %v6638_v7 = vpop.f32.mrb[55].mxu0 }
 0x573   : > { %v10635_v11 = vadd.f32 %v6636_v49, %v6524_v40  ;;  %v6639_v46 = vadd.f32 %v6638_v7, %v6637_v18 }
 0x574   : > { %v6528_v43 = vpop.f32.mrb[248].mxu1 }
 0x575   : > { %12860 = vst [vmem:[#allocation84_spill] sm:$0xff] %v10635_v11  ;;  %v10637_v3 = vadd.f32 %v6639_v46, %v6527_v47  ;;  %v6529_v39 = vpop.f32.mrb[249].mxu1 }
 0x576   : > { %v6530_v21 = vadd.f32 %v6529_v39, %v6528_v43  ;;  %v6531_v52 = vpop.f32.mrb[250].mxu1 }
 0x577   : > { %12861 = vst [vmem:[#allocation82_spill] sm:$0xff] %v10637_v3  ;;  %v6640_v19 = vpop.f32.mrb[56].mxu0  ;;  %v6532_v31 = vpop.f32.mrb[251].mxu1 }
 0x578   : > { %v6641_v44 = vpop.f32.mrb[57].mxu0  ;;  %v6533_v23 = vadd.f32 %v6532_v31, %v6531_v52 }
 0x579   : > { %v6642_v0 = vadd.f32 %v6641_v44, %v6640_v19  ;;  %v6643_v29 = vpop.f32.mrb[58].mxu0 }
 0x57a   : > { %v6644_v42 = vpop.f32.mrb[59].mxu0 }
 0x57b   : > { %v10639_v48 = vadd.f32 %v6642_v0, %v6530_v21  ;;  %v6645_v17 = vadd.f32 %v6644_v42, %v6643_v29 }
 0x57c   : > { %v6534_v40 = vpop.f32.mrb[252].mxu1 }
 0x57d   : > { %12862 = vst [vmem:[#allocation219_spill] sm:$0xff] %v10639_v48  ;;  %v10641_v63 = vadd.f32 %v6645_v17, %v6533_v23  ;;  %v6535_v7 = vpop.f32.mrb[253].mxu1 }
 0x57e   : > { %v6536_v16 = vadd.f32 %v6535_v7, %v6534_v40  ;;  %v6537_v49 = vpop.f32.mrb[254].mxu1 }
 0x57f   : > { %12863 = vst [vmem:[#allocation118_spill] sm:$0xff] %v10641_v63  ;;  %v6646_v47 = vpop.f32.mrb[60].mxu0  ;;  %v6538_v46 = vpop.f32.mrb[255].mxu1 }
 0x580   : > { %v6647_v18 = vpop.f32.mrb[61].mxu0  ;;  %v6539_v3 = vadd.f32 %v6538_v46, %v6537_v49 }
 0x581   : > { %v6648_v43 = vadd.f32 %v6647_v18, %v6646_v47  ;;  %v6649_v39 = vpop.f32.mrb[62].mxu0 }
 0x582   : > { %v6650_v11 = vpop.f32.mrb[63].mxu0 }
 0x583   : > { %v10643_v19 = vadd.f32 %v6648_v43, %v6536_v16  ;;  %v6651_v52 = vadd.f32 %v6650_v11, %v6649_v39 }
 0x584   : > { %v10647_v21 = vpop.f32.mrb[0].mxu1 }
 0x585   : > { %12864 = vst [vmem:[#allocation116_spill] sm:$0xff] %v10643_v19  ;;  %v10645_v44 = vadd.f32 %v6651_v52, %v6539_v3  ;;  %v10649_v42 = vpop.f32.mrb[1].mxu1 }
 0x586   : > { %v4150_v31 = vmax.f32 %v10647_v21, %v10649_v42  ;;  %v10655_v0 = vpop.f32.mrb[2].mxu1 }
 0x587   : > { %12865 = vst [vmem:[#allocation176_spill] sm:$0xff] %v10645_v44  ;;  %v10651_v23 = vpop.f32.mrb[64].mxu0  ;;  %v10659_v17 = vpop.f32.mrb[3].mxu1 }
 0x588   : > { %v10657_v29 = vpop.f32.mrb[65].mxu0  ;;  %v4155_v11 = vmax.f32 %v10655_v0, %v10659_v17  ;;  %v4151_v3 = vmax.f32 %v4150_v31, %v10651_v23 }
 0x589   : > { %v10661_v40 = vpop.f32.mrb[66].mxu0 }
 0x58a   : > { %v10666_v7 = vpop.f32.mrb[67].mxu0  ;;  %v4152_v47 = vmax.f32 %v4151_v3, %v10657_v29  ;;  %v4156_v16 = vmax.f32 %v4155_v11, %v10661_v40 }
 0x58c   : > { %4153 = vmax.xlane.f32.xlu0 %v4152_v47  ;;  %v10670_v49 = vpop.f32.mrb[4].mxu1  ;;  %v4157_v18 = vmax.f32 %v4156_v16, %v10666_v7 }
 0x58d   : > { %v10673_v46 = vpop.f32.mrb[5].mxu1 }
 0x58e   : > { %v4160_v39 = vmax.f32 %v10670_v49, %v10673_v46  ;;  %4158 = vmax.xlane.f32.xlu1 %v4157_v18  ;;  %v10679_v52 = vpop.f32.mrb[6].mxu1 }
 0x58f   : > { %v10675_v43 = vpop.f32.mrb[68].mxu0  ;;  %v10683_v3 = vpop.f32.mrb[7].mxu1 }
 0x590   : > { %v10681_v31 = vpop.f32.mrb[69].mxu0  ;;  %v4165_v47 = vmax.f32 %v10679_v52, %v10683_v3  ;;  %v4161_v16 = vmax.f32 %v4160_v39, %v10675_v43 }
 0x591   : > { %v10685_v11 = vpop.f32.mrb[70].mxu0 }
 0x592   : > { %v10690_v44 = vpop.f32.mrb[71].mxu0  ;;  %v4162_v19 = vmax.f32 %v4161_v16, %v10681_v31  ;;  %v4166_v63 = vmax.f32 %v4165_v47, %v10685_v11 }
 0x594   : > { %4163 = vmax.xlane.f32.xlu0 %v4162_v19  ;;  %v10694_v18 = vpop.f32.mrb[8].mxu1  ;;  %v4167_v48 = vmax.f32 %v4166_v63, %v10690_v44 }
 0x595   : > { %v10697_v50 = vpop.f32.mrb[9].mxu1 }
 0x596   : > { %v4170_v4 = vmax.f32 %v10694_v18, %v10697_v50  ;;  %4168 = vmax.xlane.f32.xlu1 %v4167_v48  ;;  %v10703_v39 = vpop.f32.mrb[10].mxu1 }
 0x597   : > { %v10699_v59 = vpop.f32.mrb[72].mxu0  ;;  %v10707_v16 = vpop.f32.mrb[11].mxu1 }
 0x598   : > { %v10705_v36 = vpop.f32.mrb[73].mxu0  ;;  %v4175_v19 = vmax.f32 %v10703_v39, %v10707_v16  ;;  %v4171_v63 = vmax.f32 %v4170_v4, %v10699_v59 }
 0x599   : > { %v10709_v47 = vpop.f32.mrb[74].mxu0 }
 0x59a   : > { %v10714_v24 = vpop.f32.mrb[75].mxu0  ;;  %v4172_v14 = vmax.f32 %v4171_v63, %v10705_v36  ;;  %v4176_v8 = vmax.f32 %v4175_v19, %v10709_v47 }
 0x59c   : > { %4173 = vmax.xlane.f32.xlu0 %v4172_v14  ;;  %v10718_v48 = vpop.f32.mrb[12].mxu1  ;;  %v4177_v45 = vmax.f32 %v4176_v8, %v10714_v24 }
 0x59d   : > { %v10721_v38 = vpop.f32.mrb[13].mxu1 }
 0x59e   : > { %v4180_v12 = vmax.f32 %v10718_v48, %v10721_v38  ;;  %4178 = vmax.xlane.f32.xlu1 %v4177_v45  ;;  %v10727_v4 = vpop.f32.mrb[14].mxu1 }
 0x59f   : > { %v10723_v54 = vpop.f32.mrb[76].mxu0  ;;  %v10731_v63 = vpop.f32.mrb[15].mxu1 }
 0x5a0   : > { %v10729_v6 = vpop.f32.mrb[77].mxu0  ;;  %v4185_v14 = vmax.f32 %v10727_v4, %v10731_v63  ;;  %v4181_v8 = vmax.f32 %v4180_v12, %v10723_v54 }
 0x5a1   : > { %v10733_v19 = vpop.f32.mrb[78].mxu0 }
 0x5a2   : > { %v10738_v34 = vpop.f32.mrb[79].mxu0  ;;  %v4182_v25 = vmax.f32 %v4181_v8, %v10729_v6  ;;  %v4186_v27 = vmax.f32 %v4185_v14, %v10733_v19 }
 0x5a4   : > { %4183 = vmax.xlane.f32.xlu0 %v4182_v25  ;;  %v10742_v45 = vpop.f32.mrb[16].mxu1  ;;  %v4187_v33 = vmax.f32 %v4186_v27, %v10738_v34 }
 0x5a5   : > { %v10745_v20 = vpop.f32.mrb[17].mxu1 }
 0x5a6   : > { %v4190_v30 = vmax.f32 %v10742_v45, %v10745_v20  ;;  %4188 = vmax.xlane.f32.xlu1 %v4187_v33  ;;  %v10751_v12 = vpop.f32.mrb[18].mxu1 }
 0x5a7   : > { %v10747_v22 = vpop.f32.mrb[80].mxu0  ;;  %v10755_v8 = vpop.f32.mrb[19].mxu1 }
 0x5a8   : > { %v10753_v62 = vpop.f32.mrb[81].mxu0  ;;  %v4195_v25 = vmax.f32 %v10751_v12, %v10755_v8  ;;  %v4191_v27 = vmax.f32 %v4190_v30, %v10747_v22 }
 0x5a9   : > { %v10757_v14 = vpop.f32.mrb[82].mxu0 }
 0x5aa   : > { %v10762_v55 = vpop.f32.mrb[83].mxu0  ;;  %v4192_v15 = vmax.f32 %v4191_v27, %v10753_v62  ;;  %v4196_v26 = vmax.f32 %v4195_v25, %v10757_v14 }
 0x5ac   : > { %4193 = vmax.xlane.f32.xlu0 %v4192_v15  ;;  %v10766_v33 = vpop.f32.mrb[20].mxu1  ;;  %v4197_v53 = vmax.f32 %v4196_v26, %v10762_v55 }
 0x5ad   : > { %v10769_v58 = vpop.f32.mrb[21].mxu1 }
 0x5ae   : > { %v4200_v51 = vmax.f32 %v10766_v33, %v10769_v58  ;;  %4198 = vmax.xlane.f32.xlu1 %v4197_v53  ;;  %v10775_v30 = vpop.f32.mrb[22].mxu1 }
 0x5af   : > { %v10771_v1 = vpop.f32.mrb[84].mxu0  ;;  %v10779_v27 = vpop.f32.mrb[23].mxu1 }
 0x5b0   : > { %v10777_v37 = vpop.f32.mrb[85].mxu0  ;;  %12866 = vst [vmem:[#allocation177_spill] sm:$0xff] %v10779_v27  ;;  %v4205_v15 = vmax.f32 %v10775_v30, %v10779_v27  ;;  %v4201_v26 = vmax.f32 %v4200_v51, %v10771_v1 }
 0x5b1   : > { %v10781_v25 = vpop.f32.mrb[86].mxu0 }
 0x5b2   : > { %12867 = vst [vmem:[#allocation220_spill] sm:$0xff] %v10781_v25  ;;  %v10786_v5 = vpop.f32.mrb[87].mxu0  ;;  %v4202_v9 = vmax.f32 %v4201_v26, %v10777_v37  ;;  %v4206_v13 = vmax.f32 %v4205_v15, %v10781_v25 }
 0x5b3   : > { %12868 = vst [vmem:[#allocation36_spill] sm:$0xff] %v10786_v5 }
 0x5b4   : > { %4203 = vmax.xlane.f32.xlu0 %v4202_v9  ;;  %v10790_v53 = vpop.f32.mrb[24].mxu1  ;;  %v4207_v61 = vmax.f32 %v4206_v13, %v10786_v5 }
 0x5b5   : > { %12869 = vst [vmem:[#allocation35_spill] sm:$0xff] %v10790_v53  ;;  %v10793_v32 = vpop.f32.mrb[25].mxu1 }
 0x5b6   : > { %12870 = vst [vmem:[#allocation62_spill] sm:$0xff] %v10793_v32  ;;  %v4210_v2 = vmax.f32 %v10790_v53, %v10793_v32  ;;  %4208 = vmax.xlane.f32.xlu1 %v4207_v61  ;;  %v10799_v51 = vpop.f32.mrb[26].mxu1 }
 0x5b7   : > { %v10795_v56 = vpop.f32.mrb[88].mxu0  ;;  %12872 = vst [vmem:[#allocation88_spill] sm:$0xff] %v10799_v51  ;;  %v10803_v26 = vpop.f32.mrb[27].mxu1 }
 0x5b8   : > { %12871 = vst [vmem:[#allocation61_spill] sm:$0xff] %v10795_v56  ;;  %v10801_v41 = vpop.f32.mrb[89].mxu0  ;;  %12874 = vst [vmem:[#allocation221_spill] sm:$0xff] %v10803_v26  ;;  %v4215_v9 = vmax.f32 %v10799_v51, %v10803_v26  ;;  %v4211_v13 = vmax.f32 %v4210_v2, %v10795_v56 }
 0x5b9   : > { %12873 = vst [vmem:[#allocation86_spill] sm:$0xff] %v10801_v41  ;;  %v10805_v15 = vpop.f32.mrb[90].mxu0 }
 0x5ba   : > { %12875 = vst [vmem:[#allocation122_spill] sm:$0xff] %v10805_v15  ;;  %v10810_v57 = vpop.f32.mrb[91].mxu0  ;;  %v4212_v28 = vmax.f32 %v4211_v13, %v10801_v41  ;;  %v4216_v32 = vmax.f32 %v4215_v9, %v10805_v15 }
 0x5bb   : > { %12876 = vst [vmem:[#allocation120_spill] sm:$0xff] %v10810_v57 }
 0x5bc   : > { %4213 = vmax.xlane.f32.xlu0 %v4212_v28  ;;  %v10814_v61 = vpop.f32.mrb[28].mxu1  ;;  %v4217_v53 = vmax.f32 %v4216_v32, %v10810_v57 }
 0x5bd   : > { %12877 = vst [vmem:[#allocation178_spill] sm:$0xff] %v10814_v61  ;;  %v10817_v5 = vpop.f32.mrb[29].mxu1 }
 0x5be   : > { %12878 = vst [vmem:[#allocation179_spill] sm:$0xff] %v10817_v5  ;;  %v4220_v26 = vmax.f32 %v10814_v61, %v10817_v5  ;;  %4218 = vmax.xlane.f32.xlu1 %v4217_v53  ;;  %v10823_v2 = vpop.f32.mrb[30].mxu1 }
 0x5bf   : > { %v10819_v25 = vpop.f32.mrb[92].mxu0  ;;  %12880 = vst [vmem:[#allocation38_spill] sm:$0xff] %v10823_v2  ;;  %v10827_v13 = vpop.f32.mrb[31].mxu1 }
 0x5c0   : > { %12879 = vst [vmem:[#allocation39_spill] sm:$0xff] %v10819_v25  ;;  %v10825_v51 = vpop.f32.mrb[93].mxu0  ;;  %12882 = vst [vmem:[#allocation65_spill] sm:$0xff] %v10827_v13  ;;  %v4225_v28 = vmax.f32 %v10823_v2, %v10827_v13  ;;  %v4221_v32 = vmax.f32 %v4220_v26, %v10819_v25 }
 0x5c1   : > { %12881 = vst [vmem:[#allocation222_spill] sm:$0xff] %v10825_v51  ;;  %v10829_v9 = vpop.f32.mrb[94].mxu0 }
 0x5c2   : > { %12883 = vst [vmem:[#allocation64_spill] sm:$0xff] %v10829_v9  ;;  %v10834_v57 = vpop.f32.mrb[95].mxu0  ;;  %v4222_v15 = vmax.f32 %v4221_v32, %v10825_v51  ;;  %v4226_v5 = vmax.f32 %v4225_v28, %v10829_v9 }
 0x5c3   : > { %12884 = vst [vmem:[#allocation92_spill] sm:$0xff] %v10834_v57 }
 0x5c4   : > { %4223 = vmax.xlane.f32.xlu0 %v4222_v15  ;;  %v10838_v53 = vpop.f32.mrb[32].mxu1  ;;  %v4227_v61 = vmax.f32 %v4226_v5, %v10834_v57 }
 0x5c5   : > { %12885 = vst [vmem:[#allocation90_spill] sm:$0xff] %v10838_v53  ;;  %v10841_v41 = vpop.f32.mrb[33].mxu1 }
 0x5c6   : > { %12886 = vst [vmem:[#allocation223_spill] sm:$0xff] %v10841_v41  ;;  %v4230_v13 = vmax.f32 %v10838_v53, %v10841_v41  ;;  %4228 = vmax.xlane.f32.xlu1 %v4227_v61  ;;  %v10847_v26 = vpop.f32.mrb[34].mxu1 }
 0x5c7   : > { %v10843_v56 = vpop.f32.mrb[96].mxu0  ;;  %12888 = vst [vmem:[#allocation124_spill] sm:$0xff] %v10847_v26  ;;  %v10851_v32 = vpop.f32.mrb[35].mxu1 }
 0x5c8   : > { %12887 = vst [vmem:[#allocation126_spill] sm:$0xff] %v10843_v56  ;;  %v10849_v2 = vpop.f32.mrb[97].mxu0  ;;  %12890 = vst [vmem:[#allocation181_spill] sm:$0xff] %v10851_v32  ;;  %v4235_v15 = vmax.f32 %v10847_v26, %v10851_v32  ;;  %v4231_v5 = vmax.f32 %v4230_v13, %v10843_v56 }
 0x5c9   : > { %12889 = vst [vmem:[#allocation180_spill] sm:$0xff] %v10849_v2  ;;  %v10853_v28 = vpop.f32.mrb[98].mxu0 }
 0x5ca   : > { %12891 = vst [vmem:[#allocation224_spill] sm:$0xff] %v10853_v28  ;;  %v10858_v57 = vpop.f32.mrb[99].mxu0  ;;  %v4232_v9 = vmax.f32 %v4231_v5, %v10849_v2  ;;  %v4236_v41 = vmax.f32 %v4235_v15, %v10853_v28 }
 0x5cb   : > { %12892 = vst [vmem:[#allocation42_spill] sm:$0xff] %v10858_v57 }
 0x5cc   : > { %4233 = vmax.xlane.f32.xlu0 %v4232_v9  ;;  %v10862_v61 = vpop.f32.mrb[36].mxu1  ;;  %v4237_v53 = vmax.f32 %v4236_v41, %v10858_v57 }
 0x5cd   : > { %12893 = vst [vmem:[#allocation41_spill] sm:$0xff] %v10862_v61  ;;  %v10865_v51 = vpop.f32.mrb[37].mxu1 }
 0x5ce   : > { %12894 = vst [vmem:[#allocation68_spill] sm:$0xff] %v10865_v51  ;;  %v4240_v32 = vmax.f32 %v10862_v61, %v10865_v51  ;;  %4238 = vmax.xlane.f32.xlu1 %v4237_v53  ;;  %v10871_v13 = vpop.f32.mrb[38].mxu1 }
 0x5cf   : > { %v10867_v25 = vpop.f32.mrb[100].mxu0  ;;  %12896 = vst [vmem:[#allocation96_spill] sm:$0xff] %v10871_v13  ;;  %v10875_v5 = vpop.f32.mrb[39].mxu1 }
 0x5d0   : > { %12895 = vst [vmem:[#allocation67_spill] sm:$0xff] %v10867_v25  ;;  %v10873_v26 = vpop.f32.mrb[101].mxu0  ;;  %12898 = vst [vmem:[#allocation225_spill] sm:$0xff] %v10875_v5  ;;  %v4245_v9 = vmax.f32 %v10871_v13, %v10875_v5  ;;  %v4241_v41 = vmax.f32 %v4240_v32, %v10867_v25 }
 0x5d1   : > { %12897 = vst [vmem:[#allocation94_spill] sm:$0xff] %v10873_v26  ;;  %v10877_v15 = vpop.f32.mrb[102].mxu0 }
 0x5d2   : > { %12899 = vst [vmem:[#allocation131_spill] sm:$0xff] %v10877_v15  ;;  %v10882_v57 = vpop.f32.mrb[103].mxu0  ;;  %v4242_v28 = vmax.f32 %v4241_v41, %v10873_v26  ;;  %v4246_v51 = vmax.f32 %v4245_v9, %v10877_v15 }
 0x5d3   : > { %12900 = vst [vmem:[#allocation128_spill] sm:$0xff] %v10882_v57 }
 0x5d4   : > { %4243 = vmax.xlane.f32.xlu0 %v4242_v28  ;;  %v10886_v53 = vpop.f32.mrb[40].mxu1  ;;  %v4247_v61 = vmax.f32 %v4246_v51, %v10882_v57 }
 0x5d5   : > { %12901 = vst [vmem:[#allocation182_spill] sm:$0xff] %v10886_v53  ;;  %v10889_v2 = vpop.f32.mrb[41].mxu1 }
 0x5d6   : > { %12902 = vst [vmem:[#allocation183_spill] sm:$0xff] %v10889_v2  ;;  %v4250_v5 = vmax.f32 %v10886_v53, %v10889_v2  ;;  %4248 = vmax.xlane.f32.xlu1 %v4247_v61  ;;  %v10895_v32 = vpop.f32.mrb[42].mxu1 }
 0x5d7   : > { %v10891_v56 = vpop.f32.mrb[104].mxu0  ;;  %12904 = vst [vmem:[#allocation46_spill] sm:$0xff] %v10895_v32  ;;  %v10899_v41 = vpop.f32.mrb[43].mxu1 }
 0x5d8   : > { %12903 = vst [vmem:[#allocation226_spill] sm:$0xff] %v10891_v56  ;;  %v10897_v13 = vpop.f32.mrb[105].mxu0  ;;  %12906 = vst [vmem:[#allocation103_spill] sm:$0xff] %v10899_v41  ;;  %v4255_v28 = vmax.f32 %v10895_v32, %v10899_v41  ;;  %v4251_v51 = vmax.f32 %v4250_v5, %v10891_v56 }
 0x5d9   : > { %12905 = vst [vmem:[#allocation45_spill] sm:$0xff] %v10897_v13  ;;  %v10901_v9 = vpop.f32.mrb[106].mxu0 }
 0x5da   : > { %12907 = vst [vmem:[#allocation102_spill] sm:$0xff] %v10901_v9  ;;  %v10906_v57 = vpop.f32.mrb[107].mxu0  ;;  %v4252_v15 = vmax.f32 %v4251_v51, %v10897_v13  ;;  %v4256_v2 = vmax.f32 %v4255_v28, %v10901_v9 }
 0x5db   : > { %12908 = vst [vmem:[#allocation184_spill] sm:$0xff] %v10906_v57 }
 0x5dc   : > { %4253 = vmax.xlane.f32.xlu0 %v4252_v15  ;;  %v10910_v61 = vpop.f32.mrb[44].mxu1  ;;  %v4257_v53 = vmax.f32 %v4256_v2, %v10906_v57 }
 0x5dd   : > { %12909 = vst [vmem:[#allocation227_spill] sm:$0xff] %v10910_v61  ;;  %v10913_v26 = vpop.f32.mrb[45].mxu1 }
 0x5de   : > { %12910 = vst [vmem:[#allocation100_spill] sm:$0xff] %v10913_v26  ;;  %v4260_v41 = vmax.f32 %v10910_v61, %v10913_v26  ;;  %4258 = vmax.xlane.f32.xlu1 %v4257_v53  ;;  %v10919_v5 = vpop.f32.mrb[46].mxu1 }
 0x5df   : > { %v10915_v25 = vpop.f32.mrb[108].mxu0  ;;  %12912 = vst [vmem:[#allocation228_spill] sm:$0xff] %v10919_v5  ;;  %v10923_v51 = vpop.f32.mrb[47].mxu1 }
 0x5e0   : > { %12911 = vst [vmem:[#allocation98_spill] sm:$0xff] %v10915_v25  ;;  %v10921_v32 = vpop.f32.mrb[109].mxu0  ;;  %12914 = vst [vmem:[#allocation147_spill] sm:$0xff] %v10923_v51  ;;  %v4265_v15 = vmax.f32 %v10919_v5, %v10923_v51  ;;  %v4261_v2 = vmax.f32 %v4260_v41, %v10915_v25 }
 0x5e1   : > { %12913 = vst [vmem:[#allocation148_spill] sm:$0xff] %v10921_v32  ;;  %v10925_v28 = vpop.f32.mrb[110].mxu0 }
 0x5e2   : > { %12915 = vst [vmem:[#allocation185_spill] sm:$0xff] %v10925_v28  ;;  %v10930_v57 = vpop.f32.mrb[111].mxu0  ;;  %v4262_v9 = vmax.f32 %v4261_v2, %v10921_v32  ;;  %v4266_v26 = vmax.f32 %v4265_v15, %v10925_v28 }
 0x5e3   : > { %12916 = vst [vmem:[#allocation186_spill] sm:$0xff] %v10930_v57 }
 0x5e4   : > { %4263 = vmax.xlane.f32.xlu0 %v4262_v9  ;;  %v10934_v53 = vpop.f32.mrb[48].mxu1  ;;  %v4267_v61 = vmax.f32 %v4266_v26, %v10930_v57 }
 0x5e5   : > { %12917 = vst [vmem:[#allocation229_spill] sm:$0xff] %v10934_v53  ;;  %v10937_v13 = vpop.f32.mrb[49].mxu1 }
 0x5e6   : > { %12918 = vst [vmem:[#allocation230_spill] sm:$0xff] %v10937_v13  ;;  %v4270_v51 = vmax.f32 %v10934_v53, %v10937_v13  ;;  %4268 = vmax.xlane.f32.xlu1 %v4267_v61  ;;  %v10943_v41 = vpop.f32.mrb[50].mxu1 }
 0x5e7   : > { %v10939_v56 = vpop.f32.mrb[112].mxu0  ;;  %12920 = vst [vmem:[#allocation188_spill] sm:$0xff] %v10943_v41  ;;  %v10947_v2 = vpop.f32.mrb[51].mxu1 }
 0x5e8   : > { %12919 = vst [vmem:[#allocation187_spill] sm:$0xff] %v10939_v56  ;;  %v10945_v5 = vpop.f32.mrb[113].mxu0  ;;  %12922 = vst [vmem:[#allocation232_spill] sm:$0xff] %v10947_v2  ;;  %v4275_v9 = vmax.f32 %v10943_v41, %v10947_v2  ;;  %v4271_v26 = vmax.f32 %v4270_v51, %v10939_v56 }
 0x5e9   : > { %12921 = vst [vmem:[#allocation231_spill] sm:$0xff] %v10945_v5  ;;  %v10949_v15 = vpop.f32.mrb[114].mxu0 }
 0x5ea   : > { %12923 = vst [vmem:[#allocation189_spill] sm:$0xff] %v10949_v15  ;;  %v10954_v57 = vpop.f32.mrb[115].mxu0  ;;  %v4272_v28 = vmax.f32 %v4271_v26, %v10945_v5  ;;  %v4276_v13 = vmax.f32 %v4275_v9, %v10949_v15 }
 0x5eb   : > { %12924 = vst [vmem:[#allocation190_spill] sm:$0xff] %v10954_v57 }
 0x5ec   : > { %4273 = vmax.xlane.f32.xlu0 %v4272_v28  ;;  %v10958_v61 = vpop.f32.mrb[52].mxu1  ;;  %v4277_v53 = vmax.f32 %v4276_v13, %v10954_v57 }
 0x5ed   : > { %12925 = vst [vmem:[#allocation233_spill] sm:$0xff] %v10958_v61  ;;  %v10961_v32 = vpop.f32.mrb[53].mxu1 }
 0x5ee   : > { %12926 = vst [vmem:[#allocation191_spill] sm:$0xff] %v10961_v32  ;;  %v4280_v2 = vmax.f32 %v10958_v61, %v10961_v32  ;;  %4278 = vmax.xlane.f32.xlu1 %v4277_v53  ;;  %v10967_v51 = vpop.f32.mrb[54].mxu1 }
 0x5ef   : > { %v10963_v25 = vpop.f32.mrb[116].mxu0  ;;  %12928 = vst [vmem:[#allocation235_spill] sm:$0xff] %v10967_v51  ;;  %v10971_v26 = vpop.f32.mrb[55].mxu1 }
 0x5f0   : > { %12927 = vst [vmem:[#allocation192_spill] sm:$0xff] %v10963_v25  ;;  %v10969_v41 = vpop.f32.mrb[117].mxu0  ;;  %12930 = vst [vmem:[#allocation236_spill] sm:$0xff] %v10971_v26  ;;  %v4285_v28 = vmax.f32 %v10967_v51, %v10971_v26  ;;  %v4281_v13 = vmax.f32 %v4280_v2, %v10963_v25 }
 0x5f1   : > { %12929 = vst [vmem:[#allocation234_spill] sm:$0xff] %v10969_v41  ;;  %v10973_v9 = vpop.f32.mrb[118].mxu0 }
 0x5f2   : > { %12931 = vst [vmem:[#allocation193_spill] sm:$0xff] %v10973_v9  ;;  %v10978_v57 = vpop.f32.mrb[119].mxu0  ;;  %v4282_v15 = vmax.f32 %v4281_v13, %v10969_v41  ;;  %v4286_v32 = vmax.f32 %v4285_v28, %v10973_v9 }
 0x5f3   : > { %12932 = vst [vmem:[#allocation194_spill] sm:$0xff] %v10978_v57 }
 0x5f4   : > { %4283 = vmax.xlane.f32.xlu0 %v4282_v15  ;;  %v10982_v53 = vpop.f32.mrb[56].mxu1  ;;  %v4287_v61 = vmax.f32 %v4286_v32, %v10978_v57 }
 0x5f5   : > { %12933 = vst [vmem:[#allocation237_spill] sm:$0xff] %v10982_v53  ;;  %v10985_v5 = vpop.f32.mrb[57].mxu1 }
 0x5f6   : > { %12934 = vst [vmem:[#allocation238_spill] sm:$0xff] %v10985_v5  ;;  %v4290_v26 = vmax.f32 %v10982_v53, %v10985_v5  ;;  %4288 = vmax.xlane.f32.xlu1 %v4287_v61  ;;  %v10991_v2 = vpop.f32.mrb[58].mxu1 }
 0x5f7   : > { %v10987_v56 = vpop.f32.mrb[120].mxu0  ;;  %12936 = vst [vmem:[#allocation196_spill] sm:$0xff] %v10991_v2  ;;  %v10995_v13 = vpop.f32.mrb[59].mxu1 }
 0x5f8   : > { %12935 = vst [vmem:[#allocation195_spill] sm:$0xff] %v10987_v56  ;;  %v10993_v51 = vpop.f32.mrb[121].mxu0  ;;  %12938 = vst [vmem:[#allocation240_spill] sm:$0xff] %v10995_v13  ;;  %v4295_v15 = vmax.f32 %v10991_v2, %v10995_v13  ;;  %v4291_v32 = vmax.f32 %v4290_v26, %v10987_v56 }
 0x5f9   : > { %12937 = vst [vmem:[#allocation239_spill] sm:$0xff] %v10993_v51  ;;  %v10997_v28 = vpop.f32.mrb[122].mxu0 }
 0x5fa   : > { %12939 = vst [vmem:[#allocation197_spill] sm:$0xff] %v10997_v28  ;;  %v11002_v57 = vpop.f32.mrb[123].mxu0  ;;  %v4292_v9 = vmax.f32 %v4291_v32, %v10993_v51  ;;  %v4296_v5 = vmax.f32 %v4295_v15, %v10997_v28 }
 0x5fb   : > { %12940 = vst [vmem:[#allocation198_spill] sm:$0xff] %v11002_v57 }
 0x5fc   : > { %4293 = vmax.xlane.f32.xlu0 %v4292_v9  ;;  %v11006_v61 = vpop.f32.mrb[60].mxu1  ;;  %v4297_v53 = vmax.f32 %v4296_v5, %v11002_v57 }
 0x5fd   : > { %12941 = vst [vmem:[#allocation241_spill] sm:$0xff] %v11006_v61  ;;  %v11009_v41 = vpop.f32.mrb[61].mxu1 }
 0x5fe   : > { %12942 = vst [vmem:[#allocation242_spill] sm:$0xff] %v11009_v41  ;;  %v4300_v13 = vmax.f32 %v11006_v61, %v11009_v41  ;;  %4298 = vmax.xlane.f32.xlu1 %v4297_v53  ;;  %v11015_v26 = vpop.f32.mrb[62].mxu1 }
 0x5ff   : > { %v11011_v25 = vpop.f32.mrb[124].mxu0  ;;  %12944 = vst [vmem:[#allocation200_spill] sm:$0xff] %v11015_v26  ;;  %v11019_v32 = vpop.f32.mrb[63].mxu1 }
 0x600   : > { %12943 = vst [vmem:[#allocation199_spill] sm:$0xff] %v11011_v25  ;;  %v11017_v2 = vpop.f32.mrb[125].mxu0  ;;  %12946 = vst [vmem:[#allocation244_spill] sm:$0xff] %v11019_v32  ;;  %v4305_v9 = vmax.f32 %v11015_v26, %v11019_v32  ;;  %v4301_v5 = vmax.f32 %v4300_v13, %v11011_v25 }
 0x601   : > { %12945 = vst [vmem:[#allocation243_spill] sm:$0xff] %v11017_v2  ;;  %v11021_v15 = vpop.f32.mrb[126].mxu0 }
 0x602   : > { %12947 = vst [vmem:[#allocation201_spill] sm:$0xff] %v11021_v15  ;;  %v11026_v57 = vpop.f32.mrb[127].mxu0  ;;  %v4302_v28 = vmax.f32 %v4301_v5, %v11017_v2  ;;  %v4306_v41 = vmax.f32 %v4305_v9, %v11021_v15 }
 0x603   : > { %12948 = vst [vmem:[#allocation202_spill] sm:$0xff] %v11026_v57 }
 0x604   : > { %4303 = vmax.xlane.f32.xlu0 %v4302_v28  ;;  %v4307_v53 = vmax.f32 %v4306_v41, %v11026_v57 }
 0x606   : > { %4308 = vmax.xlane.f32.xlu1 %v4307_v53 }
 0x619   : > { %v4154_v61 = vpop.xlane.xlu0 %4153 }
 0x61a   : > { %v4310_v51 = vsub.f32 %v10647_v21, %v4154_v61  ;;  %v4311_v56 = vsub.f32 %v10649_v42, %v4154_v61  ;;  %v4312_v27 = vsub.f32 %v10651_v23, %v4154_v61  ;;  %v4313_v32 = vsub.f32 %v10657_v29, %v4154_v61 }
 0x61b   : > { %v4159_v13 = vpop.xlane.xlu1 %4158 }
 0x61c   : > { %v4314_v26 = vsub.f32 %v10655_v0, %v4159_v13  ;;  %v4315_v5 = vsub.f32 %v10659_v17, %v4159_v13  ;;  %v4316_v9 = vsub.f32 %v10661_v40, %v4159_v13  ;;  %v4317_v28 = vsub.f32 %v10666_v7, %v4159_v13 }
 0x61e   : > { %v4438_v41 = vpack.c.bf16 %v4314_v26, %v4310_v51  ;;  %v4439_v53 = vpack.c.bf16 %v4315_v5, %v4311_v56  ;;  %v4440_v57 = vpack.c.bf16 %v4316_v9, %v4312_v27  ;;  %v4441_v15 = vpack.c.bf16 %v4317_v28, %v4313_v32 }
 0x620   : > { %v4503_v21 = vmul.bf16 1069105081, %v4438_v41  ;;  %v4506_v2 = vmul.bf16 1069105081, %v4439_v53  ;;  %v4509_v42 = vmul.bf16 1069105081, %v4440_v57 }
 0x621   : > { %v4512_v25 = vmul.bf16 1069105081, %v4441_v15  ;;  %v4164_v23 = vpop.xlane.xlu0 %4163 }
 0x622   : > { %7483 = vpow.bf16 %v4503_v21  ;;  %v4318_v29 = vsub.f32 %v10670_v49, %v4164_v23  ;;  %v4319_v0 = vsub.f32 %v10673_v46, %v4164_v23  ;;  %v4320_v17 = vsub.f32 %v10675_v43, %v4164_v23 }
 0x623   : > { %7485 = vpow.bf16 %v4506_v2  ;;  %v4169_v40 = vpop.xlane.xlu1 %4168  ;;  %v4321_v57 = vsub.f32 %v10681_v31, %v4164_v23 }
 0x624   : > { %7487 = vpow.bf16 %v4509_v42  ;;  %v4322_v7 = vsub.f32 %v10679_v52, %v4169_v40  ;;  %v4323_v56 = vsub.f32 %v10683_v3, %v4169_v40  ;;  %v4324_v27 = vsub.f32 %v10685_v11, %v4169_v40 }
 0x625   : > { %7489 = vpow.bf16 %v4512_v25  ;;  %v4325_v51 = vsub.f32 %v10690_v44, %v4169_v40 }
 0x626   : > { %v4442_v2 = vpack.c.bf16 %v4322_v7, %v4318_v29  ;;  %v4443_v61 = vpack.c.bf16 %v4323_v56, %v4319_v0  ;;  %v4444_v49 = vpack.c.bf16 %v4324_v27, %v4320_v17 }
 0x627   : > { %v4445_v26 = vpack.c.bf16 %v4325_v51, %v4321_v57 }
 0x628   : > { %v4515_v46 = vmul.bf16 1069105081, %v4442_v2  ;;  %v4518_v32 = vmul.bf16 1069105081, %v4443_v61  ;;  %v4521_v43 = vmul.bf16 1069105081, %v4444_v49 }
 0x629   : > { %v4524_v15 = vmul.bf16 1069105081, %v4445_v26  ;;  %v4174_v13 = vpop.xlane.xlu0 %4173 }
 0x62a   : > { %7491 = vpow.bf16 %v4515_v46  ;;  %v4326_v52 = vsub.f32 %v10694_v18, %v4174_v13  ;;  %v4327_v3 = vsub.f32 %v10697_v50, %v4174_v13  ;;  %v4328_v11 = vsub.f32 %v10699_v59, %v4174_v13 }
 0x62b   : > { %7493 = vpow.bf16 %v4518_v32  ;;  %v4179_v31 = vpop.xlane.xlu1 %4178  ;;  %v4329_v28 = vsub.f32 %v10705_v36, %v4174_v13 }
 0x62c   : > { %7495 = vpow.bf16 %v4521_v43  ;;  %v4330_v44 = vsub.f32 %v10703_v39, %v4179_v31  ;;  %v4331_v25 = vsub.f32 %v10707_v16, %v4179_v31  ;;  %v4332_v5 = vsub.f32 %v10709_v47, %v4179_v31 }
 0x62d   : > { %v7484_v9 = vpop.eup %7483  ;;  %7497 = vpow.bf16 %v4524_v15  ;;  %v4333_v41 = vsub.f32 %v10714_v24, %v4179_v31 }
 0x62e   : > { %v7486_v53 = vpop.eup %7485  ;;  %v4446_v18 = vpack.c.bf16 %v4330_v44, %v4326_v52  ;;  %v4447_v21 = vpack.c.bf16 %v4331_v25, %v4327_v3  ;;  %v4448_v50 = vpack.c.bf16 %v4332_v5, %v4328_v11  ;;  %v4694_v42 = vunpack.c.l.bf16 %v7484_v9 }
 0x62f   : > { %v7488_v59 = vpop.eup %7487  ;;  %v4449_v23 = vpack.c.bf16 %v4333_v41, %v4329_v28  ;;  %5014 = vmatprep.mubr.bf16.mxu1 %v7486_v53  ;;  %v4695_v29 = vunpack.c.l.bf16 %v7486_v53  ;;  %v4698_v39 = vunpack.c.h.bf16 %v7484_v9  ;;  %v4699_v0 = vunpack.c.h.bf16 %v7486_v53 }
 0x630   : > { %v7490_v16 = vpop.eup %7489  ;;  %v4527_v17 = vmul.bf16 1069105081, %v4446_v18  ;;  %v4530_v47 = vmul.bf16 1069105081, %v4447_v21  ;;  %v4533_v40 = vmul.bf16 1069105081, %v4448_v50  ;;  %5015 = vmatmul.mubr.bf16.vlgmr.msra.gmra.mrb[64].mxu1 %v7484_v9  ;;  %v4696_v7 = vunpack.c.l.bf16 %v7488_v59 }
 0x631   : > { %v4536_v36 = vmul.bf16 1069105081, %v4449_v23  ;;  %5175 = vmatprep.mubr.bf16.mxu0 %v7490_v16  ;;  %v4184_v24 = vpop.xlane.xlu0 %4183  ;;  %v4697_v56 = vunpack.c.l.bf16 %v7490_v16  ;;  %v4822_v27 = vadd.f32 %v4695_v29, %v4694_v42  ;;  %v4700_v57 = vunpack.c.h.bf16 %v7488_v59 }
 0x632   : > { %7499 = vpow.bf16 %v4527_v17  ;;  %5176 = vmatmul.mubr.bf16.vlgmr.msra.gmra.mrb[128].mxu0 %v7488_v59  ;;  %v4334_v51 = vsub.f32 %v10718_v48, %v4184_v24  ;;  %v4335_v2 = vsub.f32 %v10721_v38, %v4184_v24  ;;  %v4336_v61 = vsub.f32 %v10723_v54, %v4184_v24 }
 0x633   : > { %7501 = vpow.bf16 %v4530_v47  ;;  %v4337_v49 = vsub.f32 %v10729_v6, %v4184_v24  ;;  %v4189_v26 = vpop.xlane.xlu1 %4188  ;;  %v4823_v46 = vadd.f32 %v4822_v27, %v4696_v7  ;;  %v4701_v32 = vunpack.c.h.bf16 %v7490_v16 }
 0x634   : > { %7503 = vpow.bf16 %v4533_v40  ;;  %v4338_v43 = vsub.f32 %v10727_v4, %v4189_v26  ;;  %v4339_v15 = vsub.f32 %v10731_v63, %v4189_v26  ;;  %v4340_v13 = vsub.f32 %v10733_v19, %v4189_v26 }
 0x635   : > { %v7492_v52 = vpop.eup %7491  ;;  %7505 = vpow.bf16 %v4536_v36  ;;  %v4341_v48 = vsub.f32 %v10738_v34, %v4189_v26  ;;  %v4824_v38 = vadd.f32 %v4823_v46, %v4697_v56  ;;  %v4827_v3 = vadd.f32 %v4699_v0, %v4698_v39 }
 0x636   : > { %v7494_v54 = vpop.eup %7493  ;;  %v4450_v11 = vpack.c.bf16 %v4338_v43, %v4334_v51  ;;  %v4451_v31 = vpack.c.bf16 %v4339_v15, %v4335_v2  ;;  %v4452_v6 = vpack.c.bf16 %v4340_v13, %v4336_v61  ;;  %v4702_v44 = vunpack.c.l.bf16 %v7492_v52 }
 0x637   : > { %v7496_v25 = vpop.eup %7495  ;;  %v4453_v5 = vpack.c.bf16 %v4341_v48, %v4337_v49  ;;  %5022 = vmatprep.mubr.bf16.mxu1 %v7494_v54  ;;  %4825 = vadd.xlane.f32.xlu0 %v4824_v38  ;;  %v4828_v4 = vadd.f32 %v4827_v3, %v4700_v57  ;;  %v4703_v9 = vunpack.c.l.bf16 %v7494_v54  ;;  %v4706_v63 = vunpack.c.h.bf16 %v7492_v52 }
 0x638   : > { %v11063_v28 = vpop.eup %7497  ;;  %v4539_v19 = vmul.bf16 1069105081, %v4450_v11  ;;  %v4542_v41 = vmul.bf16 1069105081, %v4451_v31  ;;  %v4545_v53 = vmul.bf16 1069105081, %v4452_v6  ;;  %5023 = vmatmul.mubr.bf16.gmra.mrb[68].mxu1 %v7492_v52  ;;  %v4704_v34 = vunpack.c.l.bf16 %v7496_v25 }
 0x639   : > { %v4548_v18 = vmul.bf16 1069105081, %v4453_v5  ;;  %5183 = vmatprep.mubr.bf16.mxu0 %v11063_v28  ;;  %v4829_v21 = vadd.f32 %v4828_v4, %v4701_v32  ;;  %v4194_v50 = vpop.xlane.xlu0 %4193  ;;  %v4705_v42 = vunpack.c.l.bf16 %v11063_v28  ;;  %v4832_v59 = vadd.f32 %v4703_v9, %v4702_v44  ;;  %v12949_v44 = vld [vmem:[#allocation177_spill] sm:$0xff]  ;;  %v12950_v5 = vld [vmem:[#allocation220_spill] sm:$0xff] }
 0x63a   : > { %7507 = vpow.bf16 %v4539_v19  ;;  %5184 = vmatmul.mubr.bf16.gmra.mrb[132].mxu0 %v7496_v25  ;;  %v4342_v23 = vsub.f32 %v10742_v45, %v4194_v50  ;;  %v4343_v29 = vsub.f32 %v10745_v20, %v4194_v50  ;;  %v4344_v39 = vsub.f32 %v10747_v22, %v4194_v50 }
 0x63b   : > { %7509 = vpow.bf16 %v4542_v41  ;;  %4830 = vadd.xlane.f32.xlu1 %v4829_v21  ;;  %v4345_v0 = vsub.f32 %v10753_v62, %v4194_v50  ;;  %3125 = vadd.xlane.f32.xlu0 %v9940_v35  ;;  %v4199_v16 = vpop.xlane.xlu1 %4198  ;;  %v4833_v17 = vadd.f32 %v4832_v59, %v4704_v34  ;;  %v4707_v47 = vunpack.c.h.bf16 %v7494_v54 }
 0x63c   : > { %7511 = vpow.bf16 %v4545_v53  ;;  %v4346_v40 = vsub.f32 %v10751_v12, %v4199_v16  ;;  %v4347_v7 = vsub.f32 %v10755_v8, %v4199_v16  ;;  %v4348_v45 = vsub.f32 %v10757_v14, %v4199_v16 }
 0x63d   : > { %v11075_v36 = vpop.eup %7499  ;;  %7513 = vpow.bf16 %v4548_v18  ;;  %v4349_v22 = vsub.f32 %v10762_v55, %v4199_v16  ;;  %v4834_v20 = vadd.f32 %v4833_v17, %v4705_v42  ;;  %v4708_v24 = vunpack.c.h.bf16 %v7496_v25 }
 0x63e   : > { %v11078_v62 = vpop.eup %7501  ;;  %v4454_v35 = vpack.c.bf16 %v4346_v40, %v4342_v23  ;;  %v4455_v56 = vpack.c.bf16 %v4347_v7, %v4343_v29  ;;  %v4456_v27 = vpack.c.bf16 %v4348_v45, %v4344_v39  ;;  %v4709_v57 = vunpack.c.h.bf16 %v11063_v28  ;;  %v12952_v39 = vld [vmem:[#allocation153_spill] sm:$0xff]  ;;  %v12953_v45 = vld [vmem:[#allocation35_spill] sm:$0xff] }
 0x63f   : > { %v11081_v51 = vpop.eup %7503  ;;  %3130 = vadd.xlane.f32.xlu1 %v9953_v60  ;;  %v4457_v12 = vpack.c.bf16 %v4349_v22, %v4345_v0  ;;  %5030 = vmatprep.mubr.bf16.mxu1 %v11078_v62  ;;  %v4837_v8 = vadd.f32 %v4707_v47, %v4706_v63  ;;  %v4710_v14 = vunpack.c.l.bf16 %v11075_v36  ;;  %v4711_v55 = vunpack.c.l.bf16 %v11078_v62  ;;  %v12954_v22 = vld [vmem:[#allocation62_spill] sm:$0xff] }
 0x640   : > { %v11087_v2 = vpop.eup %7505  ;;  %v4551_v61 = vmul.bf16 1069105081, %v4454_v35  ;;  %v4554_v49 = vmul.bf16 1069105081, %v4455_v56  ;;  %v4557_v26 = vmul.bf16 1069105081, %v4456_v27  ;;  %4835 = vadd.xlane.f32.xlu0 %v4834_v20  ;;  %5031 = vmatmul.mubr.bf16.gmra.mrb[72].mxu1 %v11075_v36  ;;  %v4712_v46 = vunpack.c.l.bf16 %v11081_v51 }
 0x641   : > { %v4560_v32 = vmul.bf16 1069105081, %v4457_v12  ;;  %5191 = vmatprep.mubr.bf16.mxu0 %v11087_v2  ;;  %v4838_v60 = vadd.f32 %v4837_v8, %v4708_v24  ;;  %v4204_v43 = vpop.xlane.xlu0 %4203  ;;  %v4713_v15 = vunpack.c.l.bf16 %v11087_v2  ;;  %v4842_v13 = vadd.f32 %v4711_v55, %v4710_v14  ;;  %v12955_v24 = vld [vmem:[#allocation61_spill] sm:$0xff]  ;;  %v12956_v35 = vld [vmem:[#allocation86_spill] sm:$0xff]  ;;  %v12957_v12 = vld [vmem:[#allocation155_spill] sm:$0xff] }
 0x642   : > { %7515 = vpow.bf16 %v4551_v61  ;;  %5192 = vmatmul.mubr.bf16.gmra.mrb[136].mxu0 %v11081_v51  ;;  %v4350_v52 = vsub.f32 %v10766_v33, %v4204_v43  ;;  %v4351_v48 = vsub.f32 %v10769_v58, %v4204_v43  ;;  %v4352_v38 = vsub.f32 %v10771_v1, %v4204_v43  ;;  %v12951_v1 = vld [vmem:[#allocation36_spill] sm:$0xff]  ;;  %v12959_v55 = vld [vmem:[#allocation221_spill] sm:$0xff] }
 0x643   : > { %7517 = vpow.bf16 %v4554_v49  ;;  %v4839_v3 = vadd.f32 %v4838_v60, %v4709_v57  ;;  %v4353_v54 = vsub.f32 %v10777_v37, %v4204_v43  ;;  %v4209_v11 = vpop.xlane.xlu1 %4208  ;;  %v4843_v31 = vadd.f32 %v4842_v13, %v4712_v46  ;;  %v12958_v8 = vld [vmem:[#allocation88_spill] sm:$0xff]  ;;  %v12960_v49 = vld [vmem:[#allocation122_spill] sm:$0xff] }
 0x644   : > { %7519 = vpow.bf16 %v4557_v26  ;;  %3135 = vadd.xlane.f32.xlu0 %v9983_v10  ;;  %v4354_v6 = vsub.f32 %v10775_v30, %v4209_v11  ;;  %v4355_v25 = vsub.f32 %v12949_v44, %v4209_v11  ;;  %v4356_v4 = vsub.f32 %v12950_v5, %v4209_v11  ;;  %v12961_v46 = vld [vmem:[#allocation120_spill] sm:$0xff] }
 0x645   : > { %v11102_v33 = vpop.eup %7507  ;;  %7521 = vpow.bf16 %v4560_v32  ;;  %4840 = vadd.xlane.f32.xlu1 %v4839_v3  ;;  %v4357_v58 = vsub.f32 %v12951_v1, %v4209_v11  ;;  %v4844_v9 = vadd.f32 %v4843_v31, %v4713_v15  ;;  %v4714_v37 = vunpack.c.h.bf16 %v11075_v36 }
 0x646   : > { %v7510_v63 = vpop.eup %7509  ;;  %v4458_v28 = vpack.c.bf16 %v4354_v6, %v4350_v52  ;;  %v4459_v19 = vpack.c.bf16 %v4355_v25, %v4351_v48  ;;  %v4460_v41 = vpack.c.bf16 %v4356_v4, %v4352_v38  ;;  %v4715_v10 = vunpack.c.h.bf16 %v11078_v62 }
 0x647   : > { %v11107_v30 = vpop.eup %7511  ;;  %v4461_v53 = vpack.c.bf16 %v4357_v58, %v4353_v54  ;;  %5038 = vmatprep.mubr.bf16.mxu1 %v7510_v63  ;;  %v4716_v34 = vunpack.c.h.bf16 %v11081_v51  ;;  %v4717_v18 = vunpack.c.h.bf16 %v11087_v2  ;;  %v4718_v21 = vunpack.c.l.bf16 %v11102_v33 }
 0x648   : > { %v11112_v50 = vpop.eup %7513  ;;  %v4563_v42 = vmul.bf16 1069105081, %v4458_v28  ;;  %v4566_v59 = vmul.bf16 1069105081, %v4459_v19  ;;  %v4569_v23 = vmul.bf16 1069105081, %v4460_v41  ;;  %4845 = vadd.xlane.f32.xlu0 %v4844_v9  ;;  %v4847_v29 = vadd.f32 %v4715_v10, %v4714_v37  ;;  %5039 = vmatmul.mubr.bf16.gmra.mrb[76].mxu1 %v11102_v33 }
 0x649   : > { %3140 = vadd.xlane.f32.xlu1 %v12952_v39  ;;  %v4572_v0 = vmul.bf16 1069105081, %v4461_v53  ;;  %5199 = vmatprep.mubr.bf16.mxu0 %v11112_v50  ;;  %v4214_v16 = vpop.xlane.xlu0 %4213  ;;  %v4719_v17 = vunpack.c.l.bf16 %v7510_v63  ;;  %v4720_v47 = vunpack.c.l.bf16 %v11107_v30  ;;  %v4721_v40 = vunpack.c.l.bf16 %v11112_v50  ;;  %v12963_v19 = vld [vmem:[#allocation178_spill] sm:$0xff]  ;;  %v12964_v10 = vld [vmem:[#allocation179_spill] sm:$0xff]  ;;  %v12968_v39 = vld [vmem:[#allocation65_spill] sm:$0xff] }
 0x64a   : > { %7523 = vpow.bf16 %v4563_v42  ;;  %v4848_v7 = vadd.f32 %v4847_v29, %v4716_v34  ;;  %5200 = vmatmul.mubr.bf16.gmra.mrb[140].mxu0 %v11107_v30  ;;  %v4358_v36 = vsub.f32 %v12953_v45, %v4214_v16  ;;  %v4359_v20 = vsub.f32 %v12954_v22, %v4214_v16  ;;  %v12965_v53 = vld [vmem:[#allocation39_spill] sm:$0xff] }
 0x64b   : > { %7525 = vpow.bf16 %v4566_v59  ;;  %v4360_v62 = vsub.f32 %v12955_v24, %v4214_v16  ;;  %v4361_v56 = vsub.f32 %v12956_v35, %v4214_v16  ;;  %v4219_v27 = vpop.xlane.xlu1 %4218  ;;  %v4852_v57 = vadd.f32 %v4719_v17, %v4718_v21  ;;  %v12969_v17 = vld [vmem:[#allocation206_spill] sm:$0xff] }
 0x64c   : > { %7527 = vpow.bf16 %v4569_v23  ;;  %v4849_v51 = vadd.f32 %v4848_v7, %v4717_v18  ;;  %3145 = vadd.xlane.f32.xlu0 %v12957_v12  ;;  %v4362_v14 = vsub.f32 %v12958_v8, %v4219_v27  ;;  %v4363_v2 = vsub.f32 %v12959_v55, %v4219_v27  ;;  %v12966_v18 = vld [vmem:[#allocation222_spill] sm:$0xff]  ;;  %v12971_v7 = vld [vmem:[#allocation92_spill] sm:$0xff] }
 0x64d   : > { %v11127_v61 = vpop.eup %7515  ;;  %7529 = vpow.bf16 %v4572_v0  ;;  %v4364_v26 = vsub.f32 %v12960_v49, %v4219_v27  ;;  %v4365_v32 = vsub.f32 %v12961_v46, %v4219_v27  ;;  %v4853_v60 = vadd.f32 %v4852_v57, %v4720_v47  ;;  %v12967_v23 = vld [vmem:[#allocation38_spill] sm:$0xff]  ;;  %v12970_v47 = vld [vmem:[#allocation64_spill] sm:$0xff] }
 0x64e   : > { %v11131_v43 = vpop.eup %7517  ;;  %4850 = vadd.xlane.f32.xlu1 %v4849_v51  ;;  %v4462_v15 = vpack.c.bf16 %v4362_v14, %v4358_v36  ;;  %v4463_v13 = vpack.c.bf16 %v4363_v2, %v4359_v20  ;;  %v4722_v52 = vunpack.c.h.bf16 %v11102_v33  ;;  %v4723_v48 = vunpack.c.h.bf16 %v7510_v63  ;;  %v12962_v63 = vld [vmem:[#allocation205_spill] sm:$0xff] }
 0x64f   : > { %v11134_v38 = vpop.eup %7519  ;;  %v4464_v3 = vpack.c.bf16 %v4364_v26, %v4360_v62  ;;  %v4465_v54 = vpack.c.bf16 %v4365_v32, %v4361_v56  ;;  %5046 = vmatprep.mubr.bf16.mxu1 %v11131_v43  ;;  %v4854_v11 = vadd.f32 %v4853_v60, %v4721_v40  ;;  %v4724_v31 = vunpack.c.h.bf16 %v11107_v30 }
 0x650   : > { %v11138_v6 = vpop.eup %7521  ;;  %v4575_v44 = vmul.bf16 1069105081, %v4462_v15  ;;  %v4578_v25 = vmul.bf16 1069105081, %v4463_v13  ;;  %v4725_v5 = vunpack.c.h.bf16 %v11112_v50  ;;  %v4857_v4 = vadd.f32 %v4723_v48, %v4722_v52  ;;  %5047 = vmatmul.mubr.bf16.gmra.mrb[80].mxu1 %v11127_v61  ;;  %v12973_v13 = vld [vmem:[#allocation90_spill] sm:$0xff]  ;;  %v12974_v48 = vld [vmem:[#allocation223_spill] sm:$0xff] }
 0x651   : > { %v4581_v33 = vmul.bf16 1069105081, %v4464_v3  ;;  %v4584_v1 = vmul.bf16 1069105081, %v4465_v54  ;;  %5207 = vmatprep.mubr.bf16.mxu0 %v11138_v6  ;;  %4855 = vadd.xlane.f32.xlu0 %v4854_v11  ;;  %v4224_v58 = vpop.xlane.xlu0 %4223  ;;  %v4726_v9 = vunpack.c.l.bf16 %v11127_v61  ;;  %v4727_v37 = vunpack.c.l.bf16 %v11131_v43  ;;  %v12975_v54 = vld [vmem:[#allocation126_spill] sm:$0xff] }
 0x652   : > { %3150 = vadd.xlane.f32.xlu1 %v12962_v63  ;;  %7531 = vpow.bf16 %v4575_v44  ;;  %v4858_v28 = vadd.f32 %v4857_v4, %v4724_v31  ;;  %5208 = vmatmul.mubr.bf16.gmra.mrb[144].mxu0 %v11134_v38  ;;  %v4366_v41 = vsub.f32 %v12963_v19, %v4224_v58  ;;  %v4367_v30 = vsub.f32 %v12964_v10, %v4224_v58  ;;  %v12976_v31 = vld [vmem:[#allocation180_spill] sm:$0xff]  ;;  %v12978_v4 = vld [vmem:[#allocation181_spill] sm:$0xff]  ;;  %v12980_v63 = vld [vmem:[#allocation42_spill] sm:$0xff] }
 0x653   : > { %7533 = vpow.bf16 %v4578_v25  ;;  %v4368_v34 = vsub.f32 %v12965_v53, %v4224_v58  ;;  %v4369_v21 = vsub.f32 %v12966_v18, %v4224_v58  ;;  %v4229_v50 = vpop.xlane.xlu1 %4228  ;;  %v4728_v42 = vunpack.c.l.bf16 %v11134_v38  ;;  %v12977_v25 = vld [vmem:[#allocation124_spill] sm:$0xff] }
 0x654   : > { %7535 = vpow.bf16 %v4581_v33  ;;  %v4859_v59 = vadd.f32 %v4858_v28, %v4725_v5  ;;  %v4370_v29 = vsub.f32 %v12967_v23, %v4229_v50  ;;  %v4371_v0 = vsub.f32 %v12968_v39, %v4229_v50 }
 0x655   : > { %v11154_v16 = vpop.eup %7523  ;;  %7537 = vpow.bf16 %v4584_v1  ;;  %3155 = vadd.xlane.f32.xlu0 %v12969_v17  ;;  %v4372_v40 = vsub.f32 %v12970_v47, %v4229_v50  ;;  %v4373_v45 = vsub.f32 %v12971_v7, %v4229_v50  ;;  %v4729_v36 = vunpack.c.l.bf16 %v11138_v6  ;;  %v12979_v1 = vld [vmem:[#allocation224_spill] sm:$0xff] }
 0x656   : > { %v11160_v22 = vpop.eup %7525  ;;  %4860 = vadd.xlane.f32.xlu1 %v4859_v59  ;;  %v4466_v20 = vpack.c.bf16 %v4370_v29, %v4366_v41  ;;  %v4467_v24 = vpack.c.bf16 %v4371_v0, %v4367_v30  ;;  %v4862_v62 = vadd.f32 %v4727_v37, %v4726_v9  ;;  %v4730_v35 = vunpack.c.h.bf16 %v11127_v61  ;;  %v12981_v29 = vld [vmem:[#allocation158_spill] sm:$0xff] }
 0x657   : > { %v11163_v56 = vpop.eup %7527  ;;  %v4468_v27 = vpack.c.bf16 %v4372_v40, %v4368_v34  ;;  %v4469_v57 = vpack.c.bf16 %v4373_v45, %v4369_v21  ;;  %5054 = vmatprep.mubr.bf16.mxu1 %v11160_v22  ;;  %v4731_v51 = vunpack.c.h.bf16 %v11131_v43  ;;  %v4732_v12 = vunpack.c.h.bf16 %v11134_v38  ;;  %v12972_v43 = vld [vmem:[#allocation207_spill] sm:$0xff] }
 0x658   : > { %v11168_v8 = vpop.eup %7529  ;;  %v4587_v14 = vmul.bf16 1069105081, %v4466_v20  ;;  %v4590_v55 = vmul.bf16 1069105081, %v4467_v24  ;;  %v4863_v2 = vadd.f32 %v4862_v62, %v4728_v42  ;;  %v4733_v49 = vunpack.c.h.bf16 %v11138_v6  ;;  %5055 = vmatmul.mubr.bf16.gmra.mrb[84].mxu1 %v11154_v16  ;;  %v12982_v24 = vld [vmem:[#allocation41_spill] sm:$0xff] }
 0x659   : > { %v4593_v61 = vmul.bf16 1069105081, %v4468_v27  ;;  %v4596_v26 = vmul.bf16 1069105081, %v4469_v57  ;;  %5215 = vmatprep.mubr.bf16.mxu0 %v11168_v8  ;;  %v4867_v46 = vadd.f32 %v4731_v51, %v4730_v35  ;;  %v4234_v32 = vpop.xlane.xlu0 %4233  ;;  %v4734_v60 = vunpack.c.l.bf16 %v11154_v16  ;;  %v12983_v35 = vld [vmem:[#allocation68_spill] sm:$0xff]  ;;  %v12985_v51 = vld [vmem:[#allocation67_spill] sm:$0xff] }
 0x65a   : > { %3160 = vadd.xlane.f32.xlu1 %v12972_v43  ;;  %7539 = vpow.bf16 %v4587_v14  ;;  %v4864_v15 = vadd.f32 %v4863_v2, %v4729_v36  ;;  %5216 = vmatmul.mubr.bf16.gmra.mrb[148].mxu0 %v11163_v56  ;;  %v4374_v52 = vsub.f32 %v12973_v13, %v4234_v32  ;;  %v4375_v38 = vsub.f32 %v12974_v48, %v4234_v32  ;;  %v12986_v14 = vld [vmem:[#allocation94_spill] sm:$0xff]  ;;  %v12987_v2 = vld [vmem:[#allocation96_spill] sm:$0xff] }
 0x65b   : > { %7541 = vpow.bf16 %v4590_v55  ;;  %v4868_v3 = vadd.f32 %v4867_v46, %v4732_v12  ;;  %v4376_v11 = vsub.f32 %v12975_v54, %v4234_v32  ;;  %v4377_v6 = vsub.f32 %v12976_v31, %v4234_v32  ;;  %v4239_v44 = vpop.xlane.xlu1 %4238  ;;  %v12989_v32 = vld [vmem:[#allocation131_spill] sm:$0xff]  ;;  %v12990_v43 = vld [vmem:[#allocation128_spill] sm:$0xff] }
 0x65c   : > { %7543 = vpow.bf16 %v4593_v61  ;;  %4865 = vadd.xlane.f32.xlu0 %v4864_v15  ;;  %v4378_v5 = vsub.f32 %v12977_v25, %v4239_v44  ;;  %v4379_v33 = vsub.f32 %v12978_v4, %v4239_v44  ;;  %v4380_v58 = vsub.f32 %v12979_v1, %v4239_v44  ;;  %v12988_v61 = vld [vmem:[#allocation225_spill] sm:$0xff] }
 0x65d   : > { %v11183_v9 = vpop.eup %7531  ;;  %7545 = vpow.bf16 %v4596_v26  ;;  %v4869_v37 = vadd.f32 %v4868_v3, %v4733_v49  ;;  %v4381_v28 = vsub.f32 %v12980_v63, %v4239_v44  ;;  %v4735_v19 = vunpack.c.l.bf16 %v11160_v22 }
 0x65e   : > { %v11187_v41 = vpop.eup %7533  ;;  %v4470_v10 = vpack.c.bf16 %v4378_v5, %v4374_v52  ;;  %v4471_v30 = vpack.c.bf16 %v4379_v33, %v4375_v38  ;;  %v4472_v53 = vpack.c.bf16 %v4380_v58, %v4376_v11  ;;  %v4736_v34 = vunpack.c.l.bf16 %v11163_v56 }
 0x65f   : > { %v11190_v18 = vpop.eup %7535  ;;  %4870 = vadd.xlane.f32.xlu1 %v4869_v37  ;;  %v4473_v21 = vpack.c.bf16 %v4381_v28, %v4377_v6  ;;  %5062 = vmatprep.mubr.bf16.mxu1 %v11187_v41  ;;  %v4737_v50 = vunpack.c.l.bf16 %v11168_v8  ;;  %v4872_v42 = vadd.f32 %v4735_v19, %v4734_v60  ;;  %v4738_v59 = vunpack.c.h.bf16 %v11154_v16  ;;  %v12991_v37 = vld [vmem:[#allocation209_spill] sm:$0xff] }
 0x660   : > { %v11195_v23 = vpop.eup %7537  ;;  %3165 = vadd.xlane.f32.xlu0 %v12981_v29  ;;  %v4599_v39 = vmul.bf16 1069105081, %v4470_v10  ;;  %v4602_v0 = vmul.bf16 1069105081, %v4471_v30  ;;  %v4605_v17 = vmul.bf16 1069105081, %v4472_v53  ;;  %v4739_v47 = vunpack.c.h.bf16 %v11160_v22  ;;  %5063 = vmatmul.mubr.bf16.gmra.mrb[88].mxu1 %v11183_v9 }
 0x661   : > { %v4608_v40 = vmul.bf16 1069105081, %v4473_v21  ;;  %5223 = vmatprep.mubr.bf16.mxu0 %v11195_v23  ;;  %v4873_v7 = vadd.f32 %v4872_v42, %v4736_v34  ;;  %v4740_v45 = vunpack.c.h.bf16 %v11163_v56  ;;  %v4741_v36 = vunpack.c.h.bf16 %v11168_v8  ;;  %v4244_v16 = vpop.xlane.xlu0 %4243  ;;  %v12984_v22 = vld [vmem:[#allocation208_spill] sm:$0xff]  ;;  %v12993_v42 = vld [vmem:[#allocation183_spill] sm:$0xff]  ;;  %v12994_v29 = vld [vmem:[#allocation226_spill] sm:$0xff] }
 0x662   : > { %7547 = vpow.bf16 %v4599_v39  ;;  %v4877_v20 = vadd.f32 %v4739_v47, %v4738_v59  ;;  %5224 = vmatmul.mubr.bf16.gmra.mrb[152].mxu0 %v11190_v18  ;;  %v4382_v62 = vsub.f32 %v12982_v24, %v4244_v16  ;;  %v4383_v27 = vsub.f32 %v12983_v35, %v4244_v16  ;;  %v13000_v35 = vld [vmem:[#allocation184_spill] sm:$0xff] }
 0x663   : > { %3170 = vadd.xlane.f32.xlu1 %v12984_v22  ;;  %7549 = vpow.bf16 %v4602_v0  ;;  %v4874_v57 = vadd.f32 %v4873_v7, %v4737_v50  ;;  %v4384_v12 = vsub.f32 %v12985_v51, %v4244_v16  ;;  %v4385_v55 = vsub.f32 %v12986_v14, %v4244_v16  ;;  %v4249_v56 = vpop.xlane.xlu1 %4248 }
 0x664   : > { %7551 = vpow.bf16 %v4605_v17  ;;  %v4878_v8 = vadd.f32 %v4877_v20, %v4740_v45  ;;  %v4386_v49 = vsub.f32 %v12987_v2, %v4249_v56  ;;  %v4387_v26 = vsub.f32 %v12988_v61, %v4249_v56  ;;  %v12995_v17 = vld [vmem:[#allocation160_spill] sm:$0xff]  ;;  %v12999_v20 = vld [vmem:[#allocation102_spill] sm:$0xff] }
 0x665   : > { %v11211_v46 = vpop.eup %7539  ;;  %7553 = vpow.bf16 %v4608_v40  ;;  %4875 = vadd.xlane.f32.xlu0 %v4874_v57  ;;  %v4388_v60 = vsub.f32 %v12989_v32, %v4249_v56  ;;  %v4389_v15 = vsub.f32 %v12990_v43, %v4249_v56  ;;  %v4742_v13 = vunpack.c.l.bf16 %v11183_v9  ;;  %v12997_v40 = vld [vmem:[#allocation46_spill] sm:$0xff] }
 0x666   : > { %v11216_v52 = vpop.eup %7541  ;;  %v4879_v48 = vadd.f32 %v4878_v8, %v4741_v36  ;;  %v4474_v38 = vpack.c.bf16 %v4386_v49, %v4382_v62  ;;  %v4475_v3 = vpack.c.bf16 %v4387_v26, %v4383_v27  ;;  %v4743_v54 = vunpack.c.l.bf16 %v11187_v41  ;;  %v12998_v36 = vld [vmem:[#allocation103_spill] sm:$0xff] }
 0x667   : > { %v11219_v11 = vpop.eup %7543  ;;  %v4476_v31 = vpack.c.bf16 %v4388_v60, %v4384_v12  ;;  %v4477_v6 = vpack.c.bf16 %v4389_v15, %v4385_v55  ;;  %5070 = vmatprep.mubr.bf16.mxu1 %v11216_v52  ;;  %v4744_v44 = vunpack.c.l.bf16 %v11190_v18  ;;  %v4745_v25 = vunpack.c.l.bf16 %v11195_v23 }
 0x668   : > { %v11224_v5 = vpop.eup %7545  ;;  %4880 = vadd.xlane.f32.xlu1 %v4879_v48  ;;  %v4611_v4 = vmul.bf16 1069105081, %v4474_v38  ;;  %v4614_v33 = vmul.bf16 1069105081, %v4475_v3  ;;  %v4882_v1 = vadd.f32 %v4743_v54, %v4742_v13  ;;  %v4746_v58 = vunpack.c.h.bf16 %v11183_v9  ;;  %5071 = vmatmul.mubr.bf16.gmra.mrb[92].mxu1 %v11211_v46  ;;  %v12992_v9 = vld [vmem:[#allocation182_spill] sm:$0xff] }
 0x669   : > { %3175 = vadd.xlane.f32.xlu0 %v12991_v37  ;;  %v4617_v63 = vmul.bf16 1069105081, %v4476_v31  ;;  %v4620_v28 = vmul.bf16 1069105081, %v4477_v6  ;;  %5231 = vmatprep.mubr.bf16.mxu0 %v11224_v5  ;;  %v4747_v19 = vunpack.c.h.bf16 %v11187_v41  ;;  %v4748_v10 = vunpack.c.h.bf16 %v11190_v18  ;;  %v4254_v30 = vpop.xlane.xlu0 %4253  ;;  %v12996_v18 = vld [vmem:[#allocation45_spill] sm:$0xff]  ;;  %v13001_v38 = vld [vmem:[#allocation162_spill] sm:$0xff] }
 0x66a   : > { %7555 = vpow.bf16 %v4611_v4  ;;  %v4883_v53 = vadd.f32 %v4882_v1, %v4744_v44  ;;  %v4749_v34 = vunpack.c.h.bf16 %v11195_v23  ;;  %5232 = vmatmul.mubr.bf16.gmra.mrb[156].mxu0 %v11219_v11  ;;  %v4390_v21 = vsub.f32 %v12992_v9, %v4254_v30 }
 0x66b   : > { %7557 = vpow.bf16 %v4614_v33  ;;  %v4887_v50 = vadd.f32 %v4747_v19, %v4746_v58  ;;  %v4391_v59 = vsub.f32 %v12993_v42, %v4254_v30  ;;  %v4392_v39 = vsub.f32 %v12994_v29, %v4254_v30  ;;  %v4259_v0 = vpop.xlane.xlu1 %4258  ;;  %v13004_v58 = vld [vmem:[#allocation98_spill] sm:$0xff]  ;;  %v13006_v19 = vld [vmem:[#allocation148_spill] sm:$0xff] }
 0x66c   : > { %3180 = vadd.xlane.f32.xlu1 %v12995_v17  ;;  %7559 = vpow.bf16 %v4617_v63  ;;  %v4884_v41 = vadd.f32 %v4883_v53, %v4745_v25  ;;  %v4393_v47 = vsub.f32 %v12996_v18, %v4254_v30  ;;  %v4394_v7 = vsub.f32 %v12997_v40, %v4259_v0  ;;  %v13002_v25 = vld [vmem:[#allocation227_spill] sm:$0xff]  ;;  %v13007_v30 = vld [vmem:[#allocation228_spill] sm:$0xff]  ;;  %v13010_v42 = vld [vmem:[#allocation186_spill] sm:$0xff] }
 0x66d   : > { %v11240_v23 = vpop.eup %7547  ;;  %7561 = vpow.bf16 %v4620_v28  ;;  %v4888_v45 = vadd.f32 %v4887_v50, %v4748_v10  ;;  %v4395_v16 = vsub.f32 %v12998_v36, %v4259_v0  ;;  %v4396_v24 = vsub.f32 %v12999_v20, %v4259_v0  ;;  %v13005_v28 = vld [vmem:[#allocation210_spill] sm:$0xff] }
 0x66e   : > { %v11244_v62 = vpop.eup %7549  ;;  %4885 = vadd.xlane.f32.xlu0 %v4884_v41  ;;  %v4397_v27 = vsub.f32 %v13000_v35, %v4259_v0  ;;  %v4478_v22 = vpack.c.bf16 %v4394_v7, %v4390_v21  ;;  %v4750_v57 = vunpack.c.l.bf16 %v11211_v46  ;;  %v4751_v51 = vunpack.c.l.bf16 %v11216_v52  ;;  %v13009_v21 = vld [vmem:[#allocation185_spill] sm:$0xff] }
 0x66f   : > { %v11249_v12 = vpop.eup %7551  ;;  %v4889_v14 = vadd.f32 %v4888_v45, %v4749_v34  ;;  %v4479_v55 = vpack.c.bf16 %v4395_v16, %v4391_v59  ;;  %v4480_v56 = vpack.c.bf16 %v4396_v24, %v4392_v39  ;;  %5078 = vmatprep.mubr.bf16.mxu1 %v11244_v62  ;;  %v4752_v8 = vunpack.c.l.bf16 %v11219_v11  ;;  %v13008_v34 = vld [vmem:[#allocation147_spill] sm:$0xff] }
 0x670   : > { %v11253_v2 = vpop.eup %7553  ;;  %v4481_v49 = vpack.c.bf16 %v4397_v27, %v4393_v47  ;;  %v4623_v61 = vmul.bf16 1069105081, %v4478_v22  ;;  %v4753_v26 = vunpack.c.l.bf16 %v11224_v5  ;;  %v4892_v32 = vadd.f32 %v4751_v51, %v4750_v57  ;;  %5079 = vmatmul.mubr.bf16.gmra.mrb[96].mxu1 %v11240_v23  ;;  %v13011_v22 = vld [vmem:[#allocation211_spill] sm:$0xff] }
 0x671   : > { %4890 = vadd.xlane.f32.xlu1 %v4889_v14  ;;  %v4626_v60 = vmul.bf16 1069105081, %v4479_v55  ;;  %v4629_v43 = vmul.bf16 1069105081, %v4480_v56  ;;  %5239 = vmatprep.mubr.bf16.mxu0 %v11253_v2  ;;  %v4754_v15 = vunpack.c.h.bf16 %v11211_v46  ;;  %v4755_v13 = vunpack.c.h.bf16 %v11216_v52  ;;  %v4264_v48 = vpop.xlane.xlu0 %4263  ;;  %v13003_v52 = vld [vmem:[#allocation100_spill] sm:$0xff] }
 0x672   : > { %3185 = vadd.xlane.f32.xlu0 %v13001_v38  ;;  %7563 = vpow.bf16 %v4623_v61  ;;  %v4632_v3 = vmul.bf16 1069105081, %v4481_v49  ;;  %v4893_v54 = vadd.f32 %v4892_v32, %v4752_v8  ;;  %v4756_v31 = vunpack.c.h.bf16 %v11219_v11  ;;  %5240 = vmatmul.mubr.bf16.gmra.mrb[160].mxu0 %v11249_v12  ;;  %v13016_v38 = vld [vmem:[#allocation231_spill] sm:$0xff] }
 0x673   : > { %7565 = vpow.bf16 %v4626_v60  ;;  %v4757_v6 = vunpack.c.h.bf16 %v11224_v5  ;;  %v4897_v44 = vadd.f32 %v4755_v13, %v4754_v15  ;;  %v4398_v4 = vsub.f32 %v13002_v25, %v4264_v48  ;;  %v4269_v33 = vpop.xlane.xlu1 %4268  ;;  %v13014_v60 = vld [vmem:[#allocation187_spill] sm:$0xff]  ;;  %v13015_v13 = vld [vmem:[#allocation164_spill] sm:$0xff]  ;;  %v13019_v25 = vld [vmem:[#allocation189_spill] sm:$0xff] }
 0x674   : > { %7567 = vpow.bf16 %v4629_v43  ;;  %v4894_v46 = vadd.f32 %v4893_v54, %v4753_v26  ;;  %v4399_v1 = vsub.f32 %v13003_v52, %v4264_v48  ;;  %v4400_v37 = vsub.f32 %v13004_v58, %v4264_v48 }
 0x675   : > { %v11267_v63 = vpop.eup %7555  ;;  %3190 = vadd.xlane.f32.xlu1 %v13005_v28  ;;  %7569 = vpow.bf16 %v4632_v3  ;;  %v4898_v11 = vadd.f32 %v4897_v44, %v4756_v31  ;;  %v4401_v10 = vsub.f32 %v13006_v19, %v4264_v48  ;;  %v4402_v5 = vsub.f32 %v13007_v30, %v4269_v33 }
 0x676   : > { %v11272_v53 = vpop.eup %7557  ;;  %4895 = vadd.xlane.f32.xlu0 %v4894_v46  ;;  %v4403_v9 = vsub.f32 %v13008_v34, %v4269_v33  ;;  %v4404_v50 = vsub.f32 %v13009_v21, %v4269_v33  ;;  %v4405_v59 = vsub.f32 %v13010_v42, %v4269_v33  ;;  %v4758_v29 = vunpack.c.l.bf16 %v11240_v23  ;;  %v7339_v33 = vld [vmem:[#allocation9 + $0x40] sm:$0xff]  }
 0x677   : > { %v11278_v39 = vpop.eup %7559  ;;  %v4899_v0 = vadd.f32 %v4898_v11, %v4757_v6  ;;  %v4482_v17 = vpack.c.bf16 %v4402_v5, %v4398_v4  ;;  %5086 = vmatprep.mubr.bf16.mxu1 %v11272_v53  ;;  %v4759_v41 = vunpack.c.l.bf16 %v11244_v62  ;;  %v4760_v18 = vunpack.c.l.bf16 %v11249_v12  ;;  %v13018_v6 = vld [vmem:[#allocation232_spill] sm:$0xff]  ;;  %6972 = vmatprep.subr.bf16.mxu1 %v7339_v33 }
 0x678   : > { %v11283_v47 = vpop.eup %7561  ;;  %v4483_v40 = vpack.c.bf16 %v4403_v9, %v4399_v1  ;;  %v4484_v7 = vpack.c.bf16 %v4404_v50, %v4400_v37  ;;  %v4485_v45 = vpack.c.bf16 %v4405_v59, %v4401_v10  ;;  %v4761_v36 = vunpack.c.l.bf16 %v11253_v2  ;;  %5087 = vmatmul.mubr.bf16.gmra.mrb[100].mxu1 %v11267_v63  ;;  %v13020_v1 = vld [vmem:[#allocation190_spill] sm:$0xff] }
 0x679   : > { %4900 = vadd.xlane.f32.xlu1 %v4899_v0  ;;  %v4635_v16 = vmul.bf16 1069105081, %v4482_v17  ;;  %5247 = vmatprep.mubr.bf16.mxu0 %v11283_v47  ;;  %v4902_v20 = vadd.f32 %v4759_v41, %v4758_v29  ;;  %v4762_v24 = vunpack.c.h.bf16 %v11240_v23  ;;  %v4763_v35 = vunpack.c.h.bf16 %v11244_v62  ;;  %v4274_v27 = vpop.xlane.xlu0 %4273  ;;  %v13012_v23 = vld [vmem:[#allocation229_spill] sm:$0xff]  ;;  %v13013_v62 = vld [vmem:[#allocation230_spill] sm:$0xff] }
 0x67a   : > { %3195 = vadd.xlane.f32.xlu0 %v13011_v22  ;;  %v4638_v57 = vmul.bf16 1069105081, %v4483_v40  ;;  %v4641_v51 = vmul.bf16 1069105081, %v4484_v7  ;;  %v4644_v14 = vmul.bf16 1069105081, %v4485_v45  ;;  %v4764_v55 = vunpack.c.h.bf16 %v11249_v12  ;;  %5248 = vmatmul.mubr.bf16.gmra.mrb[164].mxu0 %v11278_v39 }
 0x67b   : > { %7571 = vpow.bf16 %v4635_v16  ;;  %v4903_v56 = vadd.f32 %v4902_v20, %v4760_v18  ;;  %v4765_v8 = vunpack.c.h.bf16 %v11253_v2  ;;  %v4907_v49 = vadd.f32 %v4763_v35, %v4762_v24  ;;  %v4279_v61 = vpop.xlane.xlu1 %4278  ;;  %v13017_v2 = vld [vmem:[#allocation188_spill] sm:$0xff]  ;;  %v13021_v41 = vld [vmem:[#allocation166_spill] sm:$0xff]  ;;  %v13023_v24 = vld [vmem:[#allocation191_spill] sm:$0xff] }
 0x67c   : > { %7573 = vpow.bf16 %v4638_v57  ;;  %v4406_v26 = vsub.f32 %v13012_v23, %v4274_v27  ;;  %v4407_v32 = vsub.f32 %v13013_v62, %v4274_v27  ;;  %v4408_v43 = vsub.f32 %v13014_v60, %v4274_v27  ;;  %v13024_v22 = vld [vmem:[#allocation24_spill] sm:$0xff] }
 0x67d   : > { %v11297_v15 = vpop.eup %7563  ;;  %3200 = vadd.xlane.f32.xlu1 %v13015_v13  ;;  %7575 = vpow.bf16 %v4641_v51  ;;  %v4904_v12 = vadd.f32 %v4903_v56, %v4761_v36  ;;  %v4908_v48 = vadd.f32 %v4907_v49, %v4764_v55  ;;  %v4409_v3 = vsub.f32 %v13016_v38, %v4274_v27  ;;  %v7340_v27 = vld [vmem:[#allocation9] sm:$0xff]   ;;  %v13025_v57 = vld [vmem:[#allocation192_spill] sm:$0xff] }
 0x67e   : > { %v11301_v54 = vpop.eup %7565  ;;  %7577 = vpow.bf16 %v4644_v14  ;;  %v4410_v31 = vsub.f32 %v13017_v2, %v4279_v61  ;;  %v4411_v44 = vsub.f32 %v13018_v6, %v4279_v61  ;;  %v4412_v4 = vsub.f32 %v13019_v25, %v4279_v61  ;;  %v13026_v14 = vld [vmem:[#allocation234_spill] sm:$0xff]  ;;  %v13028_v49 = vld [vmem:[#allocation236_spill] sm:$0xff]  ;;  %6973 = vmatpush3.bf16.msra.mxu1 %v7340_v27 }
 0x67f   : > { %v11306_v46 = vpop.eup %7567  ;;  %4905 = vadd.xlane.f32.xlu0 %v4904_v12  ;;  %v4909_v52 = vadd.f32 %v4908_v48, %v4765_v8  ;;  %v4413_v58 = vsub.f32 %v13020_v1, %v4279_v61  ;;  %5094 = vmatprep.mubr.bf16.mxu1 %v11301_v54  ;;  %v4766_v37 = vunpack.c.l.bf16 %v11267_v63  ;;  %v4767_v28 = vunpack.c.l.bf16 %v11272_v53  ;;  %v7341_v13 = vld [vmem:[#allocation9 + $0x48] sm:$0xff]   ;;  %v7343_v1 = vld [vmem:[#allocation9 + $0x50] sm:$0xff]  }
 0x680   : > { %v11312_v11 = vpop.eup %7569  ;;  %v4486_v19 = vpack.c.bf16 %v4410_v31, %v4406_v26  ;;  %v4487_v10 = vpack.c.bf16 %v4411_v44, %v4407_v32  ;;  %v4488_v30 = vpack.c.bf16 %v4412_v4, %v4408_v43  ;;  %v4768_v5 = vunpack.c.l.bf16 %v11278_v39  ;;  %5095 = vmatmul.mubr.bf16.gmra.mrb[104].mxu1 %v11297_v15  ;;  %v13029_v26 = vld [vmem:[#allocation193_spill] sm:$0xff]  ;;  %v13030_v32 = vld [vmem:[#allocation194_spill] sm:$0xff]  ;;  %v7342_v31 = vld [vmem:[#allocation9 + $0x8] sm:$0xff]   ;;  %6974 = vmatprep.subr.bf16.mxu1 %v7341_v13 }
 0x681   : > { %4910 = vadd.xlane.f32.xlu1 %v4909_v52  ;;  %v4489_v34 = vpack.c.bf16 %v4413_v58, %v4409_v3  ;;  %5255 = vmatprep.mubr.bf16.mxu0 %v11312_v11  ;;  %v4769_v9 = vunpack.c.l.bf16 %v11283_v47  ;;  %v4912_v21 = vadd.f32 %v4767_v28, %v4766_v37  ;;  %v4770_v50 = vunpack.c.h.bf16 %v11267_v63  ;;  %v4284_v42 = vpop.xlane.xlu0 %4283  ;;  %v13022_v63 = vld [vmem:[#allocation233_spill] sm:$0xff] }
 0x682   : > { %v4647_v59 = vmul.bf16 1069105081, %v4486_v19  ;;  %v4650_v29 = vmul.bf16 1069105081, %v4487_v10  ;;  %v4653_v0 = vmul.bf16 1069105081, %v4488_v30  ;;  %v4771_v17 = vunpack.c.h.bf16 %v11272_v53  ;;  %5256 = vmatmul.mubr.bf16.gmra.mrb[168].mxu0 %v11306_v46  ;;  %6975 = vmatpush3.bf16.msra.mxu1 %v7342_v31 }
 0x683   : > { %3205 = vadd.xlane.f32.xlu0 %v13021_v41  ;;  %v4656_v18 = vmul.bf16 1069105081, %v4489_v34  ;;  %v4913_v40 = vadd.f32 %v4912_v21, %v4768_v5  ;;  %v4772_v7 = vunpack.c.h.bf16 %v11278_v39  ;;  %v4773_v45 = vunpack.c.h.bf16 %v11283_v47  ;;  %v4289_v36 = vpop.xlane.xlu1 %4288  ;;  %v13027_v47 = vld [vmem:[#allocation235_spill] sm:$0xff]  ;;  %6976 = vmatprep.subr.bf16.mxu1 %v7343_v1 }
 0x684   : > { %7579 = vpow.bf16 %v4647_v59  ;;  %v4917_v16 = vadd.f32 %v4771_v17, %v4770_v50  ;;  %v4414_v20 = vsub.f32 %v13022_v63, %v4284_v42  ;;  %v4415_v35 = vsub.f32 %v13023_v24, %v4284_v42  ;;  %v13031_v10 = vld [vmem:[#allocation23_spill] sm:$0xff]  ;;  %v13032_v59 = vld [vmem:[#allocation237_spill] sm:$0xff]  ;;  %v13033_v17 = vld [vmem:[#allocation238_spill] sm:$0xff] }
 0x685   : > { %3210 = vadd.xlane.f32.xlu1 %v13024_v22  ;;  %7581 = vpow.bf16 %v4650_v29  ;;  %v4914_v53 = vadd.f32 %v4913_v40, %v4769_v9  ;;  %v4416_v51 = vsub.f32 %v13025_v57, %v4284_v42  ;;  %v4417_v55 = vsub.f32 %v13026_v14, %v4284_v42  ;;  %v7345_v22 = vld [vmem:[#allocation9 + $0x58] sm:$0xff]  }
 0x686   : > { %v11329_v56 = vpop.eup %7571  ;;  %7583 = vpow.bf16 %v4653_v0  ;;  %v4918_v39 = vadd.f32 %v4917_v16, %v4772_v7  ;;  %v4418_v8 = vsub.f32 %v13027_v47, %v4289_v36  ;;  %v4419_v61 = vsub.f32 %v13028_v49, %v4289_v36  ;;  %v7344_v0 = vld [vmem:[#allocation9 + $0x10] sm:$0xff]   ;;  %v13036_v7 = vld [vmem:[#allocation239_spill] sm:$0xff]  ;;  %v13040_v57 = vld [vmem:[#allocation198_spill] sm:$0xff] }
 0x687   : > { %v11333_v23 = vpop.eup %7573  ;;  %7585 = vpow.bf16 %v4656_v18  ;;  %4915 = vadd.xlane.f32.xlu0 %v4914_v53  ;;  %v4420_v62 = vsub.f32 %v13029_v26, %v4289_v36  ;;  %v4421_v60 = vsub.f32 %v13030_v32, %v4289_v36  ;;  %v4774_v43 = vunpack.c.l.bf16 %v11297_v15  ;;  %v13034_v18 = vld [vmem:[#allocation195_spill] sm:$0xff]  ;;  %v13037_v36 = vld [vmem:[#allocation196_spill] sm:$0xff]  ;;  %6977 = vmatpush3.bf16.msra.mxu1 %v7344_v0 }
 0x688   : > { %v11338_v12 = vpop.eup %7575  ;;  %v4919_v48 = vadd.f32 %v4918_v39, %v4773_v45  ;;  %v4490_v38 = vpack.c.bf16 %v4418_v8, %v4414_v20  ;;  %v4491_v3 = vpack.c.bf16 %v4419_v61, %v4415_v35  ;;  %5102 = vmatprep.mubr.bf16.mxu1 %v11333_v23  ;;  %v4775_v2 = vunpack.c.l.bf16 %v11301_v54  ;;  %v13038_v20 = vld [vmem:[#allocation240_spill] sm:$0xff]  ;;  %v13039_v35 = vld [vmem:[#allocation197_spill] sm:$0xff]  ;;  %6978 = vmatprep.subr.bf16.mxu1 %v7345_v22 }
 0x689   : > { %v11342_v6 = vpop.eup %7577  ;;  %v4492_v44 = vpack.c.bf16 %v4420_v62, %v4416_v51  ;;  %v4493_v25 = vpack.c.bf16 %v4421_v60, %v4417_v55  ;;  %v4776_v4 = vunpack.c.l.bf16 %v11306_v46  ;;  %v4777_v33 = vunpack.c.l.bf16 %v11312_v11  ;;  %5103 = vmatmul.mubr.bf16.gmra.mrb[108].mxu1 %v11329_v56  ;;  %v4294_v52 = vpop.xlane.xlu0 %4293  ;;  %v7346_v62 = vld [vmem:[#allocation9 + $0x18] sm:$0xff]   ;;  %v7349_v0 = vld [vmem:[#allocation9 + $0x68] sm:$0xff]  }
 0x68a   : > { %4920 = vadd.xlane.f32.xlu1 %v4919_v48  ;;  %v4659_v58 = vmul.bf16 1069105081, %v4490_v38  ;;  %v4662_v37 = vmul.bf16 1069105081, %v4491_v3  ;;  %5263 = vmatprep.mubr.bf16.mxu0 %v11342_v6  ;;  %v4922_v28 = vadd.f32 %v4775_v2, %v4774_v43  ;;  %v4778_v19 = vunpack.c.h.bf16 %v11297_v15  ;;  %v7347_v3 = vld [vmem:[#allocation9 + $0x60] sm:$0xff]  }
 0x68b   : > { %3215 = vadd.xlane.f32.xlu0 %v13031_v10  ;;  %v4665_v30 = vmul.bf16 1069105081, %v4492_v44  ;;  %v4668_v5 = vmul.bf16 1069105081, %v4493_v25  ;;  %v4779_v34 = vunpack.c.h.bf16 %v11301_v54  ;;  %v4780_v9 = vunpack.c.h.bf16 %v11306_v46  ;;  %5264 = vmatmul.mubr.bf16.gmra.mrb[172].mxu0 %v11338_v12  ;;  %v4299_v21 = vpop.xlane.xlu1 %4298  ;;  %v13035_v54 = vld [vmem:[#allocation212_spill] sm:$0xff] }
 0x68c   : > { %7587 = vpow.bf16 %v4659_v58  ;;  %v4923_v50 = vadd.f32 %v4922_v28, %v4776_v4  ;;  %v4781_v42 = vunpack.c.h.bf16 %v11312_v11  ;;  %v4422_v29 = vsub.f32 %v13032_v59, %v4294_v52  ;;  %v13041_v4 = vld [vmem:[#allocation50_spill] sm:$0xff]  ;;  %6979 = vmatpush3.bf16.msra.mxu1 %v7346_v62  ;;  %v13047_v59 = vld [vmem:[#allocation200_spill] sm:$0xff] }
 0x68d   : > { %7589 = vpow.bf16 %v4662_v37  ;;  %v4927_v15 = vadd.f32 %v4779_v34, %v4778_v19  ;;  %v4423_v41 = vsub.f32 %v13033_v17, %v4294_v52  ;;  %v4424_v40 = vsub.f32 %v13034_v18, %v4294_v52  ;;  %v13042_v19 = vld [vmem:[#allocation241_spill] sm:$0xff]  ;;  %v13044_v34 = vld [vmem:[#allocation199_spill] sm:$0xff]  ;;  %6980 = vmatprep.subr.bf16.mxu1 %v7347_v3  ;;  %v13048_v17 = vld [vmem:[#allocation244_spill] sm:$0xff] }
 0x68e   : > { %3220 = vadd.xlane.f32.xlu1 %v13035_v54  ;;  %7591 = vpow.bf16 %v4665_v30  ;;  %v4924_v46 = vadd.f32 %v4923_v50, %v4777_v33  ;;  %v4425_v45 = vsub.f32 %v13036_v7, %v4294_v52  ;;  %v4426_v16 = vsub.f32 %v13037_v36, %v4299_v21  ;;  %v13043_v30 = vld [vmem:[#allocation242_spill] sm:$0xff]  ;;  %v13049_v18 = vld [vmem:[#allocation201_spill] sm:$0xff] }
 0x68f   : > { %v11360_v11 = vpop.eup %7579  ;;  %7593 = vpow.bf16 %v4668_v5  ;;  %v4928_v63 = vadd.f32 %v4927_v15, %v4780_v9  ;;  %v4427_v24 = vsub.f32 %v13038_v20, %v4299_v21  ;;  %v4428_v27 = vsub.f32 %v13039_v35, %v4299_v21  ;;  %v13050_v54 = vld [vmem:[#allocation202_spill] sm:$0xff]  ;;  %v7350_v20 = vld [vmem:[#allocation9 + $0x28] sm:$0xff]  }
 0x690   : > { %v11364_v53 = vpop.eup %7581  ;;  %4925 = vadd.xlane.f32.xlu0 %v4924_v46  ;;  %v4429_v51 = vsub.f32 %v13040_v57, %v4299_v21  ;;  %v4494_v14 = vpack.c.bf16 %v4426_v16, %v4422_v29  ;;  %v4782_v55 = vunpack.c.l.bf16 %v11329_v56  ;;  %v4783_v39 = vunpack.c.l.bf16 %v11333_v23 }
 0x691   : > { %v11369_v47 = vpop.eup %7583  ;;  %v4929_v8 = vadd.f32 %v4928_v63, %v4781_v42  ;;  %v4495_v49 = vpack.c.bf16 %v4427_v24, %v4423_v41  ;;  %v4496_v61 = vpack.c.bf16 %v4428_v27, %v4424_v40  ;;  %5110 = vmatprep.mubr.bf16.mxu1 %v11364_v53  ;;  %v4784_v26 = vunpack.c.l.bf16 %v11338_v12  ;;  %v4304_v38 = vpop.xlane.xlu0 %4303  ;;  %v13046_v42 = vld [vmem:[#allocation243_spill] sm:$0xff] }
 0x692   : > { %v11373_v32 = vpop.eup %7585  ;;  %v4497_v60 = vpack.c.bf16 %v4429_v51, %v4425_v45  ;;  %v4671_v43 = vmul.bf16 1069105081, %v4494_v14  ;;  %v4785_v13 = vunpack.c.l.bf16 %v11342_v6  ;;  %v4932_v48 = vadd.f32 %v4783_v39, %v4782_v55  ;;  %5111 = vmatmul.mubr.bf16.gmra.mrb[112].mxu1 %v11360_v11  ;;  %v7351_v51 = vld [vmem:[#allocation9 + $0x70] sm:$0xff]  }
 0x693   : > { %4930 = vadd.xlane.f32.xlu1 %v4929_v8  ;;  %v4674_v2 = vmul.bf16 1069105081, %v4495_v49  ;;  %v4677_v31 = vmul.bf16 1069105081, %v4496_v61  ;;  %5271 = vmatprep.mubr.bf16.mxu0 %v11373_v32  ;;  %v4786_v44 = vunpack.c.h.bf16 %v11329_v56  ;;  %v4787_v25 = vunpack.c.h.bf16 %v11333_v23  ;;  %v4309_v58 = vpop.xlane.xlu1 %4308  ;;  %v7348_v56 = vld [vmem:[#allocation9 + $0x20] sm:$0xff]   ;;  %v13051_v49 = vld [vmem:[#allocation72_spill] sm:$0xff] }
 0x694   : > { %3225 = vadd.xlane.f32.xlu0 %v13041_v4  ;;  %7595 = vpow.bf16 %v4671_v43  ;;  %v4680_v33 = vmul.bf16 1069105081, %v4497_v60  ;;  %v4933_v52 = vadd.f32 %v4932_v48, %v4784_v26  ;;  %v4788_v1 = vunpack.c.h.bf16 %v11338_v12  ;;  %5272 = vmatmul.mubr.bf16.gmra.mrb[176].mxu0 %v11369_v47  ;;  %v13045_v12 = vld [vmem:[#allocation49_spill] sm:$0xff] }
 0x695   : > { %7597 = vpow.bf16 %v4674_v2  ;;  %v4789_v37 = vunpack.c.h.bf16 %v11342_v6  ;;  %v4937_v28 = vadd.f32 %v4787_v25, %v4786_v44  ;;  %v4430_v10 = vsub.f32 %v13042_v19, %v4304_v38  ;;  %6981 = vmatpush3.bf16.msra.mxu1 %v7348_v56  ;;  %v13052_v2 = vld [vmem:[#allocation70_spill] sm:$0xff] }
 0x696   : > { %7599 = vpow.bf16 %v4677_v31  ;;  %v4934_v23 = vadd.f32 %v4933_v52, %v4785_v13  ;;  %v4431_v5 = vsub.f32 %v13043_v30, %v4304_v38  ;;  %v4432_v9 = vsub.f32 %v13044_v34, %v4304_v38  ;;  %6982 = vmatprep.subr.bf16.mxu1 %v7349_v0  ;;  %v7352_v52 = vld [vmem:[#allocation9 + $0x30] sm:$0xff]   ;;  %v7353_v19 = vld [vmem:[#allocation9 + $0x78] sm:$0xff]  }
 0x697   : > { %v11387_v21 = vpop.eup %7587  ;;  %3230 = vadd.xlane.f32.xlu1 %v13045_v12  ;;  %7601 = vpow.bf16 %v4680_v33  ;;  %v4938_v50 = vadd.f32 %v4937_v28, %v4788_v1  ;;  %v4433_v6 = vsub.f32 %v13046_v42, %v4304_v38  ;;  %v4434_v29 = vsub.f32 %v13047_v59, %v4309_v58  ;;  %v7354_v59 = vld [vmem:[#allocation9 + $0x38] sm:$0xff]  }
 0x698   : > { %v11392_v15 = vpop.eup %7589  ;;  %4935 = vadd.xlane.f32.xlu0 %v4934_v23  ;;  %v4435_v41 = vsub.f32 %v13048_v17, %v4309_v58  ;;  %v4436_v40 = vsub.f32 %v13049_v18, %v4309_v58  ;;  %v4437_v46 = vsub.f32 %v13050_v54, %v4309_v58  ;;  %v4790_v7 = vunpack.c.l.bf16 %v11360_v11 }
 0x699   : > { %v11398_v45 = vpop.eup %7591  ;;  %v4939_v36 = vadd.f32 %v4938_v50, %v4789_v37  ;;  %v4498_v16 = vpack.c.bf16 %v4434_v29, %v4430_v10  ;;  %5118 = vmatprep.mubr.bf16.mxu1 %v11392_v15  ;;  %v4791_v63 = vunpack.c.l.bf16 %v11364_v53  ;;  %v4792_v57 = vunpack.c.l.bf16 %v11369_v47  ;;  %6983 = vmatpush3.bf16.msra.mxu1 %v7350_v20  ;;  %v13053_v29 = vld [vmem:[#allocation213_spill] sm:$0xff] }
 0x69a   : > { %v11402_v24 = vpop.eup %7593  ;;  %v4499_v35 = vpack.c.bf16 %v4435_v41, %v4431_v5  ;;  %v4500_v27 = vpack.c.bf16 %v4436_v40, %v4432_v9  ;;  %v4501_v22 = vpack.c.bf16 %v4437_v46, %v4433_v6  ;;  %5119 = vmatmul.mubr.bf16.gmra.mrb[116].mxu1 %v11387_v21  ;;  %v4794_v39 = vunpack.c.h.bf16 %v11360_v11  ;;  %6984 = vmatprep.subr.bf16.mxu1 %v7351_v51  ;;  %v13054_v40 = vld [vmem:[#allocation106_spill] sm:$0xff] }
 0x69b   : > { %4940 = vadd.xlane.f32.xlu1 %v4939_v36  ;;  %v4683_v14 = vmul.bf16 1069105081, %v4498_v16  ;;  %5279 = vmatprep.mubr.bf16.mxu0 %v11402_v24  ;;  %v4942_v55 = vadd.f32 %v4791_v63, %v4790_v7  ;;  %v4795_v8 = vunpack.c.h.bf16 %v11364_v53  ;;  %v4793_v60 = vunpack.c.l.bf16 %v11373_v32 }
 0x69c   : > { %3235 = vadd.xlane.f32.xlu0 %v13051_v49  ;;  %v4686_v61 = vmul.bf16 1069105081, %v4499_v35  ;;  %v4689_v26 = vmul.bf16 1069105081, %v4500_v27  ;;  %v4692_v62 = vmul.bf16 1069105081, %v4501_v22  ;;  %5280 = vmatmul.mubr.bf16.gmra.mrb[180].mxu0 %v11398_v45  ;;  %v4796_v13 = vunpack.c.h.bf16 %v11369_v47 }
 0x69d   : > { %7603 = vpow.bf16 %v4683_v14  ;;  %v4943_v43 = vadd.f32 %v4942_v55, %v4792_v57  ;;  %v4947_v48 = vadd.f32 %v4795_v8, %v4794_v39  ;;  %v4797_v11 = vunpack.c.h.bf16 %v11373_v32  ;;  %6985 = vmatpush3.bf16.msra.mxu1 %v7352_v52  ;;  %v13055_v39 = vld [vmem:[#allocation104_spill] sm:$0xff] }
 0x69e   : > { %7605 = vpow.bf16 %v4686_v61  ;;  %v4798_v53 = vunpack.c.l.bf16 %v11387_v21  ;;  %v4799_v38 = vunpack.c.l.bf16 %v11392_v15  ;;  %v4800_v25 = vunpack.c.l.bf16 %v11398_v45  ;;  %6986 = vmatprep.subr.bf16.mxu1 %v7353_v19 }
 0x69f   : > { %v7596_v3 = vpop.eup %7595  ;;  %3240 = vadd.xlane.f32.xlu1 %v13052_v2  ;;  %7607 = vpow.bf16 %v4689_v26  ;;  %v4944_v31 = vadd.f32 %v4943_v43, %v4793_v60  ;;  %v4948_v44 = vadd.f32 %v4947_v48, %v4796_v13  ;;  %v4802_v33 = vunpack.c.h.bf16 %v11387_v21  ;;  %v13057_v13 = vld [vmem:[#allocation170_spill] sm:$0xff]  ;;  %v13058_v48 = vld [vmem:[#allocation27_spill] sm:$0xff] }
 0x6a0   : > { %v7598_v4 = vpop.eup %7597  ;;  %7609 = vpow.bf16 %v4692_v62  ;;  %v4952_v47 = vadd.f32 %v4799_v38, %v4798_v53  ;;  %v4803_v32 = vunpack.c.h.bf16 %v11392_v15  ;;  %v4801_v37 = vunpack.c.l.bf16 %v11402_v24  ;;  %v13056_v62 = vld [vmem:[#allocation168_spill] sm:$0xff]  ;;  %v13060_v53 = vld [vmem:[#allocation26_spill] sm:$0xff] }
 0x6a1   : > { %v7600_v1 = vpop.eup %7599  ;;  %4945 = vadd.xlane.f32.xlu0 %v4944_v31  ;;  %v4949_v58 = vadd.f32 %v4948_v44, %v4797_v11  ;;  %5126 = vmatprep.mubr.bf16.mxu1 %v7598_v4  ;;  %v4806_v28 = vunpack.c.l.bf16 %v7596_v3  ;;  %v4804_v23 = vunpack.c.h.bf16 %v11398_v45  ;;  %v4807_v5 = vunpack.c.l.bf16 %v7598_v4  ;;  %v13059_v11 = vld [vmem:[#allocation214_spill] sm:$0xff] }
 0x6a2   : > { %v7602_v10 = vpop.eup %7601  ;;  %v4953_v56 = vadd.f32 %v4952_v47, %v4800_v25  ;;  %v4957_v30 = vadd.f32 %v4803_v32, %v4802_v33  ;;  %5127 = vmatmul.mubr.bf16.gmra.mrb[120].mxu1 %v7596_v3  ;;  %v4805_v34 = vunpack.c.h.bf16 %v11402_v24  ;;  %v4810_v9 = vunpack.c.h.bf16 %v7596_v3  ;;  %v13061_v32 = vld [vmem:[#allocation53_spill] sm:$0xff] }
 0x6a3   : > { %4950 = vadd.xlane.f32.xlu1 %v4949_v58  ;;  %5287 = vmatprep.mubr.bf16.mxu0 %v7602_v10  ;;  %v4811_v21 = vunpack.c.h.bf16 %v7598_v4  ;;  %v4808_v42 = vunpack.c.l.bf16 %v7600_v1  ;;  %v4962_v6 = vadd.f32 %v4807_v5, %v4806_v28  ;;  %v4812_v0 = vunpack.c.h.bf16 %v7600_v1 }
 0x6a4   : > { %v4954_v12 = vadd.f32 %v4953_v56, %v4801_v37  ;;  %v4958_v50 = vadd.f32 %v4957_v30, %v4804_v23  ;;  %5288 = vmatmul.mubr.bf16.gmra.mrb[184].mxu0 %v7600_v1  ;;  %v4809_v41 = vunpack.c.l.bf16 %v7602_v10  ;;  %v4813_v54 = vunpack.c.h.bf16 %v7602_v10  ;;  %6987 = vmatpush3.bf16.msra.mxu1 %v7354_v59  ;;  %v13062_v37 = vld [vmem:[#allocation52_spill] sm:$0xff] }
 0x6a5   : > { %3245 = vadd.xlane.f32.xlu0 %v13053_v29  ;;  %v4967_v15 = vadd.f32 %v4811_v21, %v4810_v9  ;;  %v4963_v18 = vadd.f32 %v4962_v6, %v4808_v42 }
 0x6a6   : > { %v4959_v17 = vadd.f32 %v4958_v50, %v4805_v34  ;;  %v13063_v34 = vld [vmem:[#allocation76_spill] sm:$0xff] }
 0x6a7   : > { %3250 = vadd.xlane.f32.xlu1 %v13054_v40  ;;  %v4968_v46 = vadd.f32 %v4967_v15, %v4812_v0  ;;  %v4964_v45 = vadd.f32 %v4963_v18, %v4809_v41  ;;  %v13065_v15 = vld [vmem:[#allocation215_spill] sm:$0xff]  ;;  %v13066_v40 = vld [vmem:[#allocation110_spill] sm:$0xff] }
 0x6a8   : > { %v7604_v7 = vpop.eup %7603 }
 0x6a9   : > { %v7606_v36 = vpop.eup %7605  ;;  %4955 = vadd.xlane.f32.xlu0 %v4954_v12  ;;  %v4969_v16 = vadd.f32 %v4968_v46, %v4813_v54  ;;  %v4818_v63 = vunpack.c.h.bf16 %v7604_v7  ;;  %v4814_v20 = vunpack.c.l.bf16 %v7604_v7  ;;  %v13064_v12 = vld [vmem:[#allocation74_spill] sm:$0xff] }
 0x6aa   : > { %v7608_v24 = vpop.eup %7607  ;;  %5134 = vmatprep.mubr.bf16.mxu1 %v7606_v36  ;;  %v4819_v35 = vunpack.c.h.bf16 %v7606_v36  ;;  %v4815_v27 = vunpack.c.l.bf16 %v7606_v36 }
 0x6ab   : > { %v7610_v22 = vpop.eup %7609  ;;  %4960 = vadd.xlane.f32.xlu1 %v4959_v17  ;;  %5135 = vmatmul.mubr.bf16.gmra.mrb[124].mxu1 %v7604_v7  ;;  %v4820_v57 = vunpack.c.h.bf16 %v7608_v24  ;;  %v4816_v14 = vunpack.c.l.bf16 %v7608_v24 }
 0x6ac   : > { %5295 = vmatprep.mubr.bf16.mxu0 %v7610_v22  ;;  %v4977_v51 = vadd.f32 %v4819_v35, %v4818_v63  ;;  %v4972_v55 = vadd.f32 %v4815_v27, %v4814_v20  ;;  %v4821_v8 = vunpack.c.h.bf16 %v7610_v22  ;;  %v4817_v61 = vunpack.c.l.bf16 %v7610_v22  ;;  %v13067_v63 = vld [vmem:[#allocation108_spill] sm:$0xff] }
 0x6ad   : > { %3255 = vadd.xlane.f32.xlu0 %v13055_v39  ;;  %5296 = vmatmul.mubr.bf16.gmra.mrb[188].mxu0 %v7608_v24  ;;  %v13068_v27 = vld [vmem:[#allocation172_spill] sm:$0xff] }
 0x6ae   : > { %v4978_v49 = vadd.f32 %v4977_v51, %v4820_v57  ;;  %v4973_v26 = vadd.f32 %v4972_v55, %v4816_v14 }
 0x6af   : > { %3260 = vadd.xlane.f32.xlu1 %v13056_v62  ;;  %v13070_v62 = vld [vmem:[#allocation30_spill] sm:$0xff] }
 0x6b0   : > { %v4979_v60 = vadd.f32 %v4978_v49, %v4821_v8  ;;  %v4974_v43 = vadd.f32 %v4973_v26, %v4817_v61  ;;  %v13069_v8 = vld [vmem:[#allocation173_spill] sm:$0xff] }
 0x6b1   : > { %4965 = vadd.xlane.f32.xlu0 %v4964_v45 }
 0x6b3   : > { %4970 = vadd.xlane.f32.xlu1 %v4969_v16 }
 0x6b5   : > { %3265 = vadd.xlane.f32.xlu0 %v13057_v13 }
 0x6b7   : > { %3270 = vadd.xlane.f32.xlu1 %v13058_v48 }
 0x6b9   : > { %4975 = vadd.xlane.f32.xlu0 %v4974_v43 }
 0x6bb   : > { %4980 = vadd.xlane.f32.xlu1 %v4979_v60 }
 0x6bd   : > { %3275 = vadd.xlane.f32.xlu0 %v13059_v11 }
 0x6bf   : > { %3280 = vadd.xlane.f32.xlu1 %v13060_v53 }
 0x6c4   : > { %v11431_v38 = vpop.xlane.xlu0 %4825 }
 0x6c8   : > { %v11433_v3 = vpop.xlane.xlu1 %4830  ;;  %v3126_v2 = vpop.xlane.xlu0 %3125 }
 0x6c9   : > { %7611 = vrcp.f32 %v3126_v2  ;;  %v13071_v2 = vld [vmem:[#allocation29_spill] sm:$0xff] }
 0x6cc   : > { %v3131_v31 = vpop.xlane.xlu1 %3130 }
 0x6cd   : > { %7613 = vrcp.f32 %v3131_v31  ;;  %v11435_v44 = vpop.xlane.xlu0 %4835 }
 0x6d1   : > { %v3136_v25 = vpop.xlane.xlu0 %3135 }
 0x6d2   : > { %v11437_v4 = vpop.xlane.xlu1 %4840  ;;  %7615 = vrcp.f32 %v3136_v25 }
 0x6d3   : > { %v7612_v47 = vpop.eup %7611 }
 0x6d4   : > { %v11442_v52 = vmul.f32 %v7612_v47, %v13061_v32 }
 0x6d5   : > { %v11439_v33 = vpop.xlane.xlu0 %4845 }
 0x6d6   : > { %v3141_v1 = vpop.xlane.xlu1 %3140 }
 0x6d7   : > { %v7614_v58 = vpop.eup %7613  ;;  %7617 = vrcp.f32 %v3141_v1 }
 0x6d8   : > { %v11445_v28 = vmul.f32 %v7614_v58, %v13062_v37  ;;  %v13072_v58 = vld [vmem:[#allocation216_spill] sm:$0xff] }
 0x6d9   : > { %v3146_v19 = vpop.xlane.xlu0 %3145 }
 0x6da   : > { %v3668_v10 = vpack.c.bf16 %v11445_v28, %v11442_v52  ;;  %7619 = vrcp.f32 %v3146_v19 }
 0x6db   : > { %v11449_v56 = vpop.xlane.xlu1 %4850 }
 0x6dc   : > { %v7616_v23 = vpop.eup %7615 }
 0x6dd   : > { %v11454_v9 = vmul.f32 %v7616_v23, %v13063_v34 }
 0x6de   : > { %v11451_v30 = vpop.xlane.xlu0 %4855 }
 0x6df   : > { %v3151_v5 = vpop.xlane.xlu1 %3150 }
 0x6e0   : > { %7621 = vrcp.f32 %v3151_v5 }
 0x6e1   : > { %v7618_v21 = vpop.eup %7617 }
 0x6e2   : > { %v11457_v50 = vmul.f32 %v7618_v21, %v13064_v12  ;;  %v3156_v42 = vpop.xlane.xlu0 %3155 }
 0x6e3   : > { %v11459_v6 = vpop.xlane.xlu1 %4860  ;;  %7623 = vrcp.f32 %v3156_v42 }
 0x6e4   : > { %v3669_v59 = vpack.c.bf16 %v11457_v50, %v11454_v9  ;;  %v7620_v29 = vpop.eup %7619 }
 0x6e5   : > { %v11464_v17 = vmul.f32 %v7620_v29, %v13065_v15 }
 0x6e7   : > { %v3161_v0 = vpop.xlane.xlu1 %3160 }
 0x6e8   : > { %7625 = vrcp.f32 %v3161_v0 }
 0x6e9   : > { %v11466_v41 = vpop.xlane.xlu0 %4865 }
 0x6ea   : > { %v7622_v18 = vpop.eup %7621 }
 0x6eb   : > { %v11469_v54 = vmul.f32 %v7622_v18, %v13066_v40 }
 0x6ec   : > { %v11471_v46 = vpop.xlane.xlu1 %4870 }
 0x6ed   : > { %v3670_v7 = vpack.c.bf16 %v11469_v54, %v11464_v17  ;;  %v3166_v45 = vpop.xlane.xlu0 %3165  ;;  %v7624_v36 = vpop.eup %7623  ;;  %v13080_v54 = vld [vmem:[#allocation174_spill] sm:$0xff] }
 0x6ee   : > { %7627 = vrcp.f32 %v3166_v45  ;;  %v11476_v20 = vmul.f32 %v7624_v36, %v13067_v63 }
 0x6f0   : > { %v3171_v16 = vpop.xlane.xlu1 %3170 }
 0x6f1   : > { %7629 = vrcp.f32 %v3171_v16 }
 0x6f2   : > { %v7626_v24 = vpop.eup %7625  ;;  %v11478_v35 = vpop.xlane.xlu0 %4875 }
 0x6f3   : > { %v11481_v22 = vmul.f32 %v7626_v24, %v13068_v27 }
 0x6f5   : > { %v3671_v57 = vpack.c.bf16 %v11481_v22, %v11476_v20  ;;  %v11485_v51 = vpop.xlane.xlu1 %4880 }
 0x6f6   : > { %v3176_v14 = vpop.xlane.xlu0 %3175 }
 0x6f7   : > { %7631 = vrcp.f32 %v3176_v14  ;;  %v13073_v14 = vld [vmem:[#allocation56_spill] sm:$0xff] }
 0x6f8   : > { %v7628_v55 = vpop.eup %7627 }
 0x6f9   : > { %v3181_v39 = vpop.xlane.xlu1 %3180  ;;  %v11488_v49 = vmul.f32 %v7628_v55, %v13069_v8 }
 0x6fa   : > { %7633 = vrcp.f32 %v3181_v39 }
 0x6fb   : > { %v7630_v61 = vpop.eup %7629  ;;  %v11490_v26 = vpop.xlane.xlu0 %4885 }
 0x6fc   : > { %v11493_v60 = vmul.f32 %v7630_v61, %v13070_v62 }
 0x6fe   : > { %v3672_v43 = vpack.c.bf16 %v11493_v60, %v11488_v49  ;;  %v11497_v13 = vpop.xlane.xlu1 %4890 }
 0x6ff   : > { %v3186_v48 = vpop.xlane.xlu0 %3185 }
 0x700   : > { %7635 = vrcp.f32 %v3186_v48 }
 0x701   : > { %v7632_v11 = vpop.eup %7631  ;;  %7637 = vrcp.f32 %v11431_v38 }
 0x702   : > { %7639 = vrcp.f32 %v11433_v3  ;;  %v3191_v53 = vpop.xlane.xlu1 %3190  ;;  %v11502_v31 = vmul.f32 %v7632_v11, %v13071_v2  ;;  %v13074_v2 = vld [vmem:[#allocation55_spill] sm:$0xff] }
 0x703   : > { %7641 = vrcp.f32 %v3191_v53  ;;  %v11504_v25 = vpop.xlane.xlu0 %4895  ;;  %v6764_v47 = vpop.f32.mrb[64].mxu1 }
 0x704   : > { %v7634_v32 = vpop.eup %7633  ;;  %v6765_v1 = vpop.f32.mrb[65].mxu1 }
 0x705   : > { %v11507_v37 = vmul.f32 %v7634_v32, %v13072_v58  ;;  %v6876_v19 = vpop.f32.mrb[128].mxu0  ;;  %v6766_v23 = vadd.f32 %v6765_v1, %v6764_v47  ;;  %v6767_v5 = vpop.f32.mrb[66].mxu1 }
 0x706   : > { %v11509_v34 = vpop.xlane.xlu1 %4900  ;;  %v6877_v38 = vpop.f32.mrb[129].mxu0 }
 0x707   : > { %v3673_v3 = vpack.c.bf16 %v11507_v37, %v11502_v31  ;;  %v3196_v21 = vpop.xlane.xlu0 %3195  ;;  %v6878_v12 = vadd.f32 %v6877_v38, %v6876_v19  ;;  %v6879_v42 = vpop.f32.mrb[130].mxu0 }
 0x708   : > { %7643 = vrcp.f32 %v3196_v21  ;;  %v6768_v29 = vpop.f32.mrb[67].mxu1  ;;  %v6880_v0 = vpop.f32.mrb[131].mxu0 }
 0x709   : > { %7645 = vrcp.f32 %v11435_v44  ;;  %v5178_v15 = vadd.f32 %v6878_v12, %v6766_v23  ;;  %v6769_v18 = vadd.f32 %v6768_v29, %v6767_v5  ;;  %v6881_v40 = vadd.f32 %v6880_v0, %v6879_v42 }
 0x70a   : > { %v7636_v45 = vpop.eup %7635  ;;  %7647 = vrcp.f32 %v11437_v4  ;;  %v3201_v36 = vpop.xlane.xlu1 %3200 }
 0x70b   : > { %v7638_v16 = vpop.eup %7637  ;;  %7649 = vrcp.f32 %v3201_v36  ;;  %v5181_v63 = vadd.f32 %v6881_v40, %v6769_v18  ;;  %v6770_v24 = vpop.f32.mrb[68].mxu1  ;;  %v11516_v55 = vmul.f32 %v7636_v45, %v13073_v14  ;;  %v13075_v36 = vld [vmem:[#allocation80_spill] sm:$0xff] }
 0x70c   : > { %v7640_v27 = vpop.eup %7639  ;;  %v11518_v39 = vpop.xlane.xlu0 %4905  ;;  %v5336_v44 = vmul.f32 %v7638_v16, %v5178_v15  ;;  %7651 = vrcp.f32 %v11439_v33 }
 0x70d   : > { %v6771_v8 = vpop.f32.mrb[69].mxu1  ;;  %v7642_v61 = vpop.eup %7641  ;;  %v5337_v62 = vmul.f32 %v7640_v27, %v5181_v63 }
 0x70e   : > { %v6882_v48 = vpop.f32.mrb[132].mxu0  ;;  %v6772_v11 = vadd.f32 %v6771_v8, %v6770_v24  ;;  %v6773_v53 = vpop.f32.mrb[70].mxu1  ;;  %v11521_v4 = vmul.f32 %v7642_v61, %v13074_v2 }
 0x70f   : > { %v11523_v47 = vpop.xlane.xlu1 %4910  ;;  %v6883_v32 = vpop.f32.mrb[133].mxu0  ;;  %v5368_v23 = vpack.c.bf16 %v5337_v62, %v5336_v44  ;;  %v13076_v62 = vld [vmem:[#allocation78_spill] sm:$0xff] }
 0x710   : > { %v6884_v1 = vadd.f32 %v6883_v32, %v6882_v48  ;;  %v6885_v58 = vpop.f32.mrb[134].mxu0  ;;  %v6774_v19 = vpop.f32.mrb[71].mxu1  ;;  %v3674_v5 = vpack.c.bf16 %v11521_v4, %v11516_v55 }
 0x711   : > { %v3206_v38 = vpop.xlane.xlu0 %3205  ;;  %v6775_v21 = vadd.f32 %v6774_v19, %v6773_v53  ;;  %v6886_v12 = vpop.f32.mrb[135].mxu0  ;;  %5598 = vmatprep.mubr.bf16.mxu1 %v5368_v23 }
 0x712   : > { %7653 = vrcp.f32 %v3206_v38  ;;  %v5186_v42 = vadd.f32 %v6884_v1, %v6772_v11  ;;  %v6887_v29 = vadd.f32 %v6886_v12, %v6885_v58  ;;  %v7644_v0 = vpop.eup %7643  ;;  %5599 = vmatmul.mubr.bf16.vlgmr.msra.gmra.mrb[128].mxu1 %v3668_v10 }
 0x713   : > { %7655 = vrcp.f32 %v11449_v56  ;;  %v3211_v15 = vpop.xlane.xlu1 %3210  ;;  %v7646_v18 = vpop.eup %7645  ;;  %v11533_v16 = vmul.f32 %v7644_v0, %v13075_v36 }
 0x714   : > { %7657 = vrcp.f32 %v3211_v15  ;;  %v5189_v33 = vadd.f32 %v6887_v29, %v6775_v21  ;;  %v6776_v40 = vpop.f32.mrb[72].mxu1  ;;  %v7648_v45 = vpop.eup %7647  ;;  %v5338_v14 = vmul.f32 %v7646_v18, %v5186_v42  ;;  %v13077_v15 = vld [vmem:[#allocation217_spill] sm:$0xff] }
 0x715   : > { %v11535_v63 = vpop.xlane.xlu0 %4915  ;;  %v6777_v24 = vpop.f32.mrb[73].mxu1  ;;  %7659 = vrcp.f32 %v11451_v30 }
 0x716   : > { %v7650_v27 = vpop.eup %7649  ;;  %v5339_v8 = vmul.f32 %v7648_v45, %v5189_v33  ;;  %v6888_v56 = vpop.f32.mrb[136].mxu0  ;;  %v6778_v61 = vadd.f32 %v6777_v24, %v6776_v40 }
 0x717   : > { %v6779_v44 = vpop.f32.mrb[74].mxu1  ;;  %v11538_v52 = vmul.f32 %v7650_v27, %v13076_v62  ;;  %v6889_v28 = vpop.f32.mrb[137].mxu0 }
 0x718   : > { %v6780_v10 = vpop.f32.mrb[75].mxu1  ;;  %v11540_v48 = vpop.xlane.xlu1 %4920  ;;  %v6890_v11 = vadd.f32 %v6889_v28, %v6888_v56  ;;  %v5369_v32 = vpack.c.bf16 %v5339_v8, %v5338_v14  ;;  %v13078_v14 = vld [vmem:[#allocation114_spill] sm:$0xff] }
 0x719   : > { %v6891_v53 = vpop.f32.mrb[138].mxu0  ;;  %v6781_v2 = vadd.f32 %v6780_v10, %v6779_v44  ;;  %v3675_v1 = vpack.c.bf16 %v11538_v52, %v11533_v16  ;;  %v3216_v58 = vpop.xlane.xlu0 %3215 }
 0x71a   : > { %v6892_v19 = vpop.f32.mrb[139].mxu0  ;;  %7661 = vrcp.f32 %v3216_v58  ;;  %v5194_v23 = vadd.f32 %v6890_v11, %v6778_v61  ;;  %5606 = vmatprep.mubr.bf16.mxu1 %v5369_v32  ;;  %v7652_v21 = vpop.eup %7651 }
 0x71b   : > { %v6893_v38 = vadd.f32 %v6892_v19, %v6891_v53  ;;  %7663 = vrcp.f32 %v11459_v6  ;;  %5607 = vmatmul.mubr.bf16.gmra.mrb[132].mxu1 %v3669_v59  ;;  %v6782_v30 = vpop.f32.mrb[76].mxu1 }
 0x71c   : > { %v7654_v12 = vpop.eup %7653  ;;  %v3221_v42 = vpop.xlane.xlu1 %3220  ;;  %v5340_v36 = vmul.f32 %v7652_v21, %v5194_v23 }
 0x71d   : > { %v5197_v29 = vadd.f32 %v6893_v38, %v6781_v2  ;;  %v7656_v0 = vpop.eup %7655  ;;  %v11550_v18 = vmul.f32 %v7654_v12, %v13077_v15  ;;  %7665 = vrcp.f32 %v3221_v42  ;;  %v6783_v33 = vpop.f32.mrb[77].mxu1 }
 0x71e   : > { %v7658_v40 = vpop.eup %7657  ;;  %v11552_v45 = vpop.xlane.xlu0 %4925  ;;  %v6784_v27 = vadd.f32 %v6783_v33, %v6782_v30  ;;  %7667 = vrcp.f32 %v11466_v41 }
 0x71f   : > { %v5341_v24 = vmul.f32 %v7656_v0, %v5197_v29  ;;  %v6894_v6 = vpop.f32.mrb[140].mxu0  ;;  %v11555_v9 = vmul.f32 %v7658_v40, %v13078_v14  ;;  %v6785_v59 = vpop.f32.mrb[78].mxu1  ;;  %7669 = vrcp.f32 %v11471_v46  ;;  %v13079_v29 = vld [vmem:[#allocation112_spill] sm:$0xff] }
 0x720   : > { %v6895_v50 = vpop.f32.mrb[141].mxu0  ;;  %v6786_v61 = vpop.f32.mrb[79].mxu1 }
 0x721   : > { %v6896_v8 = vadd.f32 %v6895_v50, %v6894_v6  ;;  %v6897_v56 = vpop.f32.mrb[142].mxu0  ;;  %v5370_v44 = vpack.c.bf16 %v5341_v24, %v5340_v36  ;;  %v3676_v62 = vpack.c.bf16 %v11555_v9, %v11550_v18  ;;  %v11560_v28 = vpop.xlane.xlu1 %4930  ;;  %v6787_v10 = vadd.f32 %v6786_v61, %v6785_v59 }
 0x722   : > { %v6898_v11 = vpop.f32.mrb[143].mxu0  ;;  %v3226_v53 = vpop.xlane.xlu0 %3225 }
 0x723   : > { %v5202_v2 = vadd.f32 %v6896_v8, %v6784_v27  ;;  %v6899_v32 = vadd.f32 %v6898_v11, %v6897_v56  ;;  %5614 = vmatprep.mubr.bf16.mxu1 %v5370_v44  ;;  %v7660_v58 = vpop.eup %7659  ;;  %7671 = vrcp.f32 %v3226_v53  ;;  %v6788_v23 = vpop.f32.mrb[80].mxu1 }
 0x724   : > { %5615 = vmatmul.mubr.bf16.gmra.mrb[136].mxu1 %v3670_v7  ;;  %v7662_v41 = vpop.eup %7661  ;;  %v6789_v42 = vpop.f32.mrb[81].mxu1 }
 0x725   : > { %v5205_v19 = vadd.f32 %v6899_v32, %v6787_v10  ;;  %v7664_v38 = vpop.eup %7663  ;;  %v3231_v21 = vpop.xlane.xlu1 %3230  ;;  %v5342_v12 = vmul.f32 %v7660_v58, %v5202_v2  ;;  %v11567_v30 = vmul.f32 %v7662_v41, %v13079_v29  ;;  %v6790_v33 = vadd.f32 %v6789_v42, %v6788_v23 }
 0x726   : > { %7673 = vrcp.f32 %v3231_v21  ;;  %v11569_v46 = vpop.xlane.xlu0 %4935  ;;  %v6900_v15 = vpop.f32.mrb[144].mxu0 }
 0x727   : > { %v5343_v0 = vmul.f32 %v7664_v38, %v5205_v19  ;;  %v7666_v40 = vpop.eup %7665  ;;  %v6901_v36 = vpop.f32.mrb[145].mxu0  ;;  %7675 = vrcp.f32 %v11478_v35 }
 0x728   : > { %v6791_v17 = vpop.f32.mrb[82].mxu1  ;;  %v11572_v7 = vmul.f32 %v7666_v40, %v13080_v54  ;;  %v6902_v24 = vadd.f32 %v6901_v36, %v6900_v15  ;;  %v6903_v6 = vpop.f32.mrb[146].mxu0  ;;  %7677 = vrcp.f32 %v11485_v51  ;;  %v13082_v40 = vld [vmem:[#allocation218_spill] sm:$0xff] }
 0x729   : > { %v6792_v27 = vpop.f32.mrb[83].mxu1  ;;  %v5371_v14 = vpack.c.bf16 %v5343_v0, %v5342_v12  ;;  %v11575_v50 = vpop.xlane.xlu1 %4940  ;;  %v13081_v12 = vld [vmem:[#allocation175_spill] sm:$0xff] }
 0x72a   : > { %v6793_v59 = vadd.f32 %v6792_v27, %v6791_v17  ;;  %v6904_v8 = vpop.f32.mrb[147].mxu0  ;;  %v3677_v56 = vpack.c.bf16 %v11572_v7, %v11567_v30  ;;  %v3236_v61 = vpop.xlane.xlu0 %3235  ;;  %v5210_v44 = vadd.f32 %v6902_v24, %v6790_v33 }
 0x72b   : > { %v6905_v10 = vadd.f32 %v6904_v8, %v6903_v6  ;;  %5622 = vmatprep.mubr.bf16.mxu1 %v5371_v14  ;;  %v7668_v11 = vpop.eup %7667  ;;  %7679 = vrcp.f32 %v3236_v61  ;;  %v6794_v2 = vpop.f32.mrb[84].mxu1 }
 0x72c   : > { %5623 = vmatmul.mubr.bf16.gmra.mrb[140].mxu1 %v3671_v57  ;;  %v7670_v35 = vpop.eup %7669  ;;  %v6795_v41 = vpop.f32.mrb[85].mxu1  ;;  %v5344_v51 = vmul.f32 %v7668_v11, %v5210_v44 }
 0x72d   : > { %v5213_v53 = vadd.f32 %v6905_v10, %v6793_v59  ;;  %v7672_v32 = vpop.eup %7671  ;;  %v3241_v58 = vpop.xlane.xlu1 %3240  ;;  %v6796_v38 = vadd.f32 %v6795_v41, %v6794_v2  ;;  %v13083_v41 = vld [vmem:[#allocation33_spill] sm:$0xff] }
 0x72e   : > { %7681 = vrcp.f32 %v3241_v58  ;;  %v6906_v23 = vpop.f32.mrb[148].mxu0  ;;  %v6797_v21 = vpop.f32.mrb[86].mxu1  ;;  %v11584_v42 = vmul.f32 %v7672_v32, %v13081_v12  ;;  %v13084_v12 = vld [vmem:[#allocation32_spill] sm:$0xff] }
 0x72f   : > { %v5345_v19 = vmul.f32 %v7670_v35, %v5213_v53  ;;  %v11586_v29 = vpop.xlane.xlu0 %4945  ;;  %v6907_v0 = vpop.f32.mrb[149].mxu0  ;;  %7683 = vrcp.f32 %v11490_v26 }
 0x730   : > { %v7674_v20 = vpop.eup %7673  ;;  %v6908_v22 = vadd.f32 %v6907_v0, %v6906_v23  ;;  %v6909_v57 = vpop.f32.mrb[150].mxu0  ;;  %7685 = vrcp.f32 %v11497_v13 }
 0x731   : > { %v6798_v15 = vpop.f32.mrb[87].mxu1  ;;  %v5372_v33 = vpack.c.bf16 %v5345_v19, %v5344_v51  ;;  %v11589_v36 = vmul.f32 %v7674_v20, %v13082_v40  ;;  %v11591_v17 = vpop.xlane.xlu1 %4950 }
 0x732   : > { %v6799_v54 = vadd.f32 %v6798_v15, %v6797_v21  ;;  %v6910_v24 = vpop.f32.mrb[151].mxu0  ;;  %v5218_v6 = vadd.f32 %v6908_v22, %v6796_v38  ;;  %v7676_v14 = vpop.eup %7675 }
 0x733   : > { %v6911_v27 = vadd.f32 %v6910_v24, %v6909_v57  ;;  %5630 = vmatprep.mubr.bf16.mxu1 %v5372_v33  ;;  %v3678_v59 = vpack.c.bf16 %v11589_v36, %v11584_v42  ;;  %v3246_v8 = vpop.xlane.xlu0 %3245  ;;  %v7678_v61 = vpop.eup %7677 }
 0x734   : > { %5631 = vmatmul.mubr.bf16.gmra.mrb[144].mxu1 %v3672_v43  ;;  %7687 = vrcp.f32 %v3246_v8  ;;  %v6800_v10 = vpop.f32.mrb[88].mxu1  ;;  %v5346_v53 = vmul.f32 %v7676_v14, %v5218_v6 }
 0x735   : > { %v5221_v44 = vadd.f32 %v6911_v27, %v6799_v54  ;;  %v7680_v11 = vpop.eup %7679  ;;  %v3251_v26 = vpop.xlane.xlu1 %3250 }
 0x736   : > { %v6801_v35 = vpop.f32.mrb[89].mxu1  ;;  %7689 = vrcp.f32 %v3251_v26  ;;  %v6912_v32 = vpop.f32.mrb[152].mxu0  ;;  %v11601_v51 = vmul.f32 %v7680_v11, %v13083_v41  ;;  %v13086_v41 = vld [vmem:[#allocation58_spill] sm:$0xff] }
 0x737   : > { %v5347_v2 = vmul.f32 %v7678_v61, %v5221_v44  ;;  %v6802_v13 = vadd.f32 %v6801_v35, %v6800_v10  ;;  %v6803_v58 = vpop.f32.mrb[90].mxu1  ;;  %v11603_v19 = vpop.xlane.xlu0 %4955  ;;  %7691 = vrcp.f32 %v11504_v25  ;;  %v13085_v35 = vld [vmem:[#allocation59_spill] sm:$0xff] }
 0x738   : > { %v6913_v49 = vpop.f32.mrb[153].mxu0  ;;  %v7682_v60 = vpop.eup %7681  ;;  %7693 = vrcp.f32 %v11509_v34 }
 0x739   : > { %v6914_v43 = vadd.f32 %v6913_v49, %v6912_v32  ;;  %v6915_v23 = vpop.f32.mrb[154].mxu0  ;;  %v6804_v38 = vpop.f32.mrb[91].mxu1  ;;  %v5373_v21 = vpack.c.bf16 %v5347_v2, %v5346_v53  ;;  %v11606_v0 = vmul.f32 %v7682_v60, %v13084_v12 }
 0x73a   : > { %v11608_v20 = vpop.xlane.xlu1 %4960  ;;  %v6805_v22 = vadd.f32 %v6804_v38, %v6803_v58  ;;  %v6916_v57 = vpop.f32.mrb[155].mxu0 }
 0x73b   : > { %v5226_v15 = vadd.f32 %v6914_v43, %v6802_v13  ;;  %v6917_v33 = vadd.f32 %v6916_v57, %v6915_v23  ;;  %5638 = vmatprep.mubr.bf16.mxu1 %v5373_v21  ;;  %v3679_v40 = vpack.c.bf16 %v11606_v0, %v11601_v51  ;;  %v3256_v54 = vpop.xlane.xlu0 %3255  ;;  %v7684_v24 = vpop.eup %7683 }
 0x73c   : > { %5639 = vmatmul.mubr.bf16.gmra.mrb[148].mxu1 %v3673_v3  ;;  %7695 = vrcp.f32 %v3256_v54  ;;  %v6806_v27 = vpop.f32.mrb[92].mxu1  ;;  %v7686_v14 = vpop.eup %7685 }
 0x73d   : > { %v5229_v6 = vadd.f32 %v6917_v33, %v6805_v22  ;;  %v6807_v25 = vpop.f32.mrb[93].mxu1  ;;  %v5348_v44 = vmul.f32 %v7684_v24, %v5226_v15  ;;  %v6918_v34 = vpop.f32.mrb[156].mxu0 }
 0x73e   : > { %v3261_v8 = vpop.xlane.xlu1 %3260  ;;  %v7688_v61 = vpop.eup %7687  ;;  %v6808_v11 = vadd.f32 %v6807_v25, %v6806_v27 }
 0x73f   : > { %7697 = vrcp.f32 %v3261_v8  ;;  %v5349_v10 = vmul.f32 %v7686_v14, %v5229_v6  ;;  %v6809_v26 = vpop.f32.mrb[94].mxu1  ;;  %v11618_v53 = vmul.f32 %v7688_v61, %v13085_v35  ;;  %v11620_v2 = vpop.xlane.xlu0 %4965  ;;  %v13087_v61 = vld [vmem:[#allocation84_spill] sm:$0xff]  ;;  %v13088_v35 = vld [vmem:[#allocation82_spill] sm:$0xff] }
 0x740   : > { %v6919_v31 = vpop.f32.mrb[157].mxu0  ;;  %v7690_v37 = vpop.eup %7689  ;;  %7699 = vrcp.f32 %v11518_v39 }
 0x741   : > { %v6920_v3 = vadd.f32 %v6919_v31, %v6918_v34  ;;  %v6921_v32 = vpop.f32.mrb[158].mxu0  ;;  %v6810_v13 = vpop.f32.mrb[95].mxu1  ;;  %v5374_v58 = vpack.c.bf16 %v5349_v10, %v5348_v44  ;;  %v11623_v49 = vmul.f32 %v7690_v37, %v13086_v41  ;;  %7701 = vrcp.f32 %v11523_v47 }
 0x742   : > { %v11625_v60 = vpop.xlane.xlu1 %4970  ;;  %v6811_v43 = vadd.f32 %v6810_v13, %v6809_v26  ;;  %v6922_v23 = vpop.f32.mrb[159].mxu0 }
 0x743   : > { %v5234_v38 = vadd.f32 %v6920_v3, %v6808_v11  ;;  %v6923_v21 = vadd.f32 %v6922_v23, %v6921_v32  ;;  %5646 = vmatprep.mubr.bf16.mxu1 %v5374_v58  ;;  %v3680_v12 = vpack.c.bf16 %v11623_v49, %v11618_v53  ;;  %v3266_v22 = vpop.xlane.xlu0 %3265  ;;  %v7692_v57 = vpop.eup %7691 }
 0x744   : > { %5647 = vmatmul.mubr.bf16.gmra.mrb[152].mxu1 %v3674_v5  ;;  %7703 = vrcp.f32 %v3266_v22  ;;  %v6812_v33 = vpop.f32.mrb[96].mxu1  ;;  %v7694_v54 = vpop.eup %7693 }
 0x745   : > { %v5237_v15 = vadd.f32 %v6923_v21, %v6811_v43  ;;  %v6813_v39 = vpop.f32.mrb[97].mxu1  ;;  %v5350_v27 = vmul.f32 %v7692_v57, %v5234_v38  ;;  %v6924_v47 = vpop.f32.mrb[160].mxu0 }
 0x746   : > { %v3271_v24 = vpop.xlane.xlu1 %3270  ;;  %v7696_v6 = vpop.eup %7695  ;;  %v6814_v8 = vadd.f32 %v6813_v39, %v6812_v33 }
 0x747   : > { %7705 = vrcp.f32 %v3271_v24  ;;  %v5351_v14 = vmul.f32 %v7694_v54, %v5237_v15  ;;  %v6815_v25 = vpop.f32.mrb[98].mxu1  ;;  %v11635_v44 = vmul.f32 %v7696_v6, %v13087_v61  ;;  %v11637_v10 = vpop.xlane.xlu0 %4975  ;;  %v13089_v6 = vld [vmem:[#allocation219_spill] sm:$0xff]  ;;  %v13090_v61 = vld [vmem:[#allocation118_spill] sm:$0xff] }
 0x748   : > { %v6925_v55 = vpop.f32.mrb[161].mxu0  ;;  %v6816_v11 = vpop.f32.mrb[99].mxu1  ;;  %7707 = vrcp.f32 %v11535_v63 }
 0x749   : > { %v7698_v4 = vpop.eup %7697  ;;  %v6926_v5 = vadd.f32 %v6925_v55, %v6924_v47  ;;  %v6927_v34 = vpop.f32.mrb[162].mxu0  ;;  %v5375_v26 = vpack.c.bf16 %v5351_v14, %v5350_v27  ;;  %v6817_v3 = vadd.f32 %v6816_v11, %v6815_v25  ;;  %7709 = vrcp.f32 %v11540_v48 }
 0x74a   : > { %v11640_v31 = vmul.f32 %v7698_v4, %v13088_v35  ;;  %v11642_v37 = vpop.xlane.xlu1 %4980  ;;  %v6928_v32 = vpop.f32.mrb[163].mxu0 }
 0x74b   : > { %v5242_v13 = vadd.f32 %v6926_v5, %v6814_v8  ;;  %v6929_v58 = vadd.f32 %v6928_v32, %v6927_v34  ;;  %5654 = vmatprep.mubr.bf16.mxu1 %v5375_v26  ;;  %v3276_v43 = vpop.xlane.xlu0 %3275  ;;  %v7700_v23 = vpop.eup %7699 }
 0x74c   : > { %v3681_v41 = vpack.c.bf16 %v11640_v31, %v11635_v44  ;;  %5655 = vmatmul.mubr.bf16.gmra.mrb[156].mxu1 %v3675_v1  ;;  %7711 = vrcp.f32 %v3276_v43  ;;  %v6818_v21 = vpop.f32.mrb[100].mxu1  ;;  %v7702_v22 = vpop.eup %7701 }
 0x74d   : > { %v5245_v38 = vadd.f32 %v6929_v58, %v6817_v3  ;;  %v6819_v63 = vpop.f32.mrb[101].mxu1  ;;  %v5352_v33 = vmul.f32 %v7700_v23, %v5242_v13  ;;  %v6930_v48 = vpop.f32.mrb[164].mxu0 }
 0x74e   : > { %v3281_v57 = vpop.xlane.xlu1 %3280  ;;  %v7704_v15 = vpop.eup %7703  ;;  %v6820_v24 = vadd.f32 %v6819_v63, %v6818_v21 }
 0x74f   : > { %7713 = vrcp.f32 %v3281_v57  ;;  %v5353_v54 = vmul.f32 %v7702_v22, %v5245_v38  ;;  %v6821_v39 = vpop.f32.mrb[102].mxu1  ;;  %v11652_v27 = vmul.f32 %v7704_v15, %v13089_v6  ;;  %v6931_v14 = vpop.f32.mrb[165].mxu0  ;;  %v13091_v22 = vld [vmem:[#allocation116_spill] sm:$0xff] }
 0x750   : > { %v6822_v16 = vpop.f32.mrb[103].mxu1  ;;  %v6932_v1 = vadd.f32 %v6931_v14, %v6930_v48  ;;  %v6933_v47 = vpop.f32.mrb[166].mxu0  ;;  %7715 = vrcp.f32 %v11552_v45 }
 0x751   : > { %v7706_v52 = vpop.eup %7705  ;;  %v6823_v8 = vadd.f32 %v6822_v16, %v6821_v39  ;;  %v5376_v25 = vpack.c.bf16 %v5353_v54, %v5352_v33  ;;  %v6934_v4 = vpop.f32.mrb[167].mxu0  ;;  %7717 = vrcp.f32 %v11560_v28  ;;  %v13092_v54 = vld [vmem:[#allocation176_spill] sm:$0xff] }
 0x752   : > { %v11655_v55 = vmul.f32 %v7706_v52, %v13090_v61  ;;  %v5250_v5 = vadd.f32 %v6932_v1, %v6820_v24  ;;  %v6935_v34 = vadd.f32 %v6934_v4, %v6933_v47  ;;  %v7708_v26 = vpop.eup %7707  ;;  %7719 = vrcp.f32 %v11569_v46 }
 0x753   : > { %5662 = vmatprep.mubr.bf16.mxu1 %v5376_v25  ;;  %v6824_v3 = vpop.f32.mrb[104].mxu1  ;;  %v7710_v32 = vpop.eup %7709  ;;  %7721 = vrcp.f32 %v11575_v50 }
 0x754   : > { %v3682_v11 = vpack.c.bf16 %v11655_v55, %v11652_v27  ;;  %5663 = vmatmul.mubr.bf16.gmra.mrb[160].mxu1 %v3676_v62  ;;  %v5253_v35 = vadd.f32 %v6935_v34, %v6823_v8  ;;  %v6825_v13 = vpop.f32.mrb[105].mxu1  ;;  %v5354_v43 = vmul.f32 %v7708_v26, %v5250_v5  ;;  %7723 = vrcp.f32 %v11586_v29 }
 0x755   : > { %v6936_v23 = vpop.f32.mrb[168].mxu0  ;;  %v6826_v38 = vadd.f32 %v6825_v13, %v6824_v3  ;;  %v6827_v21 = vpop.f32.mrb[106].mxu1  ;;  %7725 = vrcp.f32 %v11591_v17 }
 0x756   : > { %v7712_v58 = vpop.eup %7711  ;;  %v5355_v45 = vmul.f32 %v7710_v32, %v5253_v35  ;;  %v6937_v57 = vpop.f32.mrb[169].mxu0  ;;  %7727 = vrcp.f32 %v11603_v19 }
 0x757   : > { %v11665_v28 = vmul.f32 %v7712_v58, %v13091_v22  ;;  %v6828_v63 = vpop.f32.mrb[107].mxu1  ;;  %v6938_v33 = vadd.f32 %v6937_v57, %v6936_v23  ;;  %v6939_v18 = vpop.f32.mrb[170].mxu0  ;;  %7729 = vrcp.f32 %v11608_v20 }
 0x758   : > { %v6829_v9 = vadd.f32 %v6828_v63, %v6827_v21  ;;  %v5377_v62 = vpack.c.bf16 %v5355_v45, %v5354_v43  ;;  %v6940_v24 = vpop.f32.mrb[171].mxu0  ;;  %7731 = vrcp.f32 %v11620_v2 }
 0x759   : > { %v7714_v15 = vpop.eup %7713  ;;  %v5258_v39 = vadd.f32 %v6938_v33, %v6826_v38  ;;  %v6941_v6 = vadd.f32 %v6940_v24, %v6939_v18  ;;  %7733 = vrcp.f32 %v11625_v60 }
 0x75a   : > { %v11668_v48 = vmul.f32 %v7714_v15, %v13092_v54  ;;  %5670 = vmatprep.mubr.bf16.mxu1 %v5377_v62  ;;  %v7716_v16 = vpop.eup %7715  ;;  %7735 = vrcp.f32 %v11637_v10 }
 0x75b   : > { %v5261_v52 = vadd.f32 %v6941_v6, %v6829_v9  ;;  %v7718_v1 = vpop.eup %7717  ;;  %v5356_v8 = vmul.f32 %v7716_v16, %v5258_v39  ;;  %7737 = vrcp.f32 %v11642_v37 }
 0x75c   : > { %v3683_v14 = vpack.c.bf16 %v11668_v48, %v11665_v28  ;;  %5671 = vmatmul.mubr.bf16.gmra.mrb[164].mxu1 %v3677_v56  ;;  %v6830_v47 = vpop.f32.mrb[108].mxu1  ;;  %v7720_v50 = vpop.eup %7719 }
 0x75d   : > { %v5357_v25 = vmul.f32 %v7718_v1, %v5261_v52  ;;  %v6831_v61 = vpop.f32.mrb[109].mxu1  ;;  %v7722_v43 = vpop.eup %7721 }
 0x75e   : > { %v6942_v4 = vpop.f32.mrb[172].mxu0  ;;  %v6832_v5 = vadd.f32 %v6831_v61, %v6830_v47  ;;  %v6833_v34 = vpop.f32.mrb[110].mxu1 }
 0x75f   : > { %v6943_v46 = vpop.f32.mrb[173].mxu0  ;;  %v6834_v26 = vpop.f32.mrb[111].mxu1  ;;  %v5378_v35 = vpack.c.bf16 %v5357_v25, %v5356_v8 }
 0x760   : > { %v6944_v3 = vadd.f32 %v6943_v46, %v6942_v4  ;;  %v6945_v32 = vpop.f32.mrb[174].mxu0  ;;  %v6835_v13 = vadd.f32 %v6834_v26, %v6833_v34  ;;  %v7724_v62 = vpop.eup %7723 }
 0x761   : > { %v6946_v30 = vpop.f32.mrb[175].mxu0  ;;  %5678 = vmatprep.mubr.bf16.mxu1 %v5378_v35  ;;  %v7726_v39 = vpop.eup %7725 }
 0x762   : > { %v5266_v7 = vadd.f32 %v6944_v3, %v6832_v5  ;;  %v6947_v56 = vadd.f32 %v6946_v30, %v6945_v32 }
 0x764   : > { %5679 = vmatmul.mubr.bf16.gmra.mrb[168].mxu1 %v3678_v59  ;;  %v5269_v58 = vadd.f32 %v6947_v56, %v6835_v13  ;;  %v5358_v23 = vmul.f32 %v7720_v50, %v5266_v7 }
 0x765   : > { %v6836_v45 = vpop.f32.mrb[112].mxu1 }
 0x766   : > { %v5359_v38 = vmul.f32 %v7722_v43, %v5269_v58  ;;  %v6837_v21 = vpop.f32.mrb[113].mxu1 }
 0x767   : > { %v6948_v22 = vpop.f32.mrb[176].mxu0  ;;  %v6838_v57 = vadd.f32 %v6837_v21, %v6836_v45  ;;  %v6839_v63 = vpop.f32.mrb[114].mxu1 }
 0x768   : > { %v6949_v15 = vpop.f32.mrb[177].mxu0  ;;  %v6840_v33 = vpop.f32.mrb[115].mxu1  ;;  %v5379_v18 = vpack.c.bf16 %v5359_v38, %v5358_v23 }
 0x769   : > { %v6950_v9 = vadd.f32 %v6949_v15, %v6948_v22  ;;  %v6951_v42 = vpop.f32.mrb[178].mxu0  ;;  %v6841_v36 = vadd.f32 %v6840_v33, %v6839_v63 }
 0x76a   : > { %v6952_v59 = vpop.f32.mrb[179].mxu0  ;;  %5686 = vmatprep.mubr.bf16.mxu1 %v5379_v18 }
 0x76b   : > { %v5274_v29 = vadd.f32 %v6950_v9, %v6838_v57  ;;  %v6953_v17 = vadd.f32 %v6952_v59, %v6951_v42 }
 0x76c   : > { %5687 = vmatmul.mubr.bf16.gmra.mrb[172].mxu1 %v3679_v40  ;;  %v7728_v40 = vpop.eup %7727 }
 0x76d   : > { %v5277_v54 = vadd.f32 %v6953_v17, %v6841_v36  ;;  %v6842_v24 = vpop.f32.mrb[116].mxu1  ;;  %v5360_v16 = vmul.f32 %v7724_v62, %v5274_v29  ;;  %v7730_v35 = vpop.eup %7729 }
 0x76e   : > { %v6843_v6 = vpop.f32.mrb[117].mxu1  ;;  %v7732_v49 = vpop.eup %7731 }
 0x76f   : > { %v5361_v52 = vmul.f32 %v7726_v39, %v5277_v54  ;;  %v6954_v1 = vpop.f32.mrb[180].mxu0  ;;  %v6844_v47 = vadd.f32 %v6843_v6, %v6842_v24  ;;  %v6845_v8 = vpop.f32.mrb[118].mxu1 }
 0x770   : > { %v6955_v25 = vpop.f32.mrb[181].mxu0  ;;  %v6846_v19 = vpop.f32.mrb[119].mxu1 }
 0x771   : > { %v6956_v61 = vadd.f32 %v6955_v25, %v6954_v1  ;;  %v6957_v4 = vpop.f32.mrb[182].mxu0  ;;  %v6847_v5 = vadd.f32 %v6846_v19, %v6845_v8  ;;  %v5380_v34 = vpack.c.bf16 %v5361_v52, %v5360_v16  ;;  %v7734_v21 = vpop.eup %7733  ;;  %v5466_v16 = vlaneseq  ;;  %v5464_v1 = vld [vmem:[%s11835_s4] sm:$0x1] }
 0x772   : > { %v6958_v51 = vpop.f32.mrb[183].mxu0  ;;  %v7736_v37 = vpop.eup %7735  ;;  %v5465_v27 = vunpack.c.l.bf16 %v5464_v1 }
 0x773   : > { %v5282_v0 = vadd.f32 %v6956_v61, %v6844_v47  ;;  %v6959_v20 = vadd.f32 %v6958_v51, %v6957_v4  ;;  %5694 = vmatprep.mubr.bf16.mxu1 %v5380_v34  ;;  %v7738_v54 = vpop.eup %7737  ;;  %v5467_v52 = vshrl.u32 %v5466_v16, 7 }
 0x774   : > { %5695 = vmatmul.mubr.bf16.gmra.mrb[176].mxu1 %v3680_v12 }
 0x775   : > { %v5285_v46 = vadd.f32 %v6959_v20, %v6847_v5  ;;  %v6848_v26 = vpop.f32.mrb[120].mxu1  ;;  %v5362_v32 = vmul.f32 %v7728_v40, %v5282_v0  ;;  %v5468_v55 = vsub.s32 0, %v5467_v52 }
 0x776   : > { %v6849_v3 = vpop.f32.mrb[121].mxu1 }
 0x777   : > { %v5363_v13 = vmul.f32 %v7730_v35, %v5285_v46  ;;  %v6960_v30 = vpop.f32.mrb[184].mxu0  ;;  %v6850_v7 = vadd.f32 %v6849_v3, %v6848_v26  ;;  %v6851_v56 = vpop.f32.mrb[122].mxu1  ;;  %v11706_v8 = vrot.slane %v5465_v27, %v5468_v55 }
 0x778   : > { %v6961_v2 = vpop.f32.mrb[185].mxu0  ;;  %v6852_v50 = vpop.f32.mrb[123].mxu1 }
 0x779   : > { %v6962_v58 = vadd.f32 %v6961_v2, %v6960_v30  ;;  %v6963_v43 = vpop.f32.mrb[186].mxu0  ;;  %v6853_v45 = vadd.f32 %v6852_v50, %v6851_v56  ;;  %v5381_v60 = vpack.c.bf16 %v5363_v13, %v5362_v32 }
 0x77a   : > { %v6964_v23 = vpop.f32.mrb[187].mxu0 }
 0x77b   : > { %v5290_v38 = vadd.f32 %v6962_v58, %v6850_v7  ;;  %v6965_v53 = vadd.f32 %v6964_v23, %v6963_v43  ;;  %5702 = vmatprep.mubr.bf16.mxu1 %v5381_v60 }
 0x77c   : > { %5703 = vmatmul.mubr.bf16.gmra.mrb[180].mxu1 %v3681_v41 }
 0x77d   : > { %v5293_v12 = vadd.f32 %v6965_v53, %v6853_v45  ;;  %v5364_v57 = vmul.f32 %v7732_v49, %v5290_v38 }
 0x77e   : > { %v6854_v22 = vpop.f32.mrb[124].mxu1 }
 0x77f   : > { %v5365_v63 = vmul.f32 %v7734_v21, %v5293_v12  ;;  %v6855_v15 = vpop.f32.mrb[125].mxu1 }
 0x780   : > { %v6966_v33 = vpop.f32.mrb[188].mxu0  ;;  %v6856_v18 = vadd.f32 %v6855_v15, %v6854_v22  ;;  %v6857_v9 = vpop.f32.mrb[126].mxu1 }
 0x781   : > { %v6967_v42 = vpop.f32.mrb[189].mxu0  ;;  %v6858_v36 = vpop.f32.mrb[127].mxu1  ;;  %v5382_v59 = vpack.c.bf16 %v5365_v63, %v5364_v57 }
 0x782   : > { %v6968_v10 = vadd.f32 %v6967_v42, %v6966_v33  ;;  %v6969_v29 = vpop.f32.mrb[190].mxu0  ;;  %v6859_v17 = vadd.f32 %v6858_v36, %v6857_v9 }
 0x783   : > { %v6970_v44 = vpop.f32.mrb[191].mxu0  ;;  %5710 = vmatprep.mubr.bf16.mxu1 %v5382_v59 }
 0x784   : > { %v5298_v31 = vadd.f32 %v6968_v10, %v6856_v18  ;;  %v6971_v41 = vadd.f32 %v6970_v44, %v6969_v29  ;;  %5711 = vmatmul.mubr.bf16.gmra.mrb[184].mxu1 %v3682_v11 }
 0x786   : > { %v5301_v62 = vadd.f32 %v6971_v41, %v6859_v17  ;;  %v5366_v24 = vmul.f32 %v7736_v37, %v5298_v31 }
 0x788   : > { %v5367_v39 = vmul.f32 %v7738_v54, %v5301_v62 }
 0x78a   : > { %v5383_v6 = vpack.c.bf16 %v5367_v39, %v5366_v24 }
 0x78c   : > { %5718 = vmatprep.mubr.bf16.mxu1 %v5383_v6 }
 0x78d   : > { %5719 = vmatmul.mubr.bf16.gmra.mrb[188].mxu1 %v3683_v14 }
 0x7e5   : > { %v6988_v11 = vpop.f32.mrb[128].mxu1 }
 0x7e6   : > { %v6989_v47 = vpop.f32.mrb[129].mxu1 }
 0x7e7   : > { %v6990_v25 = vadd.f32 %v6989_v47, %v6988_v11  ;;  %v6991_v19 = vpop.f32.mrb[130].mxu1 }
 0x7e8   : > { %v6992_v61 = vpop.f32.mrb[131].mxu1 }
 0x7e9   : > { %v6993_v4 = vadd.f32 %v6992_v61, %v6991_v19  ;;  %v5601_v28 = vadd.f32 %v6990_v25, %v11706_v8 }
 0x7eb   : > { %v5604_v48 = vadd.f32 %v6993_v4, %v11706_v8 }
 0x7ed   : > { %v6240_v14 = vpack.c.bf16 %v5604_v48, %v5601_v28 }
 0x7ee   : > { %v6994_v5 = vpop.f32.mrb[132].mxu1 }
 0x7ef   : > { %v6995_v34 = vpop.f32.mrb[133].mxu1  ;;  %6241 = vst [vmem:[%s11712_s7] sm:$0xff] %v6240_v14  }
 0x7f0   : > { %v6996_v51 = vadd.f32 %v6995_v34, %v6994_v5  ;;  %v6997_v0 = vpop.f32.mrb[134].mxu1 }
 0x7f1   : > { %v6998_v20 = vpop.f32.mrb[135].mxu1 }
 0x7f2   : > { %v6999_v40 = vadd.f32 %v6998_v20, %v6997_v0  ;;  %v5609_v46 = vadd.f32 %v6996_v51, %v11706_v8 }
 0x7f4   : > { %v5612_v26 = vadd.f32 %v6999_v40, %v11706_v8 }
 0x7f6   : > { %v6245_v35 = vpack.c.bf16 %v5612_v26, %v5609_v46 }
 0x7f7   : > { %v7000_v3 = vpop.f32.mrb[136].mxu1 }
 0x7f8   : > { %v7001_v32 = vpop.f32.mrb[137].mxu1  ;;  %6317 = vst [vmem:[%s11712_s7 + $0x8] sm:$0xff] %v6245_v35  }
 0x7f9   : > { %v7002_v13 = vadd.f32 %v7001_v32, %v7000_v3  ;;  %v7003_v30 = vpop.f32.mrb[138].mxu1 }
 0x7fa   : > { %v7004_v7 = vpop.f32.mrb[139].mxu1 }
 0x7fb   : > { %v7005_v56 = vadd.f32 %v7004_v7, %v7003_v30  ;;  %v5617_v2 = vadd.f32 %v7002_v13, %v11706_v8 }
 0x7fd   : > { %v5620_v50 = vadd.f32 %v7005_v56, %v11706_v8 }
 0x7ff   : > { %v6250_v58 = vpack.c.bf16 %v5620_v50, %v5617_v2  ;;  %v7006_v43 = vpop.f32.mrb[140].mxu1 }
 0x800   : > { %v7007_v45 = vpop.f32.mrb[141].mxu1 }
 0x801   : > { %6318 = vst [vmem:[%s11712_s7 + $0x10] sm:$0xff] %v6250_v58   ;;  %v7008_v60 = vadd.f32 %v7007_v45, %v7006_v43  ;;  %v7009_v23 = vpop.f32.mrb[142].mxu1 }
 0x802   : > { %v7010_v38 = vpop.f32.mrb[143].mxu1 }
 0x803   : > { %v7011_v53 = vadd.f32 %v7010_v38, %v7009_v23  ;;  %v5625_v49 = vadd.f32 %v7008_v60, %v11706_v8 }
 0x805   : > { %v5628_v12 = vadd.f32 %v7011_v53, %v11706_v8 }
 0x807   : > { %v6255_v21 = vpack.c.bf16 %v5628_v12, %v5625_v49  ;;  %v7012_v22 = vpop.f32.mrb[144].mxu1 }
 0x808   : > { %v7013_v57 = vpop.f32.mrb[145].mxu1 }
 0x809   : > { %6319 = vst [vmem:[%s11712_s7 + $0x18] sm:$0xff] %v6255_v21   ;;  %v7014_v63 = vadd.f32 %v7013_v57, %v7012_v22  ;;  %v7015_v15 = vpop.f32.mrb[146].mxu1 }
 0x80a   : > { %v7016_v33 = vpop.f32.mrb[147].mxu1 }
 0x80b   : > { %v7017_v18 = vadd.f32 %v7016_v33, %v7015_v15  ;;  %v5633_v9 = vadd.f32 %v7014_v63, %v11706_v8 }
 0x80d   : > { %v5636_v42 = vadd.f32 %v7017_v18, %v11706_v8 }
 0x80f   : > { %v6260_v36 = vpack.c.bf16 %v5636_v42, %v5633_v9  ;;  %v7018_v59 = vpop.f32.mrb[148].mxu1 }
 0x810   : > { %v7019_v10 = vpop.f32.mrb[149].mxu1 }
 0x811   : > { %6320 = vst [vmem:[%s11712_s7 + $0x20] sm:$0xff] %v6260_v36   ;;  %v7020_v29 = vadd.f32 %v7019_v10, %v7018_v59  ;;  %v7021_v17 = vpop.f32.mrb[150].mxu1 }
 0x812   : > { %v7022_v44 = vpop.f32.mrb[151].mxu1 }
 0x813   : > { %v7023_v31 = vadd.f32 %v7022_v44, %v7021_v17  ;;  %v5641_v41 = vadd.f32 %v7020_v29, %v11706_v8 }
 0x815   : > { %v5644_v37 = vadd.f32 %v7023_v31, %v11706_v8 }
 0x817   : > { %v6265_v62 = vpack.c.bf16 %v5644_v37, %v5641_v41  ;;  %v7024_v54 = vpop.f32.mrb[152].mxu1 }
 0x818   : > { %v7025_v24 = vpop.f32.mrb[153].mxu1 }
 0x819   : > { %6321 = vst [vmem:[%s11712_s7 + $0x28] sm:$0xff] %v6265_v62   ;;  %v7026_v39 = vadd.f32 %v7025_v24, %v7024_v54  ;;  %v7027_v6 = vpop.f32.mrb[154].mxu1 }
 0x81a   : > { %v7028_v16 = vpop.f32.mrb[155].mxu1 }
 0x81b   : > { %v7029_v52 = vadd.f32 %v7028_v16, %v7027_v6  ;;  %v5649_v1 = vadd.f32 %v7026_v39, %v11706_v8 }
 0x81d   : > { %v5652_v27 = vadd.f32 %v7029_v52, %v11706_v8 }
 0x81f   : > { %v6270_v55 = vpack.c.bf16 %v5652_v27, %v5649_v1  ;;  %v7030_v11 = vpop.f32.mrb[156].mxu1 }
 0x820   : > { %v7031_v47 = vpop.f32.mrb[157].mxu1 }
 0x821   : > { %6322 = vst [vmem:[%s11712_s7 + $0x30] sm:$0xff] %v6270_v55   ;;  %v7032_v25 = vadd.f32 %v7031_v47, %v7030_v11  ;;  %v7033_v19 = vpop.f32.mrb[158].mxu1 }
 0x822   : > { %v7034_v61 = vpop.f32.mrb[159].mxu1 }
 0x823   : > { %v7035_v4 = vadd.f32 %v7034_v61, %v7033_v19  ;;  %v5657_v28 = vadd.f32 %v7032_v25, %v11706_v8 }
 0x825   : > { %v5660_v48 = vadd.f32 %v7035_v4, %v11706_v8 }
 0x827   : > { %v6275_v14 = vpack.c.bf16 %v5660_v48, %v5657_v28  ;;  %v7036_v5 = vpop.f32.mrb[160].mxu1 }
 0x828   : > { %v7037_v34 = vpop.f32.mrb[161].mxu1 }
 0x829   : > { %6323 = vst [vmem:[%s11712_s7 + $0x38] sm:$0xff] %v6275_v14   ;;  %v7038_v51 = vadd.f32 %v7037_v34, %v7036_v5  ;;  %v7039_v0 = vpop.f32.mrb[162].mxu1 }
 0x82a   : > { %v7040_v20 = vpop.f32.mrb[163].mxu1 }
 0x82b   : > { %v7041_v40 = vadd.f32 %v7040_v20, %v7039_v0  ;;  %v5665_v46 = vadd.f32 %v7038_v51, %v11706_v8 }
 0x82d   : > { %v5668_v26 = vadd.f32 %v7041_v40, %v11706_v8 }
 0x82f   : > { %v6280_v35 = vpack.c.bf16 %v5668_v26, %v5665_v46  ;;  %v7042_v3 = vpop.f32.mrb[164].mxu1 }
 0x830   : > { %v7043_v32 = vpop.f32.mrb[165].mxu1 }
 0x831   : > { %6324 = vst [vmem:[%s11712_s7 + $0x40] sm:$0xff] %v6280_v35   ;;  %v7044_v13 = vadd.f32 %v7043_v32, %v7042_v3  ;;  %v7045_v30 = vpop.f32.mrb[166].mxu1 }
 0x832   : > { %v7046_v7 = vpop.f32.mrb[167].mxu1 }
 0x833   : > { %v7047_v56 = vadd.f32 %v7046_v7, %v7045_v30  ;;  %v5673_v2 = vadd.f32 %v7044_v13, %v11706_v8 }
 0x835   : > { %v5676_v50 = vadd.f32 %v7047_v56, %v11706_v8 }
 0x837   : > { %v6285_v58 = vpack.c.bf16 %v5676_v50, %v5673_v2  ;;  %v7048_v43 = vpop.f32.mrb[168].mxu1 }
 0x838   : > { %v7049_v45 = vpop.f32.mrb[169].mxu1 }
 0x839   : > { %6325 = vst [vmem:[%s11712_s7 + $0x48] sm:$0xff] %v6285_v58   ;;  %v7050_v60 = vadd.f32 %v7049_v45, %v7048_v43  ;;  %v7051_v23 = vpop.f32.mrb[170].mxu1 }
 0x83a   : > { %v7052_v38 = vpop.f32.mrb[171].mxu1 }
 0x83b   : > { %v7053_v53 = vadd.f32 %v7052_v38, %v7051_v23  ;;  %v5681_v49 = vadd.f32 %v7050_v60, %v11706_v8 }
 0x83d   : > { %v5684_v12 = vadd.f32 %v7053_v53, %v11706_v8 }
 0x83f   : > { %v6290_v21 = vpack.c.bf16 %v5684_v12, %v5681_v49  ;;  %v7054_v22 = vpop.f32.mrb[172].mxu1 }
 0x840   : > { %v7055_v57 = vpop.f32.mrb[173].mxu1 }
 0x841   : > { %6326 = vst [vmem:[%s11712_s7 + $0x50] sm:$0xff] %v6290_v21   ;;  %v7056_v63 = vadd.f32 %v7055_v57, %v7054_v22  ;;  %v7057_v15 = vpop.f32.mrb[174].mxu1 }
 0x842   : > { %v7058_v33 = vpop.f32.mrb[175].mxu1 }
 0x843   : > { %v7059_v18 = vadd.f32 %v7058_v33, %v7057_v15  ;;  %v5689_v9 = vadd.f32 %v7056_v63, %v11706_v8 }
 0x845   : > { %v5692_v42 = vadd.f32 %v7059_v18, %v11706_v8 }
 0x847   : > { %v6295_v36 = vpack.c.bf16 %v5692_v42, %v5689_v9  ;;  %v7060_v59 = vpop.f32.mrb[176].mxu1 }
 0x848   : > { %v7061_v10 = vpop.f32.mrb[177].mxu1 }
 0x849   : > { %6327 = vst [vmem:[%s11712_s7 + $0x58] sm:$0xff] %v6295_v36   ;;  %v7062_v29 = vadd.f32 %v7061_v10, %v7060_v59  ;;  %v7063_v17 = vpop.f32.mrb[178].mxu1 }
 0x84a   : > { %v7064_v44 = vpop.f32.mrb[179].mxu1 }
 0x84b   : > { %v7065_v31 = vadd.f32 %v7064_v44, %v7063_v17  ;;  %v5697_v41 = vadd.f32 %v7062_v29, %v11706_v8 }
 0x84d   : > { %v5700_v37 = vadd.f32 %v7065_v31, %v11706_v8 }
 0x84f   : > { %v6300_v62 = vpack.c.bf16 %v5700_v37, %v5697_v41  ;;  %v7066_v54 = vpop.f32.mrb[180].mxu1 }
 0x850   : > { %v7067_v24 = vpop.f32.mrb[181].mxu1 }
 0x851   : > { %6328 = vst [vmem:[%s11712_s7 + $0x60] sm:$0xff] %v6300_v62   ;;  %v7068_v39 = vadd.f32 %v7067_v24, %v7066_v54  ;;  %v7069_v6 = vpop.f32.mrb[182].mxu1 }
 0x852   : > { %v7070_v16 = vpop.f32.mrb[183].mxu1 }
 0x853   : > { %v7071_v52 = vadd.f32 %v7070_v16, %v7069_v6  ;;  %v5705_v1 = vadd.f32 %v7068_v39, %v11706_v8 }
 0x855   : > { %v5708_v27 = vadd.f32 %v7071_v52, %v11706_v8 }
 0x857   : > { %v6305_v55 = vpack.c.bf16 %v5708_v27, %v5705_v1  ;;  %v7072_v11 = vpop.f32.mrb[184].mxu1 }
 0x858   : > { %v7073_v47 = vpop.f32.mrb[185].mxu1 }
 0x859   : > { %6329 = vst [vmem:[%s11712_s7 + $0x68] sm:$0xff] %v6305_v55   ;;  %v7074_v25 = vadd.f32 %v7073_v47, %v7072_v11  ;;  %v7075_v19 = vpop.f32.mrb[186].mxu1 }
 0x85a   : > { %v7076_v61 = vpop.f32.mrb[187].mxu1 }
 0x85b   : > { %v7077_v4 = vadd.f32 %v7076_v61, %v7075_v19  ;;  %v5713_v28 = vadd.f32 %v7074_v25, %v11706_v8 }
 0x85d   : > { %v5716_v48 = vadd.f32 %v7077_v4, %v11706_v8 }
 0x85f   : > { %v6310_v14 = vpack.c.bf16 %v5716_v48, %v5713_v28 }
 0x860   : > { %v7078_v5 = vpop.f32.mrb[188].mxu1 }
 0x861   : > { %6330 = vst [vmem:[%s11712_s7 + $0x70] sm:$0xff] %v6310_v14   ;;  %v7079_v34 = vpop.f32.mrb[189].mxu1 }
 0x862   : > { %v7080_v51 = vadd.f32 %v7079_v34, %v7078_v5  ;;  %v7081_v0 = vpop.f32.mrb[190].mxu1 }
 0x863   : > { %v7082_v20 = vpop.f32.mrb[191].mxu1 }
 0x864   : > { %v7083_v40 = vadd.f32 %v7082_v20, %v7081_v0  ;;  %v5721_v46 = vadd.f32 %v7080_v51, %v11706_v8 }
 0x866   : > { %v5724_v26 = vadd.f32 %v7083_v40, %v11706_v8 }
 0x868   : > { %v6315_v35 = vpack.c.bf16 %v5724_v26, %v5721_v46 }
 0x86a   : > { %6331 = vst [vmem:[%s11712_s7 + $0x78] sm:$0xff] %v6315_v35  }
 0x86b   : > { %7868 = shalt.err (!%p7865_p2)
}
 0x86c   : > { %s7869_s6 = scalar_lea.hbm %s11767_s9, 2048  ;;  %s7873_s15 = scalar_lea.hbm %s13095_s13, 8192 }
 0x86d   : > { %p7870_p11 = scmp.ne.s32.totalorder %s11767_s9, %s7869_s6  ;;  %p7874_p10 = scmp.lt.u32.totalorder %s11767_s9, %s13095_s13 }
 0x86e   : > { %p7875_p13 = scmp.lt.u32.totalorder %s7873_s15, %s7869_s6  ;;  %p7877_p5 = scmp.lt.u32.totalorder %s7869_s6, %s11767_s9 }
 0x86f   : > { %p7871_p0 = pnand %p7870_p11, %p8196_p8 }
 0x870   : > { %p7876_p9 = por %p7875_p13, %p7874_p10 }
 0x871   : > { %p7872_p3 = pneg %p7871_p0 }
 0x872   : > { %p7878_p6 = por %p7877_p5, %p7876_p9 }
 0x874   : > { %p7879_p7 = pnand %p7878_p6, %p7872_p3 }
 0x876   : > { %7882 = shalt.err (!%p7879_p7)
}
 0x877   : > { %s8001_s30 = smov 64   ;;  %s8002_s24 = smov 4  }
 0x878   : > { %7096 = dma.vmem_to_hbm [thread:$0]  (%p8196_p8), %s11762_s10, 2048, %s11767_s9, %s5888_s3, %s8001_s30, %s8001_s30, %s8002_s24  }
 0x879 PF: > { %s13096_s25 = sld [smem:[#allocation17_spill]]  ;;  %s13097_s17 = sld [smem:[#allocation19_spill]] }
 0x87a   : > { %p7121_p1 = scmp.ge.s32.totalorder %s7989_s28, 2 }
 0x87f   : > { %s5918_s12 = sand.u32 1, %s13096_s25   ;;  %p13098_p4 = scmp.ne.s32.totalorder %s13097_s17, 0 }
 0x880   : > { %s5919_s11 = scalar_lea.sflag [#allocation5], %s5918_s12 }
 0x881   : > { %p7113_p12 = pnand %p7121_p1, %p13098_p4 }
 0x883   : > { %7944 = dma.done.wait (!%p7113_p12), %s5919_s11, 2048  }
 0x884   : > { %7946 = vsyncadd (!%p7113_p12), %s5919_s11, 4294965248  ;;  %s25_s28 = sadd.s32 1, %s7989_s28   ;;  %s13099_s10 = sld [smem:[#allocation20_spill]] }
 0x885   : > { %p22_p2 = scmp.ge.s32.totalorder %s25_s28, 6   ;;  %s13100_s9 = sld [smem:[#allocation22_spill]] }
 0x886   : > { %s13101_s18 = smov %s7953_s19  ;;  %s13102_s19 = smov %s7957_s20 }
 0x887   : > { %s13103_s20 = smov %s8267_s8  ;;  %s13104_s21 = smov %s7965_s22 }
 0x888   : > { %s13105_s22 = smov %s7969_s23  ;;  %s13106_s23 = smov %s8213_s2 }
 0x889   : > { %s13107_s24 = smov %s7981_s26  ;;  %s13108_s25 = smov %s7985_s27 }
 0x88a   : > { %s13109_s26 = smov %s13099_s10  ;;  %24 = sbr.rel (!%p22_p2) target bundleno = 16 (0x10), region = 106 }
 0x88b   : > { %s13110_s27 = smov %s13100_s9 }
 0x891   :  { %5924 = vsyncpa [#allocation4], 1 }
 0x892   :  { %5926 = vsyncpa [#allocation4 + $0x1], 1 }
 0x893   :  { %5927 = vsyncpa [#allocation7], 1 }
 0x894   :  { %5929 = vsyncpa [#allocation7 + $0x1], 1 }
 0x895   :  { %5930 = vsyncpa [#allocation10], 1 }
 0x896   :  { %5931 = vsyncpa [#allocation5], 1 }
 0x897   :  { %5933 = vsyncpa [#allocation5 + $0x1], 1 }

</bundles_post_ra>
